<compile_context>
chip_gen: v7x
topology: tpu7x:2x2x1
jax: 0.10.0
libtpu: 0.0.40
codegen_flags: <defaults>
</compile_context>

<pallas_src>
import functools

import jax
import jax.numpy as jnp
import numpy as np
from jax import lax
from jax.experimental import pallas as pl
from jax.experimental.pallas import tpu as pltpu

BN_EPS = 1e-5          # torch BatchNorm2d default
NEG_SLOPE = 0.01       # torch LeakyReLU default


def _leaky(v):
    return jnp.where(v > 0, v, NEG_SLOPE * v)


# ---------------- Pallas kernel (fully fused forward) ----------------

def ssconv_kernel(x_ref, w1_ref, w2_ref, b2_ref, o_ref, xq_ref, col_ref,
                  *, B, H, W, Cmid, gap):
    HW = H * W
    stride = HW + gap                      # image-to-image stride inside xq_ref
    Lout = B * HW + (B - 1) * gap          # rows covered by the single big matmul
    Cout = o_ref.shape[1]

    # --- BatchNorm2d (training mode, gamma=1, beta=0): one-pass batch stats ---
    xs = x_ref[...]                                            # (B*HW, Cin) f32
    n = xs.shape[0]
    s1 = jnp.sum(xs, axis=0, keepdims=True)                    # (1, Cin)
    s2 = jnp.sum(xs * xs, axis=0, keepdims=True)               # (1, Cin)
    mean = s1 * (1.0 / n)
    var = s2 * (1.0 / n) - mean * mean                         # biased variance
    xn = (xs - mean) * lax.rsqrt(var + BN_EPS)                 # f32 elementwise

    # --- point_conv (1x1, no bias) + LeakyReLU: one bf16 MXU matmul ---
    mid = _leaky(jnp.dot(xn.astype(jnp.bfloat16), w1_ref[...],
                         preferred_element_type=jnp.float32))  # (B*HW, Cmid) f32

    # --- write mid through VMEM: zero only the B+1 halo/gap bands, then store
    #     each image interior (all offsets are multiples of 8 -> aligned) ---
    for b in range(B + 1):
        xq_ref[b * stride: b * stride + gap, :] = jnp.zeros((gap, Cmid),
                                                            jnp.float32)
    for b in range(B):
        xq_ref[gap + b * stride: gap + b * stride + HW, :] = \
            mid[b * HW:(b + 1) * HW, :]

    # --- im2col: copy the 9 shifted windows into lane blocks of col_ref.
    #     Zeroed gap bands handle the vertical edges; only dx=+-1 taps need a
    #     left/right column mask, built in-kernel (no HBM mask input), hoisted
    #     out of the tap loop. ---
    if W & (W - 1) == 0:
        xpos = lax.broadcasted_iota(jnp.int32, (Lout, Cmid), 0) & (W - 1)
    else:
        xpos = lax.broadcasted_iota(jnp.int32, (Lout, Cmid), 0) % W
    not_left = (xpos != 0).astype(jnp.float32)        # kills x == 0 rows
    not_right = (xpos != W - 1).astype(jnp.float32)   # kills x == W-1 rows

    for t in range(9):                                # static tap loop: copies only
        dy, dx = t // 3 - 1, t % 3 - 1
        s = dy * W + dx                               # flat window shift
        patch = xq_ref[gap + s: gap + s + Lout, :]    # (Lout, Cmid) f32
        if dx == -1:
            patch = patch * not_left
        elif dx == 1:
            patch = patch * not_right
        col_ref[:, t * Cmid:(t + 1) * Cmid] = patch

    # --- depth_conv (3x3, bias) + LeakyReLU: ONE K=9*Cmid bf16 MXU matmul ---
    res = jnp.dot(col_ref[...].astype(jnp.bfloat16), w2_ref[...],
                  preferred_element_type=jnp.float32)          # (Lout, Cout) f32
    res = _leaky(res + b2_ref[...])

    # keep only the valid image rows (gap rows are discarded)
    for b in range(B):
        o_ref[b * HW:(b + 1) * HW, :] = res[b * stride: b * stride + HW, :]


# ---------------- wrapper ----------------

def _full(shape):
    nd = len(shape)
    return pl.BlockSpec(shape, lambda i, nd=nd: (0,) * nd)


def ssconv_forward(x_nchw, w1, w2, b2):
    """x: (B, Cin, H, W); w1: (Cmid, Cin, 1, 1); w2: (Cout, Cmid, 3, 3); b2: (Cout,)."""
    B, Cin, H, W = x_nchw.shape
    Cout, Cmid, KH, KW = w2.shape
    assert (KH, KW) == (3, 3) and w1.shape == (Cmid, Cin, 1, 1)
    HW = H * W

    # gap between image interiors in the flat scratch:
    #  >= W+1 (bounds every 3x3 shift), multiple of 8 (aligned interior stores)
    #  and multiple of W (so the in-kernel column index is simply row % W).
    g = int(np.lcm(8, W))
    gap = ((W + 1 + g - 1) // g) * g
    Lout = B * HW + (B - 1) * gap
    Ntot = gap + B * (HW + gap)

    # layout plumbing kept in the wrapper (see TODO about NHWC end-to-end)
    x_flat = jnp.transpose(x_nchw, (0, 2, 3, 1)).reshape(B * HW, Cin)
    w1_mat = jnp.transpose(w1[:, :, 0, 0], (1, 0)).astype(jnp.bfloat16)   # (Cin, Cmid)
    w2_mat = jnp.transpose(w2, (2, 3, 1, 0)).reshape(9 * Cmid, Cout) \
                .astype(jnp.bfloat16)                                     # (9*Cmid, Cout)
    b2_row = b2.reshape(1, Cout).astype(jnp.float32)

    kernel = functools.partial(ssconv_kernel, B=B, H=H, W=W, Cmid=Cmid, gap=gap)
    out_flat = pl.pallas_call(
        kernel,
        grid=(1,),
        in_specs=[
            _full((B * HW, Cin)),
            _full((Cin, Cmid)),
            _full((9 * Cmid, Cout)),
            _full((1, Cout)),
        ],
        out_specs=_full((B * HW, Cout)),
        out_shape=jax.ShapeDtypeStruct((B * HW, Cout), jnp.float32),
        scratch_shapes=[
            pltpu.VMEM((Ntot, Cmid), jnp.float32),        # padded mid (zeroed gaps)
            pltpu.VMEM((Lout, 9 * Cmid), jnp.float32),    # im2col buffer
        ],
        compiler_params=pltpu.CompilerParams(
            dimension_semantics=("arbitrary",)),
    )(x_flat, w1_mat, w2_mat, b2_row)

    # back to torch NCHW layout
    return jnp.transpose(out_flat.reshape(B, H, W, Cout), (0, 3, 1, 2))


# ---------------- pure-JAX reference (for verification) ----------------
# Mirrors the kernel's mixed precision: bf16 matmul operands, f32 accumulation,
# f32 BN / LeakyReLU (so the comparison validates structure, not MXU rounding).

def ref_forward(x, w1, w2, b2):
    mean = x.mean(axis=(0, 2, 3), keepdims=True)
    var = ((x - mean) ** 2).mean(axis=(0, 2, 3), keepdims=True)
    xn = (x - mean) * lax.rsqrt(var + BN_EPS)
    dn = ("NCHW", "OIHW", "NCHW")
    mid = lax.conv_general_dilated(xn.astype(jnp.bfloat16),
                                   w1.astype(jnp.bfloat16),
                                   (1, 1), [(0, 0), (0, 0)],
                                   dimension_numbers=dn,
                                   preferred_element_type=jnp.float32,
                                   precision=lax.Precision.HIGHEST)
    mid = jnp.where(mid > 0, mid, NEG_SLOPE * mid)
    out = lax.conv_general_dilated(mid.astype(jnp.bfloat16),
                                   w2.astype(jnp.bfloat16),
                                   (1, 1), [(1, 1), (1, 1)],
                                   dimension_numbers=dn,
                                   preferred_element_type=jnp.float32,
                                   precision=lax.Precision.HIGHEST)
    out = out + b2[None, :, None, None]
    return jnp.where(out > 0, out, NEG_SLOPE * out)


# ---------------- main ----------------

if __name__ == "__main__":
    key = jax.random.PRNGKey(0)
    kx, kw1, kw2, kb2 = jax.random.split(key, 4)

    B, Cin, H, W = 2, 4, 16, 16      # SSConv(in_ch=4, out_ch=8, kernel_size=3)
    Cout = 8
    Cmid = Cout // 2

    x = jax.random.normal(kx, (B, Cin, H, W), dtype=jnp.float32)
    b1 = 1.0 / np.sqrt(Cin * 1 * 1)
    w1 = jax.random.uniform(kw1, (Cmid, Cin, 1, 1), minval=-b1, maxval=b1,
                            dtype=jnp.float32)
    b2b = 1.0 / np.sqrt(Cmid * 3 * 3)
    w2 = jax.random.uniform(kw2, (Cout, Cmid, 3, 3), minval=-b2b, maxval=b2b,
                            dtype=jnp.float32)
    b2 = jax.random.uniform(kb2, (Cout,), minval=-b2b, maxval=b2b,
                            dtype=jnp.float32)

    # keep inputs/weights bf16-representable so the bf16 weight casts are exact
    q = lambda a: a.astype(jnp.bfloat16).astype(jnp.float32)
    x, w1, w2, b2 = q(x), q(w1), q(w2), q(b2)

    out = jax.jit(ssconv_forward)(x, w1, w2, b2)
    jax.block_until_ready(out)

    out_ref = ref_forward(x, w1, w2, b2)
    # bf16-operand matmuls on both sides -> allow bf16-level accumulation slack
    np.testing.assert_allclose(np.asarray(out), np.asarray(out_ref),
                               rtol=2e-3, atol=2e-3)

    print("KERNEL_OK")
</pallas_src>

<mosaic_0001>
module attributes {stable_mosaic.version = 11 : i64} {
  func.func @ssconv_kernel(%arg0: i32, %arg1: memref<512x4xf32, #tpu.memory_space<vmem>>, %arg2: memref<4x4xbf16, #tpu.memory_space<vmem>>, %arg3: memref<36x8xbf16, #tpu.memory_space<vmem>>, %arg4: memref<1x8xf32, #tpu.memory_space<vmem>>, %arg5: memref<512x8xf32, #tpu.memory_space<vmem>>, %arg6: memref<608x4xf32, #tpu.memory_space<vmem>>, %arg7: memref<544x36xf32, #tpu.memory_space<vmem>>) attributes {dimension_semantics = [#tpu.dimension_semantics<arbitrary>], iteration_bounds = array<i64: 1>, scalar_prefetch = 0 : i64, scratch_operands = 2 : i64, tpu.core_type = #tpu.core_type<tc>, window_params = [{pipeline_mode = #tpu.pipeline_mode<synchronous>, transform_indices = @transform_0, window_bounds = array<i64: 512, 4>}, {pipeline_mode = #tpu.pipeline_mode<synchronous>, transform_indices = @transform_1, window_bounds = array<i64: 4, 4>}, {pipeline_mode = #tpu.pipeline_mode<synchronous>, transform_indices = @transform_2, window_bounds = array<i64: 36, 8>}, {pipeline_mode = #tpu.pipeline_mode<synchronous>, transform_indices = @transform_3, window_bounds = array<i64: 1, 8>}, {pipeline_mode = #tpu.pipeline_mode<synchronous>, transform_indices = @transform_4, window_bounds = array<i64: 512, 8>}]} {
    %c0 = arith.constant 0 : index
    %c0_0 = arith.constant 0 : index
    %0 = vector.load %arg1[%c0, %c0_0] : memref<512x4xf32, #tpu.memory_space<vmem>>, vector<512x4xf32>
    %cst = arith.constant dense<0.000000e+00> : vector<4xf32>
    %1 = vector.multi_reduction <add>, %0, %cst [0] : vector<512x4xf32> to vector<4xf32>
    %2 = vector.shape_cast %1 : vector<4xf32> to vector<1x4xf32>
    %3 = arith.mulf %0, %0 : vector<512x4xf32>
    %cst_1 = arith.constant dense<0.000000e+00> : vector<4xf32>
    %4 = vector.multi_reduction <add>, %3, %cst_1 [0] : vector<512x4xf32> to vector<4xf32>
    %5 = vector.shape_cast %4 : vector<4xf32> to vector<1x4xf32>
    %cst_2 = arith.constant 0.001953125 : f32
    %6 = vector.broadcast %cst_2 : f32 to vector<1x4xf32>
    %7 = arith.mulf %2, %6 : vector<1x4xf32>
    %cst_3 = arith.constant 0.001953125 : f32
    %8 = vector.broadcast %cst_3 : f32 to vector<1x4xf32>
    %9 = arith.mulf %5, %8 : vector<1x4xf32>
    %10 = arith.mulf %7, %7 : vector<1x4xf32>
    %11 = arith.subf %9, %10 : vector<1x4xf32>
    %12 = vector.broadcast %7 : vector<1x4xf32> to vector<512x4xf32>
    %13 = arith.subf %0, %12 : vector<512x4xf32>
    %cst_4 = arith.constant 9.99999974E-6 : f32
    %14 = vector.broadcast %cst_4 : f32 to vector<1x4xf32>
    %15 = arith.addf %11, %14 : vector<1x4xf32>
    %16 = math.rsqrt %15 : vector<1x4xf32>
    %17 = vector.broadcast %16 : vector<1x4xf32> to vector<512x4xf32>
    %18 = arith.mulf %13, %17 : vector<512x4xf32>
    %19 = arith.truncf %18 : vector<512x4xf32> to vector<512x4xbf16>
    %c0_5 = arith.constant 0 : index
    %c0_6 = arith.constant 0 : index
    %20 = vector.load %arg2[%c0_5, %c0_6] : memref<4x4xbf16, #tpu.memory_space<vmem>>, vector<4x4xbf16>
    %cst_7 = arith.constant dense<0.000000e+00> : vector<512x4xf32>
    %21 = tpu.matmul %19, %20, %cst_7 {dimension_numbers = #tpu.dot_dimension_numbers<[1], [0], [0], [1], [0, 0, 1, 1], [], []>} : vector<512x4xbf16>, vector<4x4xbf16>, vector<512x4xf32> -> vector<512x4xf32>
    %cst_8 = arith.constant 0.000000e+00 : f32
    %22 = vector.broadcast %cst_8 : f32 to vector<512x4xf32>
    %23 = arith.cmpf ogt, %21, %22 : vector<512x4xf32>
    %cst_9 = arith.constant 0.00999999977 : f32
    %24 = vector.broadcast %cst_9 : f32 to vector<512x4xf32>
    %25 = arith.mulf %24, %21 : vector<512x4xf32>
    %26 = arith.select %23, %21, %25 : vector<512x4xi1>, vector<512x4xf32>
    %cst_10 = arith.constant 0.000000e+00 : f32
    %27 = vector.broadcast %cst_10 : f32 to vector<32x4xf32>
    %c0_11 = arith.constant 0 : index
    %c0_12 = arith.constant 0 : index
    %28 = vector.load %arg6[%c0_11, %c0_12] : memref<608x4xf32, #tpu.memory_space<vmem>>, vector<32x4xf32>
    tpu.vector_store %arg6[%c0_11, %c0_12], %27 {strides = array<i32>} : memref<608x4xf32, #tpu.memory_space<vmem>>, vector<32x4xf32>,
    %cst_13 = arith.constant 0.000000e+00 : f32
    %29 = vector.broadcast %cst_13 : f32 to vector<32x4xf32>
    %c288 = arith.constant 288 : index
    %c0_14 = arith.constant 0 : index
    %30 = vector.load %arg6[%c288, %c0_14] : memref<608x4xf32, #tpu.memory_space<vmem>>, vector<32x4xf32>
    tpu.vector_store %arg6[%c288, %c0_14], %29 {strides = array<i32>} : memref<608x4xf32, #tpu.memory_space<vmem>>, vector<32x4xf32>,
    %cst_15 = arith.constant 0.000000e+00 : f32
    %31 = vector.broadcast %cst_15 : f32 to vector<32x4xf32>
    %c576 = arith.constant 576 : index
    %c0_16 = arith.constant 0 : index
    %32 = vector.load %arg6[%c576, %c0_16] : memref<608x4xf32, #tpu.memory_space<vmem>>, vector<32x4xf32>
    tpu.vector_store %arg6[%c576, %c0_16], %31 {strides = array<i32>} : memref<608x4xf32, #tpu.memory_space<vmem>>, vector<32x4xf32>,
    %33 = vector.extract_strided_slice %26 {offsets = [0, 0], sizes = [256, 4], strides = [1, 1]} : vector<512x4xf32> to vector<256x4xf32>
    %c32 = arith.constant 32 : index
    %c0_17 = arith.constant 0 : index
    %34 = vector.load %arg6[%c32, %c0_17] : memref<608x4xf32, #tpu.memory_space<vmem>>, vector<256x4xf32>
    tpu.vector_store %arg6[%c32, %c0_17], %33 {strides = array<i32>} : memref<608x4xf32, #tpu.memory_space<vmem>>, vector<256x4xf32>,
    %35 = vector.extract_strided_slice %26 {offsets = [256, 0], sizes = [256, 4], strides = [1, 1]} : vector<512x4xf32> to vector<256x4xf32>
    %c320 = arith.constant 320 : index
    %c0_18 = arith.constant 0 : index
    %36 = vector.load %arg6[%c320, %c0_18] : memref<608x4xf32, #tpu.memory_space<vmem>>, vector<256x4xf32>
    tpu.vector_store %arg6[%c320, %c0_18], %35 {strides = array<i32>} : memref<608x4xf32, #tpu.memory_space<vmem>>, vector<256x4xf32>,
    %37 = tpu.iota {dimensions = array<i32: 0>} : vector<544x4xi32>
    %c15_i32 = arith.constant 15 : i32
    %38 = vector.broadcast %c15_i32 : i32 to vector<544x4xi32>
    %39 = arith.andi %37, %38 : vector<544x4xi32>
    %c0_i32 = arith.constant 0 : i32
    %40 = vector.broadcast %c0_i32 : i32 to vector<544x4xi32>
    %41 = arith.cmpi ne, %39, %40 : vector<544x4xi32>
    %42 = arith.extui %41 : vector<544x4xi1> to vector<544x4xi32>
    %43 = arith.sitofp %42 : vector<544x4xi32> to vector<544x4xf32>
    %c15_i32_19 = arith.constant 15 : i32
    %44 = vector.broadcast %c15_i32_19 : i32 to vector<544x4xi32>
    %45 = arith.cmpi ne, %39, %44 : vector<544x4xi32>
    %46 = arith.extui %45 : vector<544x4xi1> to vector<544x4xi32>
    %47 = arith.sitofp %46 : vector<544x4xi32> to vector<544x4xf32>
    %c15 = arith.constant 15 : index
    %c0_20 = arith.constant 0 : index
    %48 = vector.load %arg6[%c15, %c0_20] : memref<608x4xf32, #tpu.memory_space<vmem>>, vector<544x4xf32>
    %49 = arith.mulf %48, %43 : vector<544x4xf32>
    %c0_21 = arith.constant 0 : index
    %c0_22 = arith.constant 0 : index
    %50 = vector.load %arg7[%c0_21, %c0_22] : memref<544x36xf32, #tpu.memory_space<vmem>>, vector<544x4xf32>
    tpu.vector_store %arg7[%c0_21, %c0_22], %49 {strides = array<i32>} : memref<544x36xf32, #tpu.memory_space<vmem>>, vector<544x4xf32>,
    %c16 = arith.constant 16 : index
    %c0_23 = arith.constant 0 : index
    %51 = vector.load %arg6[%c16, %c0_23] : memref<608x4xf32, #tpu.memory_space<vmem>>, vector<544x4xf32>
    %c0_24 = arith.constant 0 : index
    %c4 = arith.constant 4 : index
    %52 = vector.load %arg7[%c0_24, %c4] : memref<544x36xf32, #tpu.memory_space<vmem>>, vector<544x4xf32>
    tpu.vector_store %arg7[%c0_24, %c4], %51 {strides = array<i32>} : memref<544x36xf32, #tpu.memory_space<vmem>>, vector<544x4xf32>,
    %c17 = arith.constant 17 : index
    %c0_25 = arith.constant 0 : index
    %53 = vector.load %arg6[%c17, %c0_25] : memref<608x4xf32, #tpu.memory_space<vmem>>, vector<544x4xf32>
    %54 = arith.mulf %53, %47 : vector<544x4xf32>
    %c0_26 = arith.constant 0 : index
    %c8 = arith.constant 8 : index
    %55 = vector.load %arg7[%c0_26, %c8] : memref<544x36xf32, #tpu.memory_space<vmem>>, vector<544x4xf32>
    tpu.vector_store %arg7[%c0_26, %c8], %54 {strides = array<i32>} : memref<544x36xf32, #tpu.memory_space<vmem>>, vector<544x4xf32>,
    %c31 = arith.constant 31 : index
    %c0_27 = arith.constant 0 : index
    %56 = vector.load %arg6[%c31, %c0_27] : memref<608x4xf32, #tpu.memory_space<vmem>>, vector<544x4xf32>
    %57 = arith.mulf %56, %43 : vector<544x4xf32>
    %c0_28 = arith.constant 0 : index
    %c12 = arith.constant 12 : index
    %58 = vector.load %arg7[%c0_28, %c12] : memref<544x36xf32, #tpu.memory_space<vmem>>, vector<544x4xf32>
    tpu.vector_store %arg7[%c0_28, %c12], %57 {strides = array<i32>} : memref<544x36xf32, #tpu.memory_space<vmem>>, vector<544x4xf32>,
    %c32_29 = arith.constant 32 : index
    %c0_30 = arith.constant 0 : index
    %59 = vector.load %arg6[%c32_29, %c0_30] : memref<608x4xf32, #tpu.memory_space<vmem>>, vector<544x4xf32>
    %c0_31 = arith.constant 0 : index
    %c16_32 = arith.constant 16 : index
    %60 = vector.load %arg7[%c0_31, %c16_32] : memref<544x36xf32, #tpu.memory_space<vmem>>, vector<544x4xf32>
    tpu.vector_store %arg7[%c0_31, %c16_32], %59 {strides = array<i32>} : memref<544x36xf32, #tpu.memory_space<vmem>>, vector<544x4xf32>,
    %c33 = arith.constant 33 : index
    %c0_33 = arith.constant 0 : index
    %61 = vector.load %arg6[%c33, %c0_33] : memref<608x4xf32, #tpu.memory_space<vmem>>, vector<544x4xf32>
    %62 = arith.mulf %61, %47 : vector<544x4xf32>
    %c0_34 = arith.constant 0 : index
    %c20 = arith.constant 20 : index
    %63 = vector.load %arg7[%c0_34, %c20] : memref<544x36xf32, #tpu.memory_space<vmem>>, vector<544x4xf32>
    tpu.vector_store %arg7[%c0_34, %c20], %62 {strides = array<i32>} : memref<544x36xf32, #tpu.memory_space<vmem>>, vector<544x4xf32>,
    %c47 = arith.constant 47 : index
    %c0_35 = arith.constant 0 : index
    %64 = vector.load %arg6[%c47, %c0_35] : memref<608x4xf32, #tpu.memory_space<vmem>>, vector<544x4xf32>
    %65 = arith.mulf %64, %43 : vector<544x4xf32>
    %c0_36 = arith.constant 0 : index
    %c24 = arith.constant 24 : index
    %66 = vector.load %arg7[%c0_36, %c24] : memref<544x36xf32, #tpu.memory_space<vmem>>, vector<544x4xf32>
    tpu.vector_store %arg7[%c0_36, %c24], %65 {strides = array<i32>} : memref<544x36xf32, #tpu.memory_space<vmem>>, vector<544x4xf32>,
    %c48 = arith.constant 48 : index
    %c0_37 = arith.constant 0 : index
    %67 = vector.load %arg6[%c48, %c0_37] : memref<608x4xf32, #tpu.memory_space<vmem>>, vector<544x4xf32>
    %c0_38 = arith.constant 0 : index
    %c28 = arith.constant 28 : index
    %68 = vector.load %arg7[%c0_38, %c28] : memref<544x36xf32, #tpu.memory_space<vmem>>, vector<544x4xf32>
    tpu.vector_store %arg7[%c0_38, %c28], %67 {strides = array<i32>} : memref<544x36xf32, #tpu.memory_space<vmem>>, vector<544x4xf32>,
    %c49 = arith.constant 49 : index
    %c0_39 = arith.constant 0 : index
    %69 = vector.load %arg6[%c49, %c0_39] : memref<608x4xf32, #tpu.memory_space<vmem>>, vector<544x4xf32>
    %70 = arith.mulf %69, %47 : vector<544x4xf32>
    %c0_40 = arith.constant 0 : index
    %c32_41 = arith.constant 32 : index
    %71 = vector.load %arg7[%c0_40, %c32_41] : memref<544x36xf32, #tpu.memory_space<vmem>>, vector<544x4xf32>
    tpu.vector_store %arg7[%c0_40, %c32_41], %70 {strides = array<i32>} : memref<544x36xf32, #tpu.memory_space<vmem>>, vector<544x4xf32>,
    %c0_42 = arith.constant 0 : index
    %c0_43 = arith.constant 0 : index
    %72 = vector.load %arg7[%c0_42, %c0_43] : memref<544x36xf32, #tpu.memory_space<vmem>>, vector<544x36xf32>
    %73 = arith.truncf %72 : vector<544x36xf32> to vector<544x36xbf16>
    %c0_44 = arith.constant 0 : index
    %c0_45 = arith.constant 0 : index
    %74 = vector.load %arg3[%c0_44, %c0_45] : memref<36x8xbf16, #tpu.memory_space<vmem>>, vector<36x8xbf16>
    %cst_46 = arith.constant dense<0.000000e+00> : vector<544x8xf32>
    %75 = tpu.matmul %73, %74, %cst_46 {dimension_numbers = #tpu.dot_dimension_numbers<[1], [0], [0], [1], [0, 0, 1, 1], [], []>} : vector<544x36xbf16>, vector<36x8xbf16>, vector<544x8xf32> -> vector<544x8xf32>
    %c0_47 = arith.constant 0 : index
    %c0_48 = arith.constant 0 : index
    %76 = vector.load %arg4[%c0_47, %c0_48] : memref<1x8xf32, #tpu.memory_space<vmem>>, vector<1x8xf32>
    %77 = vector.broadcast %76 : vector<1x8xf32> to vector<544x8xf32>
    %78 = arith.addf %75, %77 : vector<544x8xf32>
    %cst_49 = arith.constant 0.000000e+00 : f32
    %79 = vector.broadcast %cst_49 : f32 to vector<544x8xf32>
    %80 = arith.cmpf ogt, %78, %79 : vector<544x8xf32>
    %cst_50 = arith.constant 0.00999999977 : f32
    %81 = vector.broadcast %cst_50 : f32 to vector<544x8xf32>
    %82 = arith.mulf %81, %78 : vector<544x8xf32>
    %83 = arith.select %80, %78, %82 : vector<544x8xi1>, vector<544x8xf32>
    %84 = vector.extract_strided_slice %83 {offsets = [0, 0], sizes = [256, 8], strides = [1, 1]} : vector<544x8xf32> to vector<256x8xf32>
    %c0_51 = arith.constant 0 : index
    %c0_52 = arith.constant 0 : index
    %85 = vector.load %arg5[%c0_51, %c0_52] : memref<512x8xf32, #tpu.memory_space<vmem>>, vector<256x8xf32>
    tpu.vector_store %arg5[%c0_51, %c0_52], %84 {strides = array<i32>} : memref<512x8xf32, #tpu.memory_space<vmem>>, vector<256x8xf32>,
    %86 = vector.extract_strided_slice %83 {offsets = [288, 0], sizes = [256, 8], strides = [1, 1]} : vector<544x8xf32> to vector<256x8xf32>
    %c256 = arith.constant 256 : index
    %c0_53 = arith.constant 0 : index
    %87 = vector.load %arg5[%c256, %c0_53] : memref<512x8xf32, #tpu.memory_space<vmem>>, vector<256x8xf32>
    tpu.vector_store %arg5[%c256, %c0_53], %86 {strides = array<i32>} : memref<512x8xf32, #tpu.memory_space<vmem>>, vector<256x8xf32>,
    return
  }
  func.func @transform_0(%arg0: i32) -> (i32, i32) {
    %c0_i32 = arith.constant 0 : i32
    %c0_i32_0 = arith.constant 0 : i32
    %c0_i32_1 = arith.constant 0 : i32
    return %c0_i32, %c0_i32_0 : i32, i32
  }
  func.func @transform_1(%arg0: i32) -> (i32, i32) {
    %c0_i32 = arith.constant 0 : i32
    %c0_i32_0 = arith.constant 0 : i32
    %c0_i32_1 = arith.constant 0 : i32
    return %c0_i32, %c0_i32_0 : i32, i32
  }
  func.func @transform_2(%arg0: i32) -> (i32, i32) {
    %c0_i32 = arith.constant 0 : i32
    %c0_i32_0 = arith.constant 0 : i32
    %c0_i32_1 = arith.constant 0 : i32
    return %c0_i32, %c0_i32_0 : i32, i32
  }
  func.func @transform_3(%arg0: i32) -> (i32, i32) {
    %c0_i32 = arith.constant 0 : i32
    %c0_i32_0 = arith.constant 0 : i32
    %c0_i32_1 = arith.constant 0 : i32
    return %c0_i32, %c0_i32_0 : i32, i32
  }
  func.func @transform_4(%arg0: i32) -> (i32, i32) {
    %c0_i32 = arith.constant 0 : i32
    %c0_i32_0 = arith.constant 0 : i32
    %c0_i32_1 = arith.constant 0 : i32
    return %c0_i32, %c0_i32_0 : i32, i32
  }
}

</mosaic_0001>

<bundles_post_ra>
// kernel: ssconv_forward.1
= control target key start
LH: loop header
LB: loop body
LE: loop exit
PB: predicated region body
PF: predicated region fallthrough
CT: control target
= control target key end

     0   :  { %vm676_vm0 = vcmask 1041408   ;;  %vm82_vm1 = vcmask 31744   ;;  %s6792_s8 = smov 4   ;;  %s6793_s11 = smov 8   ;;  %vm2326_vm5 = vcmask 64544   ;;  %vm2803_vm7 = vcmask 97344   ;;  %s10499_s1 = inlined_call_operand.vmem [shape: bf16[4,4], index: 1, kind: input, shape index: {}]   ;;  %s10500_s0 = inlined_call_operand.vmem [shape: f32[512,4], index: 0, kind: input, shape index: {}]   ;;  %s10501_s2 = inlined_call_operand.vmem [shape: bf16[36,8], index: 2, kind: input, shape index: {}]   ;;  %s10502_s3 = inlined_call_operand.vmem [shape: f32[1,8], index: 3, kind: input, shape index: {}]   ;;  %s10503_s4 = inlined_call_operand.vmem [shape: f32[512,8], index: 4, kind: output, shape index: {}]  }
   0x1   :  { %v579_v0 = vld [vmem:[%s10499_s1] sm:$0x3]  ;;  %v6836_v2 = vld [vmem:[%s10500_s0 + $0x8] sm:$0xff]  ;;  %v6843_v4 = vld [vmem:[%s10500_s0 + $0x10] sm:$0xff]  ;;  %s6794_s12 = smov 12   ;;  %s6795_s13 = smov 16  }
   0x2   :  { %v6831_v1 = vld [vmem:[%s10500_s0] sm:$0xff]  ;;  %6749 = vmatprep.subr.msk.bf16.mxu0 %vm676_vm0, %v579_v0  ;;  %v678_v3 = vsel %vm676_vm0, %v579_v0, 0  ;;  %v6848_v5 = vld [vmem:[%s10500_s0 + $0x18] sm:$0xff]  ;;  %v84_v7 = vsel %vm82_vm1, %v6836_v2, 0.0  ;;  %v86_v10 = vsel %vm82_vm1, %v6843_v4, 0.0  ;;  %v6866_v12 = vld [vmem:[%s10500_s0 + $0x28] sm:$0xff]  ;;  %v217_v60 = vmul.f32 %v6836_v2, %v6836_v2 }
   0x3   :  { %v83_v6 = vsel %vm82_vm1, %v6831_v1, 0.0  ;;  %6604 = vmatpush3.bf16.msra.mxu0 %v678_v3  ;;  %v6857_v8 = vld [vmem:[%s10500_s0 + $0x20] sm:$0xff]  ;;  %v88_v11 = vsel %vm82_vm1, %v6848_v5, 0.0  ;;  %v6873_v15 = vld [vmem:[%s10500_s0 + $0x30] sm:$0xff]  ;;  %v92_v17 = vsel %vm82_vm1, %v6866_v12, 0.0  ;;  %v6880_v18 = vld [vmem:[%s10500_s0 + $0x38] sm:$0xff]  ;;  %v216_v57 = vmul.f32 %v6831_v1, %v6831_v1 }
   0x4   :  { %v85_v9 = vadd.f32 %v84_v7, %v83_v6  ;;  %v90_v14 = vsel %vm82_vm1, %v6857_v8, 0.0  ;;  %v94_v20 = vsel %vm82_vm1, %v6873_v15, 0.0  ;;  %v6887_v21 = vld [vmem:[%s10500_s0 + $0x40] sm:$0xff]  ;;  %v96_v23 = vsel %vm82_vm1, %v6880_v18, 0.0  ;;  %v6894_v24 = vld [vmem:[%s10500_s0 + $0x48] sm:$0xff]  ;;  %v6901_v27 = vld [vmem:[%s10500_s0 + $0x50] sm:$0xff] }
   0x5   :  { %v98_v26 = vsel %vm82_vm1, %v6887_v21, 0.0  ;;  %v100_v29 = vsel %vm82_vm1, %v6894_v24, 0.0  ;;  %v6908_v30 = vld [vmem:[%s10500_s0 + $0x58] sm:$0xff]  ;;  %v102_v32 = vsel %vm82_vm1, %v6901_v27, 0.0  ;;  %v6915_v33 = vld [vmem:[%s10500_s0 + $0x60] sm:$0xff]  ;;  %v6922_v36 = vld [vmem:[%s10500_s0 + $0x68] sm:$0xff]  ;;  %v218_v61 = vmul.f32 %v6843_v4, %v6843_v4 }
   0x6   :  { %v87_v13 = vadd.f32 %v86_v10, %v85_v9  ;;  %v104_v35 = vsel %vm82_vm1, %v6908_v30, 0.0  ;;  %v106_v38 = vsel %vm82_vm1, %v6915_v33, 0.0  ;;  %v6929_v39 = vld [vmem:[%s10500_s0 + $0x70] sm:$0xff]  ;;  %v108_v41 = vsel %vm82_vm1, %v6922_v36, 0.0  ;;  %v6936_v42 = vld [vmem:[%s10500_s0 + $0x78] sm:$0xff]  ;;  %v6943_v45 = vld [vmem:[%s10500_s0 + $0x80] sm:$0xff] }
   0x7   :  { %v110_v44 = vsel %vm82_vm1, %v6929_v39, 0.0  ;;  %v112_v47 = vsel %vm82_vm1, %v6936_v42, 0.0  ;;  %v6950_v48 = vld [vmem:[%s10500_s0 + $0x88] sm:$0xff]  ;;  %v114_v50 = vsel %vm82_vm1, %v6943_v45, 0.0  ;;  %v6957_v51 = vld [vmem:[%s10500_s0 + $0x90] sm:$0xff]  ;;  %v6964_v54 = vld [vmem:[%s10500_s0 + $0x98] sm:$0xff]  ;;  %v219_v3 = vmul.f32 %v6848_v5, %v6848_v5 }
   0x8   :  { %v89_v16 = vadd.f32 %v88_v11, %v87_v13  ;;  %v116_v53 = vsel %vm82_vm1, %v6950_v48, 0.0  ;;  %v118_v56 = vsel %vm82_vm1, %v6957_v51, 0.0  ;;  %v6973_v58 = vld [vmem:[%s10500_s0 + $0xa0] sm:$0xff]  ;;  %v120_v62 = vsel %vm82_vm1, %v6964_v54, 0.0  ;;  %v6984_v63 = vld [vmem:[%s10500_s0 + $0xa8] sm:$0xff]  ;;  %v6994_v9 = vld [vmem:[%s10500_s0 + $0xb0] sm:$0xff] }
   0x9   :  { %v122_v6 = vsel %vm82_vm1, %v6973_v58, 0.0  ;;  %v280_v7 = vsel %vm82_vm1, %v216_v57, 0.0  ;;  %v220_v11 = vmul.f32 %v6857_v8, %v6857_v8  ;;  %v281_v13 = vsel %vm82_vm1, %v217_v60, 0.0  ;;  %s6799_s15 = smov 32  }
   0xa   :  { %v91_v19 = vadd.f32 %v90_v14, %v89_v16  ;;  %v283_v14 = vsel %vm82_vm1, %v218_v61, 0.0  ;;  %v124_v16 = vsel %vm82_vm1, %v6984_v63, 0.0  ;;  %v225_v57 = vmul.f32 %v6894_v24, %v6894_v24 }
   0xb   :  { %vm3280_vm8 = vcmask 130144   ;;  %vm3689_vm9 = vcmask 162944  }
   0xc   :  { %v93_v22 = vadd.f32 %v92_v17, %v91_v19  ;;  %v282_v17 = vadd.f32 %v281_v13, %v280_v7  ;;  %v7005_v19 = vld [vmem:[%s10500_s0 + $0xb8] sm:$0xff] }
   0xe   :  { %v95_v25 = vadd.f32 %v94_v20, %v93_v22  ;;  %v221_v22 = vmul.f32 %v6866_v12, %v6866_v12 }
  0x10   :  { %v97_v28 = vadd.f32 %v96_v23, %v95_v25  ;;  %v285_v23 = vsel %vm82_vm1, %v219_v3, 0.0  ;;  %v126_v25 = vsel %vm82_vm1, %v6994_v9, 0.0  ;;  %v226_v3 = vmul.f32 %v6901_v27, %v6901_v27 }
  0x12   :  { %v99_v31 = vadd.f32 %v98_v26, %v97_v28  ;;  %v284_v26 = vadd.f32 %v283_v14, %v282_v17  ;;  %v7015_v28 = vld [vmem:[%s10500_s0 + $0xc0] sm:$0xff]  ;;  %v227_v14 = vmul.f32 %v6908_v30, %v6908_v30 }
  0x14   :  { %v101_v34 = vadd.f32 %v100_v29, %v99_v31  ;;  %v222_v31 = vmul.f32 %v6873_v15, %v6873_v15 }
  0x16   :  { %v103_v37 = vadd.f32 %v102_v32, %v101_v34  ;;  %v287_v32 = vsel %vm82_vm1, %v220_v11, 0.0  ;;  %v128_v34 = vsel %vm82_vm1, %v7005_v19, 0.0  ;;  %v7065_v11 = vld [vmem:[%s10500_s0 + $0xe8] sm:$0xff] }
  0x17   :  { %10575 = vst [vmem:[#allocation4_spill] sm:$0xff] %v7065_v11 }
  0x18   :  { %v105_v40 = vadd.f32 %v104_v35, %v103_v37  ;;  %v286_v35 = vadd.f32 %v285_v23, %v284_v26  ;;  %v7025_v37 = vld [vmem:[%s10500_s0 + $0xc8] sm:$0xff]  ;;  %v299_v26 = vsel %vm82_vm1, %v226_v3, 0.0 }
  0x1a   :  { %v107_v43 = vadd.f32 %v106_v38, %v105_v40  ;;  %v223_v40 = vmul.f32 %v6880_v18, %v6880_v18 }
  0x1c   :  { %v109_v46 = vadd.f32 %v108_v41, %v107_v43  ;;  %v289_v41 = vsel %vm82_vm1, %v221_v22, 0.0  ;;  %v130_v43 = vsel %vm82_vm1, %v7015_v28, 0.0  ;;  %v7075_v22 = vld [vmem:[%s10500_s0 + $0xf0] sm:$0xff] }
  0x1d   :  { %10576 = vst [vmem:[#allocation5_spill] sm:$0xff] %v7075_v22 }
  0x1e   :  { %v111_v49 = vadd.f32 %v110_v44, %v109_v46  ;;  %v288_v44 = vadd.f32 %v287_v32, %v286_v35  ;;  %v7035_v46 = vld [vmem:[%s10500_s0 + $0xd0] sm:$0xff]  ;;  %v7085_v32 = vld [vmem:[%s10500_s0 + $0xf8] sm:$0xff]  ;;  %v229_v35 = vmul.f32 %v6922_v36, %v6922_v36 }
  0x1f   :  { %v134_v60 = vsel %vm82_vm1, %v7035_v46, 0.0  ;;  %10577 = vst [vmem:[#allocation6_spill] sm:$0xff] %v7085_v32 }
  0x20   :  { %v113_v52 = vadd.f32 %v112_v47, %v111_v49  ;;  %v224_v49 = vmul.f32 %v6887_v21, %v6887_v21 }
  0x22   :  { %v115_v55 = vadd.f32 %v114_v50, %v113_v52  ;;  %v291_v50 = vsel %vm82_vm1, %v222_v31, 0.0  ;;  %v132_v52 = vsel %vm82_vm1, %v7025_v37, 0.0 }
  0x24   :  { %v117_v59 = vadd.f32 %v116_v53, %v115_v55  ;;  %v290_v53 = vadd.f32 %v289_v41, %v288_v44  ;;  %v7045_v55 = vld [vmem:[%s10500_s0 + $0xd8] sm:$0xff] }
  0x25   :  { %v136_v7 = vsel %vm82_vm1, %v7045_v55, 0.0 }
  0x26   :  { %v119_v0 = vadd.f32 %v118_v56, %v117_v59  ;;  %v293_v59 = vsel %vm82_vm1, %v223_v40, 0.0  ;;  %v292_v61 = vadd.f32 %v291_v50, %v290_v53  ;;  %v142_v40 = vsel %vm82_vm1, %v7075_v22, 0.0  ;;  %v7105_v53 = vld [vmem:[%s10500_s0 + $0x108] sm:$0xff] }
  0x27   :  { %v144_v50 = vsel %vm82_vm1, %v7085_v32, 0.0  ;;  %10579 = vst [vmem:[#allocation8_spill] sm:$0xff] %v7105_v53 }
  0x28   :  { %v121_v10 = vadd.f32 %v120_v62, %v119_v0  ;;  %v7055_v62 = vld [vmem:[%s10500_s0 + $0xe0] sm:$0xff] }
  0x29   :  { %v138_v17 = vsel %vm82_vm1, %v7055_v62, 0.0 }
  0x2a   :  { %v123_v20 = vadd.f32 %v122_v6, %v121_v10  ;;  %v295_v6 = vsel %vm82_vm1, %v224_v49, 0.0  ;;  %v294_v10 = vadd.f32 %v293_v59, %v292_v61  ;;  %v305_v59 = vsel %vm82_vm1, %v229_v35, 0.0 }
  0x2c   :  { %v125_v29 = vadd.f32 %v124_v16, %v123_v20  ;;  %v297_v16 = vsel %vm82_vm1, %v225_v57, 0.0  ;;  %v296_v20 = vadd.f32 %v295_v6, %v294_v10  ;;  %v231_v57 = vmul.f32 %v6936_v42, %v6936_v42 }
  0x2d   :  { %v232_v6 = vmul.f32 %v6943_v45, %v6943_v45  ;;  %v148_v10 = vsel %vm82_vm1, %v7105_v53, 0.0 }
  0x2e   :  { %v127_v38 = vadd.f32 %v126_v25, %v125_v29  ;;  %v228_v25 = vmul.f32 %v6915_v33, %v6915_v33  ;;  %v140_v29 = vsel %vm82_vm1, %v7065_v11, 0.0  ;;  %v298_v31 = vadd.f32 %v297_v16, %v296_v20 }
  0x2f   :  { %v309_v20 = vsel %vm82_vm1, %v231_v57, 0.0  ;;  %v236_v57 = vmul.f32 %v6973_v58, %v6973_v58 }
  0x30   :  { %v129_v47 = vadd.f32 %v128_v34, %v127_v38  ;;  %v301_v38 = vsel %vm82_vm1, %v227_v14, 0.0  ;;  %v300_v41 = vadd.f32 %v299_v26, %v298_v31  ;;  %v303_v49 = vsel %vm82_vm1, %v228_v25, 0.0  ;;  %v7125_v14 = vld [vmem:[%s10500_s0 + $0x118] sm:$0xff]  ;;  %v7135_v26 = vld [vmem:[%s10500_s0 + $0x120] sm:$0xff] }
  0x31   :  { %10581 = vst [vmem:[#allocation10_spill] sm:$0xff] %v7125_v14  ;;  %10582 = vst [vmem:[#allocation11_spill] sm:$0xff] %v7135_v26  ;;  %v234_v31 = vmul.f32 %v6957_v51, %v6957_v51  ;;  %v152_v35 = vsel %vm82_vm1, %v7125_v14, 0.0 }
  0x32   :  { %v131_v56 = vadd.f32 %v130_v43, %v129_v47  ;;  %v7095_v43 = vld [vmem:[%s10500_s0 + $0x100] sm:$0xff]  ;;  %v230_v47 = vmul.f32 %v6929_v39, %v6929_v39 }
  0x33   :  { %10578 = vst [vmem:[#allocation7_spill] sm:$0xff] %v7095_v43 }
  0x34   :  { %v133_v0 = vadd.f32 %v132_v52, %v131_v56  ;;  %v302_v52 = vadd.f32 %v301_v38, %v300_v41 }
  0x36   :  { %v135_v13 = vadd.f32 %v134_v60, %v133_v0  ;;  %v146_v60 = vsel %vm82_vm1, %v7095_v43, 0.0  ;;  %v304_v61 = vadd.f32 %v303_v49, %v302_v52  ;;  %v7115_v0 = vld [vmem:[%s10500_s0 + $0x110] sm:$0xff]  ;;  %v154_v49 = vsel %vm82_vm1, %v7135_v26, 0.0 }
  0x37   :  { %10580 = vst [vmem:[#allocation9_spill] sm:$0xff] %v7115_v0  ;;  %v7155_v52 = vld [vmem:[%s10500_s0 + $0x130] sm:$0xff] }
  0x38   :  { %v137_v23 = vadd.f32 %v136_v7, %v135_v13  ;;  %v307_v7 = vsel %vm82_vm1, %v230_v47, 0.0  ;;  %v306_v13 = vadd.f32 %v305_v59, %v304_v61  ;;  %v315_v59 = vsel %vm82_vm1, %v234_v31, 0.0 }
  0x3a   :  { %v139_v34 = vadd.f32 %v138_v17, %v137_v23  ;;  %v233_v17 = vmul.f32 %v6950_v48, %v6950_v48  ;;  %v150_v23 = vsel %vm82_vm1, %v7115_v0, 0.0  ;;  %v308_v25 = vadd.f32 %v307_v7, %v306_v13 }
  0x3b   :  { %v237_v7 = vmul.f32 %v6984_v63, %v6984_v63  ;;  %v158_v13 = vsel %vm82_vm1, %v7155_v52, 0.0 }
  0x3c   :  { %v141_v44 = vadd.f32 %v140_v29, %v139_v34  ;;  %v311_v34 = vsel %vm82_vm1, %v232_v6, 0.0  ;;  %v310_v38 = vadd.f32 %v309_v20, %v308_v25  ;;  %v313_v47 = vsel %vm82_vm1, %v233_v17, 0.0  ;;  %v7175_v17 = vld [vmem:[%s10500_s0 + $0x140] sm:$0xff] }
  0x3d   :  { %v319_v25 = vsel %vm82_vm1, %v236_v57, 0.0 }
  0x3e   :  { %v143_v56 = vadd.f32 %v142_v40, %v141_v44  ;;  %v7145_v40 = vld [vmem:[%s10500_s0 + $0x128] sm:$0xff]  ;;  %v235_v44 = vmul.f32 %v6964_v54, %v6964_v54 }
  0x3f   :  { %10583 = vst [vmem:[#allocation12_spill] sm:$0xff] %v7145_v40 }
  0x40   :  { %v145_v3 = vadd.f32 %v144_v50, %v143_v56  ;;  %v312_v50 = vadd.f32 %v311_v34, %v310_v38  ;;  %v7185_v34 = vld [vmem:[%s10500_s0 + $0x148] sm:$0xff]  ;;  %v239_v38 = vmul.f32 %v7005_v19, %v7005_v19 }
  0x41   :  { %10584 = vst [vmem:[#allocation13_spill] sm:$0xff] %v7185_v34 }
  0x42   :  { %v147_v16 = vadd.f32 %v146_v60, %v145_v3  ;;  %v156_v60 = vsel %vm82_vm1, %v7145_v40, 0.0  ;;  %v314_v61 = vadd.f32 %v313_v47, %v312_v50  ;;  %v7165_v3 = vld [vmem:[%s10500_s0 + $0x138] sm:$0xff] }
  0x44   :  { %v149_v29 = vadd.f32 %v148_v10, %v147_v16  ;;  %v317_v10 = vsel %vm82_vm1, %v235_v44, 0.0  ;;  %v316_v16 = vadd.f32 %v315_v59, %v314_v61  ;;  %v162_v44 = vsel %vm82_vm1, %v7175_v17, 0.0  ;;  %v7205_v61 = vld [vmem:[%s10500_s0 + $0x158] sm:$0xff] }
  0x45   :  { %v164_v59 = vsel %vm82_vm1, %v7185_v34, 0.0  ;;  %10586 = vst [vmem:[#allocation15_spill] sm:$0xff] %v7205_v61 }
  0x46   :  { %v151_v41 = vadd.f32 %v150_v23, %v149_v29  ;;  %v238_v23 = vmul.f32 %v6994_v9, %v6994_v9  ;;  %v160_v29 = vsel %vm82_vm1, %v7165_v3, 0.0  ;;  %v318_v31 = vadd.f32 %v317_v10, %v316_v16 }
  0x47   :  { %v325_v10 = vsel %vm82_vm1, %v239_v38, 0.0  ;;  %v7225_v38 = vld [vmem:[%s10500_s0 + $0x168] sm:$0xff] }
  0x48   :  { %v153_v56 = vadd.f32 %v152_v35, %v151_v41  ;;  %v321_v41 = vsel %vm82_vm1, %v237_v7, 0.0  ;;  %v320_v47 = vadd.f32 %v319_v25, %v318_v31  ;;  %v323_v57 = vsel %vm82_vm1, %v238_v23, 0.0  ;;  %10588 = vst [vmem:[#allocation17_spill] sm:$0xff] %v7225_v38 }
  0x49   :  { %v241_v7 = vmul.f32 %v7025_v37, %v7025_v37  ;;  %v242_v25 = vmul.f32 %v7035_v46, %v7035_v46  ;;  %v168_v31 = vsel %vm82_vm1, %v7205_v61, 0.0 }
  0x4a   :  { %v155_v6 = vadd.f32 %v154_v49, %v153_v56  ;;  %v7195_v49 = vld [vmem:[%s10500_s0 + $0x150] sm:$0xff]  ;;  %v240_v56 = vmul.f32 %v7015_v28, %v7015_v28 }
  0x4b   :  { %10585 = vst [vmem:[#allocation14_spill] sm:$0xff] %v7195_v49 }
  0x4c   :  { %v157_v20 = vadd.f32 %v156_v60, %v155_v6  ;;  %v322_v60 = vadd.f32 %v321_v41, %v320_v47  ;;  %v329_v47 = vsel %vm82_vm1, %v241_v7, 0.0  ;;  %v7245_v7 = vld [vmem:[%s10500_s0 + $0x178] sm:$0xff] }
  0x4d   :  { %10590 = vst [vmem:[#allocation19_spill] sm:$0xff] %v7245_v7 }
  0x4e   :  { %v159_v35 = vadd.f32 %v158_v13, %v157_v20  ;;  %v166_v13 = vsel %vm82_vm1, %v7195_v49, 0.0  ;;  %v324_v16 = vadd.f32 %v323_v57, %v322_v60  ;;  %v7215_v20 = vld [vmem:[%s10500_s0 + $0x160] sm:$0xff]  ;;  %v244_v60 = vmul.f32 %v7055_v62, %v7055_v62 }
  0x4f   :  { %10587 = vst [vmem:[#allocation16_spill] sm:$0xff] %v7215_v20 }
  0x50   :  { %v161_v50 = vadd.f32 %v160_v29, %v159_v35  ;;  %v327_v29 = vsel %vm82_vm1, %v240_v56, 0.0  ;;  %v326_v35 = vadd.f32 %v325_v10, %v324_v16  ;;  %v7235_v56 = vld [vmem:[%s10500_s0 + $0x170] sm:$0xff]  ;;  %v172_v10 = vsel %vm82_vm1, %v7225_v38, 0.0 }
  0x51   :  { %10589 = vst [vmem:[#allocation18_spill] sm:$0xff] %v7235_v56 }
  0x52   :  { %v163_v6 = vadd.f32 %v162_v44, %v161_v50  ;;  %v243_v44 = vmul.f32 %v7045_v55, %v7045_v55  ;;  %v170_v50 = vsel %vm82_vm1, %v7215_v20, 0.0  ;;  %v328_v57 = vadd.f32 %v327_v29, %v326_v35 }
  0x54   :  { %v165_v23 = vadd.f32 %v164_v59, %v163_v6  ;;  %v331_v6 = vsel %vm82_vm1, %v242_v25, 0.0  ;;  %v333_v29 = vsel %vm82_vm1, %v243_v44, 0.0  ;;  %v7255_v25 = vld [vmem:[%s10500_s0 + $0x180] sm:$0xff]  ;;  %v7265_v44 = vld [vmem:[%s10500_s0 + $0x188] sm:$0xff] }
  0x55   :  { %10591 = vst [vmem:[#allocation20_spill] sm:$0xff] %v7255_v25  ;;  %10592 = vst [vmem:[#allocation21_spill] sm:$0xff] %v7265_v44 }
  0x56   :  { %v167_v41 = vadd.f32 %v166_v13, %v165_v23  ;;  %v330_v13 = vadd.f32 %v329_v47, %v328_v57  ;;  %v245_v23 = vmul.f32 %v7065_v11, %v7065_v11  ;;  %v246_v47 = vmul.f32 %v7075_v22, %v7075_v22 }
  0x57   :  { %v176_v57 = vsel %vm82_vm1, %v7245_v7, 0.0  ;;  %v253_v11 = vmul.f32 %v7145_v40, %v7145_v40 }
  0x58   :  { %v169_v59 = vadd.f32 %v168_v31, %v167_v41  ;;  %v174_v31 = vsel %vm82_vm1, %v7235_v56, 0.0  ;;  %v332_v35 = vadd.f32 %v331_v6, %v330_v13  ;;  %v247_v13 = vmul.f32 %v7085_v32, %v7085_v32 }
  0x59   :  { %v353_v40 = vsel %vm82_vm1, %v253_v11, 0.0 }
  0x5a   :  { %v171_v16 = vadd.f32 %v170_v50, %v169_v59  ;;  %v335_v50 = vsel %vm82_vm1, %v244_v60, 0.0  ;;  %v334_v59 = vadd.f32 %v333_v29, %v332_v35  ;;  %v7275_v60 = vld [vmem:[%s10500_s0 + $0x190] sm:$0xff]  ;;  %v248_v35 = vmul.f32 %v7095_v43, %v7095_v43 }
  0x5b   :  { %10593 = vst [vmem:[#allocation22_spill] sm:$0xff] %v7275_v60 }
  0x5c   :  { %v173_v41 = vadd.f32 %v172_v10, %v171_v16  ;;  %v337_v10 = vsel %vm82_vm1, %v245_v23, 0.0  ;;  %v178_v16 = vsel %vm82_vm1, %v7255_v25, 0.0  ;;  %v336_v22 = vadd.f32 %v335_v50, %v334_v59  ;;  %v7285_v23 = vld [vmem:[%s10500_s0 + $0x198] sm:$0xff] }
  0x5d   :  { %10594 = vst [vmem:[#allocation23_spill] sm:$0xff] %v7285_v23  ;;  %v249_v59 = vmul.f32 %v7105_v53, %v7105_v53 }
  0x5e   :  { %v175_v6 = vadd.f32 %v174_v31, %v173_v41  ;;  %v339_v31 = vsel %vm82_vm1, %v246_v47, 0.0  ;;  %v180_v41 = vsel %vm82_vm1, %v7265_v44, 0.0  ;;  %v338_v32 = vadd.f32 %v337_v10, %v336_v22  ;;  %v7295_v47 = vld [vmem:[%s10500_s0 + $0x1a0] sm:$0xff] }
  0x5f   :  { %v250_v10 = vmul.f32 %v7115_v0, %v7115_v0 }
  0x60   :  { %v177_v29 = vadd.f32 %v176_v57, %v175_v6  ;;  %v341_v57 = vsel %vm82_vm1, %v247_v13, 0.0  ;;  %v182_v6 = vsel %vm82_vm1, %v7275_v60, 0.0  ;;  %v340_v43 = vadd.f32 %v339_v31, %v338_v32  ;;  %v7305_v13 = vld [vmem:[%s10500_s0 + $0x1a8] sm:$0xff] }
  0x61   :  { %v251_v31 = vmul.f32 %v7125_v14, %v7125_v14 }
  0x62   :  { %v179_v50 = vadd.f32 %v178_v16, %v177_v29  ;;  %v343_v16 = vsel %vm82_vm1, %v248_v35, 0.0  ;;  %v184_v29 = vsel %vm82_vm1, %v7285_v23, 0.0  ;;  %v342_v53 = vadd.f32 %v341_v57, %v340_v43  ;;  %v7315_v35 = vld [vmem:[%s10500_s0 + $0x1b0] sm:$0xff] }
  0x63   :  { %v252_v57 = vmul.f32 %v7135_v26, %v7135_v26  ;;  %v254_v26 = vmul.f32 %v7155_v52, %v7155_v52 }
  0x64   :  { %v181_v22 = vadd.f32 %v180_v41, %v179_v50  ;;  %v345_v41 = vsel %vm82_vm1, %v249_v59, 0.0  ;;  %v186_v50 = vsel %vm82_vm1, %v7295_v47, 0.0  ;;  %v344_v0 = vadd.f32 %v343_v16, %v342_v53  ;;  %v7328_v16 = vld [vmem:[%s10500_s0 + $0x1b8] sm:$0xff] }
  0x65   :  { %v349_v53 = vsel %vm82_vm1, %v251_v31, 0.0  ;;  %v192_v31 = vsel %vm82_vm1, %v7328_v16, 0.0 }
  0x66   :  { %v183_v32 = vadd.f32 %v182_v6, %v181_v22  ;;  %v347_v6 = vsel %vm82_vm1, %v250_v10, 0.0  ;;  %v188_v22 = vsel %vm82_vm1, %v7305_v13, 0.0  ;;  %v346_v14 = vadd.f32 %v345_v41, %v344_v0 }
  0x67   :  { %v351_v0 = vsel %vm82_vm1, %v252_v57, 0.0  ;;  %v355_v57 = vsel %vm82_vm1, %v254_v26, 0.0 }
  0x68   :  { %v185_v43 = vadd.f32 %v184_v29, %v183_v32  ;;  %v190_v29 = vsel %vm82_vm1, %v7315_v35, 0.0  ;;  %v348_v32 = vadd.f32 %v347_v6, %v346_v14  ;;  %v7343_v14 = vld [vmem:[%s10500_s0 + $0x1c0] sm:$0xff] }
  0x6a   :  { %v187_v59 = vadd.f32 %v186_v50, %v185_v43  ;;  %v350_v41 = vadd.f32 %v349_v53, %v348_v32  ;;  %v255_v43 = vmul.f32 %v7165_v3, %v7165_v3  ;;  %v257_v32 = vmul.f32 %v7185_v34, %v7185_v34  ;;  %v7369_v34 = vld [vmem:[%s10500_s0 + $0x1d0] sm:$0xff] }
  0x6c   :  { %v189_v10 = vadd.f32 %v188_v22, %v187_v59  ;;  %v352_v6 = vadd.f32 %v351_v0, %v350_v41  ;;  %v256_v22 = vmul.f32 %v7175_v17, %v7175_v17  ;;  %v357_v11 = vsel %vm82_vm1, %v255_v43, 0.0 }
  0x6d   :  { %v258_v41 = vmul.f32 %v7195_v49, %v7195_v49  ;;  %v361_v43 = vsel %vm82_vm1, %v257_v32, 0.0 }
  0x6e   :  { %v191_v50 = vadd.f32 %v190_v29, %v189_v10  ;;  %v354_v53 = vadd.f32 %v353_v40, %v352_v6  ;;  %v194_v29 = vsel %vm82_vm1, %v7343_v14, 0.0  ;;  %v7356_v10 = vld [vmem:[%s10500_s0 + $0x1c8] sm:$0xff]  ;;  %v359_v26 = vsel %vm82_vm1, %v256_v22, 0.0 }
  0x6f   :  { %v259_v6 = vmul.f32 %v7205_v61, %v7205_v61  ;;  %v363_v22 = vsel %vm82_vm1, %v258_v41, 0.0  ;;  %v7382_v61 = vld [vmem:[%s10500_s0 + $0x1d8] sm:$0xff] }
  0x70   :  { %v193_v59 = vadd.f32 %v192_v31, %v191_v50  ;;  %v356_v0 = vadd.f32 %v355_v57, %v354_v53  ;;  %v196_v31 = vsel %vm82_vm1, %v7356_v10, 0.0  ;;  %v260_v53 = vmul.f32 %v7215_v20, %v7215_v20 }
  0x71   :  { %v365_v32 = vsel %vm82_vm1, %v259_v6, 0.0 }
  0x72   :  { %v195_v40 = vadd.f32 %v194_v29, %v193_v59  ;;  %v358_v50 = vadd.f32 %v357_v11, %v356_v0  ;;  %v198_v11 = vsel %vm82_vm1, %v7369_v34, 0.0  ;;  %v261_v0 = vmul.f32 %v7225_v38, %v7225_v38  ;;  %v7395_v38 = vld [vmem:[%s10500_s0 + $0x1e0] sm:$0xff] }
  0x73   :  { %v367_v41 = vsel %vm82_vm1, %v260_v53, 0.0 }
  0x74   :  { %v360_v57 = vadd.f32 %v359_v26, %v358_v50  ;;  %v197_v59 = vadd.f32 %v196_v31, %v195_v40  ;;  %v262_v50 = vmul.f32 %v7235_v56, %v7235_v56  ;;  %v369_v6 = vsel %vm82_vm1, %v261_v0, 0.0 }
  0x75   :  { %v265_v0 = vmul.f32 %v7265_v44, %v7265_v44  ;;  %v10518_v56 = vmov 0.0   ;;  %v267_v44 = vmul.f32 %v7285_v23, %v7285_v23 }
  0x76   :  { %v362_v29 = vadd.f32 %v361_v43, %v360_v57  ;;  %v199_v40 = vadd.f32 %v198_v11, %v197_v59  ;;  %v200_v43 = vsel %vm82_vm1, %v7382_v61, 0.0  ;;  %v263_v57 = vmul.f32 %v7245_v7, %v7245_v7  ;;  %1163 = vst.msk [vmem:[#allocation2 + $0x10] sm:$0xff] %vm82_vm1, %v10518_v56  ;;  %1162 = vst.msk [vmem:[#allocation2 + $0x8] sm:$0xff] %vm82_vm1, %v10518_v56 }
  0x77   :  { %v371_v53 = vsel %vm82_vm1, %v262_v50, 0.0  ;;  %1164 = vst.msk [vmem:[#allocation2 + $0x18] sm:$0xff] %vm82_vm1, %v10518_v56  ;;  %1165 = vst.msk [vmem:[#allocation2 + $0x120] sm:$0xff] %vm82_vm1, %v10518_v56  ;;  %v7428_v50 = vld [vmem:[%s10500_s0 + $0x1e8] sm:$0xff] }
  0x78   :  { %v364_v26 = vadd.f32 %v363_v22, %v362_v29  ;;  %v264_v29 = vmul.f32 %v7255_v25, %v7255_v25  ;;  %v201_v59 = vadd.f32 %v200_v43, %v199_v40  ;;  %v373_v7 = vsel %vm82_vm1, %v263_v57, 0.0  ;;  %1166 = vst.msk [vmem:[#allocation2 + $0x128] sm:$0xff] %vm82_vm1, %v10518_v56  ;;  %1167 = vst.msk [vmem:[#allocation2 + $0x130] sm:$0xff] %vm82_vm1, %v10518_v56 }
  0x79   :  { %1168 = vst.msk [vmem:[#allocation2 + $0x138] sm:$0xff] %vm82_vm1, %v10518_v56  ;;  %1169 = vst.msk [vmem:[#allocation2 + $0x240] sm:$0xff] %vm82_vm1, %v10518_v56  ;;  %v377_v25 = vsel %vm82_vm1, %v265_v0, 0.0  ;;  %v269_v0 = vmul.f32 %v7305_v13, %v7305_v13 }
  0x7a   :  { %v366_v31 = vadd.f32 %v365_v32, %v364_v26  ;;  %v1237_v32 = vlaneseq  ;;  %v202_v26 = vsel %vm82_vm1, %v7395_v38, 0.0  ;;  %1170 = vst.msk [vmem:[#allocation2 + $0x248] sm:$0xff] %vm82_vm1, %v10518_v56  ;;  %1171 = vst.msk [vmem:[#allocation2 + $0x250] sm:$0xff] %vm82_vm1, %v10518_v56  ;;  %v375_v43 = vsel %vm82_vm1, %v264_v29, 0.0 }
  0x7b   :  { %v203_v57 = vadd.f32 %v202_v26, %v201_v59  ;;  %v204_v56 = vsel %vm82_vm1, %v7428_v50, 0.0 }
  0x7c   :  { %v368_v22 = vadd.f32 %v367_v41, %v366_v31  ;;  %v7430_v40 = vshrl.u32 %v1237_v32, 7  ;;  %v266_v31 = vmul.f32 %v7275_v60, %v7275_v60  ;;  %v381_v60 = vsel %vm82_vm1, %v267_v44, 0.0 }
  0x7d   :  { %v205_v59 = vadd.f32 %v204_v56, %v203_v57  ;;  %v81_v56 = vld [vmem:[%s10500_s0 + $0x1f8] sm:$0xff]  ;;  %v10595_v57 = vmov 0.0  }
  0x7e   :  { %v370_v11 = vadd.f32 %v369_v6, %v368_v22  ;;  %v1273_v22 = vadd.s32 280, %v7430_v40  ;;  %v379_v29 = vsel %vm82_vm1, %v266_v31, 0.0  ;;  %v270_v31 = vmul.f32 %v7315_v35, %v7315_v35  ;;  %v7476_v20 = vld [vmem:[#allocation2 + $0x120] sm:$0xff] }
  0x7f   :  { %v385_v35 = vsel %vm82_vm1, %v269_v0, 0.0 }
  0x80   :  { %v372_v41 = vadd.f32 %v371_v53, %v370_v11  ;;  %v7444_v53 = vld [vmem:[%s10500_s0 + $0x1f0] sm:$0xff]  ;;  %v1341_v32 = vand.u32 15, %v1273_v22  ;;  %v7465_v44 = vld [vmem:[#allocation2 + $0x138] sm:$0xff] }
  0x81   :  { %v206_v23 = vsel %vm82_vm1, %v7444_v53, 0.0  ;;  %v2430_v22 = vld [vmem:[#allocation2 + $0x129] sm:$0xff] }
  0x82   :  { %v374_v6 = vadd.f32 %v373_v7, %v372_v41  ;;  %v268_v7 = vmul.f32 %v7295_v47, %v7295_v47  ;;  %v1986_v41 = vld [vmem:[#allocation2 + $0x10] sm:$0xff]  ;;  %vm1613_vm2 = vcmp.ne.s32.totalorder %v1341_v32, 15  ;;  %v1987_v47 = vld [vmem:[#allocation2 + $0x18] sm:$0xff]  ;;  %v207_v32 = vadd.f32 %v206_v23, %v205_v59 }
  0x83   :  { %2122 = vrot.lane.b32.xlu0 %v1986_v41, %s6792_s8  ;;  %v387_v59 = vsel %vm82_vm1, %v270_v31, 0.0 }
  0x84   :  { %v376_v11 = vadd.f32 %v375_v43, %v374_v6  ;;  %v7455_v43 = vld [vmem:[#allocation2 + $0x128] sm:$0xff]  ;;  %v383_v13 = vsel %vm82_vm1, %v268_v7, 0.0  ;;  %v7468_v6 = vsel %vm1613_vm2, 1.0, %v10595_v57 }
  0x85   :  { %2192 = vrot.lane.b32.xlu1 %v7455_v43, %s6792_s8  ;;  %10596 = vst [vmem:[#allocation24_spill] sm:$0xff] %v7468_v6  ;;  %v2498_v23 = vmul.f32 %v7468_v6, %v2430_v22  ;;  %v1272_v22 = vadd.s32 272, %v7430_v40 }
  0x86   :  { %v378_v26 = vadd.f32 %v377_v25, %v376_v11  ;;  %v2905_v11 = vld [vmem:[#allocation2 + $0x127] sm:$0xff] }
  0x87   :  { %1953 = vst.msk [vmem:[#allocation3 + $0x118] sm:$0xff] %vm82_vm1, %v2905_v11  ;;  %2124 = vrot.lane.b32.xlu0 %v1987_v47, %s6792_s8 }
  0x88   :  { %v380_v25 = vadd.f32 %v379_v29, %v378_v26  ;;  %v208_v29 = vsel %vm82_vm1, %v81_v56, 0.0  ;;  %v271_v26 = vmul.f32 %v7328_v16, %v7328_v16  ;;  %v273_v16 = vmul.f32 %v7356_v10, %v7356_v10 }
  0x89   :  { %2196 = vrot.lane.b32.xlu1 %v7465_v44, %s6792_s8 }
  0x8a   :  { %v382_v41 = vadd.f32 %v381_v60, %v380_v25  ;;  %v272_v60 = vmul.f32 %v7343_v14, %v7343_v14  ;;  %v209_v25 = vadd.f32 %v208_v29, %v207_v32  ;;  %v389_v0 = vsel %vm82_vm1, %v271_v26, 0.0  ;;  %v2395_v26 = vld [vmem:[#allocation2 + $0x11] sm:$0xff] }
  0x8b   :  { %2190 = vrot.lane.b32.xlu0 %v7476_v20, %s6792_s8  ;;  %v274_v14 = vmul.f32 %v7369_v34, %v7369_v34  ;;  %v393_v29 = vsel %vm82_vm1, %v273_v16, 0.0  ;;  %v276_v34 = vmul.f32 %v7395_v38, %v7395_v38 }
  0x8c   :  { %v384_v7 = vadd.f32 %v383_v13, %v382_v41  ;;  %v7489_v13 = vld [vmem:[#allocation2 + $0x130] sm:$0xff]  ;;  %v391_v31 = vsel %vm82_vm1, %v272_v60, 0.0  ;;  %v210_v32 = vrot.slane %v209_v25, 4  ;;  %v275_v41 = vmul.f32 %v7382_v61, %v7382_v61 }
  0x8d   :  { %2669 = vrot.lane.b32.xlu1 %v2498_v23, %s6793_s11  ;;  %v277_v61 = vmul.f32 %v7428_v50, %v7428_v50 }
  0x8e   :  { %v386_v49 = vadd.f32 %v385_v35, %v384_v7  ;;  %v395_v35 = vsel %vm82_vm1, %v274_v14, 0.0  ;;  %v1340_v7 = vand.u32 15, %v1272_v22  ;;  %v211_v23 = vadd.f32 %v210_v32, %v209_v25  ;;  %v2431_v22 = vld [vmem:[#allocation2 + $0x131] sm:$0xff] }
  0x8f   :  { %2194 = vrot.lane.b32.xlu0 %v7489_v13, %s6792_s8  ;;  %v401_v25 = vsel %vm82_vm1, %v277_v61, 0.0 }
  0x90   :  { %v388_v47 = vadd.f32 %v387_v59, %v386_v49  ;;  %v397_v59 = vsel %vm82_vm1, %v275_v41, 0.0  ;;  %vm1408_vm3 = vcmp.ne.s32.totalorder %v1340_v7, 0  ;;  %v212_v38 = vrot.slane %v211_v23, 2 }
  0x91   :  { %3142 = vrot.lane.b32.xlu1 %v2905_v11, %s6794_s12  ;;  %v278_v11 = vmul.f32 %v7444_v53, %v7444_v53  ;;  %v7515_v32 = vsel %vm1408_vm3, 1.0, %v10595_v57 }
  0x92   :  { %v390_v10 = vadd.f32 %v389_v0, %v388_v47  ;;  %v2429_v0 = vld [vmem:[#allocation2 + $0x121] sm:$0xff]  ;;  %v399_v47 = vsel %vm82_vm1, %v276_v34, 0.0  ;;  %10597 = vst [vmem:[#allocation25_spill] sm:$0xff] %v7515_v32  ;;  %v213_v53 = vadd.f32 %v212_v38, %v211_v23 }
  0x93   :  { %2599 = vrot.lane.b32.xlu0 %v2395_v26, %s6793_s11  ;;  %v403_v41 = vsel %vm82_vm1, %v278_v11, 0.0 }
  0x94   :  { %v392_v49 = vadd.f32 %v391_v31, %v390_v10  ;;  %v279_v31 = vmul.f32 %v81_v56, %v81_v56  ;;  %v7517_v10 = vld [vmem:[#allocation2 + $0x12f] sm:$0xff]  ;;  %v214_v34 = vrot.slane %v213_v53, 1 }
  0x95   :  { %v2974_v56 = vmul.f32 %v7515_v32, %v7517_v10 }
  0x96   :  { %v394_v60 = vadd.f32 %v393_v29, %v392_v49  ;;  %v405_v49 = vsel %vm82_vm1, %v279_v31, 0.0 }
  0x97   :  { %2667 = vrot.lane.b32.xlu0 %v2429_v0, %s6793_s11 }
  0x98   :  { %v396_v16 = vadd.f32 %v395_v35, %v394_v60  ;;  %v215_v60 = vadd.f32 %v214_v34, %v213_v53 }
  0x9a   :  { %v398_v14 = vadd.f32 %v397_v59, %v396_v16  ;;  %v7525_v0 = vmul.f32 0.001953125, %v215_v60 }
  0x9b   :  { %2671 = vrot.lane.b32.xlu0 %v2431_v22, %s6793_s11 }
  0x9c   :  { %v400_v50 = vadd.f32 %v399_v47, %v398_v14  ;;  %v415_v47 = vmul.f32 %v7525_v0, %v7525_v0  ;;  %v419_v22 = vsub.f32 %v6843_v4, %v7525_v0  ;;  %v421_v53 = vsub.f32 %v6857_v8, %v7525_v0 }
  0x9d   :  { %v423_v8 = vsub.f32 %v6873_v15, %v7525_v0  ;;  %v426_v60 = vsub.f32 %v6894_v24, %v7525_v0  ;;  %v428_v24 = vsub.f32 %v6908_v30, %v7525_v0 }
  0x9e   :  { %v402_v29 = vadd.f32 %v401_v25, %v400_v50  ;;  %v417_v25 = vsub.f32 %v6831_v1, %v7525_v0  ;;  %v418_v50 = vsub.f32 %v6836_v2, %v7525_v0 }
  0x9f   :  { %3144 = vrot.lane.b32.xlu0 %v2974_v56, %s6794_s12 }
  0xa0   :  { %v404_v26 = vadd.f32 %v403_v41, %v402_v29  ;;  %v420_v41 = vsub.f32 %v6848_v5, %v7525_v0  ;;  %v422_v29 = vsub.f32 %v6866_v12, %v7525_v0  ;;  %v424_v12 = vsub.f32 %v6880_v18, %v7525_v0 }
  0xa2   :  { %v406_v35 = vadd.f32 %v405_v49, %v404_v26 }
  0xa3   :  { %3549 = vrot.lane.b32.xlu0 %v7476_v20, %s6795_s13  ;;  %v10604_v20 = vld [vmem:[#allocation10_spill] sm:$0xff] }
  0xa4   :  { %v407_v7 = vrot.slane %v406_v35, 4 }
  0xa6   :  { %v408_v61 = vadd.f32 %v407_v7, %v406_v35  ;;  %v425_v7 = vsub.f32 %v6887_v21, %v7525_v0  ;;  %v427_v21 = vsub.f32 %v6901_v27, %v7525_v0 }
  0xa7   :  { %3553 = vrot.lane.b32.xlu0 %v7489_v13, %s6795_s13 }
  0xa8   :  { %v409_v59 = vrot.slane %v408_v61, 2 }
  0xaa   :  { %v410_v16 = vadd.f32 %v409_v59, %v408_v61 }
  0xac   :  { %v411_v23 = vrot.slane %v410_v16, 1 }
  0xae   :  { %v412_v11 = vadd.f32 %v411_v23, %v410_v16 }
  0xb0   :  { %v414_v38 = vmul.f32 0.001953125, %v412_v11 }
  0xb2   :  { %v416_v14 = vsub.f32 %v414_v38, %v415_v47  ;;  %v429_v47 = vsub.f32 %v6915_v33, %v7525_v0  ;;  %v430_v38 = vsub.f32 %v6922_v36, %v7525_v0  ;;  %v432_v33 = vsub.f32 %v6936_v42, %v7525_v0 }
  0xb4   :  { %v481_v31 = vadd.f32 1e-05, %v416_v14 }
  0xb6   :  { %6764 = vrsqrt.f32 %v481_v31 }
  0xc0   :  { %v7541_v49 = vpop.eup %6764 }
  0xc1   :  { %v483_v56 = vmul.f32 %v7541_v49, %v417_v25  ;;  %v484_v1 = vmul.f32 %v7541_v49, %v418_v50  ;;  %v485_v2 = vmul.f32 %v7541_v49, %v419_v22  ;;  %v486_v26 = vmul.f32 %v7541_v49, %v420_v41 }
  0xc2   :  { %v487_v4 = vmul.f32 %v7541_v49, %v421_v53  ;;  %v488_v5 = vmul.f32 %v7541_v49, %v422_v29  ;;  %v489_v59 = vmul.f32 %v7541_v49, %v423_v8  ;;  %v490_v15 = vmul.f32 %v7541_v49, %v424_v12 }
  0xc3   :  { %v547_v34 = vpack.c.bf16 %v484_v1, %v483_v56  ;;  %v548_v35 = vpack.c.bf16 %v486_v26, %v485_v2  ;;  %v491_v18 = vmul.f32 %v7541_v49, %v425_v7  ;;  %v492_v16 = vmul.f32 %v7541_v49, %v426_v60 }
  0xc4   :  { %v549_v61 = vpack.c.bf16 %v488_v5, %v487_v4  ;;  %v550_v23 = vpack.c.bf16 %v490_v15, %v489_v59  ;;  %v493_v14 = vmul.f32 %v7541_v49, %v427_v21  ;;  %v494_v31 = vmul.f32 %v7541_v49, %v428_v24 }
  0xc5   :  { %6605 = vmatprep.mubr.msk.bf16.mxu0 %vm82_vm1, %v547_v34  ;;  %v551_v11 = vpack.c.bf16 %v492_v16, %v491_v18  ;;  %v495_v27 = vmul.f32 %v7541_v49, %v429_v47  ;;  %v496_v25 = vmul.f32 %v7541_v49, %v430_v38  ;;  %v431_v50 = vsub.f32 %v6929_v39, %v7525_v0  ;;  %v10598_v18 = vld [vmem:[#allocation4_spill] sm:$0xff] }
  0xc6   :  { %6606 = vmatmul.mubr.msk.bf16.vlgmr.msra.gmra.mrb[0].mxu0 %vm82_vm1, %v548_v35  ;;  %v552_v30 = vpack.c.bf16 %v494_v31, %v493_v14  ;;  %v433_v22 = vsub.f32 %v6943_v45, %v7525_v0  ;;  %v434_v41 = vsub.f32 %v6950_v48, %v7525_v0  ;;  %v498_v29 = vmul.f32 %v7541_v49, %v432_v33 }
  0xc7   :  { %6609 = vmatprep.mubr.msk.bf16.mxu0 %vm82_vm1, %v549_v61  ;;  %v553_v36 = vpack.c.bf16 %v496_v25, %v495_v27  ;;  %v497_v53 = vmul.f32 %v7541_v49, %v431_v50  ;;  %v435_v1 = vsub.f32 %v6957_v51, %v7525_v0  ;;  %v436_v45 = vsub.f32 %v6964_v54, %v7525_v0  ;;  %v10601_v50 = vld [vmem:[#allocation7_spill] sm:$0xff] }
  0xc8   :  { %v499_v39 = vmul.f32 %v7541_v49, %v433_v22  ;;  %v500_v56 = vmul.f32 %v7541_v49, %v434_v41  ;;  %v437_v2 = vsub.f32 %v6973_v58, %v7525_v0  ;;  %v438_v26 = vsub.f32 %v6984_v63, %v7525_v0  ;;  %v10603_v41 = vld [vmem:[#allocation9_spill] sm:$0xff] }
  0xc9   :  { %v554_v42 = vpack.c.bf16 %v498_v29, %v497_v53  ;;  %v501_v4 = vmul.f32 %v7541_v49, %v435_v1  ;;  %v502_v5 = vmul.f32 %v7541_v49, %v436_v45  ;;  %v439_v12 = vsub.f32 %v6994_v9, %v7525_v0  ;;  %v10605_v1 = vld [vmem:[#allocation11_spill] sm:$0xff] }
  0xca   :  { %v555_v48 = vpack.c.bf16 %v500_v56, %v499_v39  ;;  %v503_v51 = vmul.f32 %v7541_v49, %v437_v2  ;;  %v504_v8 = vmul.f32 %v7541_v49, %v438_v26  ;;  %v440_v58 = vsub.f32 %v7005_v19, %v7525_v0 }
  0xcb   :  { %v556_v54 = vpack.c.bf16 %v502_v5, %v501_v4  ;;  %v441_v34 = vsub.f32 %v7015_v28, %v7525_v0  ;;  %v442_v35 = vsub.f32 %v7025_v37, %v7525_v0  ;;  %v505_v7 = vmul.f32 %v7541_v49, %v439_v12 }
  0xcc   :  { %v557_v63 = vpack.c.bf16 %v504_v8, %v503_v51  ;;  %v506_v60 = vmul.f32 %v7541_v49, %v440_v58  ;;  %v443_v59 = vsub.f32 %v7035_v46, %v7525_v0  ;;  %v444_v28 = vsub.f32 %v7045_v55, %v7525_v0 }
  0xcd   :  { %v507_v9 = vmul.f32 %v7541_v49, %v441_v34  ;;  %v508_v61 = vmul.f32 %v7541_v49, %v442_v35  ;;  %v445_v15 = vsub.f32 %v7055_v62, %v7525_v0  ;;  %v446_v16 = vsub.f32 %v10598_v18, %v7525_v0  ;;  %v10600_v62 = vld [vmem:[#allocation6_spill] sm:$0xff] }
  0xce   :  { %6610 = vmatmul.mubr.msk.bf16.gmra.mrb[4].mxu0 %vm82_vm1, %v550_v23  ;;  %v558_v19 = vpack.c.bf16 %v506_v60, %v505_v7  ;;  %v509_v23 = vmul.f32 %v7541_v49, %v443_v59  ;;  %v510_v21 = vmul.f32 %v7541_v49, %v444_v28  ;;  %v448_v38 = vsub.f32 %v10600_v62, %v7525_v0  ;;  %v10608_v34 = vld [vmem:[#allocation14_spill] sm:$0xff]  ;;  %v10609_v7 = vld [vmem:[#allocation15_spill] sm:$0xff] }
  0xcf   :  { %6613 = vmatprep.mubr.msk.bf16.mxu0 %vm82_vm1, %v551_v11  ;;  %v559_v37 = vpack.c.bf16 %v508_v61, %v507_v9  ;;  %v511_v46 = vmul.f32 %v7541_v49, %v445_v15  ;;  %v512_v24 = vmul.f32 %v7541_v49, %v446_v16  ;;  %v10599_v11 = vld [vmem:[#allocation5_spill] sm:$0xff]  ;;  %v449_v33 = vsub.f32 %v10601_v50, %v7525_v0  ;;  %v10612_v50 = vld [vmem:[#allocation16_spill] sm:$0xff] }
  0xd0   :  { %v560_v55 = vpack.c.bf16 %v510_v21, %v509_v23  ;;  %v447_v47 = vsub.f32 %v10599_v11, %v7525_v0  ;;  %v514_v27 = vmul.f32 %v7541_v49, %v448_v38  ;;  %v451_v53 = vsub.f32 %v10603_v41, %v7525_v0  ;;  %v1782_v16 = vld [vmem:[#allocation2 + $0xf] sm:$0xff] }
  0xd1   :  { %v561_v14 = vpack.c.bf16 %v512_v24, %v511_v46  ;;  %v452_v29 = vsub.f32 %v10604_v20, %v7525_v0  ;;  %v453_v45 = vsub.f32 %v10605_v1, %v7525_v0  ;;  %v455_v26 = vsub.f32 %v7155_v52, %v7525_v0  ;;  %v1783_v46 = vld [vmem:[#allocation2 + $0x17] sm:$0xff] }
  0xd2   :  { %v513_v31 = vmul.f32 %v7541_v49, %v447_v47  ;;  %v517_v13 = vmul.f32 %v7541_v49, %v451_v53  ;;  %v456_v4 = vsub.f32 %v7165_v3, %v7525_v0  ;;  %v457_v52 = vsub.f32 %v7175_v17, %v7525_v0  ;;  %1919 = vst.msk [vmem:[#allocation3 + $0x8] sm:$0xff] %vm82_vm1, %v1783_v46  ;;  %v10614_v41 = vld [vmem:[#allocation18_spill] sm:$0xff] }
  0xd3   :  { %v519_v5 = vmul.f32 %v7541_v49, %v453_v45  ;;  %v521_v8 = vmul.f32 %v7541_v49, %v455_v26  ;;  %v459_v35 = vsub.f32 %v10608_v34, %v7525_v0  ;;  %v460_v60 = vsub.f32 %v10609_v7, %v7525_v0 }
  0xd4   :  { %v562_v25 = vpack.c.bf16 %v514_v27, %v513_v31  ;;  %v523_v9 = vmul.f32 %v7541_v49, %v457_v52  ;;  %v463_v53 = vsub.f32 %v10614_v41, %v7525_v0  ;;  %v1240_v26 = vadd.s32 16, %v7430_v40  ;;  %v10620_v41 = vld [vmem:[#allocation20_spill] sm:$0xff] }
  0xd5   :  { %v525_v59 = vmul.f32 %v7541_v49, %v459_v35  ;;  %v526_v28 = vmul.f32 %v7541_v49, %v460_v60  ;;  %v1241_v60 = vadd.s32 24, %v7430_v40 }
  0xd6   :  { %6614 = vmatmul.mubr.msk.bf16.gmra.mrb[8].mxu0 %vm82_vm1, %v552_v30  ;;  %v2907_v30 = vld [vmem:[#allocation2 + $0x137] sm:$0xff] }
  0xd7   :  { %6617 = vmatprep.mubr.msk.bf16.mxu0 %vm82_vm1, %v553_v36  ;;  %3146 = vrot.lane.b32.xlu1 %v2907_v30, %s6794_s12  ;;  %1955 = vst.msk [vmem:[#allocation3 + $0x128] sm:$0xff] %vm82_vm1, %v2907_v30  ;;  %v10602_v36 = vld [vmem:[#allocation8_spill] sm:$0xff] }
  0xd8   :  { %v450_v22 = vsub.f32 %v10602_v36, %v7525_v0  ;;  %v10613_v36 = vld [vmem:[#allocation17_spill] sm:$0xff] }
  0xda   :  { %v516_v39 = vmul.f32 %v7541_v49, %v450_v22  ;;  %v462_v22 = vsub.f32 %v10613_v36, %v7525_v0 }
  0xdb   :  { %3551 = vrot.lane.b32.xlu1 %v7455_v43, %s6795_s13  ;;  %v515_v43 = vmul.f32 %v7541_v49, %v449_v33  ;;  %v461_v33 = vsub.f32 %v10612_v50, %v7525_v0 }
  0xdd   :  { %v563_v56 = vpack.c.bf16 %v516_v39, %v515_v43  ;;  %v527_v39 = vmul.f32 %v7541_v49, %v461_v33 }
  0xde   :  { %6618 = vmatmul.mubr.msk.bf16.gmra.mrb[12].mxu0 %vm82_vm1, %v554_v42 }
  0xdf   :  { %6621 = vmatprep.mubr.msk.bf16.mxu0 %vm82_vm1, %v555_v48  ;;  %3555 = vrot.lane.b32.xlu1 %v7465_v44, %s6795_s13  ;;  %v518_v44 = vmul.f32 %v7541_v49, %v452_v29  ;;  %v10606_v48 = vld [vmem:[#allocation12_spill] sm:$0xff] }
  0xe0   :  { %v454_v2 = vsub.f32 %v10606_v48, %v7525_v0 }
  0xe1   :  { %v564_v42 = vpack.c.bf16 %v518_v44, %v517_v13  ;;  %v528_v13 = vmul.f32 %v7541_v49, %v462_v22  ;;  %v529_v44 = vmul.f32 %v7541_v49, %v463_v53  ;;  %v465_v53 = vsub.f32 %v10620_v41, %v7525_v0 }
  0xe2   :  { %v520_v51 = vmul.f32 %v7541_v49, %v454_v2 }
  0xe4   :  { %v565_v12 = vpack.c.bf16 %v520_v51, %v519_v5  ;;  %v1308_v51 = vand.u32 15, %v1240_v26 }
  0xe6   :  { %6622 = vmatmul.mubr.msk.bf16.gmra.mrb[16].mxu0 %vm82_vm1, %v556_v54  ;;  %v522_v54 = vmul.f32 %v7541_v49, %v456_v4  ;;  %v1242_v4 = vadd.s32 32, %v7430_v40  ;;  %vm1376_vm14 = vcmp.ne.s32.totalorder %v1308_v51, 0 }
  0xe7   :  { %6625 = vmatprep.mubr.msk.bf16.mxu0 %vm82_vm1, %v557_v63  ;;  %v10607_v63 = vld [vmem:[#allocation13_spill] sm:$0xff] }
  0xe8   :  { %v566_v58 = vpack.c.bf16 %v522_v54, %v521_v8  ;;  %v458_v3 = vsub.f32 %v10607_v63, %v7525_v0 }
  0xea   :  { %v524_v61 = vmul.f32 %v7541_v49, %v458_v3  ;;  %v1239_v3 = vadd.s32 8, %v7430_v40 }
  0xec   :  { %v567_v17 = vpack.c.bf16 %v524_v61, %v523_v9 }
  0xee   :  { %6626 = vmatmul.mubr.msk.bf16.gmra.mrb[20].mxu0 %vm82_vm1, %v558_v19  ;;  %v1306_v19 = vand.u32 15, %v7430_v40 }
  0xef   :  { %6629 = vmatprep.mubr.msk.bf16.mxu0 %vm82_vm1, %v559_v37  ;;  %v568_v37 = vpack.c.bf16 %v526_v28, %v525_v59 }
  0xf0   :  { %vm1374_vm4 = vcmp.ne.s32.totalorder %v1306_v19, 0  ;;  %v1243_v19 = vadd.s32 40, %v7430_v40 }
  0xf1   :  { %v7697_v15 = vsel %vm1374_vm4, 1.0, %v10595_v57 }
  0xf2   :  { %10610 = vst [vmem:[#allocation4_spill] sm:$0xff] %v7697_v15  ;;  %v1850_v23 = vmul.f32 %v7697_v15, %v1782_v16  ;;  %v7752_v16 = vsel %vm1376_vm14, 1.0, %v10595_v57  ;;  %v1311_v46 = vand.u32 15, %v1243_v19 }
  0xf3   :  { %10616 = vst [vmem:[#allocation6_spill] sm:$0xff] %v7752_v16 }
  0xf4   :  { %1918 = vst.msk [vmem:[#allocation3] sm:$0xff] %vm82_vm1, %v1850_v23  ;;  %v1309_v23 = vand.u32 15, %v1241_v60 }
  0xf5   :  { %v2123_v18 = vpop.permute.xlu0 %2122 }
  0xf6   :  { %6630 = vmatmul.mubr.msk.bf16.gmra.mrb[24].mxu0 %vm82_vm1, %v560_v55  ;;  %2327 = vst.msk [vmem:[#allocation3] sm:$0xff] %vm2326_vm5, %v2123_v18  ;;  %v1274_v55 = vadd.s32 288, %v7430_v40 }
  0xf7   :  { %6633 = vmatprep.mubr.msk.bf16.mxu0 %vm82_vm1, %v561_v14  ;;  %v2193_v47 = vpop.permute.xlu1 %2192 }
  0xf8   :  { %2362 = vst.msk [vmem:[#allocation3 + $0x118] sm:$0xff] %vm2326_vm5, %v2193_v47  ;;  %v1342_v62 = vand.u32 15, %v1274_v55 }
  0xf9   :  { %v2125_v21 = vpop.permute.xlu0 %2124 }
  0xfa   :  { %2328 = vst.msk [vmem:[#allocation3 + $0x8] sm:$0xff] %vm2326_vm5, %v2125_v21  ;;  %vm1410_vm6 = vcmp.ne.s32.totalorder %v1342_v62, 0  ;;  %v1246_v62 = vadd.s32 64, %v7430_v40 }
  0xfb   :  { %v2197_v14 = vpop.permute.xlu1 %2196  ;;  %v7709_v31 = vsel %vm1410_vm6, 1.0, %v10595_v57 }
  0xfc   :  { %10611 = vst [vmem:[#allocation5_spill] sm:$0xff] %v7709_v31  ;;  %2364 = vst.msk [vmem:[#allocation3 + $0x128] sm:$0xff] %vm2326_vm5, %v2197_v14  ;;  %v1886_v27 = vmul.f32 %v7709_v31, %v7517_v10  ;;  %v10615_v10 = vld [vmem:[#allocation19_spill] sm:$0xff]  ;;  %v1314_v26 = vand.u32 15, %v1246_v62  ;;  %v1252_v62 = vadd.s32 112, %v7430_v40 }
  0xfd   :  { %v7704_v24 = vpop.permute.xlu0 %2190  ;;  %v464_v20 = vsub.f32 %v10615_v10, %v7525_v0 }
  0xfe   :  { %6634 = vmatmul.mubr.msk.bf16.gmra.mrb[28].mxu0 %vm82_vm1, %v562_v25  ;;  %1954 = vst.msk [vmem:[#allocation3 + $0x120] sm:$0xff] %vm82_vm1, %v1886_v27  ;;  %v7763_v27 = vadd.s32 56, %v7430_v40 }
  0xff   :  { %6637 = vmatprep.mubr.msk.bf16.mxu0 %vm82_vm1, %v563_v56  ;;  %v2670_v30 = vpop.permute.xlu1 %2669  ;;  %v530_v56 = vmul.f32 %v7541_v49, %v464_v20 }
 0x100   :  { %2839 = vst.msk [vmem:[#allocation3 + $0x118] sm:$0xff] %vm2803_vm7, %v2670_v30  ;;  %v7766_v30 = vadd.s32 80, %v7430_v40  ;;  %v1313_v19 = vand.u32 15, %v7763_v27 }
 0x101   :  { %v2195_v11 = vpop.permute.xlu0 %2194  ;;  %v570_v1 = vpack.c.bf16 %v530_v56, %v529_v44  ;;  %v10625_v56 = vld [vmem:[#allocation21_spill] sm:$0xff] }
 0x102   :  { %2363 = vst.msk [vmem:[#allocation3 + $0x120] sm:$0xff] %vm2326_vm5, %v2195_v11 }
 0x103   :  { %v7728_v43 = vpop.permute.xlu1 %3142 }
 0x105   :  { %v2600_v38 = vpop.permute.xlu0 %2599 }
 0x106   :  { %6638 = vmatmul.mubr.msk.bf16.gmra.mrb[32].mxu0 %vm82_vm1, %v564_v42  ;;  %2804 = vst.msk [vmem:[#allocation3] sm:$0xff] %vm2803_vm7, %v2600_v38  ;;  %v569_v42 = vpack.c.bf16 %v528_v13, %v527_v39 }
 0x107   :  { %6641 = vmatprep.mubr.msk.bf16.mxu0 %vm82_vm1, %v565_v12  ;;  %v1310_v12 = vand.u32 15, %v1242_v4 }
 0x109   :  { %v7716_v25 = vpop.permute.xlu0 %2667  ;;  %vm1378_vm15 = vcmp.ne.s32.totalorder %v1310_v12, 0 }
 0x10a   :  { %v7755_v21 = vsel %vm1378_vm15, 1.0, %v10595_v57  ;;  %vm7825_vm15 = vcmp.ne.s32.totalorder %v1314_v26, 0 }
 0x10b   :  { %10617 = vst [vmem:[#allocation7_spill] sm:$0xff] %v7755_v21 }
 0x10d   :  { %v2672_v29 = vpop.permute.xlu0 %2671 }
 0x10e   :  { %6642 = vmatmul.mubr.msk.bf16.gmra.mrb[36].mxu0 %vm82_vm1, %v566_v58  ;;  %2840 = vst.msk [vmem:[#allocation3 + $0x120] sm:$0xff] %vm2803_vm7, %v2672_v29  ;;  %v1244_v58 = vadd.s32 48, %v7430_v40 }
 0x10f   :  { %6645 = vmatprep.mubr.msk.bf16.mxu0 %vm82_vm1, %v567_v17 }
 0x110   :  { %v1312_v28 = vand.u32 15, %v1244_v58  ;;  %v10628_v58 = vld [vmem:[#allocation22_spill] sm:$0xff] }
 0x112   :  { %vm7757_vm3 = vcmp.ne.s32.totalorder %v1312_v28, 0 }
 0x116   :  { %6646 = vmatmul.mubr.msk.bf16.gmra.mrb[40].mxu0 %vm82_vm1, %v568_v37  ;;  %v1307_v37 = vand.u32 15, %v1239_v3  ;;  %v7808_v3 = vsel %vm7757_vm3, 1.0, %v10595_v57 }
 0x117   :  { %6649 = vmatprep.mubr.msk.bf16.mxu0 %vm82_vm1, %v569_v42  ;;  %v466_v42 = vsub.f32 %v10625_v56, %v7525_v0  ;;  %10629 = vst [vmem:[#allocation8_spill] sm:$0xff] %v7808_v3 }
 0x119   :  { %v532_v12 = vmul.f32 %v7541_v49, %v466_v42 }
 0x11e   :  { %6650 = vmatmul.mubr.msk.bf16.gmra.mrb[44].mxu0 %vm82_vm1, %v570_v1 }
 0x149   :  { %v3147_v45 = vpop.permute.xlu1 %3146 }
 0x14a   :  { %3316 = vst.msk [vmem:[#allocation3 + $0x118] sm:$0xff] %vm3280_vm8, %v3147_v45 }
 0x14d   :  { %v7738_v48 = vpop.permute.xlu1 %3551 }
 0x151   :  { %v3556_v2 = vpop.permute.xlu1 %3555 }
 0x152   :  { %3725 = vst.msk [vmem:[#allocation3 + $0x118] sm:$0xff] %vm3689_vm9, %v3556_v2 }
 0x199   :  { %v6607_v5 = vpop.f32.mrb[0].mxu0 }
 0x19a   :  { %vm971_vm10 = vcmp.gt.f32.partialorder %v6607_v5, 0.0  ;;  %v1035_v8 = vmul.f32 0.01, %v6607_v5  ;;  %v714_v54 = vpop.f32.mrb[1].mxu0 }
 0x19b   :  { %vm969_vm11 = vcmp.gt.f32.partialorder %v714_v54, 0.0  ;;  %v1033_v52 = vmul.f32 0.01, %v714_v54  ;;  %v6608_v63 = vpop.f32.mrb[2].mxu0 }
 0x19c   :  { %v1099_v34 = vsel %vm971_vm10, %v6607_v5, %v1035_v8  ;;  %vm972_vm12 = vcmp.gt.f32.partialorder %v6608_v63, 0.0  ;;  %v1036_v35 = vmul.f32 0.01, %v6608_v63  ;;  %v717_v7 = vpop.f32.mrb[3].mxu0  ;;  %v1250_v5 = vadd.s32 96, %v7430_v40 }
 0x19d   :  { %1175 = vst.msk [vmem:[#allocation2 + $0x30] sm:$0xff] %vm82_vm1, %v1099_v34  ;;  %v1097_v9 = vsel %vm969_vm11, %v714_v54, %v1033_v52  ;;  %vm970_vm13 = vcmp.gt.f32.partialorder %v717_v7, 0.0  ;;  %v1034_v61 = vmul.f32 0.01, %v717_v7  ;;  %vm7774_vm11 = vcmp.ne.s32.totalorder %v1307_v37, 15 }
 0x19e   :  { %1173 = vst.msk [vmem:[#allocation2 + $0x20] sm:$0xff] %vm82_vm1, %v1097_v9  ;;  %v1100_v59 = vsel %vm972_vm12, %v6608_v63, %v1036_v35  ;;  %vm7778_vm12 = vcmp.ne.s32.totalorder %v1309_v23, 15  ;;  %v531_v54 = vmul.f32 %v7541_v49, %v465_v53  ;;  %v467_v52 = vsub.f32 %v10628_v58, %v7525_v0 }
 0x19f   :  { %1176 = vst.msk [vmem:[#allocation2 + $0x38] sm:$0xff] %vm82_vm1, %v1100_v59  ;;  %v1098_v17 = vsel %vm970_vm13, %v717_v7, %v1034_v61  ;;  %vm7787_vm13 = vcmp.ne.s32.totalorder %v1311_v46, 15  ;;  %v7811_v34 = vadd.s32 72, %v7430_v40  ;;  %v10630_v7 = vld [vmem:[#allocation23_spill] sm:$0xff]  ;;  %v1316_v59 = vand.u32 15, %v7766_v30 }
 0x1a0   :  { %1174 = vst.msk [vmem:[#allocation2 + $0x28] sm:$0xff] %vm82_vm1, %v1098_v17  ;;  %v468_v60 = vsub.f32 %v10630_v7, %v7525_v0  ;;  %v571_v28 = vpack.c.bf16 %v532_v12, %v531_v54  ;;  %v533_v17 = vmul.f32 %v7541_v49, %v467_v52  ;;  %v1318_v47 = vand.u32 15, %v1250_v5 }
 0x1a1   :  { %v6611_v18 = vpop.f32.mrb[4].mxu0  ;;  %v7870_v5 = vsel %vm7774_vm11, 1.0, %v10595_v57  ;;  %v1254_v58 = vadd.s32 128, %v7430_v40  ;;  %v7887_v13 = vsel %vm7787_vm13, 1.0, %v10595_v57 }
 0x1a2   :  { %vm975_vm2 = vcmp.gt.f32.partialorder %v6611_v18, 0.0  ;;  %v1039_v55 = vmul.f32 0.01, %v6611_v18  ;;  %v730_v11 = vpop.f32.mrb[5].mxu0  ;;  %v534_v46 = vmul.f32 %v7541_v49, %v468_v60  ;;  %6653 = vmatprep.mubr.msk.bf16.mxu0 %vm82_vm1, %v571_v28  ;;  %v7975_v28 = vadd.s32 136, %v7430_v40 }
 0x1a3   :  { %vm973_vm4 = vcmp.gt.f32.partialorder %v730_v11, 0.0  ;;  %v1037_v38 = vmul.f32 0.01, %v730_v11  ;;  %v6612_v14 = vpop.f32.mrb[6].mxu0 }
 0x1a4   :  { %v1103_v50 = vsel %vm975_vm2, %v6611_v18, %v1039_v55  ;;  %v1990_v33 = vld [vmem:[#allocation2 + $0x30] sm:$0xff]  ;;  %vm976_vm6 = vcmp.gt.f32.partialorder %v6612_v14, 0.0  ;;  %v1040_v36 = vmul.f32 0.01, %v6612_v14  ;;  %v733_v22 = vpop.f32.mrb[7].mxu0  ;;  %v572_v30 = vpack.c.bf16 %v534_v46, %v533_v17 }
 0x1a5   :  { %1179 = vst.msk [vmem:[#allocation2 + $0x50] sm:$0xff] %vm82_vm1, %v1103_v50  ;;  %v1101_v10 = vsel %vm973_vm4, %v730_v11, %v1037_v38  ;;  %2130 = vrot.lane.b32.xlu0 %v1990_v33, %s6792_s8  ;;  %v1988_v20 = vld [vmem:[#allocation2 + $0x20] sm:$0xff]  ;;  %vm974_vm10 = vcmp.gt.f32.partialorder %v733_v22, 0.0  ;;  %v1038_v29 = vmul.f32 0.01, %v733_v22  ;;  %v1322_v46 = vand.u32 15, %v1254_v58 }
 0x1a6   :  { %v7772_v39 = vld [vmem:[#allocation2 + $0x1f] sm:$0xff]  ;;  %1177 = vst.msk [vmem:[#allocation2 + $0x40] sm:$0xff] %vm82_vm1, %v1101_v10  ;;  %2126 = vrot.lane.b32.xlu1 %v1988_v20, %s6792_s8  ;;  %v2875_v1 = vld [vmem:[#allocation2 + $0x37] sm:$0xff]  ;;  %v1104_v45 = vsel %vm976_vm6, %v6612_v14, %v1040_v36  ;;  %vm7846_vm6 = vcmp.ne.s32.totalorder %v1313_v19, 15  ;;  %6654 = vmatmul.mubr.msk.bf16.gmra.mrb[48].mxu0 %vm82_vm1, %v572_v30  ;;  %v7962_v58 = vadd.s32 120, %v7430_v40 }
 0x1a7   :  { %v1852_v4 = vmul.f32 %v7752_v16, %v7772_v39  ;;  %1180 = vst.msk [vmem:[#allocation2 + $0x58] sm:$0xff] %vm82_vm1, %v1104_v45  ;;  %v1102_v51 = vsel %vm974_vm10, %v733_v22, %v1038_v29  ;;  %v7795_v8 = vld [vmem:[#allocation2 + $0x2f] sm:$0xff]  ;;  %1923 = vst.msk [vmem:[#allocation3 + $0x28] sm:$0xff] %vm82_vm1, %v2875_v1  ;;  %v7803_v63 = vld [vmem:[#allocation2 + $0x27] sm:$0xff]  ;;  %v7840_v22 = vsel %vm7825_vm15, 1.0, %v10595_v57  ;;  %vm7850_vm10 = vcmp.ne.s32.totalorder %v1316_v59, 0 }
 0x1a8   :  { %1178 = vst.msk [vmem:[#allocation2 + $0x48] sm:$0xff] %vm82_vm1, %v1102_v51  ;;  %v1854_v35 = vmul.f32 %v7755_v21, %v7795_v8  ;;  %v1991_v9 = vld [vmem:[#allocation2 + $0x38] sm:$0xff]  ;;  %1921 = vst.msk [vmem:[#allocation3 + $0x18] sm:$0xff] %vm82_vm1, %v7803_v63  ;;  %v1249_v29 = vadd.s32 88, %v7430_v40  ;;  %v1320_v45 = vand.u32 15, %v1252_v62  ;;  %v7875_v51 = vsel %vm7778_vm12, 1.0, %v10595_v57 }
 0x1a9   :  { %1920 = vst.msk [vmem:[#allocation3 + $0x10] sm:$0xff] %vm82_vm1, %v1852_v4  ;;  %3489 = vrot.lane.b32.xlu0 %v1990_v33, %s6795_s13  ;;  %v6615_v61 = vpop.f32.mrb[8].mxu0  ;;  %10633 = vst [vmem:[#allocation9_spill] sm:$0xff] %v7840_v22  ;;  %v2399_v4 = vld [vmem:[#allocation2 + $0x31] sm:$0xff]  ;;  %v7892_v44 = vsel %vm7846_vm6, 1.0, %v10595_v57  ;;  %v7898_v7 = vsel %vm7850_vm10, 1.0, %v10595_v57 }
 0x1aa   :  { %2132 = vrot.lane.b32.xlu1 %v1991_v9, %s6792_s8  ;;  %vm979_vm14 = vcmp.gt.f32.partialorder %v6615_v61, 0.0  ;;  %v1043_v37 = vmul.f32 0.01, %v6615_v61  ;;  %v746_v18 = vpop.f32.mrb[9].mxu0  ;;  %1922 = vst.msk [vmem:[#allocation3 + $0x20] sm:$0xff] %vm82_vm1, %v1854_v35  ;;  %v1315_v35 = vand.u32 15, %v7811_v34 }
 0x1ab   :  { %vm977_vm2 = vcmp.gt.f32.partialorder %v746_v18, 0.0  ;;  %v1041_v55 = vmul.f32 0.01, %v746_v18  ;;  %v6616_v11 = vpop.f32.mrb[10].mxu0  ;;  %10640 = vst [vmem:[#allocation10_spill] sm:$0xff] %v7898_v7  ;;  %vm7910_vm13 = vcmp.ne.s32.totalorder %v1320_v45, 0 }
 0x1ac   :  { %v1107_v38 = vsel %vm979_vm14, %v6615_v61, %v1043_v37  ;;  %vm980_vm3 = vcmp.gt.f32.partialorder %v6616_v11, 0.0  ;;  %v1044_v14 = vmul.f32 0.01, %v6616_v11  ;;  %v749_v27 = vpop.f32.mrb[11].mxu0  ;;  %vm7859_vm14 = vcmp.ne.s32.totalorder %v1318_v47, 0  ;;  %v2397_v17 = vld [vmem:[#allocation2 + $0x21] sm:$0xff] }
 0x1ad   :  { %3485 = vrot.lane.b32.xlu0 %v1988_v20, %s6795_s13  ;;  %1183 = vst.msk [vmem:[#allocation2 + $0x70] sm:$0xff] %vm82_vm1, %v1107_v38  ;;  %v1105_v50 = vsel %vm977_vm2, %v746_v18, %v1041_v55  ;;  %vm978_vm4 = vcmp.gt.f32.partialorder %v749_v27, 0.0  ;;  %v1042_v33 = vmul.f32 0.01, %v749_v27  ;;  %v7835_v36 = vld [vmem:[#allocation2 + $0x3f] sm:$0xff]  ;;  %v1317_v61 = vand.u32 15, %v1249_v29 }
 0x1ae   :  { %3082 = vrot.lane.b32.xlu1 %v2875_v1, %s6794_s12  ;;  %1181 = vst.msk [vmem:[#allocation2 + $0x60] sm:$0xff] %vm82_vm1, %v1105_v50  ;;  %v7844_v41 = vld [vmem:[#allocation2 + $0x57] sm:$0xff]  ;;  %v1108_v53 = vsel %vm980_vm3, %v6616_v11, %v1044_v14  ;;  %v1856_v26 = vmul.f32 %v7808_v3, %v7835_v36  ;;  %v7907_v34 = vsel %vm7859_vm14, 1.0, %v10595_v57  ;;  %v7918_v55 = vld [vmem:[#allocation2 + $0x28] sm:$0xff]  ;;  %vm7929_vm3 = vcmp.ne.s32.totalorder %v1315_v35, 15 }
 0x1af   :  { %1184 = vst.msk [vmem:[#allocation2 + $0x78] sm:$0xff] %vm82_vm1, %v1108_v53  ;;  %v1106_v56 = vsel %vm978_vm4, %v749_v27, %v1042_v33  ;;  %v7857_v42 = vld [vmem:[#allocation2 + $0x4f] sm:$0xff]  ;;  %1927 = vst.msk [vmem:[#allocation3 + $0x48] sm:$0xff] %vm82_vm1, %v7844_v41  ;;  %v7878_v54 = vld [vmem:[#allocation2 + $0x47] sm:$0xff]  ;;  %v2940_v53 = vmul.f32 %v7697_v15, %v7772_v39  ;;  %vm7937_vm4 = vcmp.ne.s32.totalorder %v1317_v61, 15  ;;  %vm7964_vm6 = vcmp.ne.s32.totalorder %v1322_v46, 0 }
 0x1b0   :  { %1182 = vst.msk [vmem:[#allocation2 + $0x68] sm:$0xff] %vm82_vm1, %v1106_v56  ;;  %v1858_v12 = vmul.f32 %v7840_v22, %v7857_v42  ;;  %1924 = vst.msk [vmem:[#allocation3 + $0x30] sm:$0xff] %vm82_vm1, %v1856_v26  ;;  %v2396_v11 = vld [vmem:[#allocation2 + $0x19] sm:$0xff]  ;;  %v7942_v56 = vadd.s32 104, %v7430_v40  ;;  %v7956_v26 = vsel %vm7910_vm13, 1.0, %v10595_v57  ;;  %v2942_v61 = vmul.f32 %v7752_v16, %v7795_v8 }
 0x1b1   :  { %2607 = vrot.lane.b32.xlu0 %v2399_v4, %s6793_s11  ;;  %v6619_v52 = vpop.f32.mrb[12].mxu0  ;;  %1925 = vst.msk [vmem:[#allocation3 + $0x38] sm:$0xff] %vm82_vm1, %v7878_v54  ;;  %10641 = vst [vmem:[#allocation11_spill] sm:$0xff] %v7907_v34  ;;  %v2464_v1 = vmul.f32 %v7870_v5, %v2396_v11  ;;  %v7987_v11 = vsel %vm7964_vm6, 1.0, %v10595_v57 }
 0x1b2   :  { %3491 = vrot.lane.b32.xlu1 %v1991_v9, %s6795_s13  ;;  %vm983_vm11 = vcmp.gt.f32.partialorder %v6619_v52, 0.0  ;;  %v1047_v2 = vmul.f32 0.01, %v6619_v52  ;;  %v762_v60 = vpop.f32.mrb[13].mxu0  ;;  %1926 = vst.msk [vmem:[#allocation3 + $0x40] sm:$0xff] %vm82_vm1, %v1858_v12  ;;  %v7915_v9 = vadd.s32 144, %v7430_v40 }
 0x1b3   :  { %vm981_vm12 = vcmp.gt.f32.partialorder %v762_v60, 0.0  ;;  %v1045_v19 = vmul.f32 0.01, %v762_v60  ;;  %v6620_v59 = vpop.f32.mrb[14].mxu0  ;;  %10648 = vst [vmem:[#allocation12_spill] sm:$0xff] %v7956_v26  ;;  %10653 = vst [vmem:[#allocation15_spill] sm:$0xff] %v7987_v11 }
 0x1b4   :  { %v1111_v37 = vsel %vm983_vm11, %v6619_v52, %v1047_v2  ;;  %vm984_vm15 = vcmp.gt.f32.partialorder %v6620_v59, 0.0  ;;  %v1048_v18 = vmul.f32 0.01, %v6620_v59  ;;  %v765_v23 = vpop.f32.mrb[15].mxu0  ;;  %v1324_v35 = vand.u32 15, %v7915_v9 }
 0x1b5   :  { %2603 = vrot.lane.b32.xlu0 %v2397_v17, %s6793_s11  ;;  %1187 = vst.msk [vmem:[#allocation2 + $0x90] sm:$0xff] %vm82_vm1, %v1111_v37  ;;  %v1109_v47 = vsel %vm981_vm12, %v762_v60, %v1045_v19  ;;  %vm982_vm2 = vcmp.gt.f32.partialorder %v765_v23, 0.0  ;;  %v1046_v62 = vmul.f32 0.01, %v765_v23  ;;  %v2880_v38 = vld [vmem:[#allocation2 + $0x5f] sm:$0xff] }
 0x1b6   :  { %2128 = vrot.lane.b32.xlu1 %v7918_v55, %s6792_s8  ;;  %1185 = vst.msk [vmem:[#allocation2 + $0x80] sm:$0xff] %vm82_vm1, %v1109_v47  ;;  %v1112_v14 = vsel %vm984_vm15, %v6620_v59, %v1048_v18  ;;  %v7924_v27 = vld [vmem:[#allocation2 + $0x77] sm:$0xff]  ;;  %v7927_v30 = vmul.f32 %v7840_v22, %v2880_v38  ;;  %v1860_v33 = vmul.f32 %v7898_v7, %v2880_v38  ;;  %vm7991_vm13 = vcmp.ne.s32.totalorder %v1324_v35, 0 }
 0x1b7   :  { %1188 = vst.msk [vmem:[#allocation2 + $0x98] sm:$0xff] %vm82_vm1, %v1112_v14  ;;  %v1110_v10 = vsel %vm982_vm2, %v765_v23, %v1046_v62  ;;  %v2882_v20 = vld [vmem:[#allocation2 + $0x6f] sm:$0xff]  ;;  %1931 = vst.msk [vmem:[#allocation3 + $0x68] sm:$0xff] %vm82_vm1, %v7924_v27  ;;  %v7951_v45 = vld [vmem:[#allocation2 + $0x67] sm:$0xff]  ;;  %v1319_v35 = vand.u32 15, %v7942_v56  ;;  %v1321_v56 = vand.u32 15, %v7962_v58 }
 0x1b8   :  { %1186 = vst.msk [vmem:[#allocation2 + $0x88] sm:$0xff] %vm82_vm1, %v1110_v10  ;;  %v7949_v39 = vmul.f32 %v7898_v7, %v2882_v20  ;;  %v1862_v4 = vmul.f32 %v7907_v34, %v2882_v20  ;;  %1928 = vst.msk [vmem:[#allocation3 + $0x50] sm:$0xff] %vm82_vm1, %v1860_v33  ;;  %v3765_v2 = vld [vmem:[#allocation2 + $0x59] sm:$0xff]  ;;  %v3767_v60 = vld [vmem:[#allocation2 + $0x69] sm:$0xff]  ;;  %v8036_v29 = vsel %vm7991_vm13, 1.0, %v10595_v57 }
 0x1b9   :  { %3076 = vrot.lane.b32.xlu0 %v2940_v53, %s6794_s12  ;;  %v6623_v12 = vpop.f32.mrb[16].mxu0  ;;  %1929 = vst.msk [vmem:[#allocation3 + $0x58] sm:$0xff] %vm82_vm1, %v7951_v45  ;;  %v7979_v37 = vmul.f32 %v7887_v13, %v3765_v2  ;;  %v7982_v18 = vmul.f32 %v7892_v44, %v3767_v60  ;;  %v1994_v33 = vld [vmem:[#allocation2 + $0x50] sm:$0xff]  ;;  %v8013_v60 = vadd.s32 176, %v7430_v40  ;;  %10656 = vst [vmem:[#allocation16_spill] sm:$0xff] %v8036_v29 }
 0x1ba   :  { %2601 = vrot.lane.b32.xlu1 %v2464_v1, %s6793_s11  ;;  %vm987_vm10 = vcmp.gt.f32.partialorder %v6623_v12, 0.0  ;;  %v1051_v19 = vmul.f32 0.01, %v6623_v12  ;;  %v778_v59 = vpop.f32.mrb[17].mxu0  ;;  %1930 = vst.msk [vmem:[#allocation3 + $0x60] sm:$0xff] %vm82_vm1, %v1862_v4  ;;  %v1258_v1 = vadd.s32 160, %v7430_v40 }
 0x1bb   :  { %vm985_vm14 = vcmp.gt.f32.partialorder %v778_v59, 0.0  ;;  %v1049_v9 = vmul.f32 0.01, %v778_v59  ;;  %v6624_v17 = vpop.f32.mrb[18].mxu0  ;;  %10651 = vst [vmem:[#allocation13_spill] sm:$0xff] %v7979_v37  ;;  %10652 = vst [vmem:[#allocation14_spill] sm:$0xff] %v7982_v18 }
 0x1bc   :  { %v1115_v23 = vsel %vm987_vm10, %v6623_v12, %v1051_v19  ;;  %vm988_vm11 = vcmp.gt.f32.partialorder %v6624_v17, 0.0  ;;  %v1052_v8 = vmul.f32 0.01, %v6624_v17  ;;  %v781_v46 = vpop.f32.mrb[19].mxu0  ;;  %v2398_v12 = vld [vmem:[#allocation2 + $0x29] sm:$0xff]  ;;  %vm8068_vm10 = vcmp.ne.s32.totalorder %v1321_v56, 15 }
 0x1bd   :  { %3080 = vrot.lane.b32.xlu0 %v2942_v61, %s6794_s12  ;;  %1191 = vst.msk [vmem:[#allocation2 + $0xb0] sm:$0xff] %vm82_vm1, %v1115_v23  ;;  %v1113_v47 = vsel %vm985_vm14, %v778_v59, %v1049_v9  ;;  %vm986_vm12 = vcmp.gt.f32.partialorder %v781_v46, 0.0  ;;  %v1050_v62 = vmul.f32 0.01, %v781_v46  ;;  %v2884_v38 = vld [vmem:[#allocation2 + $0x7f] sm:$0xff]  ;;  %v8021_v61 = vsel %vm7937_vm4, 1.0, %v10595_v57 }
 0x1be   :  { %3078 = vrot.lane.b32.xlu1 %v7803_v63, %s6794_s12  ;;  %1189 = vst.msk [vmem:[#allocation2 + $0xa0] sm:$0xff] %vm82_vm1, %v1113_v47  ;;  %v1116_v53 = vsel %vm988_vm11, %v6624_v17, %v1052_v8  ;;  %v7998_v10 = vld [vmem:[#allocation2 + $0x97] sm:$0xff]  ;;  %v8001_v20 = vmul.f32 %v7907_v34, %v2884_v38  ;;  %v1864_v4 = vmul.f32 %v7956_v26, %v2884_v38  ;;  %v8009_v63 = vsel %vm7929_vm3, 1.0, %v10595_v57 }
 0x1bf   :  { %1192 = vst.msk [vmem:[#allocation2 + $0xb8] sm:$0xff] %vm82_vm1, %v1116_v53  ;;  %v1114_v52 = vsel %vm986_vm12, %v781_v46, %v1050_v62  ;;  %v2886_v2 = vld [vmem:[#allocation2 + $0x8f] sm:$0xff]  ;;  %1935 = vst.msk [vmem:[#allocation3 + $0x88] sm:$0xff] %vm82_vm1, %v7998_v10  ;;  %v8026_v19 = vld [vmem:[#allocation2 + $0x87] sm:$0xff]  ;;  %v8039_v23 = vadd.s32 152, %v7430_v40  ;;  %v1262_v8 = vadd.s32 192, %v7430_v40  ;;  %v2466_v58 = vmul.f32 %v7875_v51, %v2398_v12 }
 0x1c0   :  { %1190 = vst.msk [vmem:[#allocation2 + $0xa8] sm:$0xff] %vm82_vm1, %v1114_v52  ;;  %v8024_v50 = vmul.f32 %v7956_v26, %v2886_v2  ;;  %v1866_v59 = vmul.f32 %v7987_v11, %v2886_v2  ;;  %1932 = vst.msk [vmem:[#allocation3 + $0x70] sm:$0xff] %vm82_vm1, %v1864_v4  ;;  %v1326_v62 = vand.u32 15, %v1258_v1  ;;  %v1328_v53 = vand.u32 15, %v8013_v60  ;;  %v6766_v1 = vld [vmem:[%s10500_s0 + $0x1a0] sm:$0xff] }
 0x1c1   :  { %2138 = vrot.lane.b32.xlu0 %v1994_v33, %s6792_s8  ;;  %v6627_v9 = vpop.f32.mrb[20].mxu0  ;;  %1933 = vst.msk [vmem:[#allocation3 + $0x78] sm:$0xff] %vm82_vm1, %v8026_v19  ;;  %v1330_v4 = vand.u32 15, %v1262_v8  ;;  %vm8049_vm4 = vcmp.ne.s32.totalorder %v1319_v35, 15  ;;  %v469_v12 = vsub.f32 %v6766_v1, %v7525_v0  ;;  %v6767_v35 = vld [vmem:[%s10500_s0 + $0x1a8] sm:$0xff] }
 0x1c2   :  { %3487 = vrot.lane.b32.xlu1 %v7918_v55, %s6795_s13  ;;  %vm991_vm15 = vcmp.gt.f32.partialorder %v6627_v9, 0.0  ;;  %v1055_v46 = vmul.f32 0.01, %v6627_v9  ;;  %v794_v47 = vpop.f32.mrb[21].mxu0  ;;  %1934 = vst.msk [vmem:[#allocation3 + $0x80] sm:$0xff] %vm82_vm1, %v1866_v59  ;;  %v470_v8 = vsub.f32 %v6767_v35, %v7525_v0  ;;  %vm8079_vm14 = vcmp.ne.s32.totalorder %v1326_v62, 0 }
 0x1c3   :  { %vm989_vm2 = vcmp.gt.f32.partialorder %v794_v47, 0.0  ;;  %v1053_v38 = vmul.f32 0.01, %v794_v47  ;;  %v6628_v14 = vpop.f32.mrb[22].mxu0  ;;  %v1992_v35 = vld [vmem:[#allocation2 + $0x40] sm:$0xff]  ;;  %vm8105_vm11 = vcmp.ne.s32.totalorder %v1328_v53, 0 }
 0x1c4   :  { %v1119_v52 = vsel %vm991_vm15, %v6627_v9, %v1055_v46  ;;  %vm992_vm3 = vcmp.gt.f32.partialorder %v6628_v14, 0.0  ;;  %v1056_v2 = vmul.f32 0.01, %v6628_v14  ;;  %v797_v17 = vpop.f32.mrb[23].mxu0  ;;  %v536_v56 = vmul.f32 %v7541_v49, %v470_v8 }
 0x1c5   :  { %3497 = vrot.lane.b32.xlu0 %v1994_v33, %s6795_s13  ;;  %1195 = vst.msk [vmem:[#allocation2 + $0xd0] sm:$0xff] %vm82_vm1, %v1119_v52  ;;  %v1117_v60 = vsel %vm989_vm2, %v794_v47, %v1053_v38  ;;  %vm990_vm6 = vcmp.gt.f32.partialorder %v797_v17, 0.0  ;;  %v1054_v59 = vmul.f32 0.01, %v797_v17  ;;  %v8059_v9 = vld [vmem:[#allocation2 + $0x9f] sm:$0xff]  ;;  %v535_v52 = vmul.f32 %v7541_v49, %v469_v12 }
 0x1c6   :  { %2605 = vrot.lane.b32.xlu1 %v2466_v58, %s6793_s11  ;;  %1193 = vst.msk [vmem:[#allocation2 + $0xc0] sm:$0xff] %vm82_vm1, %v1117_v60  ;;  %v1120_v46 = vsel %vm992_vm3, %v6628_v14, %v1056_v2  ;;  %v8072_v47 = vld [vmem:[#allocation2 + $0xb7] sm:$0xff]  ;;  %v8076_v38 = vmul.f32 %v7987_v11, %v8059_v9  ;;  %vm8114_vm12 = vcmp.ne.s32.totalorder %v1330_v4, 0  ;;  %v8132_v34 = vsel %vm8105_vm11, 1.0, %v10595_v57 }
 0x1c7   :  { %1196 = vst.msk [vmem:[#allocation2 + $0xd8] sm:$0xff] %vm82_vm1, %v1120_v46  ;;  %v1118_v58 = vsel %vm990_vm6, %v797_v17, %v1054_v59  ;;  %v2890_v14 = vld [vmem:[#allocation2 + $0xaf] sm:$0xff]  ;;  %v6769_v12 = vld [vmem:[%s10500_s0 + $0x1b8] sm:$0xff]  ;;  %1939 = vst.msk [vmem:[#allocation3 + $0xa8] sm:$0xff] %vm82_vm1, %v8072_v47  ;;  %v8103_v46 = vadd.s32 168, %v7430_v40  ;;  %v8137_v1 = vsel %vm8114_vm12, 1.0, %v10595_v57 }
 0x1c8   :  { %v6768_v2 = vld [vmem:[%s10500_s0 + $0x1b0] sm:$0xff]  ;;  %v472_v62 = vsub.f32 %v6769_v12, %v7525_v0  ;;  %1194 = vst.msk [vmem:[#allocation2 + $0xc8] sm:$0xff] %vm82_vm1, %v1118_v58  ;;  %v8097_v17 = vmul.f32 %v8036_v29, %v2890_v14  ;;  %v8099_v59 = vld [vmem:[#allocation2 + $0xa7] sm:$0xff]  ;;  %v8110_v12 = vld [vmem:[#allocation2 + $0x58] sm:$0xff]  ;;  %v573_v58 = vpack.c.bf16 %v536_v56, %v535_v52  ;;  %v8125_v52 = vsel %vm8079_vm14, 1.0, %v10595_v57 }
 0x1c9   :  { %v471_v60 = vsub.f32 %v6768_v2, %v7525_v0  ;;  %2134 = vrot.lane.b32.xlu0 %v1992_v35, %s6792_s8  ;;  %v6631_v16 = vpop.f32.mrb[24].mxu0  ;;  %1937 = vst.msk [vmem:[#allocation3 + $0x98] sm:$0xff] %vm82_vm1, %v8099_v59  ;;  %10667 = vst [vmem:[#allocation17_spill] sm:$0xff] %v8125_v52  ;;  %v1264_v56 = vadd.s32 208, %v7430_v40  ;;  %v10670_v2 = vand.u32 15, %v7975_v28  ;;  %v1868_v28 = vmul.f32 %v8036_v29, %v8059_v9  ;;  %v3773_v33 = vld [vmem:[#allocation2 + $0x99] sm:$0xff] }
 0x1ca   :  { %v538_v11 = vmul.f32 %v7541_v49, %v472_v62  ;;  %2140 = vrot.lane.b32.xlu1 %v8110_v12, %s6792_s8  ;;  %vm995_vm13 = vcmp.gt.f32.partialorder %v6631_v16, 0.0  ;;  %v1059_v53 = vmul.f32 0.01, %v6631_v16  ;;  %v810_v8 = vpop.f32.mrb[25].mxu0  ;;  %6657 = vmatprep.mubr.msk.bf16.mxu0 %vm82_vm1, %v573_v58  ;;  %10668 = vst [vmem:[#allocation18_spill] sm:$0xff] %v8132_v34  ;;  %10669 = vst [vmem:[#allocation19_spill] sm:$0xff] %v8137_v1 }
 0x1cb   :  { %v537_v15 = vmul.f32 %v7541_v49, %v471_v60  ;;  %vm993_vm15 = vcmp.gt.f32.partialorder %v810_v8, 0.0  ;;  %v1057_v4 = vmul.f32 0.01, %v810_v8  ;;  %v6632_v60 = vpop.f32.mrb[26].mxu0  ;;  %vm8148_vm6 = vcmp.ne.s32.totalorder %v10670_v2, 15  ;;  %1936 = vst.msk [vmem:[#allocation3 + $0x90] sm:$0xff] %vm82_vm1, %v1868_v28 }
 0x1cc   :  { %v1123_v7 = vsel %vm995_vm13, %v6631_v16, %v1059_v53  ;;  %vm996_vm2 = vcmp.gt.f32.partialorder %v6632_v60, 0.0  ;;  %v1060_v22 = vmul.f32 0.01, %v6632_v60  ;;  %v813_v18 = vpop.f32.mrb[27].mxu0  ;;  %v1870_v16 = vmul.f32 %v8125_v52, %v2890_v14  ;;  %v2400_v28 = vld [vmem:[#allocation2 + $0x39] sm:$0xff] }
 0x1cd   :  { %v574_v62 = vpack.c.bf16 %v538_v11, %v537_v15  ;;  %3493 = vrot.lane.b32.xlu0 %v1992_v35, %s6795_s13  ;;  %1199 = vst.msk [vmem:[#allocation2 + $0xf0] sm:$0xff] %vm82_vm1, %v1123_v7  ;;  %v1121_v58 = vsel %vm993_vm15, %v810_v8, %v1057_v4  ;;  %vm994_vm3 = vcmp.gt.f32.partialorder %v813_v18, 0.0  ;;  %v1058_v15 = vmul.f32 0.01, %v813_v18  ;;  %v2892_v11 = vld [vmem:[#allocation2 + $0xbf] sm:$0xff] }
 0x1ce   :  { %3090 = vrot.lane.b32.xlu1 %v7844_v41, %s6794_s12  ;;  %1197 = vst.msk [vmem:[#allocation2 + $0xe0] sm:$0xff] %vm82_vm1, %v1121_v58  ;;  %v1124_v26 = vsel %vm996_vm2, %v6632_v60, %v1060_v22  ;;  %v8152_v7 = vld [vmem:[#allocation2 + $0xd7] sm:$0xff]  ;;  %v8155_v8 = vmul.f32 %v8125_v52, %v2892_v11  ;;  %v1332_v53 = vand.u32 15, %v1264_v56  ;;  %v8161_v22 = vsel %vm8049_vm4, 1.0, %v10595_v57  ;;  %1938 = vst.msk [vmem:[#allocation3 + $0xa0] sm:$0xff] %vm82_vm1, %v1870_v16 }
 0x1cf   :  { %6658 = vmatmul.mubr.msk.bf16.gmra.mrb[52].mxu0 %vm82_vm1, %v574_v62  ;;  %v3769_v4 = vld [vmem:[#allocation2 + $0x79] sm:$0xff]  ;;  %1200 = vst.msk [vmem:[#allocation2 + $0xf8] sm:$0xff] %vm82_vm1, %v1124_v26  ;;  %v1122_v14 = vsel %vm994_vm3, %v813_v18, %v1058_v15  ;;  %v2894_v41 = vld [vmem:[#allocation2 + $0xcf] sm:$0xff]  ;;  %v1872_v60 = vmul.f32 %v8132_v34, %v2892_v11  ;;  %1943 = vst.msk [vmem:[#allocation3 + $0xc8] sm:$0xff] %vm82_vm1, %v8152_v7  ;;  %v1327_v18 = vand.u32 15, %v8103_v46  ;;  %v8185_v16 = vsel %vm8068_vm10, 1.0, %v10595_v57 }
 0x1d0   :  { %v2403_v56 = vld [vmem:[#allocation2 + $0x51] sm:$0xff]  ;;  %1198 = vst.msk [vmem:[#allocation2 + $0xe8] sm:$0xff] %vm82_vm1, %v1122_v14  ;;  %v8172_v55 = vmul.f32 %v8132_v34, %v2894_v41  ;;  %v8174_v62 = vld [vmem:[#allocation2 + $0xc7] sm:$0xff]  ;;  %vm8176_vm4 = vcmp.ne.s32.totalorder %v1332_v53, 0  ;;  %v1874_v9 = vmul.f32 %v8137_v1, %v2894_v41  ;;  %v8190_v46 = vsel %vm8148_vm6, 1.0, %v10595_v57  ;;  %v3777_v41 = vld [vmem:[#allocation2 + $0xb9] sm:$0xff] }
 0x1d1   :  { %v3771_v15 = vld [vmem:[#allocation2 + $0x89] sm:$0xff]  ;;  %2615 = vrot.lane.b32.xlu0 %v2403_v56, %s6793_s11  ;;  %v6635_v11 = vpop.f32.mrb[28].mxu0  ;;  %v10675_v26 = vand.u32 15, %v8039_v23  ;;  %1940 = vst.msk [vmem:[#allocation3 + $0xb0] sm:$0xff] %vm82_vm1, %v1872_v60  ;;  %1941 = vst.msk [vmem:[#allocation3 + $0xb8] sm:$0xff] %vm82_vm1, %v8174_v62  ;;  %v8203_v53 = vmul.f32 %v8009_v63, %v3769_v4  ;;  %vm8216_vm13 = vcmp.ne.s32.totalorder %v1327_v18, 15  ;;  %v8229_v18 = vmul.f32 %v8190_v46, %v3777_v41 }
 0x1d2   :  { %3499 = vrot.lane.b32.xlu1 %v8110_v12, %s6795_s13  ;;  %vm999_vm10 = vcmp.gt.f32.partialorder %v6635_v11, 0.0  ;;  %v1063_v23 = vmul.f32 0.01, %v6635_v11  ;;  %v826_v35 = vpop.f32.mrb[29].mxu0  ;;  %1942 = vst.msk [vmem:[#allocation3 + $0xc0] sm:$0xff] %vm82_vm1, %v1874_v9  ;;  %v3775_v14 = vld [vmem:[#allocation2 + $0xa9] sm:$0xff]  ;;  %v8214_v4 = vmul.f32 %v8021_v61, %v3771_v15  ;;  %v8223_v15 = vmul.f32 %v8161_v22, %v3773_v33 }
 0x1d3   :  { %vm8194_vm14 = vcmp.ne.s32.totalorder %v10675_v26, 15  ;;  %10678 = vst [vmem:[#allocation20_spill] sm:$0xff] %v8203_v53  ;;  %vm997_vm11 = vcmp.gt.f32.partialorder %v826_v35, 0.0  ;;  %v1061_v60 = vmul.f32 0.01, %v826_v35  ;;  %v6636_v56 = vpop.f32.mrb[30].mxu0  ;;  %v2468_v2 = vmul.f32 %v7887_v13, %v2400_v28 }
 0x1d4   :  { %v8211_v26 = vsel %vm8176_vm4, 1.0, %v10595_v57  ;;  %10680 = vst [vmem:[#allocation22_spill] sm:$0xff] %v8214_v4  ;;  %v2401_v12 = vld [vmem:[#allocation2 + $0x41] sm:$0xff]  ;;  %v1127_v34 = vsel %vm999_vm10, %v6635_v11, %v1063_v23  ;;  %vm1000_vm12 = vcmp.gt.f32.partialorder %v6636_v56, 0.0  ;;  %v1064_v52 = vmul.f32 0.01, %v6636_v56 }
 0x1d5   :  { %10679 = vst [vmem:[#allocation21_spill] sm:$0xff] %v8211_v26  ;;  %v3779_v29 = vld [vmem:[#allocation2 + $0xc9] sm:$0xff]  ;;  %2611 = vrot.lane.b32.xlu0 %v2401_v12, %s6793_s11  ;;  %1203 = vst.msk [vmem:[#allocation2 + $0x110] sm:$0xff] %vm82_vm1, %v1127_v34  ;;  %v1125_v58 = vsel %vm997_vm11, %v826_v35, %v1061_v60  ;;  %v2896_v37 = vld [vmem:[#allocation2 + $0xdf] sm:$0xff]  ;;  %v8226_v11 = vmul.f32 %v8185_v16, %v3775_v14  ;;  %v8236_v34 = vsel %vm8194_vm14, 1.0, %v10595_v57  ;;  %v8248_v41 = vsel %vm8216_vm13, 1.0, %v10595_v57  ;;  %v3145_v60 = vpop.permute.xlu0 %3144 }
 0x1d6   :  { %v1993_v53 = vld [vmem:[#allocation2 + $0x48] sm:$0xff]  ;;  %v3781_v6 = vld [vmem:[#allocation2 + $0xd9] sm:$0xff]  ;;  %10683 = vst [vmem:[#allocation23_spill] sm:$0xff] %v8223_v15  ;;  %10685 = vst [vmem:[#allocation27_spill] sm:$0xff] %v8229_v18  ;;  %v1128_v23 = vsel %vm1000_vm12, %v6636_v56, %v1064_v52  ;;  %v8239_v35 = vmul.f32 %v8137_v1, %v2896_v37  ;;  %v1876_v33 = vmul.f32 %v8211_v26, %v2896_v37 }
 0x1d7   :  { %10684 = vst [vmem:[#allocation26_spill] sm:$0xff] %v8226_v11  ;;  %2136 = vrot.lane.b32.xlu1 %v1993_v53, %s6792_s8  ;;  %1201 = vst.msk [vmem:[#allocation2 + $0x100] sm:$0xff] %vm82_vm1, %v1125_v58  ;;  %v2944_v14 = vmul.f32 %v7755_v21, %v7835_v36  ;;  %v8251_v52 = vmul.f32 %v8236_v34, %v3779_v29  ;;  %v8256_v37 = vmul.f32 %v8248_v41, %v3781_v6  ;;  %v1998_v29 = vld [vmem:[#allocation2 + $0x70] sm:$0xff]  ;;  %v6770_v9 = vld [vmem:[%s10500_s0 + $0x1c0] sm:$0xff] }
 0x1d8   :  { %1204 = vst.msk [vmem:[#allocation2 + $0x118] sm:$0xff] %vm82_vm1, %v1128_v23  ;;  %1944 = vst.msk [vmem:[#allocation3 + $0xd0] sm:$0xff] %vm82_vm1, %v1876_v33  ;;  %v2946_v36 = vmul.f32 %v7808_v3, %v7857_v42  ;;  %v1261_v6 = vadd.s32 184, %v7430_v40  ;;  %v473_v58 = vsub.f32 %v6770_v9, %v7525_v0  ;;  %v6771_v42 = vld [vmem:[%s10500_s0 + $0x1c8] sm:$0xff]  ;;  %v1263_v23 = vadd.s32 200, %v7430_v40 }
 0x1d9   :  { %10686 = vst [vmem:[#allocation28_spill] sm:$0xff] %v8251_v52  ;;  %10687 = vst [vmem:[#allocation29_spill] sm:$0xff] %v8256_v37  ;;  %3084 = vrot.lane.b32.xlu0 %v2944_v14, %s6794_s12  ;;  %v8265_v56 = vpop.permute.xlu0 %3549  ;;  %v2402_v33 = vld [vmem:[#allocation2 + $0x49] sm:$0xff]  ;;  %v1266_v9 = vadd.s32 224, %v7430_v40 }
 0x1da   :  { %v6772_v14 = vld [vmem:[%s10500_s0 + $0x1d0] sm:$0xff]  ;;  %v1329_v1 = vand.u32 15, %v1261_v6 }
 0x1db   :  { %2609 = vrot.lane.b32.xlu1 %v2468_v2, %s6793_s11  ;;  %v475_v2 = vsub.f32 %v6772_v14, %v7525_v0  ;;  %v1334_v37 = vand.u32 15, %v1266_v9  ;;  %v3783_v9 = vld [vmem:[#allocation2 + $0xe9] sm:$0xff] }
 0x1dc   :  { %vm1601_vm2 = vcmp.ne.s32.totalorder %v1329_v1, 15 }
 0x1dd   :  { %3088 = vrot.lane.b32.xlu0 %v2946_v36, %s6794_s12  ;;  %v6773_v36 = vld [vmem:[%s10500_s0 + $0x1d8] sm:$0xff]  ;;  %v541_v14 = vmul.f32 %v7541_v49, %v475_v2  ;;  %vm1402_vm15 = vcmp.ne.s32.totalorder %v1334_v37, 0  ;;  %v8313_v37 = vld [vmem:[#allocation2 + $0xe7] sm:$0xff] }
 0x1de   :  { %v8308_v6 = vsel %vm1402_vm15, 1.0, %v10595_v57  ;;  %1945 = vst.msk [vmem:[#allocation3 + $0xd8] sm:$0xff] %vm82_vm1, %v8313_v37 }
 0x1df   :  { %3086 = vrot.lane.b32.xlu1 %v7878_v54, %s6794_s12  ;;  %v1816_v28 = vld [vmem:[#allocation2 + $0x11f] sm:$0xff]  ;;  %v474_v54 = vsub.f32 %v6771_v42, %v7525_v0  ;;  %10688 = vst [vmem:[#allocation30_spill] sm:$0xff] %v8308_v6 }
 0x1e0   :  { %v1884_v12 = vmul.f32 %v7515_v32, %v1816_v28  ;;  %v476_v28 = vsub.f32 %v6773_v36, %v7525_v0  ;;  %v1268_v32 = vadd.s32 240, %v7430_v40 }
 0x1e1   :  { %2146 = vrot.lane.b32.xlu0 %v1998_v29, %s6792_s8  ;;  %v540_v42 = vmul.f32 %v7541_v49, %v474_v54 }
 0x1e2   :  { %1952 = vst.msk [vmem:[#allocation3 + $0x110] sm:$0xff] %vm82_vm1, %v1884_v12  ;;  %v539_v12 = vmul.f32 %v7541_v49, %v473_v58  ;;  %v542_v36 = vmul.f32 %v7541_v49, %v476_v28  ;;  %v1331_v58 = vand.u32 15, %v1263_v23  ;;  %v1336_v18 = vand.u32 15, %v1268_v32  ;;  %v1996_v32 = vld [vmem:[#allocation2 + $0x60] sm:$0xff] }
 0x1e3   :  { %3495 = vrot.lane.b32.xlu1 %v1993_v53, %s6795_s13  ;;  %2361 = vst.msk [vmem:[#allocation3 + $0x110] sm:$0xff] %vm2326_vm5, %v7704_v24  ;;  %v2470_v53 = vmul.f32 %v7892_v44, %v2402_v33  ;;  %v3554_v24 = vpop.permute.xlu0 %3553  ;;  %v2900_v33 = vld [vmem:[#allocation2 + $0xff] sm:$0xff] }
 0x1e4   :  { %2838 = vst.msk [vmem:[#allocation3 + $0x110] sm:$0xff] %vm2803_vm7, %v7716_v25  ;;  %v575_v52 = vpack.c.bf16 %v540_v42, %v539_v12  ;;  %v576_v54 = vpack.c.bf16 %v542_v36, %v541_v14  ;;  %v8305_v25 = vld [vmem:[#allocation2 + $0xf7] sm:$0xff]  ;;  %vm1404_vm3 = vcmp.ne.s32.totalorder %v1336_v18, 0  ;;  %vm1603_vm6 = vcmp.ne.s32.totalorder %v1331_v58, 15  ;;  %v1997_v58 = vld [vmem:[#allocation2 + $0x68] sm:$0xff] }
 0x1e5   :  { %3315 = vst.msk [vmem:[#allocation3 + $0x110] sm:$0xff] %vm3280_vm8, %v3145_v60  ;;  %3505 = vrot.lane.b32.xlu0 %v1998_v29, %s6795_s13  ;;  %v2898_v60 = vld [vmem:[#allocation2 + $0xef] sm:$0xff]  ;;  %v8316_v29 = vsel %vm1404_vm3, 1.0, %v10595_v57  ;;  %v8327_v18 = vsel %vm1601_vm2, 1.0, %v10595_v57  ;;  %v8330_v2 = vmul.f32 %v8308_v6, %v2900_v33  ;;  %v8334_v12 = vsel %vm1603_vm6, 1.0, %v10595_v57  ;;  %v3785_v42 = vld [vmem:[#allocation2 + $0xf9] sm:$0xff] }
 0x1e6   :  { %3724 = vst.msk [vmem:[#allocation3 + $0x110] sm:$0xff] %vm3689_vm9, %v3554_v24  ;;  %6661 = vmatprep.mubr.msk.bf16.mxu0 %vm82_vm1, %v575_v52  ;;  %10689 = vst [vmem:[#allocation31_spill] sm:$0xff] %v8316_v29  ;;  %v1999_v52 = vld [vmem:[#allocation2 + $0x78] sm:$0xff]  ;;  %v8320_v23 = vmul.f32 %v8211_v26, %v2898_v60  ;;  %v1878_v1 = vmul.f32 %v8308_v6, %v2898_v60  ;;  %v1880_v28 = vmul.f32 %v8316_v29, %v2900_v33  ;;  %v2405_v24 = vld [vmem:[#allocation2 + $0x61] sm:$0xff] }
 0x1e7   :  { %2613 = vrot.lane.b32.xlu1 %v2470_v53, %s6793_s11  ;;  %6662 = vmatmul.mubr.msk.bf16.gmra.mrb[56].mxu0 %vm82_vm1, %v576_v54  ;;  %1947 = vst.msk [vmem:[#allocation3 + $0xe8] sm:$0xff] %vm82_vm1, %v8305_v25  ;;  %10690 = vst [vmem:[#allocation32_spill] sm:$0xff] %v8334_v12  ;;  %v8338_v14 = vmul.f32 %v8327_v18, %v3783_v9  ;;  %v8342_v36 = vmul.f32 %v8334_v12, %v3785_v42  ;;  %v2407_v53 = vld [vmem:[#allocation2 + $0x71] sm:$0xff]  ;;  %v2404_v54 = vld [vmem:[#allocation2 + $0x59] sm:$0xff] }
 0x1e8   :  { %1946 = vst.msk [vmem:[#allocation3 + $0xe0] sm:$0xff] %vm82_vm1, %v1878_v1  ;;  %1948 = vst.msk [vmem:[#allocation3 + $0xf0] sm:$0xff] %vm82_vm1, %v1880_v28  ;;  %v2472_v60 = vmul.f32 %v8009_v63, %v2404_v54  ;;  %v6775_v33 = vld [vmem:[%s10500_s0 + $0x1e8] sm:$0xff]  ;;  %v6776_v1 = vld [vmem:[%s10500_s0 + $0x1f0] sm:$0xff]  ;;  %v829_v54 = vpop.f32.mrb[31].mxu0 }
 0x1e9   :  { %2142 = vrot.lane.b32.xlu0 %v1996_v32, %s6792_s8  ;;  %10691 = vst [vmem:[#allocation33_spill] sm:$0xff] %v8338_v14  ;;  %10692 = vst [vmem:[#allocation34_spill] sm:$0xff] %v8342_v36  ;;  %v479_v28 = vsub.f32 %v6776_v1, %v7525_v0  ;;  %v6777_v9 = vld [vmem:[%s10500_s0 + $0x1f8] sm:$0xff]  ;;  %vm998_vm4 = vcmp.gt.f32.partialorder %v829_v54, 0.0 }
 0x1ea   :  { %v480_v42 = vsub.f32 %v6777_v9, %v7525_v0  ;;  %v8389_v9 = vld [vmem:[#allocation2 + $0x117] sm:$0xff] }
 0x1eb   :  { %2148 = vrot.lane.b32.xlu1 %v1999_v52, %s6792_s8  ;;  %1951 = vst.msk [vmem:[#allocation3 + $0x108] sm:$0xff] %vm82_vm1, %v8389_v9 }
 0x1ed   :  { %3501 = vrot.lane.b32.xlu0 %v1996_v32, %s6795_s13  ;;  %v6774_v32 = vld [vmem:[%s10500_s0 + $0x1e0] sm:$0xff]  ;;  %s6796_s0 = smov 20  }
 0x1ef   :  { %3098 = vrot.lane.b32.xlu1 %v7924_v27, %s6794_s12  ;;  %v477_v27 = vsub.f32 %v6774_v32, %v7525_v0  ;;  %v546_v32 = vmul.f32 %v7541_v49, %v480_v42  ;;  %v2000_v42 = vld [vmem:[#allocation2 + $0x80] sm:$0xff] }
 0x1f1   :  { %2623 = vrot.lane.b32.xlu0 %v2407_v53, %s6793_s11  ;;  %v543_v53 = vmul.f32 %v7541_v49, %v477_v27  ;;  %v2406_v27 = vld [vmem:[#allocation2 + $0x69] sm:$0xff] }
 0x1f3   :  { %3507 = vrot.lane.b32.xlu1 %v1999_v52, %s6795_s13  ;;  %v478_v52 = vsub.f32 %v6775_v33, %v7525_v0  ;;  %v1062_v33 = vmul.f32 0.01, %v829_v54  ;;  %v2002_v0 = vld [vmem:[#allocation2 + $0x90] sm:$0xff] }
 0x1f5   :  { %2619 = vrot.lane.b32.xlu0 %v2405_v24, %s6793_s11  ;;  %v544_v24 = vmul.f32 %v7541_v49, %v478_v52  ;;  %v1270_v52 = vadd.s32 256, %v7430_v40 }
 0x1f7   :  { %2144 = vrot.lane.b32.xlu1 %v1997_v58, %s6792_s8  ;;  %v577_v1 = vpack.c.bf16 %v544_v24, %v543_v53  ;;  %v2003_v24 = vld [vmem:[#allocation2 + $0x98] sm:$0xff] }
 0x1f9   :  { %3092 = vrot.lane.b32.xlu0 %v7927_v30, %s6794_s12  ;;  %v545_v30 = vmul.f32 %v7541_v49, %v479_v28  ;;  %6665 = vmatprep.mubr.msk.bf16.mxu0 %vm82_vm1, %v577_v1  ;;  %v1265_v49 = vadd.s32 216, %v7430_v40  ;;  %v1338_v28 = vand.u32 15, %v1270_v52 }
 0x1fb   :  { %2617 = vrot.lane.b32.xlu1 %v2472_v60, %s6793_s11  ;;  %v578_v6 = vpack.c.bf16 %v546_v32, %v545_v30  ;;  %v1126_v60 = vsel %vm998_vm4, %v829_v54, %v1062_v33  ;;  %vm1406_vm14 = vcmp.ne.s32.totalorder %v1338_v28, 0 }
 0x1fc   :  { %1202 = vst.msk [vmem:[#allocation2 + $0x108] sm:$0xff] %vm82_vm1, %v1126_v60  ;;  %v2409_v60 = vld [vmem:[#allocation2 + $0x81] sm:$0xff] }
 0x1fd   :  { %3096 = vrot.lane.b32.xlu0 %v7949_v39, %s6794_s12  ;;  %6666 = vmatmul.mubr.msk.bf16.gmra.mrb[60].mxu0 %vm82_vm1, %v578_v6  ;;  %v1333_v39 = vand.u32 15, %v1265_v49  ;;  %v8392_v6 = vsel %vm1406_vm14, 1.0, %v10595_v57  ;;  %v2001_v49 = vld [vmem:[#allocation2 + $0x88] sm:$0xff] }
 0x1fe   :  { %10693 = vst [vmem:[#allocation35_spill] sm:$0xff] %v8392_v6 }
 0x1ff   :  { %3094 = vrot.lane.b32.xlu1 %v7951_v45, %s6794_s12  ;;  %v2474_v45 = vmul.f32 %v8021_v61, %v2406_v27  ;;  %vm1605_vm10 = vcmp.ne.s32.totalorder %v1333_v39, 15  ;;  %v2408_v27 = vld [vmem:[#allocation2 + $0x79] sm:$0xff] }
 0x200   :  { %v8407_v32 = vsel %vm1605_vm10, 1.0, %v10595_v57  ;;  %v2476_v28 = vmul.f32 %v8161_v22, %v2408_v27  ;;  %v2006_v27 = vld [vmem:[#allocation2 + $0xb0] sm:$0xff] }
 0x201   :  { %2154 = vrot.lane.b32.xlu0 %v2002_v0, %s6792_s8  ;;  %10694 = vst [vmem:[#allocation36_spill] sm:$0xff] %v8407_v32 }
 0x203   :  { %3503 = vrot.lane.b32.xlu1 %v1997_v58, %s6795_s13  ;;  %v8396_v58 = vld [vmem:[#allocation2 + $0x107] sm:$0xff]  ;;  %v2902_v53 = vld [vmem:[#allocation2 + $0x10f] sm:$0xff] }
 0x204   :  { %v8400_v54 = vmul.f32 %v8316_v29, %v2902_v53  ;;  %v1882_v30 = vmul.f32 %v8392_v6, %v2902_v53  ;;  %1949 = vst.msk [vmem:[#allocation3 + $0xf8] sm:$0xff] %vm82_vm1, %v8396_v58  ;;  %v3787_v33 = vld [vmem:[#allocation2 + $0x109] sm:$0xff] }
 0x205   :  { %3513 = vrot.lane.b32.xlu0 %v2002_v0, %s6795_s13  ;;  %v8411_v1 = vmul.f32 %v8407_v32, %v3787_v33  ;;  %v2411_v0 = vld [vmem:[#allocation2 + $0x91] sm:$0xff] }
 0x206   :  { %1950 = vst.msk [vmem:[#allocation3 + $0x100] sm:$0xff] %vm82_vm1, %v1882_v30 }
 0x207   :  { %2621 = vrot.lane.b32.xlu1 %v2474_v45, %s6793_s11  ;;  %10695 = vst [vmem:[#allocation37_spill] sm:$0xff] %v8411_v1 }
 0x209   :  { %2150 = vrot.lane.b32.xlu0 %v2000_v42, %s6792_s8 }
 0x20b   :  { %2156 = vrot.lane.b32.xlu1 %v2003_v24, %s6792_s8 }
 0x20d   :  { %3509 = vrot.lane.b32.xlu0 %v2000_v42, %s6795_s13 }
 0x20f   :  { %3106 = vrot.lane.b32.xlu1 %v7998_v10, %s6794_s12  ;;  %v6639_v10 = vpop.f32.mrb[32].mxu0 }
 0x210   :  { %vm1003_vm11 = vcmp.gt.f32.partialorder %v6639_v10, 0.0  ;;  %v1067_v42 = vmul.f32 0.01, %v6639_v10  ;;  %v842_v53 = vpop.f32.mrb[33].mxu0 }
 0x211   :  { %2631 = vrot.lane.b32.xlu0 %v2411_v0, %s6793_s11  ;;  %vm1001_vm12 = vcmp.gt.f32.partialorder %v842_v53, 0.0  ;;  %v1065_v30 = vmul.f32 0.01, %v842_v53  ;;  %v6640_v33 = vpop.f32.mrb[34].mxu0 }
 0x212   :  { %v1131_v0 = vsel %vm1003_vm11, %v6639_v10, %v1067_v42  ;;  %vm1004_vm13 = vcmp.gt.f32.partialorder %v6640_v33, 0.0 }
 0x213   :  { %3515 = vrot.lane.b32.xlu1 %v2003_v24, %s6795_s13  ;;  %1207 = vst.msk [vmem:[#allocation2 + $0x150] sm:$0xff] %vm82_vm1, %v1131_v0 }
 0x215   :  { %2627 = vrot.lane.b32.xlu0 %v2409_v60, %s6793_s11  ;;  %v845_v60 = vpop.f32.mrb[35].mxu0 }
 0x216   :  { %vm1002_vm15 = vcmp.gt.f32.partialorder %v845_v60, 0.0 }
 0x217   :  { %2152 = vrot.lane.b32.xlu1 %v2001_v49, %s6792_s8  ;;  %v2131_v52 = vpop.permute.xlu0 %2130 }
 0x218   :  { %2331 = vst.msk [vmem:[#allocation3 + $0x20] sm:$0xff] %vm2326_vm5, %v2131_v52  ;;  %v2127_v39 = vpop.permute.xlu1 %2126  ;;  %v1129_v52 = vsel %vm1001_vm12, %v842_v53, %v1065_v30  ;;  %v2410_v53 = vld [vmem:[#allocation2 + $0x89] sm:$0xff] }
 0x219   :  { %2329 = vst.msk [vmem:[#allocation3 + $0x10] sm:$0xff] %vm2326_vm5, %v2127_v39  ;;  %3100 = vrot.lane.b32.xlu0 %v8001_v20, %s6794_s12  ;;  %v1068_v20 = vmul.f32 0.01, %v6640_v33  ;;  %v1066_v39 = vmul.f32 0.01, %v845_v60 }
 0x21a   :  { %1205 = vst.msk [vmem:[#allocation2 + $0x140] sm:$0xff] %vm82_vm1, %v1129_v52  ;;  %v1276_v52 = vadd.s32 304, %v7430_v40 }
 0x21b   :  { %2625 = vrot.lane.b32.xlu1 %v2476_v28, %s6793_s11  ;;  %v8426_v45 = vpop.permute.xlu0 %3489  ;;  %v6643_v28 = vpop.f32.mrb[36].mxu0  ;;  %v1130_v1 = vsel %vm1002_vm15, %v845_v60, %v1066_v39  ;;  %v2478_v60 = vmul.f32 %v8185_v16, %v2410_v53 }
 0x21c   :  { %v2133_v24 = vpop.permute.xlu1 %2132  ;;  %vm1007_vm2 = vcmp.gt.f32.partialorder %v6643_v28, 0.0  ;;  %v858_v10 = vpop.f32.mrb[37].mxu0  ;;  %1206 = vst.msk [vmem:[#allocation2 + $0x148] sm:$0xff] %vm82_vm1, %v1130_v1  ;;  %v1278_v1 = vadd.s32 320, %v7430_v40 }
 0x21d   :  { %2332 = vst.msk [vmem:[#allocation3 + $0x28] sm:$0xff] %vm2326_vm5, %v2133_v24  ;;  %3104 = vrot.lane.b32.xlu0 %v8024_v50, %s6794_s12  ;;  %v1132_v24 = vsel %vm1004_vm13, %v6640_v33, %v1068_v20  ;;  %v1071_v50 = vmul.f32 0.01, %v6643_v28  ;;  %vm1005_vm3 = vcmp.gt.f32.partialorder %v858_v10, 0.0 }
 0x21e   :  { %1208 = vst.msk [vmem:[#allocation2 + $0x158] sm:$0xff] %vm82_vm1, %v1132_v24  ;;  %v1346_v24 = vand.u32 15, %v1278_v1 }
 0x21f   :  { %3102 = vrot.lane.b32.xlu1 %v8026_v19, %s6794_s12  ;;  %v3486_v29 = vpop.permute.xlu0 %3485  ;;  %v1069_v19 = vmul.f32 0.01, %v858_v10  ;;  %v1135_v30 = vsel %vm1007_vm2, %v6643_v28, %v1071_v50  ;;  %v1344_v28 = vand.u32 15, %v1276_v52 }
 0x220   :  { %v8435_v42 = vpop.permute.xlu1 %3082  ;;  %1211 = vst.msk [vmem:[#allocation2 + $0x170] sm:$0xff] %vm82_vm1, %v1135_v30  ;;  %vm1414_vm4 = vcmp.ne.s32.totalorder %v1346_v24, 0 }
 0x221   :  { %2162 = vrot.lane.b32.xlu0 %v2006_v27, %s6792_s8  ;;  %v1133_v33 = vsel %vm1005_vm3, %v858_v10, %v1069_v19  ;;  %v2004_v10 = vld [vmem:[#allocation2 + $0xa0] sm:$0xff]  ;;  %vm1412_vm6 = vcmp.ne.s32.totalorder %v1344_v28, 0 }
 0x222   :  { %1209 = vst.msk [vmem:[#allocation2 + $0x160] sm:$0xff] %vm82_vm1, %v1133_v33  ;;  %v8459_v30 = vsel %vm1412_vm6, 1.0, %v10595_v57  ;;  %v8467_v52 = vld [vmem:[#allocation2 + $0x13f] sm:$0xff] }
 0x223   :  { %3511 = vrot.lane.b32.xlu1 %v2001_v49, %s6795_s13  ;;  %v2608_v0 = vpop.permute.xlu0 %2607  ;;  %v1280_v49 = vadd.s32 336, %v7430_v40  ;;  %10696 = vst [vmem:[#allocation38_spill] sm:$0xff] %v8459_v30  ;;  %v2910_v1 = vld [vmem:[#allocation2 + $0x14f] sm:$0xff]  ;;  %v8478_v28 = vld [vmem:[#allocation2 + $0x147] sm:$0xff] }
 0x224   :  { %2808 = vst.msk [vmem:[#allocation3 + $0x20] sm:$0xff] %vm2803_vm7, %v2608_v0  ;;  %v8444_v20 = vpop.permute.xlu1 %3491  ;;  %v8462_v0 = vsel %vm1414_vm4, 1.0, %v10595_v57 }
 0x225   :  { %3521 = vrot.lane.b32.xlu0 %v2006_v27, %s6795_s13  ;;  %v1348_v19 = vand.u32 15, %v1280_v49  ;;  %v2007_v27 = vld [vmem:[#allocation2 + $0xb8] sm:$0xff]  ;;  %10697 = vst [vmem:[#allocation39_spill] sm:$0xff] %v8462_v0  ;;  %1957 = vst.msk [vmem:[#allocation3 + $0x138] sm:$0xff] %vm82_vm1, %v8478_v28 }
 0x226   :  { %v8456_v53 = vld [vmem:[#allocation2 + $0x157] sm:$0xff] }
 0x227   :  { %2629 = vrot.lane.b32.xlu1 %v2478_v60, %s6793_s11  ;;  %v2604_v39 = vpop.permute.xlu0 %2603  ;;  %vm1416_vm14 = vcmp.ne.s32.totalorder %v1348_v19, 0  ;;  %1959 = vst.msk [vmem:[#allocation3 + $0x148] sm:$0xff] %vm82_vm1, %v8456_v53 }
 0x228   :  { %2806 = vst.msk [vmem:[#allocation3 + $0x10] sm:$0xff] %vm2803_vm7, %v2604_v39  ;;  %v2129_v50 = vpop.permute.xlu1 %2128  ;;  %v8470_v49 = vsel %vm1416_vm14, 1.0, %v10595_v57  ;;  %v8476_v39 = vmul.f32 %v8459_v30, %v2910_v1 }
 0x229   :  { %2330 = vst.msk [vmem:[#allocation3 + $0x18] sm:$0xff] %vm2326_vm5, %v2129_v50  ;;  %2158 = vrot.lane.b32.xlu0 %v2004_v10, %s6792_s8  ;;  %10698 = vst [vmem:[#allocation40_spill] sm:$0xff] %v8470_v49  ;;  %v2912_v24 = vld [vmem:[#allocation2 + $0x15f] sm:$0xff]  ;;  %v1890_v50 = vmul.f32 %v8462_v0, %v2910_v1  ;;  %v2415_v1 = vld [vmem:[#allocation2 + $0xb1] sm:$0xff] }
 0x22a   :  { %v8484_v19 = vmul.f32 %v8462_v0, %v2912_v24 }
 0x22b   :  { %2164 = vrot.lane.b32.xlu1 %v2007_v27, %s6792_s8  ;;  %v3077_v33 = vpop.permute.xlu0 %3076  ;;  %1958 = vst.msk [vmem:[#allocation3 + $0x140] sm:$0xff] %vm82_vm1, %v1890_v50  ;;  %v2413_v50 = vld [vmem:[#allocation2 + $0xa1] sm:$0xff] }
 0x22c   :  { %3281 = vst.msk [vmem:[#allocation3] sm:$0xff] %vm3280_vm8, %v3077_v33  ;;  %v2602_v60 = vpop.permute.xlu1 %2601 }
 0x22d   :  { %3690 = vst.msk [vmem:[#allocation3] sm:$0xff] %vm3689_vm9, %v3486_v29  ;;  %3517 = vrot.lane.b32.xlu0 %v2004_v10, %s6795_s13  ;;  %v1888_v29 = vmul.f32 %v8459_v30, %v8467_v52  ;;  %v1892_v10 = vmul.f32 %v8470_v49, %v2912_v24  ;;  %v2414_v30 = vld [vmem:[#allocation2 + $0xa9] sm:$0xff] }
 0x22e   :  { %2805 = vst.msk [vmem:[#allocation3 + $0x8] sm:$0xff] %vm2803_vm7, %v2602_v60 }
 0x22f   :  { %3114 = vrot.lane.b32.xlu1 %v8072_v47, %s6794_s12  ;;  %v3081_v33 = vpop.permute.xlu0 %3080  ;;  %1956 = vst.msk [vmem:[#allocation3 + $0x130] sm:$0xff] %vm82_vm1, %v1888_v29  ;;  %1960 = vst.msk [vmem:[#allocation3 + $0x150] sm:$0xff] %vm82_vm1, %v1892_v10  ;;  %v2005_v29 = vld [vmem:[#allocation2 + $0xa8] sm:$0xff]  ;;  %v2412_v10 = vld [vmem:[#allocation2 + $0x99] sm:$0xff] }
 0x230   :  { %3283 = vst.msk [vmem:[#allocation3 + $0x10] sm:$0xff] %vm3280_vm8, %v3081_v33  ;;  %v3079_v60 = vpop.permute.xlu1 %3078 }
 0x231   :  { %3692 = vst.msk [vmem:[#allocation3 + $0x10] sm:$0xff] %vm3689_vm9, %v8426_v45  ;;  %2639 = vrot.lane.b32.xlu0 %v2415_v1, %s6793_s11 }
 0x232   :  { %3282 = vst.msk [vmem:[#allocation3 + $0x8] sm:$0xff] %vm3280_vm8, %v3079_v60  ;;  %v2480_v60 = vmul.f32 %v8190_v46, %v2412_v10 }
 0x233   :  { %3523 = vrot.lane.b32.xlu1 %v2007_v27, %s6795_s13  ;;  %v2139_v47 = vpop.permute.xlu0 %2138 }
 0x234   :  { %2335 = vst.msk [vmem:[#allocation3 + $0x40] sm:$0xff] %vm2326_vm5, %v2139_v47  ;;  %v3488_v24 = vpop.permute.xlu1 %3487  ;;  %v6644_v47 = vpop.f32.mrb[38].mxu0 }
 0x235   :  { %3691 = vst.msk [vmem:[#allocation3 + $0x8] sm:$0xff] %vm3689_vm9, %v3488_v24  ;;  %2635 = vrot.lane.b32.xlu0 %v2413_v50, %s6793_s11  ;;  %vm1008_vm10 = vcmp.gt.f32.partialorder %v6644_v47, 0.0  ;;  %v861_v24 = vpop.f32.mrb[39].mxu0 }
 0x236   :  { %vm1006_vm11 = vcmp.gt.f32.partialorder %v861_v24, 0.0  ;;  %v1070_v50 = vmul.f32 0.01, %v861_v24 }
 0x237   :  { %2160 = vrot.lane.b32.xlu1 %v2005_v29, %s6792_s8  ;;  %v8504_v45 = vpop.permute.xlu0 %3497 }
 0x238   :  { %v2606_v33 = vpop.permute.xlu1 %2605 }
 0x239   :  { %2807 = vst.msk [vmem:[#allocation3 + $0x18] sm:$0xff] %vm2803_vm7, %v2606_v33  ;;  %3108 = vrot.lane.b32.xlu0 %v8076_v38, %s6794_s12  ;;  %v1072_v38 = vmul.f32 0.01, %v6644_v47 }
 0x23a   :  { %3284 = vst.msk [vmem:[#allocation3 + $0x18] sm:$0xff] %vm3280_vm8, %v8435_v42  ;;  %v2010_v42 = vld [vmem:[#allocation2 + $0xd0] sm:$0xff] }
 0x23b   :  { %2633 = vrot.lane.b32.xlu1 %v2480_v60, %s6793_s11  ;;  %3693 = vst.msk [vmem:[#allocation3 + $0x18] sm:$0xff] %vm3689_vm9, %v8444_v20  ;;  %v2135_v27 = vpop.permute.xlu0 %2134  ;;  %v6647_v20 = vpop.f32.mrb[40].mxu0  ;;  %v1136_v33 = vsel %vm1008_vm10, %v6644_v47, %v1072_v38 }
 0x23c   :  { %2333 = vst.msk [vmem:[#allocation3 + $0x30] sm:$0xff] %vm2326_vm5, %v2135_v27  ;;  %v2141_v1 = vpop.permute.xlu1 %2140  ;;  %vm1011_vm12 = vcmp.gt.f32.partialorder %v6647_v20, 0.0  ;;  %v1075_v60 = vmul.f32 0.01, %v6647_v20  ;;  %v874_v27 = vpop.f32.mrb[41].mxu0 }
 0x23d   :  { %2336 = vst.msk [vmem:[#allocation3 + $0x48] sm:$0xff] %vm2326_vm5, %v2141_v1  ;;  %3112 = vrot.lane.b32.xlu0 %v8097_v17, %s6794_s12  ;;  %v1134_v17 = vsel %vm1006_vm11, %v861_v24, %v1070_v50  ;;  %vm1009_vm13 = vcmp.gt.f32.partialorder %v874_v27, 0.0  ;;  %v1073_v1 = vmul.f32 0.01, %v874_v27  ;;  %v2482_v24 = vmul.f32 %v8236_v34, %v2414_v30  ;;  %v2011_v30 = vld [vmem:[#allocation2 + $0xd8] sm:$0xff] }
 0x23e   :  { %1212 = vst.msk [vmem:[#allocation2 + $0x178] sm:$0xff] %vm82_vm1, %v1136_v33  ;;  %1210 = vst.msk [vmem:[#allocation2 + $0x168] sm:$0xff] %vm82_vm1, %v1134_v17  ;;  %v1282_v50 = vadd.s32 352, %v7430_v40 }
 0x23f   :  { %3110 = vrot.lane.b32.xlu1 %v8099_v59, %s6794_s12  ;;  %v3494_v10 = vpop.permute.xlu0 %3493  ;;  %v1139_v59 = vsel %vm1011_vm12, %v6647_v20, %v1075_v60  ;;  %v1137_v47 = vsel %vm1009_vm13, %v874_v27, %v1073_v1  ;;  %v1284_v20 = vadd.s32 368, %v7430_v40  ;;  %v2008_v1 = vld [vmem:[#allocation2 + $0xc0] sm:$0xff] }
 0x240   :  { %v8521_v0 = vpop.permute.xlu1 %3090  ;;  %1215 = vst.msk [vmem:[#allocation2 + $0x190] sm:$0xff] %vm82_vm1, %v1139_v59  ;;  %1213 = vst.msk [vmem:[#allocation2 + $0x180] sm:$0xff] %vm82_vm1, %v1137_v47  ;;  %v1350_v60 = vand.u32 15, %v1282_v50 }
 0x241   :  { %2170 = vrot.lane.b32.xlu0 %v2010_v42, %s6792_s8  ;;  %v1352_v27 = vand.u32 15, %v1284_v20 }
 0x242   :  { %vm1418_vm15 = vcmp.ne.s32.totalorder %v1350_v60, 0 }
 0x243   :  { %3519 = vrot.lane.b32.xlu1 %v2005_v29, %s6795_s13  ;;  %v2616_v38 = vpop.permute.xlu0 %2615  ;;  %vm1420_vm2 = vcmp.ne.s32.totalorder %v1352_v27, 0  ;;  %v8544_v59 = vsel %vm1418_vm15, 1.0, %v10595_v57 }
 0x244   :  { %2812 = vst.msk [vmem:[#allocation3 + $0x40] sm:$0xff] %vm2803_vm7, %v2616_v38  ;;  %v8530_v33 = vpop.permute.xlu1 %3499  ;;  %10699 = vst [vmem:[#allocation41_spill] sm:$0xff] %v8544_v59  ;;  %v8547_v38 = vsel %vm1420_vm2, 1.0, %v10595_v57 }
 0x245   :  { %3529 = vrot.lane.b32.xlu0 %v2010_v42, %s6795_s13  ;;  %v8541_v42 = vld [vmem:[#allocation2 + $0x177] sm:$0xff]  ;;  %10700 = vst [vmem:[#allocation42_spill] sm:$0xff] %v8547_v38  ;;  %v2914_v50 = vld [vmem:[#allocation2 + $0x16f] sm:$0xff]  ;;  %v8552_v20 = vld [vmem:[#allocation2 + $0x167] sm:$0xff] }
 0x246   :  { %1963 = vst.msk [vmem:[#allocation3 + $0x168] sm:$0xff] %vm82_vm1, %v8541_v42  ;;  %v1894_v27 = vmul.f32 %v8544_v59, %v2914_v50  ;;  %1961 = vst.msk [vmem:[#allocation3 + $0x158] sm:$0xff] %vm82_vm1, %v8552_v20 }
 0x247   :  { %2637 = vrot.lane.b32.xlu1 %v2482_v24, %s6793_s11  ;;  %v2612_v29 = vpop.permute.xlu0 %2611  ;;  %v2916_v60 = vld [vmem:[#allocation2 + $0x17f] sm:$0xff] }
 0x248   :  { %2810 = vst.msk [vmem:[#allocation3 + $0x30] sm:$0xff] %vm2803_vm7, %v2612_v29  ;;  %v8558_v29 = vmul.f32 %v8470_v49, %v2914_v50  ;;  %v2418_v49 = vld [vmem:[#allocation2 + $0xc9] sm:$0xff] }
 0x249   :  { %v2137_v17 = vpop.permute.xlu1 %2136  ;;  %2166 = vrot.lane.b32.xlu0 %v2008_v1, %s6792_s8  ;;  %1962 = vst.msk [vmem:[#allocation3 + $0x160] sm:$0xff] %vm82_vm1, %v1894_v27  ;;  %v2009_v27 = vld [vmem:[#allocation2 + $0xc8] sm:$0xff] }
 0x24a   :  { %2334 = vst.msk [vmem:[#allocation3 + $0x38] sm:$0xff] %vm2326_vm5, %v2137_v17  ;;  %v8566_v17 = vmul.f32 %v8544_v59, %v2916_v60 }
 0x24b   :  { %2172 = vrot.lane.b32.xlu1 %v2011_v30, %s6792_s8  ;;  %v3085_v47 = vpop.permute.xlu0 %3084 }
 0x24c   :  { %3285 = vst.msk [vmem:[#allocation3 + $0x20] sm:$0xff] %vm3280_vm8, %v3085_v47 }
 0x24d   :  { %v2610_v24 = vpop.permute.xlu1 %2609  ;;  %3694 = vst.msk [vmem:[#allocation3 + $0x20] sm:$0xff] %vm3689_vm9, %v3494_v10  ;;  %3525 = vrot.lane.b32.xlu0 %v2008_v1, %s6795_s13  ;;  %v1896_v10 = vmul.f32 %v8547_v38, %v2916_v60  ;;  %v2417_v60 = vld [vmem:[#allocation2 + $0xc1] sm:$0xff] }
 0x24e   :  { %2809 = vst.msk [vmem:[#allocation3 + $0x28] sm:$0xff] %vm2803_vm7, %v2610_v24  ;;  %v2419_v24 = vld [vmem:[#allocation2 + $0xd1] sm:$0xff] }
 0x24f   :  { %3122 = vrot.lane.b32.xlu1 %v8152_v7, %s6794_s12  ;;  %v3089_v47 = vpop.permute.xlu0 %3088  ;;  %1964 = vst.msk [vmem:[#allocation3 + $0x170] sm:$0xff] %vm82_vm1, %v1896_v10  ;;  %v2416_v10 = vld [vmem:[#allocation2 + $0xb9] sm:$0xff] }
 0x250   :  { %3287 = vst.msk [vmem:[#allocation3 + $0x30] sm:$0xff] %vm3280_vm8, %v3089_v47 }
 0x251   :  { %v3087_v1 = vpop.permute.xlu1 %3086  ;;  %3696 = vst.msk [vmem:[#allocation3 + $0x30] sm:$0xff] %vm3689_vm9, %v8504_v45  ;;  %2647 = vrot.lane.b32.xlu0 %v2419_v24, %s6793_s11 }
 0x252   :  { %3286 = vst.msk [vmem:[#allocation3 + $0x28] sm:$0xff] %vm3280_vm8, %v3087_v1  ;;  %v2484_v1 = vmul.f32 %v8248_v41, %v2416_v10 }
 0x253   :  { %3531 = vrot.lane.b32.xlu1 %v2011_v30, %s6795_s13  ;;  %v2147_v7 = vpop.permute.xlu0 %2146 }
 0x254   :  { %2339 = vst.msk [vmem:[#allocation3 + $0x60] sm:$0xff] %vm2326_vm5, %v2147_v7  ;;  %v6648_v7 = vpop.f32.mrb[42].mxu0 }
 0x255   :  { %v3496_v50 = vpop.permute.xlu1 %3495  ;;  %2643 = vrot.lane.b32.xlu0 %v2417_v60, %s6793_s11  ;;  %vm1012_vm3 = vcmp.gt.f32.partialorder %v6648_v7, 0.0 }
 0x256   :  { %3695 = vst.msk [vmem:[#allocation3 + $0x28] sm:$0xff] %vm3689_vm9, %v3496_v50  ;;  %v877_v50 = vpop.f32.mrb[43].mxu0 }
 0x257   :  { %2168 = vrot.lane.b32.xlu1 %v2009_v27, %s6792_s8  ;;  %v8581_v45 = vpop.permute.xlu0 %3505  ;;  %vm1010_vm6 = vcmp.gt.f32.partialorder %v877_v50, 0.0  ;;  %v1074_v60 = vmul.f32 0.01, %v877_v50 }
 0x259   :  { %v2614_v47 = vpop.permute.xlu1 %2613  ;;  %3116 = vrot.lane.b32.xlu0 %v8155_v8, %s6794_s12  ;;  %v1076_v8 = vmul.f32 0.01, %v6648_v7 }
 0x25a   :  { %2811 = vst.msk [vmem:[#allocation3 + $0x38] sm:$0xff] %vm2803_vm7, %v2614_v47 }
 0x25b   :  { %3288 = vst.msk [vmem:[#allocation3 + $0x38] sm:$0xff] %vm3280_vm8, %v8521_v0  ;;  %2641 = vrot.lane.b32.xlu1 %v2484_v1, %s6793_s11  ;;  %v2143_v30 = vpop.permute.xlu0 %2142  ;;  %v2014_v0 = vld [vmem:[#allocation2 + $0xf0] sm:$0xff]  ;;  %v1140_v47 = vsel %vm1012_vm3, %v6648_v7, %v1076_v8 }
 0x25c   :  { %3697 = vst.msk [vmem:[#allocation3 + $0x38] sm:$0xff] %vm3689_vm9, %v8530_v33  ;;  %v6651_v33 = vpop.f32.mrb[44].mxu0 }
 0x25d   :  { %2337 = vst.msk [vmem:[#allocation3 + $0x50] sm:$0xff] %vm2326_vm5, %v2143_v30  ;;  %v2149_v24 = vpop.permute.xlu1 %2148  ;;  %3120 = vrot.lane.b32.xlu0 %v8172_v55, %s6794_s12  ;;  %vm1015_vm4 = vcmp.gt.f32.partialorder %v6651_v33, 0.0  ;;  %v1079_v1 = vmul.f32 0.01, %v6651_v33  ;;  %v890_v30 = vpop.f32.mrb[45].mxu0  ;;  %v1138_v55 = vsel %vm1010_vm6, %v877_v50, %v1074_v60  ;;  %v2486_v50 = vmul.f32 %v8327_v18, %v2418_v49  ;;  %v2015_v49 = vld [vmem:[#allocation2 + $0xf8] sm:$0xff] }
 0x25e   :  { %2340 = vst.msk [vmem:[#allocation3 + $0x68] sm:$0xff] %vm2326_vm5, %v2149_v24  ;;  %vm1013_vm14 = vcmp.gt.f32.partialorder %v890_v30, 0.0  ;;  %v1077_v24 = vmul.f32 0.01, %v890_v30  ;;  %v1286_v60 = vadd.s32 384, %v7430_v40 }
 0x25f   :  { %3118 = vrot.lane.b32.xlu1 %v8174_v62, %s6794_s12  ;;  %v3502_v10 = vpop.permute.xlu0 %3501  ;;  %1216 = vst.msk [vmem:[#allocation2 + $0x198] sm:$0xff] %vm82_vm1, %v1140_v47  ;;  %1214 = vst.msk [vmem:[#allocation2 + $0x188] sm:$0xff] %vm82_vm1, %v1138_v55  ;;  %v1143_v62 = vsel %vm1015_vm4, %v6651_v33, %v1079_v1  ;;  %v1288_v33 = vadd.s32 400, %v7430_v40 }
 0x260   :  { %1219 = vst.msk [vmem:[#allocation2 + $0x1b0] sm:$0xff] %vm82_vm1, %v1143_v62  ;;  %v1141_v7 = vsel %vm1013_vm14, %v890_v30, %v1077_v24  ;;  %v1354_v1 = vand.u32 15, %v1286_v60  ;;  %v2012_v24 = vld [vmem:[#allocation2 + $0xe0] sm:$0xff] }
 0x261   :  { %v8598_v59 = vpop.permute.xlu1 %3098  ;;  %2178 = vrot.lane.b32.xlu0 %v2014_v0, %s6792_s8  ;;  %1217 = vst.msk [vmem:[#allocation2 + $0x1a0] sm:$0xff] %vm82_vm1, %v1141_v7  ;;  %v1356_v30 = vand.u32 15, %v1288_v33 }
 0x262   :  { %vm1422_vm10 = vcmp.ne.s32.totalorder %v1354_v1, 0 }
 0x263   :  { %3527 = vrot.lane.b32.xlu1 %v2009_v27, %s6795_s13  ;;  %v2624_v8 = vpop.permute.xlu0 %2623  ;;  %vm1424_vm11 = vcmp.ne.s32.totalorder %v1356_v30, 0  ;;  %v8621_v62 = vsel %vm1422_vm10, 1.0, %v10595_v57 }
 0x264   :  { %2816 = vst.msk [vmem:[#allocation3 + $0x60] sm:$0xff] %vm2803_vm7, %v2624_v8  ;;  %10701 = vst [vmem:[#allocation43_spill] sm:$0xff] %v8621_v62  ;;  %v8624_v8 = vsel %vm1424_vm11, 1.0, %v10595_v57 }
 0x265   :  { %v8607_v47 = vpop.permute.xlu1 %3507  ;;  %3537 = vrot.lane.b32.xlu0 %v2014_v0, %s6795_s13  ;;  %10702 = vst [vmem:[#allocation44_spill] sm:$0xff] %v8624_v8 }
 0x266   :  { %v8618_v0 = vld [vmem:[#allocation2 + $0x197] sm:$0xff]  ;;  %v2918_v60 = vld [vmem:[#allocation2 + $0x18f] sm:$0xff]  ;;  %v8629_v33 = vld [vmem:[#allocation2 + $0x187] sm:$0xff] }
 0x267   :  { %2645 = vrot.lane.b32.xlu1 %v2486_v50, %s6793_s11  ;;  %v2620_v27 = vpop.permute.xlu0 %2619  ;;  %1967 = vst.msk [vmem:[#allocation3 + $0x188] sm:$0xff] %vm82_vm1, %v8618_v0  ;;  %v1898_v30 = vmul.f32 %v8621_v62, %v2918_v60  ;;  %1965 = vst.msk [vmem:[#allocation3 + $0x178] sm:$0xff] %vm82_vm1, %v8629_v33 }
 0x268   :  { %2814 = vst.msk [vmem:[#allocation3 + $0x50] sm:$0xff] %vm2803_vm7, %v2620_v27  ;;  %v8635_v27 = vmul.f32 %v8547_v38, %v2918_v60  ;;  %v2920_v1 = vld [vmem:[#allocation2 + $0x19f] sm:$0xff] }
 0x269   :  { %v2145_v55 = vpop.permute.xlu1 %2144  ;;  %2174 = vrot.lane.b32.xlu0 %v2012_v24, %s6792_s8  ;;  %1966 = vst.msk [vmem:[#allocation3 + $0x180] sm:$0xff] %vm82_vm1, %v1898_v30  ;;  %v2013_v30 = vld [vmem:[#allocation2 + $0xe8] sm:$0xff] }
 0x26a   :  { %2338 = vst.msk [vmem:[#allocation3 + $0x58] sm:$0xff] %vm2326_vm5, %v2145_v55  ;;  %v8643_v55 = vmul.f32 %v8621_v62, %v2920_v1 }
 0x26b   :  { %2180 = vrot.lane.b32.xlu1 %v2015_v49, %s6792_s8  ;;  %v3093_v7 = vpop.permute.xlu0 %3092 }
 0x26c   :  { %3289 = vst.msk [vmem:[#allocation3 + $0x40] sm:$0xff] %vm3280_vm8, %v3093_v7 }
 0x26d   :  { %v2618_v50 = vpop.permute.xlu1 %2617  ;;  %3698 = vst.msk [vmem:[#allocation3 + $0x40] sm:$0xff] %vm3689_vm9, %v3502_v10  ;;  %3533 = vrot.lane.b32.xlu0 %v2012_v24, %s6795_s13  ;;  %v1900_v10 = vmul.f32 %v8624_v8, %v2920_v1  ;;  %v2421_v1 = vld [vmem:[#allocation2 + $0xe1] sm:$0xff] }
 0x26e   :  { %2813 = vst.msk [vmem:[#allocation3 + $0x48] sm:$0xff] %vm2803_vm7, %v2618_v50  ;;  %v2423_v50 = vld [vmem:[#allocation2 + $0xf1] sm:$0xff] }
 0x26f   :  { %3130 = vrot.lane.b32.xlu1 %v8305_v25, %s6794_s12  ;;  %v3097_v7 = vpop.permute.xlu0 %3096  ;;  %1968 = vst.msk [vmem:[#allocation3 + $0x190] sm:$0xff] %vm82_vm1, %v1900_v10  ;;  %v2420_v10 = vld [vmem:[#allocation2 + $0xd9] sm:$0xff] }
 0x270   :  { %3291 = vst.msk [vmem:[#allocation3 + $0x50] sm:$0xff] %vm3280_vm8, %v3097_v7 }
 0x271   :  { %v3095_v24 = vpop.permute.xlu1 %3094  ;;  %3700 = vst.msk [vmem:[#allocation3 + $0x50] sm:$0xff] %vm3689_vm9, %v8581_v45  ;;  %2655 = vrot.lane.b32.xlu0 %v2423_v50, %s6793_s11 }
 0x272   :  { %3290 = vst.msk [vmem:[#allocation3 + $0x48] sm:$0xff] %vm3280_vm8, %v3095_v24  ;;  %v2488_v24 = vmul.f32 %v8334_v12, %v2420_v10  ;;  %v2032_v12 = vld [vmem:[#allocation2 + $0x180] sm:$0xff] }
 0x273   :  { %3539 = vrot.lane.b32.xlu1 %v2015_v49, %s6795_s13  ;;  %v2155_v25 = vpop.permute.xlu0 %2154 }
 0x274   :  { %2343 = vst.msk [vmem:[#allocation3 + $0x80] sm:$0xff] %vm2326_vm5, %v2155_v25  ;;  %v6652_v25 = vpop.f32.mrb[46].mxu0 }
 0x275   :  { %v3504_v60 = vpop.permute.xlu1 %3503  ;;  %2651 = vrot.lane.b32.xlu0 %v2421_v1, %s6793_s11  ;;  %vm1016_vm12 = vcmp.gt.f32.partialorder %v6652_v25, 0.0 }
 0x276   :  { %3699 = vst.msk [vmem:[#allocation3 + $0x48] sm:$0xff] %vm3689_vm9, %v3504_v60  ;;  %v893_v60 = vpop.f32.mrb[47].mxu0 }
 0x277   :  { %2176 = vrot.lane.b32.xlu1 %v2013_v30, %s6792_s8  ;;  %v8658_v45 = vpop.permute.xlu0 %3513  ;;  %vm1014_vm13 = vcmp.gt.f32.partialorder %v893_v60, 0.0  ;;  %v1078_v1 = vmul.f32 0.01, %v893_v60 }
 0x279   :  { %v2622_v7 = vpop.permute.xlu1 %2621  ;;  %3124 = vrot.lane.b32.xlu0 %v8239_v35, %s6794_s12  ;;  %v1080_v35 = vmul.f32 0.01, %v6652_v25 }
 0x27a   :  { %2815 = vst.msk [vmem:[#allocation3 + $0x58] sm:$0xff] %vm2803_vm7, %v2622_v7 }
 0x27b   :  { %3292 = vst.msk [vmem:[#allocation3 + $0x58] sm:$0xff] %vm3280_vm8, %v8598_v59  ;;  %2649 = vrot.lane.b32.xlu1 %v2488_v24, %s6793_s11  ;;  %v2151_v49 = vpop.permute.xlu0 %2150  ;;  %v2018_v59 = vld [vmem:[#allocation2 + $0x110] sm:$0xff]  ;;  %v1144_v10 = vsel %vm1016_vm12, %v6652_v25, %v1080_v35  ;;  %v1142_v24 = vsel %vm1014_vm13, %v893_v60, %v1078_v1 }
 0x27c   :  { %3701 = vst.msk [vmem:[#allocation3 + $0x58] sm:$0xff] %vm3689_vm9, %v8607_v47 }
 0x27d   :  { %2341 = vst.msk [vmem:[#allocation3 + $0x70] sm:$0xff] %vm2326_vm5, %v2151_v49  ;;  %v2157_v50 = vpop.permute.xlu1 %2156  ;;  %3128 = vrot.lane.b32.xlu0 %v8320_v23, %s6794_s12  ;;  %v2422_v49 = vld [vmem:[#allocation2 + $0xe9] sm:$0xff]  ;;  %v6655_v23 = vpop.f32.mrb[48].mxu0 }
 0x27e   :  { %2344 = vst.msk [vmem:[#allocation3 + $0x88] sm:$0xff] %vm2326_vm5, %v2157_v50  ;;  %vm1019_vm15 = vcmp.gt.f32.partialorder %v6655_v23, 0.0  ;;  %v906_v50 = vpop.f32.mrb[49].mxu0  ;;  %v2490_v35 = vmul.f32 %v8407_v32, %v2422_v49  ;;  %v2016_v49 = vld [vmem:[#allocation2 + $0x100] sm:$0xff] }
 0x27f   :  { %3126 = vrot.lane.b32.xlu1 %v8313_v37, %s6794_s12  ;;  %v3510_v47 = vpop.permute.xlu0 %3509  ;;  %1220 = vst.msk [vmem:[#allocation2 + $0x1b8] sm:$0xff] %vm82_vm1, %v1144_v10  ;;  %1218 = vst.msk [vmem:[#allocation2 + $0x1a8] sm:$0xff] %vm82_vm1, %v1142_v24  ;;  %v1083_v37 = vmul.f32 0.01, %v6655_v23  ;;  %vm1017_vm2 = vcmp.gt.f32.partialorder %v906_v50, 0.0  ;;  %v1292_v10 = vadd.s32 432, %v7430_v40 }
 0x280   :  { %v1081_v38 = vmul.f32 0.01, %v906_v50 }
 0x281   :  { %v8675_v7 = vpop.permute.xlu1 %3106  ;;  %2186 = vrot.lane.b32.xlu0 %v2018_v59, %s6792_s8  ;;  %v1147_v60 = vsel %vm1019_vm15, %v6655_v23, %v1083_v37  ;;  %v1360_v23 = vand.u32 15, %v1292_v10 }
 0x282   :  { %1223 = vst.msk [vmem:[#allocation2 + $0x1d0] sm:$0xff] %vm82_vm1, %v1147_v60  ;;  %v1145_v1 = vsel %vm1017_vm2, %v906_v50, %v1081_v38  ;;  %v2019_v38 = vld [vmem:[#allocation2 + $0x118] sm:$0xff] }
 0x283   :  { %3535 = vrot.lane.b32.xlu1 %v2013_v30, %s6795_s13  ;;  %v2632_v62 = vpop.permute.xlu0 %2631  ;;  %v1290_v30 = vadd.s32 416, %v7430_v40  ;;  %1221 = vst.msk [vmem:[#allocation2 + $0x1c0] sm:$0xff] %vm82_vm1, %v1145_v1  ;;  %vm1428_vm6 = vcmp.ne.s32.totalorder %v1360_v23, 0 }
 0x284   :  { %2820 = vst.msk [vmem:[#allocation3 + $0x80] sm:$0xff] %vm2803_vm7, %v2632_v62 }
 0x285   :  { %v8682_v25 = vpop.permute.xlu1 %3515  ;;  %3545 = vrot.lane.b32.xlu0 %v2018_v59, %s6795_s13  ;;  %v1358_v62 = vand.u32 15, %v1290_v30  ;;  %v1267_v59 = vadd.s32 232, %v7430_v40  ;;  %v8707_v30 = vsel %vm1428_vm6, 1.0, %v10595_v57 }
 0x286   :  { %v8696_v37 = vld [vmem:[#allocation2 + $0x1b7] sm:$0xff]  ;;  %v2922_v60 = vld [vmem:[#allocation2 + $0x1af] sm:$0xff]  ;;  %v8704_v1 = vld [vmem:[#allocation2 + $0x1a7] sm:$0xff]  ;;  %10704 = vst [vmem:[#allocation46_spill] sm:$0xff] %v8707_v30 }
 0x287   :  { %2653 = vrot.lane.b32.xlu1 %v2490_v35, %s6793_s11  ;;  %v2628_v24 = vpop.permute.xlu0 %2627  ;;  %vm1426_vm3 = vcmp.ne.s32.totalorder %v1358_v62, 0  ;;  %1971 = vst.msk [vmem:[#allocation3 + $0x1a8] sm:$0xff] %vm82_vm1, %v8696_v37  ;;  %v8713_v10 = vmul.f32 %v8624_v8, %v2922_v60  ;;  %1969 = vst.msk [vmem:[#allocation3 + $0x198] sm:$0xff] %vm82_vm1, %v8704_v1  ;;  %v1335_v23 = vand.u32 15, %v1267_v59  ;;  %v2427_v8 = vld [vmem:[#allocation2 + $0x111] sm:$0xff] }
 0x288   :  { %2818 = vst.msk [vmem:[#allocation3 + $0x70] sm:$0xff] %vm2803_vm7, %v2628_v24  ;;  %v8699_v50 = vsel %vm1426_vm3, 1.0, %v10595_v57 }
 0x289   :  { %v2153_v36 = vpop.permute.xlu1 %2152  ;;  %2182 = vrot.lane.b32.xlu0 %v2016_v49, %s6792_s8  ;;  %10703 = vst [vmem:[#allocation45_spill] sm:$0xff] %v8699_v50  ;;  %v1902_v62 = vmul.f32 %v8699_v50, %v2922_v60  ;;  %vm1607_vm4 = vcmp.ne.s32.totalorder %v1335_v23, 15  ;;  %v2425_v60 = vld [vmem:[#allocation2 + $0x101] sm:$0xff] }
 0x28a   :  { %2342 = vst.msk [vmem:[#allocation3 + $0x78] sm:$0xff] %vm2326_vm5, %v2153_v36  ;;  %v2924_v24 = vld [vmem:[#allocation2 + $0x1bf] sm:$0xff] }
 0x28b   :  { %2188 = vrot.lane.b32.xlu1 %v2019_v38, %s6792_s8  ;;  %v3101_v35 = vpop.permute.xlu0 %3100  ;;  %1970 = vst.msk [vmem:[#allocation3 + $0x1a0] sm:$0xff] %vm82_vm1, %v1902_v62  ;;  %v8736_v62 = vsel %vm1607_vm4, 1.0, %v10595_v57 }
 0x28c   :  { %3293 = vst.msk [vmem:[#allocation3 + $0x60] sm:$0xff] %vm3280_vm8, %v3101_v35  ;;  %v8721_v35 = vmul.f32 %v8699_v50, %v2924_v24  ;;  %10705 = vst [vmem:[#allocation47_spill] sm:$0xff] %v8736_v62 }
 0x28d   :  { %v2626_v36 = vpop.permute.xlu1 %2625  ;;  %3702 = vst.msk [vmem:[#allocation3 + $0x60] sm:$0xff] %vm3689_vm9, %v3510_v47  ;;  %3541 = vrot.lane.b32.xlu0 %v2016_v49, %s6795_s13  ;;  %v1904_v47 = vmul.f32 %v8707_v30, %v2924_v24  ;;  %v2017_v24 = vld [vmem:[#allocation2 + $0x108] sm:$0xff] }
 0x28e   :  { %2817 = vst.msk [vmem:[#allocation3 + $0x68] sm:$0xff] %vm2803_vm7, %v2626_v36 }
 0x28f   :  { %3138 = vrot.lane.b32.xlu1 %v8389_v9, %s6794_s12  ;;  %v3105_v36 = vpop.permute.xlu0 %3104  ;;  %1972 = vst.msk [vmem:[#allocation3 + $0x1b0] sm:$0xff] %vm82_vm1, %v1904_v47 }
 0x290   :  { %3295 = vst.msk [vmem:[#allocation3 + $0x70] sm:$0xff] %vm3280_vm8, %v3105_v36  ;;  %v2904_v36 = vld [vmem:[#allocation2 + $0x11f] sm:$0xff] }
 0x291   :  { %v3103_v49 = vpop.permute.xlu1 %3102  ;;  %3704 = vst.msk [vmem:[#allocation3 + $0x70] sm:$0xff] %vm3689_vm9, %v8658_v45  ;;  %2663 = vrot.lane.b32.xlu0 %v2427_v8, %s6793_s11  ;;  %v2424_v45 = vld [vmem:[#allocation2 + $0xf9] sm:$0xff]  ;;  %v1271_v8 = vadd.s32 264, %v7430_v40 }
 0x292   :  { %3294 = vst.msk [vmem:[#allocation3 + $0x68] sm:$0xff] %vm3280_vm8, %v3103_v49  ;;  %v2492_v47 = vmul.f32 %v8736_v62, %v2424_v45  ;;  %v6656_v45 = vpop.f32.mrb[50].mxu0 }
 0x293   :  { %3547 = vrot.lane.b32.xlu1 %v2019_v38, %s6795_s13  ;;  %v2163_v9 = vpop.permute.xlu0 %2162  ;;  %v1339_v49 = vand.u32 15, %v1271_v8  ;;  %vm1020_vm14 = vcmp.gt.f32.partialorder %v6656_v45, 0.0 }
 0x294   :  { %2347 = vst.msk [vmem:[#allocation3 + $0xa0] sm:$0xff] %vm2326_vm5, %v2163_v9  ;;  %v1269_v9 = vadd.s32 248, %v7430_v40 }
 0x295   :  { %v3512_v59 = vpop.permute.xlu1 %3511  ;;  %2659 = vrot.lane.b32.xlu0 %v2425_v60, %s6793_s11  ;;  %v2972_v60 = vmul.f32 %v8392_v6, %v2904_v36  ;;  %vm1611_vm10 = vcmp.ne.s32.totalorder %v1339_v49, 15 }
 0x296   :  { %3703 = vst.msk [vmem:[#allocation3 + $0x68] sm:$0xff] %vm3689_vm9, %v3512_v59  ;;  %v1337_v8 = vand.u32 15, %v1269_v9  ;;  %v2026_v9 = vld [vmem:[#allocation2 + $0x150] sm:$0xff] }
 0x297   :  { %2184 = vrot.lane.b32.xlu1 %v2017_v24, %s6792_s8  ;;  %v8740_v38 = vpop.permute.xlu0 %3521 }
 0x298   :  { %vm1609_vm13 = vcmp.ne.s32.totalorder %v1337_v8, 15  ;;  %v2426_v8 = vld [vmem:[#allocation2 + $0x109] sm:$0xff] }
 0x299   :  { %v2630_v23 = vpop.permute.xlu1 %2629  ;;  %3132 = vrot.lane.b32.xlu0 %v8330_v2, %s6794_s12  ;;  %v1084_v2 = vmul.f32 0.01, %v6656_v45 }
 0x29a   :  { %2819 = vst.msk [vmem:[#allocation3 + $0x78] sm:$0xff] %vm2803_vm7, %v2630_v23 }
 0x29b   :  { %3296 = vst.msk [vmem:[#allocation3 + $0x78] sm:$0xff] %vm3280_vm8, %v8675_v7  ;;  %2657 = vrot.lane.b32.xlu1 %v2492_v47, %s6793_s11  ;;  %v2159_v59 = vpop.permute.xlu0 %2158  ;;  %v909_v7 = vpop.f32.mrb[51].mxu0 }
 0x29c   :  { %3705 = vst.msk [vmem:[#allocation3 + $0x78] sm:$0xff] %vm3689_vm9, %v8682_v25  ;;  %v1148_v25 = vsel %vm1020_vm14, %v6656_v45, %v1084_v2  ;;  %vm1018_vm11 = vcmp.gt.f32.partialorder %v909_v7, 0.0  ;;  %v1082_v36 = vmul.f32 0.01, %v909_v7 }
 0x29d   :  { %2345 = vst.msk [vmem:[#allocation3 + $0x90] sm:$0xff] %vm2326_vm5, %v2159_v59  ;;  %v2165_v23 = vpop.permute.xlu1 %2164  ;;  %3140 = vrot.lane.b32.xlu0 %v2972_v60, %s6794_s12  ;;  %v8764_v60 = vsel %vm1611_vm10, 1.0, %v10595_v57 }
 0x29e   :  { %2348 = vst.msk [vmem:[#allocation3 + $0xa8] sm:$0xff] %vm2326_vm5, %v2165_v23  ;;  %10706 = vst [vmem:[#allocation48_spill] sm:$0xff] %v8764_v60  ;;  %v2428_v23 = vld [vmem:[#allocation2 + $0x119] sm:$0xff]  ;;  %v1146_v6 = vsel %vm1018_vm11, %v909_v7, %v1082_v36 }
 0x29f   :  { %3134 = vrot.lane.b32.xlu1 %v8396_v58, %s6794_s12  ;;  %v3518_v47 = vpop.permute.xlu0 %3517  ;;  %1224 = vst.msk [vmem:[#allocation2 + $0x1d8] sm:$0xff] %vm82_vm1, %v1148_v25  ;;  %1222 = vst.msk [vmem:[#allocation2 + $0x1c8] sm:$0xff] %vm82_vm1, %v1146_v6  ;;  %v2496_v26 = vmul.f32 %v8764_v60, %v2428_v23  ;;  %v1294_v6 = vadd.s32 448, %v7430_v40 }
 0x2a1   :  { %v8759_v59 = vpop.permute.xlu1 %3114  ;;  %3136 = vrot.lane.b32.xlu0 %v8400_v54, %s6794_s12 }
 0x2a2   :  { %v6659_v50 = vpop.f32.mrb[52].mxu0 }
 0x2a3   :  { %vm1023_vm12 = vcmp.gt.f32.partialorder %v6659_v50, 0.0  ;;  %v1087_v58 = vmul.f32 0.01, %v6659_v50  ;;  %v922_v49 = vpop.f32.mrb[53].mxu0  ;;  %3543 = vrot.lane.b32.xlu1 %v2017_v24, %s6795_s13  ;;  %v2640_v2 = vpop.permute.xlu0 %2639  ;;  %v8775_v24 = vsel %vm1609_vm13, 1.0, %v10595_v57 }
 0x2a4   :  { %vm1021_vm15 = vcmp.gt.f32.partialorder %v922_v49, 0.0  ;;  %v1085_v45 = vmul.f32 0.01, %v922_v49  ;;  %2824 = vst.msk [vmem:[#allocation3 + $0xa0] sm:$0xff] %vm2803_vm7, %v2640_v2  ;;  %10707 = vst [vmem:[#allocation49_spill] sm:$0xff] %v8775_v24 }
 0x2a5   :  { %v1151_v25 = vsel %vm1023_vm12, %v6659_v50, %v1087_v58  ;;  %v8769_v54 = vpop.permute.xlu1 %3523  ;;  %2202 = vrot.lane.b32.xlu0 %v2026_v9, %s6792_s8  ;;  %v1296_v50 = vadd.s32 464, %v7430_v40  ;;  %v1362_v58 = vand.u32 15, %v1294_v6  ;;  %v2024_v6 = vld [vmem:[#allocation2 + $0x140] sm:$0xff] }
 0x2a6   :  { %1227 = vst.msk [vmem:[#allocation2 + $0x1f0] sm:$0xff] %vm82_vm1, %v1151_v25  ;;  %v1149_v7 = vsel %vm1021_vm15, %v922_v49, %v1085_v45  ;;  %v2494_v45 = vmul.f32 %v8775_v24, %v2426_v8  ;;  %v8786_v2 = vld [vmem:[#allocation2 + $0x1d7] sm:$0xff] }
 0x2a7   :  { %1225 = vst.msk [vmem:[#allocation2 + $0x1e0] sm:$0xff] %vm82_vm1, %v1149_v7  ;;  %2665 = vrot.lane.b32.xlu1 %v2496_v26, %s6793_s11  ;;  %v2636_v36 = vpop.permute.xlu0 %2635  ;;  %v1364_v23 = vand.u32 15, %v1296_v50  ;;  %vm1430_vm2 = vcmp.ne.s32.totalorder %v1362_v58, 0  ;;  %v2926_v7 = vld [vmem:[#allocation2 + $0x1cf] sm:$0xff]  ;;  %1975 = vst.msk [vmem:[#allocation3 + $0x1c8] sm:$0xff] %vm82_vm1, %v8786_v2  ;;  %v8797_v50 = vld [vmem:[#allocation2 + $0x1c7] sm:$0xff] }
 0x2a8   :  { %2822 = vst.msk [vmem:[#allocation3 + $0x90] sm:$0xff] %vm2803_vm7, %v2636_v36  ;;  %v8789_v26 = vsel %vm1430_vm2, 1.0, %v10595_v57 }
 0x2a9   :  { %v2161_v49 = vpop.permute.xlu1 %2160  ;;  %3561 = vrot.lane.b32.xlu0 %v2026_v9, %s6795_s13  ;;  %vm1432_vm3 = vcmp.ne.s32.totalorder %v1364_v23, 0  ;;  %10708 = vst [vmem:[#allocation50_spill] sm:$0xff] %v8789_v26  ;;  %v8795_v9 = vmul.f32 %v8707_v30, %v2926_v7  ;;  %v1906_v23 = vmul.f32 %v8789_v26, %v2926_v7  ;;  %1973 = vst.msk [vmem:[#allocation3 + $0x1b8] sm:$0xff] %vm82_vm1, %v8797_v50  ;;  %v2435_v30 = vld [vmem:[#allocation2 + $0x151] sm:$0xff] }
 0x2aa   :  { %2346 = vst.msk [vmem:[#allocation3 + $0x98] sm:$0xff] %vm2326_vm5, %v2161_v49  ;;  %v8800_v58 = vsel %vm1432_vm3, 1.0, %v10595_v57  ;;  %v2027_v49 = vld [vmem:[#allocation2 + $0x158] sm:$0xff] }
 0x2ab   :  { %2661 = vrot.lane.b32.xlu1 %v2494_v45, %s6793_s11  ;;  %v3109_v25 = vpop.permute.xlu0 %3108  ;;  %10709 = vst [vmem:[#allocation51_spill] sm:$0xff] %v8800_v58  ;;  %v1275_v45 = vadd.s32 296, %v7430_v40  ;;  %1974 = vst.msk [vmem:[#allocation3 + $0x1c0] sm:$0xff] %vm82_vm1, %v1906_v23 }
 0x2ac   :  { %3297 = vst.msk [vmem:[#allocation3 + $0x80] sm:$0xff] %vm3280_vm8, %v3109_v25 }
 0x2ad   :  { %v2634_v8 = vpop.permute.xlu1 %2633  ;;  %3706 = vst.msk [vmem:[#allocation3 + $0x80] sm:$0xff] %vm3689_vm9, %v3518_v47  ;;  %2198 = vrot.lane.b32.xlu0 %v2024_v6, %s6792_s8 }
 0x2ae   :  { %v2928_v36 = vld [vmem:[#allocation2 + $0x1df] sm:$0xff]  ;;  %2821 = vst.msk [vmem:[#allocation3 + $0x88] sm:$0xff] %vm2803_vm7, %v2634_v8 }
 0x2af   :  { %v8808_v25 = vmul.f32 %v8789_v26, %v2928_v36  ;;  %2204 = vrot.lane.b32.xlu1 %v2027_v49, %s6792_s8  ;;  %v3113_v7 = vpop.permute.xlu0 %3112  ;;  %v1908_v47 = vmul.f32 %v8800_v58, %v2928_v36  ;;  %v1343_v26 = vand.u32 15, %v1275_v45  ;;  %v2433_v45 = vld [vmem:[#allocation2 + $0x141] sm:$0xff] }
 0x2b0   :  { %3299 = vst.msk [vmem:[#allocation3 + $0x90] sm:$0xff] %vm3280_vm8, %v3113_v7 }
 0x2b1   :  { %v3111_v8 = vpop.permute.xlu1 %3110  ;;  %3708 = vst.msk [vmem:[#allocation3 + $0x90] sm:$0xff] %vm3689_vm9, %v8740_v38  ;;  %3557 = vrot.lane.b32.xlu0 %v2024_v6, %s6795_s13  ;;  %vm1615_vm6 = vcmp.ne.s32.totalorder %v1343_v26, 15  ;;  %v1277_v26 = vadd.s32 312, %v7430_v40 }
 0x2b2   :  { %3298 = vst.msk [vmem:[#allocation3 + $0x88] sm:$0xff] %vm3280_vm8, %v3111_v8  ;;  %v8830_v7 = vsel %vm1615_vm6, 1.0, %v10595_v57  ;;  %v2432_v8 = vld [vmem:[#allocation2 + $0x139] sm:$0xff] }
 0x2b3   :  { %1976 = vst.msk [vmem:[#allocation3 + $0x1d0] sm:$0xff] %vm82_vm1, %v1908_v47  ;;  %3154 = vrot.lane.b32.xlu1 %v8456_v53, %s6794_s12  ;;  %v2171_v23 = vpop.permute.xlu0 %2170  ;;  %10710 = vst [vmem:[#allocation52_spill] sm:$0xff] %v8830_v7  ;;  %v6660_v53 = vpop.f32.mrb[54].mxu0  ;;  %v2025_v47 = vld [vmem:[#allocation2 + $0x148] sm:$0xff]  ;;  %v2500_v4 = vmul.f32 %v8830_v7, %v2432_v8 }
 0x2b4   :  { %2351 = vst.msk [vmem:[#allocation3 + $0xc0] sm:$0xff] %vm2326_vm5, %v2171_v23  ;;  %vm1024_vm4 = vcmp.gt.f32.partialorder %v6660_v53, 0.0  ;;  %v1088_v23 = vmul.f32 0.01, %v6660_v53 }
 0x2b5   :  { %v3520_v36 = vpop.permute.xlu1 %3519  ;;  %2679 = vrot.lane.b32.xlu0 %v2435_v30, %s6793_s11  ;;  %v925_v30 = vpop.f32.mrb[55].mxu0 }
 0x2b6   :  { %3707 = vst.msk [vmem:[#allocation3 + $0x88] sm:$0xff] %vm3689_vm9, %v3520_v36  ;;  %vm1022_vm14 = vcmp.gt.f32.partialorder %v925_v30, 0.0  ;;  %v1152_v14 = vsel %vm1024_vm4, %v6660_v53, %v1088_v23 }
 0x2b7   :  { %3563 = vrot.lane.b32.xlu1 %v2027_v49, %s6795_s13  ;;  %v8827_v38 = vpop.permute.xlu0 %3529  ;;  %v1086_v49 = vmul.f32 0.01, %v925_v30  ;;  %1228 = vst.msk [vmem:[#allocation2 + $0x1f8] sm:$0xff] %vm82_vm1, %v1152_v14  ;;  %v1295_v14 = vadd.s32 456, %v7430_v40 }
 0x2b9   :  { %v2638_v6 = vpop.permute.xlu1 %2637  ;;  %2675 = vrot.lane.b32.xlu0 %v2433_v45, %s6793_s11  ;;  %v2976_v45 = vmul.f32 %v7709_v31, %v8467_v52  ;;  %v1150_v3 = vsel %vm1022_vm14, %v925_v30, %v1086_v49  ;;  %v1297_v30 = vadd.s32 472, %v7430_v40 }
 0x2ba   :  { %2823 = vst.msk [vmem:[#allocation3 + $0x98] sm:$0xff] %vm2803_vm7, %v2638_v6  ;;  %v6663_v36 = vpop.f32.mrb[56].mxu0 }
 0x2bb   :  { %3300 = vst.msk [vmem:[#allocation3 + $0x98] sm:$0xff] %vm3280_vm8, %v8759_v59  ;;  %2200 = vrot.lane.b32.xlu1 %v2025_v47, %s6792_s8  ;;  %v2167_v6 = vpop.permute.xlu0 %2166  ;;  %vm1027_vm10 = vcmp.gt.f32.partialorder %v6663_v36, 0.0  ;;  %v1091_v11 = vmul.f32 0.01, %v6663_v36  ;;  %v938_v15 = vpop.f32.mrb[57].mxu0 }
 0x2bc   :  { %3709 = vst.msk [vmem:[#allocation3 + $0x98] sm:$0xff] %vm3689_vm9, %v8769_v54  ;;  %vm1025_vm11 = vcmp.gt.f32.partialorder %v938_v15, 0.0  ;;  %v1089_v21 = vmul.f32 0.01, %v938_v15  ;;  %v1345_v54 = vand.u32 15, %v1277_v26  ;;  %v1365_v26 = vand.u32 15, %v1297_v30 }
 0x2bd   :  { %2349 = vst.msk [vmem:[#allocation3 + $0xb0] sm:$0xff] %vm2326_vm5, %v2167_v6  ;;  %v2173_v59 = vpop.permute.xlu1 %2172  ;;  %3148 = vrot.lane.b32.xlu0 %v2976_v45, %s6794_s12  ;;  %v1155_v52 = vsel %vm1027_vm10, %v6663_v36, %v1091_v11  ;;  %v1363_v11 = vand.u32 15, %v1295_v14  ;;  %v2434_v45 = vld [vmem:[#allocation2 + $0x149] sm:$0xff] }
 0x2be   :  { %2352 = vst.msk [vmem:[#allocation3 + $0xc8] sm:$0xff] %vm2326_vm5, %v2173_v59  ;;  %v1153_v53 = vsel %vm1025_vm11, %v938_v15, %v1089_v21  ;;  %v2030_v21 = vld [vmem:[#allocation2 + $0x170] sm:$0xff]  ;;  %vm1617_vm12 = vcmp.ne.s32.totalorder %v1345_v54, 15  ;;  %vm1637_vm13 = vcmp.ne.s32.totalorder %v1365_v26, 15 }
 0x2bf   :  { %1226 = vst.msk [vmem:[#allocation2 + $0x1e8] sm:$0xff] %vm82_vm1, %v1150_v3  ;;  %2673 = vrot.lane.b32.xlu1 %v2500_v4, %s6793_s11  ;;  %1231 = vst.msk [vmem:[#allocation2 + $0x210] sm:$0xff] %vm82_vm1, %v1155_v52  ;;  %v3526_v23 = vpop.permute.xlu0 %3525  ;;  %v1298_v3 = vadd.s32 480, %v7430_v40  ;;  %v1300_v4 = vadd.s32 496, %v7430_v40  ;;  %v8872_v52 = vld [vmem:[#allocation2 + $0x1f7] sm:$0xff]  ;;  %vm8874_vm3 = vcmp.ne.s32.totalorder %v1363_v11, 15 }
 0x2c0   :  { %1229 = vst.msk [vmem:[#allocation2 + $0x200] sm:$0xff] %vm82_vm1, %v1153_v53  ;;  %1979 = vst.msk [vmem:[#allocation3 + $0x1e8] sm:$0xff] %vm82_vm1, %v8872_v52  ;;  %v1279_v53 = vadd.s32 328, %v7430_v40 }
 0x2c1   :  { %v8852_v8 = vpop.permute.xlu1 %3122  ;;  %3152 = vrot.lane.b32.xlu0 %v8476_v39, %s6794_s12  ;;  %v1366_v49 = vand.u32 15, %v1298_v3  ;;  %v1368_v36 = vand.u32 15, %v1300_v4  ;;  %v8866_v39 = vsel %vm1617_vm12, 1.0, %v10595_v57  ;;  %v8886_v4 = vsel %vm1637_vm13, 1.0, %v10595_v57 }
 0x2c2   :  { %10711 = vst [vmem:[#allocation53_spill] sm:$0xff] %v8866_v39  ;;  %v2502_v30 = vmul.f32 %v8866_v39, %v2434_v45  ;;  %v8908_v45 = vsel %vm8874_vm3, 1.0, %v10595_v57  ;;  %v2028_v39 = vld [vmem:[#allocation2 + $0x160] sm:$0xff] }
 0x2c3   :  { %3150 = vrot.lane.b32.xlu1 %v8478_v28, %s6794_s12  ;;  %v2648_v15 = vpop.permute.xlu0 %2647  ;;  %vm1434_vm15 = vcmp.ne.s32.totalorder %v1366_v49, 0  ;;  %vm1436_vm2 = vcmp.ne.s32.totalorder %v1368_v36, 0 }
 0x2c4   :  { %2828 = vst.msk [vmem:[#allocation3 + $0xc0] sm:$0xff] %vm2803_vm7, %v2648_v15  ;;  %v8870_v28 = vsel %vm1434_vm15, 1.0, %v10595_v57  ;;  %v8891_v11 = vsel %vm1436_vm2, 1.0, %v10595_v57 }
 0x2c5   :  { %v8862_v6 = vpop.permute.xlu1 %3531  ;;  %2210 = vrot.lane.b32.xlu0 %v2030_v21, %s6792_s8  ;;  %10712 = vst [vmem:[#allocation54_spill] sm:$0xff] %v8870_v28  ;;  %10715 = vst [vmem:[#allocation55_spill] sm:$0xff] %v8891_v11 }
 0x2c6   :  { %v2930_v54 = vld [vmem:[#allocation2 + $0x1ef] sm:$0xff] }
 0x2c7   :  { %3559 = vrot.lane.b32.xlu1 %v2025_v47, %s6795_s13  ;;  %v2644_v59 = vpop.permute.xlu0 %2643  ;;  %v8881_v3 = vmul.f32 %v8800_v58, %v2930_v54  ;;  %v8883_v47 = vld [vmem:[#allocation2 + $0x1e7] sm:$0xff]  ;;  %v2932_v26 = vld [vmem:[#allocation2 + $0x1ff] sm:$0xff] }
 0x2c8   :  { %2826 = vst.msk [vmem:[#allocation3 + $0xb0] sm:$0xff] %vm2803_vm7, %v2644_v59  ;;  %v8888_v15 = vld [vmem:[#allocation2 + $0x1e9] sm:$0xff]  ;;  %v8898_v49 = vmul.f32 %v8870_v28, %v2932_v26  ;;  %v8900_v36 = vld [vmem:[#allocation2 + $0x1f9] sm:$0xff] }
 0x2c9   :  { %v2169_v14 = vpop.permute.xlu1 %2168  ;;  %3569 = vrot.lane.b32.xlu0 %v2030_v21, %s6795_s13  ;;  %1977 = vst.msk [vmem:[#allocation3 + $0x1d8] sm:$0xff] %vm82_vm1, %v8883_v47  ;;  %v1912_v21 = vmul.f32 %v8891_v11, %v2932_v26  ;;  %v8914_v58 = vmul.f32 %v8908_v45, %v8888_v15  ;;  %v8918_v31 = vmul.f32 %v8886_v4, %v8900_v36 }
 0x2ca   :  { %2350 = vst.msk [vmem:[#allocation3 + $0xb8] sm:$0xff] %vm2326_vm5, %v2169_v14  ;;  %v1910_v14 = vmul.f32 %v8870_v28, %v2930_v54  ;;  %v2031_v54 = vld [vmem:[#allocation2 + $0x178] sm:$0xff]  ;;  %v6664_v28 = vpop.f32.mrb[58].mxu0 }
 0x2cb   :  { %2677 = vrot.lane.b32.xlu1 %v2502_v30, %s6793_s11  ;;  %v3117_v59 = vpop.permute.xlu0 %3116  ;;  %10716 = vst [vmem:[#allocation56_spill] sm:$0xff] %v8914_v58  ;;  %10717 = vst [vmem:[#allocation57_spill] sm:$0xff] %v8918_v31  ;;  %vm1028_vm6 = vcmp.gt.f32.partialorder %v6664_v28, 0.0 }
 0x2cc   :  { %3301 = vst.msk [vmem:[#allocation3 + $0xa0] sm:$0xff] %vm3280_vm8, %v3117_v59 }
 0x2cd   :  { %v2642_v30 = vpop.permute.xlu1 %2641  ;;  %3710 = vst.msk [vmem:[#allocation3 + $0xa0] sm:$0xff] %vm3689_vm9, %v3526_v23  ;;  %2206 = vrot.lane.b32.xlu0 %v2028_v39, %s6792_s8  ;;  %v1092_v23 = vmul.f32 0.01, %v6664_v28 }
 0x2ce   :  { %2825 = vst.msk [vmem:[#allocation3 + $0xa8] sm:$0xff] %vm2803_vm7, %v2642_v30 }
 0x2cf   :  { %1978 = vst.msk [vmem:[#allocation3 + $0x1e0] sm:$0xff] %vm82_vm1, %v1910_v14  ;;  %1980 = vst.msk [vmem:[#allocation3 + $0x1f0] sm:$0xff] %vm82_vm1, %v1912_v21  ;;  %2212 = vrot.lane.b32.xlu1 %v2031_v54, %s6792_s8  ;;  %v3121_v26 = vpop.permute.xlu0 %3120  ;;  %v941_v14 = vpop.f32.mrb[59].mxu0  ;;  %v1347_v21 = vand.u32 15, %v1279_v53  ;;  %v1156_v58 = vsel %vm1028_vm6, %v6664_v28, %v1092_v23 }
 0x2d0   :  { %3303 = vst.msk [vmem:[#allocation3 + $0xb0] sm:$0xff] %vm3280_vm8, %v3121_v26  ;;  %vm1026_vm4 = vcmp.gt.f32.partialorder %v941_v14, 0.0  ;;  %v1090_v30 = vmul.f32 0.01, %v941_v14  ;;  %v6667_v31 = vpop.f32.mrb[60].mxu0 }
 0x2d1   :  { %v3119_v59 = vpop.permute.xlu1 %3118  ;;  %3712 = vst.msk [vmem:[#allocation3 + $0xb0] sm:$0xff] %vm3689_vm9, %v8827_v38  ;;  %3565 = vrot.lane.b32.xlu0 %v2028_v39, %s6795_s13  ;;  %vm1031_vm14 = vcmp.gt.f32.partialorder %v6667_v31, 0.0  ;;  %v1095_v7 = vmul.f32 0.01, %v6667_v31  ;;  %v954_v60 = vpop.f32.mrb[61].mxu0  ;;  %vm1619_vm11 = vcmp.ne.s32.totalorder %v1347_v21, 15 }
 0x2d2   :  { %3302 = vst.msk [vmem:[#allocation3 + $0xa8] sm:$0xff] %vm3280_vm8, %v3119_v59  ;;  %v2439_v59 = vld [vmem:[#allocation2 + $0x171] sm:$0xff]  ;;  %v1154_v39 = vsel %vm1026_vm4, %v941_v14, %v1090_v30  ;;  %vm1029_vm10 = vcmp.gt.f32.partialorder %v954_v60, 0.0  ;;  %v1093_v24 = vmul.f32 0.01, %v954_v60  ;;  %v2437_v14 = vld [vmem:[#allocation2 + $0x161] sm:$0xff] }
 0x2d3   :  { %3162 = vrot.lane.b32.xlu1 %v8541_v42, %s6794_s12  ;;  %v2179_v26 = vpop.permute.xlu0 %2178  ;;  %1232 = vst.msk [vmem:[#allocation2 + $0x218] sm:$0xff] %vm82_vm1, %v1156_v58  ;;  %1230 = vst.msk [vmem:[#allocation2 + $0x208] sm:$0xff] %vm82_vm1, %v1154_v39  ;;  %v1159_v42 = vsel %vm1031_vm14, %v6667_v31, %v1095_v7  ;;  %v1299_v58 = vadd.s32 488, %v7430_v40  ;;  %v2029_v30 = vld [vmem:[#allocation2 + $0x168] sm:$0xff]  ;;  %v8949_v31 = vsel %vm1619_vm11, 1.0, %v10595_v57  ;;  %v2436_v7 = vld [vmem:[#allocation2 + $0x159] sm:$0xff] }
 0x2d4   :  { %2355 = vst.msk [vmem:[#allocation3 + $0xe0] sm:$0xff] %vm2326_vm5, %v2179_v26  ;;  %v1157_v28 = vsel %vm1029_vm10, %v954_v60, %v1093_v24  ;;  %10718 = vst [vmem:[#allocation58_spill] sm:$0xff] %v8949_v31  ;;  %v1302_v60 = vadd.s32 512, %v7430_v40  ;;  %v1304_v24 = vadd.s32 528, %v7430_v40  ;;  %v1281_v21 = vadd.s32 344, %v7430_v40 }
 0x2d5   :  { %v3528_v38 = vpop.permute.xlu1 %3527  ;;  %2687 = vrot.lane.b32.xlu0 %v2439_v59, %s6793_s11  ;;  %1235 = vst.msk [vmem:[#allocation2 + $0x230] sm:$0xff] %vm82_vm1, %v1159_v42  ;;  %1233 = vst.msk [vmem:[#allocation2 + $0x220] sm:$0xff] %vm82_vm1, %v1157_v28 }
 0x2d6   :  { %3711 = vst.msk [vmem:[#allocation3 + $0xa8] sm:$0xff] %vm3689_vm9, %v3528_v38  ;;  %v1367_v38 = vand.u32 15, %v1299_v58  ;;  %v1370_v39 = vand.u32 15, %v1302_v60  ;;  %v1372_v42 = vand.u32 15, %v1304_v24 }
 0x2d7   :  { %3571 = vrot.lane.b32.xlu1 %v2031_v54, %s6795_s13  ;;  %v8942_v53 = vpop.permute.xlu0 %3537  ;;  %v1301_v54 = vadd.s32 504, %v7430_v40 }
 0x2d8   :  { %vm1438_vm13 = vcmp.ne.s32.totalorder %v1370_v39, 0  ;;  %vm1440_vm15 = vcmp.ne.s32.totalorder %v1372_v42, 0  ;;  %vm8971_vm2 = vcmp.ne.s32.totalorder %v1367_v38, 15 }
 0x2d9   :  { %v2646_v23 = vpop.permute.xlu1 %2645  ;;  %2683 = vrot.lane.b32.xlu0 %v2437_v14, %s6793_s11  ;;  %v1369_v59 = vand.u32 15, %v1301_v54  ;;  %v8988_v39 = vsel %vm1440_vm15, 1.0, %v10595_v57 }
 0x2da   :  { %2827 = vst.msk [vmem:[#allocation3 + $0xb8] sm:$0xff] %vm2803_vm7, %v2646_v23  ;;  %v2504_v23 = vmul.f32 %v8949_v31, %v2436_v7  ;;  %v8969_v14 = vld [vmem:[#allocation2 + $0x217] sm:$0xff]  ;;  %v2934_v54 = vld [vmem:[#allocation2 + $0x20f] sm:$0xff]  ;;  %v8980_v24 = vld [vmem:[#allocation2 + $0x207] sm:$0xff] }
 0x2db   :  { %3304 = vst.msk [vmem:[#allocation3 + $0xb8] sm:$0xff] %vm3280_vm8, %v8852_v8  ;;  %2208 = vrot.lane.b32.xlu1 %v2029_v30, %s6792_s8  ;;  %v2175_v26 = vpop.permute.xlu0 %2174  ;;  %vm1641_vm12 = vcmp.ne.s32.totalorder %v1369_v59, 15  ;;  %v1349_v8 = vand.u32 15, %v1281_v21 }
 0x2dc   :  { %3713 = vst.msk [vmem:[#allocation3 + $0xb8] sm:$0xff] %vm3689_vm9, %v8862_v6  ;;  %v8967_v6 = vsel %vm1438_vm13, 1.0, %v10595_v57  ;;  %v8983_v21 = vsel %vm1641_vm12, 1.0, %v10595_v57  ;;  %v2936_v59 = vld [vmem:[#allocation2 + $0x21f] sm:$0xff] }
 0x2dd   :  { %2353 = vst.msk [vmem:[#allocation3 + $0xd0] sm:$0xff] %vm2326_vm5, %v2175_v26  ;;  %v2181_v28 = vpop.permute.xlu1 %2180  ;;  %3156 = vrot.lane.b32.xlu0 %v8484_v19, %s6794_s12  ;;  %10719 = vst [vmem:[#allocation59_spill] sm:$0xff] %v8967_v6  ;;  %v8978_v19 = vmul.f32 %v8891_v11, %v2934_v54  ;;  %v8985_v26 = vld [vmem:[#allocation2 + $0x209] sm:$0xff]  ;;  %v8995_v38 = vmul.f32 %v8967_v6, %v2936_v59  ;;  %v8997_v42 = vld [vmem:[#allocation2 + $0x219] sm:$0xff]  ;;  %vm1621_vm3 = vcmp.ne.s32.totalorder %v1349_v8, 15 }
 0x2de   :  { %2356 = vst.msk [vmem:[#allocation3 + $0xe8] sm:$0xff] %vm2326_vm5, %v2181_v28  ;;  %v2034_v28 = vld [vmem:[#allocation2 + $0x190] sm:$0xff]  ;;  %v1916_v31 = vmul.f32 %v8988_v39, %v2936_v59  ;;  %v9016_v32 = vmul.f32 %v8983_v21, %v8997_v42  ;;  %v9023_v8 = vsel %vm1621_vm3, 1.0, %v10595_v57  ;;  %vm6326_vm3 = vcmask 64512  }
 0x2df   :  { %2681 = vrot.lane.b32.xlu1 %v2504_v23, %s6793_s11  ;;  %v3534_v58 = vpop.permute.xlu0 %3533  ;;  %1983 = vst.msk [vmem:[#allocation3 + $0x208] sm:$0xff] %vm82_vm1, %v8969_v14  ;;  %1981 = vst.msk [vmem:[#allocation3 + $0x1f8] sm:$0xff] %vm82_vm1, %v8980_v24  ;;  %v9006_v23 = vsel %vm8971_vm2, 1.0, %v10595_v57 }
 0x2e0   :  { %v9012_v62 = vmul.f32 %v9006_v23, %v8985_v26  ;;  %10723 = vst [vmem:[#allocation61_spill] sm:$0xff] %v9016_v32  ;;  %1984 = vst.msk [vmem:[#allocation3 + $0x210] sm:$0xff] %vm82_vm1, %v1916_v31 }
 0x2e1   :  { %v8975_v60 = vpop.permute.xlu1 %3130  ;;  %3160 = vrot.lane.b32.xlu0 %v8558_v29, %s6794_s12  ;;  %v1914_v29 = vmul.f32 %v8967_v6, %v2934_v54  ;;  %v2438_v54 = vld [vmem:[#allocation2 + $0x169] sm:$0xff]  ;;  %v6668_v6 = vpop.f32.mrb[62].mxu0 }
 0x2e2   :  { %10722 = vst [vmem:[#allocation60_spill] sm:$0xff] %v9012_v62  ;;  %vm1032_vm6 = vcmp.gt.f32.partialorder %v6668_v6, 0.0  ;;  %v1096_v32 = vmul.f32 0.01, %v6668_v6  ;;  %v957_v62 = vpop.f32.mrb[63].mxu0 }
 0x2e3   :  { %3158 = vrot.lane.b32.xlu1 %v8552_v20, %s6794_s12  ;;  %v2656_v11 = vpop.permute.xlu0 %2655  ;;  %1982 = vst.msk [vmem:[#allocation3 + $0x200] sm:$0xff] %vm82_vm1, %v1914_v29  ;;  %vm1030_vm4 = vcmp.gt.f32.partialorder %v957_v62, 0.0  ;;  %v1094_v31 = vmul.f32 0.01, %v957_v62 }
 0x2e4   :  { %2832 = vst.msk [vmem:[#allocation3 + $0xe0] sm:$0xff] %vm2803_vm7, %v2656_v11  ;;  %v2506_v11 = vmul.f32 %v9023_v8, %v2438_v54 }
 0x2e5   :  { %v9019_v20 = vpop.permute.xlu1 %3539  ;;  %2218 = vrot.lane.b32.xlu0 %v2034_v28, %s6792_s8  ;;  %v1158_v54 = vsel %vm1030_vm4, %v957_v62, %v1094_v31  ;;  %v2443_v31 = vld [vmem:[#allocation2 + $0x191] sm:$0xff] }
 0x2e6   :  { %1234 = vst.msk [vmem:[#allocation2 + $0x228] sm:$0xff] %vm82_vm1, %v1158_v54  ;;  %v2440_v54 = vld [vmem:[#allocation2 + $0x179] sm:$0xff] }
 0x2e7   :  { %3567 = vrot.lane.b32.xlu1 %v2029_v30, %s6795_s13  ;;  %v2652_v7 = vpop.permute.xlu0 %2651  ;;  %v1160_v30 = vsel %vm1032_vm6, %v6668_v6, %v1096_v32  ;;  %v1283_v32 = vadd.s32 360, %v7430_v40 }
 0x2e8   :  { %2830 = vst.msk [vmem:[#allocation3 + $0xd0] sm:$0xff] %vm2803_vm7, %v2652_v7 }
 0x2e9   :  { %v2177_v59 = vpop.permute.xlu1 %2176  ;;  %3577 = vrot.lane.b32.xlu0 %v2034_v28, %s6795_s13  ;;  %1236 = vst.msk [vmem:[#allocation2 + $0x238] sm:$0xff] %vm82_vm1, %v1160_v30  ;;  %v2035_v28 = vld [vmem:[#allocation2 + $0x198] sm:$0xff]  ;;  %v1351_v62 = vand.u32 15, %v1283_v32  ;;  %v2441_v30 = vld [vmem:[#allocation2 + $0x181] sm:$0xff] }
 0x2ea   :  { %2354 = vst.msk [vmem:[#allocation3 + $0xd8] sm:$0xff] %vm2326_vm5, %v2177_v59 }
 0x2eb   :  { %2685 = vrot.lane.b32.xlu1 %v2506_v11, %s6793_s11  ;;  %v3125_v29 = vpop.permute.xlu0 %3124  ;;  %vm1623_vm14 = vcmp.ne.s32.totalorder %v1351_v62, 15 }
 0x2ec   :  { %3305 = vst.msk [vmem:[#allocation3 + $0xc0] sm:$0xff] %vm3280_vm8, %v3125_v29 }
 0x2ed   :  { %v2650_v7 = vpop.permute.xlu1 %2649  ;;  %3714 = vst.msk [vmem:[#allocation3 + $0xc0] sm:$0xff] %vm3689_vm9, %v3534_v58  ;;  %2214 = vrot.lane.b32.xlu0 %v2032_v12, %s6792_s8  ;;  %v9054_v29 = vld [vmem:[#allocation2 + $0x227] sm:$0xff] }
 0x2ee   :  { %2829 = vst.msk [vmem:[#allocation3 + $0xc8] sm:$0xff] %vm2803_vm7, %v2650_v7  ;;  %v9061_v7 = vsel %vm1623_vm14, 1.0, %v10595_v57 }
 0x2ef   :  { %2220 = vrot.lane.b32.xlu1 %v2035_v28, %s6792_s8  ;;  %v3129_v6 = vpop.permute.xlu0 %3128  ;;  %1985 = vst.msk [vmem:[#allocation3 + $0x218] sm:$0xff] %vm82_vm1, %v9054_v29 }
 0x2f0   :  { %3307 = vst.msk [vmem:[#allocation3 + $0xd0] sm:$0xff] %vm3280_vm8, %v3129_v6 }
 0x2f1   :  { %v3127_v59 = vpop.permute.xlu1 %3126  ;;  %3716 = vst.msk [vmem:[#allocation3 + $0xd0] sm:$0xff] %vm3689_vm9, %v8942_v53  ;;  %3573 = vrot.lane.b32.xlu0 %v2032_v12, %s6795_s13 }
 0x2f2   :  { %3306 = vst.msk [vmem:[#allocation3 + $0xc8] sm:$0xff] %vm3280_vm8, %v3127_v59  ;;  %v2508_v59 = vmul.f32 %v9061_v7, %v2440_v54 }
 0x2f3   :  { %3170 = vrot.lane.b32.xlu1 %v8618_v0, %s6794_s12  ;;  %v2187_v58 = vpop.permute.xlu0 %2186  ;;  %v2033_v0 = vld [vmem:[#allocation2 + $0x188] sm:$0xff] }
 0x2f4   :  { %2359 = vst.msk [vmem:[#allocation3 + $0x100] sm:$0xff] %vm2326_vm5, %v2187_v58 }
 0x2f5   :  { %v3536_v11 = vpop.permute.xlu1 %3535  ;;  %2695 = vrot.lane.b32.xlu0 %v2443_v31, %s6793_s11 }
 0x2f6   :  { %3715 = vst.msk [vmem:[#allocation3 + $0xc8] sm:$0xff] %vm3689_vm9, %v3536_v11 }
 0x2f7   :  { %3579 = vrot.lane.b32.xlu1 %v2035_v28, %s6795_s13  ;;  %v9052_v53 = vpop.permute.xlu0 %3545  ;;  %v1285_v28 = vadd.s32 376, %v7430_v40 }
 0x2f9   :  { %v2654_v12 = vpop.permute.xlu1 %2653  ;;  %2691 = vrot.lane.b32.xlu0 %v2441_v30, %s6793_s11 }
 0x2fa   :  { %2831 = vst.msk [vmem:[#allocation3 + $0xd8] sm:$0xff] %vm2803_vm7, %v2654_v12  ;;  %v2442_v12 = vld [vmem:[#allocation2 + $0x189] sm:$0xff] }
 0x2fb   :  { %3308 = vst.msk [vmem:[#allocation3 + $0xd8] sm:$0xff] %vm3280_vm8, %v8975_v60  ;;  %2216 = vrot.lane.b32.xlu1 %v2033_v0, %s6792_s8  ;;  %v2183_v32 = vpop.permute.xlu0 %2182  ;;  %v1353_v60 = vand.u32 15, %v1285_v28 }
 0x2fc   :  { %3717 = vst.msk [vmem:[#allocation3 + $0xd8] sm:$0xff] %vm3689_vm9, %v9019_v20  ;;  %v2038_v20 = vld [vmem:[#allocation2 + $0x1b0] sm:$0xff] }
 0x2fd   :  { %2357 = vst.msk [vmem:[#allocation3 + $0xf0] sm:$0xff] %vm2326_vm5, %v2183_v32  ;;  %v2189_v6 = vpop.permute.xlu1 %2188  ;;  %3164 = vrot.lane.b32.xlu0 %v8566_v17, %s6794_s12  ;;  %vm1625_vm1 = vcmp.ne.s32.totalorder %v1353_v60, 15  ;;  %v2036_v32 = vld [vmem:[#allocation2 + $0x1a0] sm:$0xff] }
 0x2fe   :  { %2360 = vst.msk [vmem:[#allocation3 + $0x108] sm:$0xff] %vm2326_vm5, %v2189_v6  ;;  %v9084_v17 = vsel %vm1625_vm1, 1.0, %v10595_v57  ;;  %v1287_v6 = vadd.s32 392, %v7430_v40 }
 0x2ff   :  { %2689 = vrot.lane.b32.xlu1 %v2508_v59, %s6793_s11  ;;  %v3542_v62 = vpop.permute.xlu0 %3541 }
 0x301   :  { %v9075_v58 = vpop.permute.xlu1 %3138  ;;  %3168 = vrot.lane.b32.xlu0 %v8635_v27, %s6794_s12 }
 0x303   :  { %3166 = vrot.lane.b32.xlu1 %v8629_v33, %s6794_s12  ;;  %v2664_v11 = vpop.permute.xlu0 %2663  ;;  %v2510_v33 = vmul.f32 %v9084_v17, %v2442_v12  ;;  %v2447_v12 = vld [vmem:[#allocation2 + $0x1b1] sm:$0xff] }
 0x304   :  { %2836 = vst.msk [vmem:[#allocation3 + $0x100] sm:$0xff] %vm2803_vm7, %v2664_v11 }
 0x305   :  { %v3548_v31 = vpop.permute.xlu1 %3547  ;;  %2226 = vrot.lane.b32.xlu0 %v2038_v20, %s6792_s8 }
 0x307   :  { %3575 = vrot.lane.b32.xlu1 %v2033_v0, %s6795_s13  ;;  %v2660_v30 = vpop.permute.xlu0 %2659  ;;  %v2039_v0 = vld [vmem:[#allocation2 + $0x1b8] sm:$0xff] }
 0x308   :  { %2834 = vst.msk [vmem:[#allocation3 + $0xf0] sm:$0xff] %vm2803_vm7, %v2660_v30  ;;  %v2445_v30 = vld [vmem:[#allocation2 + $0x1a1] sm:$0xff] }
 0x309   :  { %v2185_v27 = vpop.permute.xlu1 %2184  ;;  %3585 = vrot.lane.b32.xlu0 %v2038_v20, %s6795_s13 }
 0x30a   :  { %2358 = vst.msk [vmem:[#allocation3 + $0xf8] sm:$0xff] %vm2326_vm5, %v2185_v27  ;;  %v2037_v27 = vld [vmem:[#allocation2 + $0x1a8] sm:$0xff] }
 0x30b   :  { %2693 = vrot.lane.b32.xlu1 %v2510_v33, %s6793_s11  ;;  %v3133_v54 = vpop.permute.xlu0 %3132 }
 0x30c   :  { %3309 = vst.msk [vmem:[#allocation3 + $0xe0] sm:$0xff] %vm3280_vm8, %v3133_v54  ;;  %v1289_v54 = vadd.s32 408, %v7430_v40 }
 0x30d   :  { %v2658_v28 = vpop.permute.xlu1 %2657  ;;  %3718 = vst.msk [vmem:[#allocation3 + $0xe0] sm:$0xff] %vm3689_vm9, %v3542_v62  ;;  %2222 = vrot.lane.b32.xlu0 %v2036_v32, %s6792_s8  ;;  %v1355_v62 = vand.u32 15, %v1287_v6 }
 0x30e   :  { %2833 = vst.msk [vmem:[#allocation3 + $0xe8] sm:$0xff] %vm2803_vm7, %v2658_v28 }
 0x30f   :  { %2228 = vrot.lane.b32.xlu1 %v2039_v0, %s6792_s8  ;;  %v3141_v59 = vpop.permute.xlu0 %3140  ;;  %vm1627_vm10 = vcmp.ne.s32.totalorder %v1355_v62, 15  ;;  %v2040_v62 = vld [vmem:[#allocation2 + $0x1c0] sm:$0xff] }
 0x310   :  { %3313 = vst.msk [vmem:[#allocation3 + $0x100] sm:$0xff] %vm3280_vm8, %v3141_v59  ;;  %v9115_v33 = vsel %vm1627_vm10, 1.0, %v10595_v57 }
 0x311   :  { %v3135_v60 = vpop.permute.xlu1 %3134  ;;  %3722 = vst.msk [vmem:[#allocation3 + $0x100] sm:$0xff] %vm3689_vm9, %v8265_v56  ;;  %3581 = vrot.lane.b32.xlu0 %v2036_v32, %s6795_s13 }
 0x312   :  { %3310 = vst.msk [vmem:[#allocation3 + $0xe8] sm:$0xff] %vm3280_vm8, %v3135_v60  ;;  %v2446_v60 = vld [vmem:[#allocation2 + $0x1a9] sm:$0xff] }
 0x313   :  { %3178 = vrot.lane.b32.xlu1 %v8696_v37, %s6794_s12  ;;  %v3137_v20 = vpop.permute.xlu0 %3136 }
 0x314   :  { %3311 = vst.msk [vmem:[#allocation3 + $0xf0] sm:$0xff] %vm3280_vm8, %v3137_v20 }
 0x315   :  { %v3544_v11 = vpop.permute.xlu1 %3543  ;;  %3720 = vst.msk [vmem:[#allocation3 + $0xf0] sm:$0xff] %vm3689_vm9, %v9052_v53  ;;  %2703 = vrot.lane.b32.xlu0 %v2447_v12, %s6793_s11  ;;  %v2444_v53 = vld [vmem:[#allocation2 + $0x199] sm:$0xff] }
 0x316   :  { %3719 = vst.msk [vmem:[#allocation3 + $0xe8] sm:$0xff] %vm3689_vm9, %v3544_v11  ;;  %v1291_v11 = vadd.s32 424, %v7430_v40 }
 0x317   :  { %3587 = vrot.lane.b32.xlu1 %v2039_v0, %s6795_s13  ;;  %v2203_v56 = vpop.permute.xlu0 %2202  ;;  %v2512_v0 = vmul.f32 %v9115_v33, %v2444_v53 }
 0x318   :  { %2367 = vst.msk [vmem:[#allocation3 + $0x140] sm:$0xff] %vm2326_vm5, %v2203_v56 }
 0x319   :  { %v2666_v37 = vpop.permute.xlu1 %2665  ;;  %2699 = vrot.lane.b32.xlu0 %v2445_v30, %s6793_s11  ;;  %v1359_v30 = vand.u32 15, %v1291_v11 }
 0x31a   :  { %2837 = vst.msk [vmem:[#allocation3 + $0x108] sm:$0xff] %vm2803_vm7, %v2666_v37  ;;  %v9153_v37 = vld [vmem:[#allocation2 + $0x1d8] sm:$0xff] }
 0x31b   :  { %3314 = vst.msk [vmem:[#allocation3 + $0x108] sm:$0xff] %vm3280_vm8, %v7728_v43  ;;  %2224 = vrot.lane.b32.xlu1 %v2037_v27, %s6792_s8  ;;  %v3562_v28 = vpop.permute.xlu0 %3561  ;;  %v1357_v43 = vand.u32 15, %v1289_v54  ;;  %v2451_v54 = vld [vmem:[#allocation2 + $0x1d1] sm:$0xff]  ;;  %vm1631_vm12 = vcmp.ne.s32.totalorder %v1359_v30, 15 }
 0x31c   :  { %3723 = vst.msk [vmem:[#allocation3 + $0x108] sm:$0xff] %vm3689_vm9, %v7738_v48 }
 0x31d   :  { %v2662_v32 = vpop.permute.xlu1 %2661  ;;  %3172 = vrot.lane.b32.xlu0 %v8643_v55, %s6794_s12  ;;  %v9137_v55 = vld [vmem:[#allocation2 + $0x1d0] sm:$0xff]  ;;  %vm1629_vm11 = vcmp.ne.s32.totalorder %v1357_v43, 15  ;;  %v2449_v43 = vld [vmem:[#allocation2 + $0x1c1] sm:$0xff] }
 0x31e   :  { %2835 = vst.msk [vmem:[#allocation3 + $0xf8] sm:$0xff] %vm2803_vm7, %v2662_v32 }
 0x31f   :  { %3312 = vst.msk [vmem:[#allocation3 + $0xf8] sm:$0xff] %vm3280_vm8, %v9075_v58  ;;  %2697 = vrot.lane.b32.xlu1 %v2512_v0, %s6793_s11  ;;  %v2199_v6 = vpop.permute.xlu0 %2198 }
 0x320   :  { %3721 = vst.msk [vmem:[#allocation3 + $0xf8] sm:$0xff] %vm3689_vm9, %v3548_v31  ;;  %v9142_v31 = vsel %vm1629_vm11, 1.0, %v10595_v57 }
 0x321   :  { %2365 = vst.msk [vmem:[#allocation3 + $0x130] sm:$0xff] %vm2326_vm5, %v2199_v6  ;;  %v2205_v48 = vpop.permute.xlu1 %2204  ;;  %3176 = vrot.lane.b32.xlu0 %v8713_v10, %s6794_s12  ;;  %v2041_v6 = vld [vmem:[#allocation2 + $0x1c8] sm:$0xff] }
 0x322   :  { %2368 = vst.msk [vmem:[#allocation3 + $0x148] sm:$0xff] %vm2326_vm5, %v2205_v48  ;;  %v9168_v48 = vsel %vm1631_vm12, 1.0, %v10595_v57 }
 0x323   :  { %3174 = vrot.lane.b32.xlu1 %v8704_v1, %s6794_s12  ;;  %v3558_v58 = vpop.permute.xlu0 %3557  ;;  %v2514_v1 = vmul.f32 %v9142_v31, %v2446_v60 }
 0x325   :  { %v3155_v59 = vpop.permute.xlu1 %3154  ;;  %2234 = vrot.lane.b32.xlu0 %v9137_v55, %s6792_s8 }
 0x327   :  { %3583 = vrot.lane.b32.xlu1 %v2037_v27, %s6795_s13  ;;  %v2680_v20 = vpop.permute.xlu0 %2679 }
 0x328   :  { %2844 = vst.msk [vmem:[#allocation3 + $0x140] sm:$0xff] %vm2803_vm7, %v2680_v20 }
 0x329   :  { %v3564_v10 = vpop.permute.xlu1 %3563  ;;  %2230 = vrot.lane.b32.xlu0 %v2040_v62, %s6792_s8 }
 0x32b   :  { %2701 = vrot.lane.b32.xlu1 %v2514_v1, %s6793_s11  ;;  %v2676_v12 = vpop.permute.xlu0 %2675 }
 0x32c   :  { %2842 = vst.msk [vmem:[#allocation3 + $0x130] sm:$0xff] %vm2803_vm7, %v2676_v12  ;;  %v9184_v12 = vld [vmem:[#allocation2 + $0x1f0] sm:$0xff] }
 0x32d   :  { %v2201_v56 = vpop.permute.xlu1 %2200  ;;  %3589 = vrot.lane.b32.xlu0 %v2040_v62, %s6795_s13 }
 0x32e   :  { %2366 = vst.msk [vmem:[#allocation3 + $0x138] sm:$0xff] %vm2326_vm5, %v2201_v56 }
 0x32f   :  { %2236 = vrot.lane.b32.xlu1 %v9153_v37, %s6792_s8  ;;  %v3149_v27 = vpop.permute.xlu0 %3148 }
 0x330   :  { %3317 = vst.msk [vmem:[#allocation3 + $0x120] sm:$0xff] %vm3280_vm8, %v3149_v27 }
 0x331   :  { %v2674_v53 = vpop.permute.xlu1 %2673  ;;  %3726 = vst.msk [vmem:[#allocation3 + $0x120] sm:$0xff] %vm3689_vm9, %v3558_v58  ;;  %2711 = vrot.lane.b32.xlu0 %v2451_v54, %s6793_s11  ;;  %v2448_v58 = vld [vmem:[#allocation2 + $0x1b9] sm:$0xff] }
 0x332   :  { %2841 = vst.msk [vmem:[#allocation3 + $0x128] sm:$0xff] %vm2803_vm7, %v2674_v53  ;;  %v2516_v20 = vmul.f32 %v9168_v48, %v2448_v58  ;;  %v2453_v58 = vld [vmem:[#allocation2 + $0x1e1] sm:$0xff] }
 0x333   :  { %3186 = vrot.lane.b32.xlu1 %v8786_v2, %s6794_s12  ;;  %v3153_v32 = vpop.permute.xlu0 %3152  ;;  %v1293_v2 = vadd.s32 440, %v7430_v40 }
 0x334   :  { %3319 = vst.msk [vmem:[#allocation3 + $0x130] sm:$0xff] %vm3280_vm8, %v3153_v32  ;;  %v2455_v32 = vld [vmem:[#allocation2 + $0x1f1] sm:$0xff] }
 0x335   :  { %v3151_v0 = vpop.permute.xlu1 %3150  ;;  %3728 = vst.msk [vmem:[#allocation3 + $0x130] sm:$0xff] %vm3689_vm9, %v3562_v28  ;;  %2707 = vrot.lane.b32.xlu0 %v2449_v43, %s6793_s11  ;;  %v1361_v28 = vand.u32 15, %v1293_v2 }
 0x336   :  { %3318 = vst.msk [vmem:[#allocation3 + $0x128] sm:$0xff] %vm3280_vm8, %v3151_v0  ;;  %v9203_v0 = vld [vmem:[#allocation2 + $0x1f8] sm:$0xff] }
 0x337   :  { %2232 = vrot.lane.b32.xlu1 %v2041_v6, %s6792_s8  ;;  %v2211_v60 = vpop.permute.xlu0 %2210  ;;  %vm1633_vm13 = vcmp.ne.s32.totalorder %v1361_v28, 15 }
 0x338   :  { %2371 = vst.msk [vmem:[#allocation3 + $0x160] sm:$0xff] %vm2326_vm5, %v2211_v60 }
 0x339   :  { %v3560_v62 = vpop.permute.xlu1 %3559  ;;  %3180 = vrot.lane.b32.xlu0 %v8721_v35, %s6794_s12 }
 0x33a   :  { %3727 = vst.msk [vmem:[#allocation3 + $0x128] sm:$0xff] %vm3689_vm9, %v3560_v62  ;;  %v9217_v62 = vld [vmem:[#allocation2 + $0x1e8] sm:$0xff] }
 0x33b   :  { %2705 = vrot.lane.b32.xlu1 %v2516_v20, %s6793_s11  ;;  %v3570_v1 = vpop.permute.xlu0 %3569  ;;  %v2452_v20 = vld [vmem:[#allocation2 + $0x1d9] sm:$0xff] }
 0x33d   :  { %v2678_v11 = vpop.permute.xlu1 %2677  ;;  %3184 = vrot.lane.b32.xlu0 %v8795_v9, %s6794_s12  ;;  %v9192_v9 = vsel %vm1633_vm13, 1.0, %v10595_v57 }
 0x33e   :  { %2843 = vst.msk [vmem:[#allocation3 + $0x138] sm:$0xff] %vm2803_vm7, %v2678_v11  ;;  %v2520_v11 = vmul.f32 %v8908_v45, %v2452_v20  ;;  %v2524_v20 = vmul.f32 %v9006_v23, %v8900_v36  ;;  %v9285_v36 = vld [vmem:[#allocation2 + $0x221] sm:$0xff] }
 0x33f   :  { %3320 = vst.msk [vmem:[#allocation3 + $0x138] sm:$0xff] %vm3280_vm8, %v3155_v59  ;;  %3182 = vrot.lane.b32.xlu1 %v8797_v50, %s6794_s12  ;;  %v2207_v35 = vpop.permute.xlu0 %2206  ;;  %v2450_v59 = vld [vmem:[#allocation2 + $0x1c9] sm:$0xff]  ;;  %v9195_v50 = vld [vmem:[#allocation2 + $0x1e0] sm:$0xff] }
 0x340   :  { %3729 = vst.msk [vmem:[#allocation3 + $0x138] sm:$0xff] %vm3689_vm9, %v3564_v10  ;;  %v2518_v10 = vmul.f32 %v9192_v9, %v2450_v59 }
 0x341   :  { %2369 = vst.msk [vmem:[#allocation3 + $0x150] sm:$0xff] %vm2326_vm5, %v2207_v35  ;;  %v2213_v56 = vpop.permute.xlu1 %2212  ;;  %2242 = vrot.lane.b32.xlu0 %v9184_v12, %s6792_s8 }
 0x342   :  { %2372 = vst.msk [vmem:[#allocation3 + $0x168] sm:$0xff] %vm2326_vm5, %v2213_v56 }
 0x343   :  { %3591 = vrot.lane.b32.xlu1 %v2041_v6, %s6795_s13  ;;  %v3566_v30 = vpop.permute.xlu0 %3565 }
 0x345   :  { %v3163_v27 = vpop.permute.xlu1 %3162  ;;  %2238 = vrot.lane.b32.xlu0 %v9195_v50, %s6792_s8 }
 0x347   :  { %2709 = vrot.lane.b32.xlu1 %v2518_v10, %s6793_s11  ;;  %v2688_v53 = vpop.permute.xlu0 %2687 }
 0x348   :  { %2848 = vst.msk [vmem:[#allocation3 + $0x160] sm:$0xff] %vm2803_vm7, %v2688_v53  ;;  %v9247_v53 = vld [vmem:[#allocation2 + $0x211] sm:$0xff] }
 0x349   :  { %v3572_v54 = vpop.permute.xlu1 %3571  ;;  %2719 = vrot.lane.b32.xlu0 %v2455_v32, %s6793_s11 }
 0x34b   :  { %2244 = vrot.lane.b32.xlu1 %v9203_v0, %s6792_s8  ;;  %v2684_v43 = vpop.permute.xlu0 %2683 }
 0x34c   :  { %2846 = vst.msk [vmem:[#allocation3 + $0x150] sm:$0xff] %vm2803_vm7, %v2684_v43  ;;  %v9256_v43 = vld [vmem:[#allocation2 + $0x201] sm:$0xff] }
 0x34d   :  { %v2209_v6 = vpop.permute.xlu1 %2208  ;;  %2715 = vrot.lane.b32.xlu0 %v2453_v58, %s6793_s11  ;;  %v9265_v58 = vld [vmem:[#allocation2 + $0x208] sm:$0xff] }
 0x34e   :  { %2370 = vst.msk [vmem:[#allocation3 + $0x158] sm:$0xff] %vm2326_vm5, %v2209_v6 }
 0x34f   :  { %3194 = vrot.lane.b32.xlu1 %v8872_v52, %s6794_s12  ;;  %v3157_v2 = vpop.permute.xlu0 %3156 }
 0x350   :  { %3321 = vst.msk [vmem:[#allocation3 + $0x140] sm:$0xff] %vm3280_vm8, %v3157_v2 }
 0x351   :  { %v2682_v60 = vpop.permute.xlu1 %2681  ;;  %3730 = vst.msk [vmem:[#allocation3 + $0x140] sm:$0xff] %vm3689_vm9, %v3566_v30  ;;  %3188 = vrot.lane.b32.xlu0 %v8808_v25, %s6794_s12  ;;  %v9228_v25 = vld [vmem:[#allocation2 + $0x210] sm:$0xff]  ;;  %v2522_v30 = vmul.f32 %v8886_v4, %v8888_v15  ;;  %v9252_v15 = vld [vmem:[#allocation2 + $0x218] sm:$0xff] }
 0x352   :  { %2845 = vst.msk [vmem:[#allocation3 + $0x148] sm:$0xff] %vm2803_vm7, %v2682_v60 }
 0x353   :  { %2240 = vrot.lane.b32.xlu1 %v9217_v62, %s6792_s8  ;;  %v3161_v28 = vpop.permute.xlu0 %3160 }
 0x354   :  { %3323 = vst.msk [vmem:[#allocation3 + $0x150] sm:$0xff] %vm3280_vm8, %v3161_v28 }
 0x355   :  { %v3159_v52 = vpop.permute.xlu1 %3158  ;;  %3732 = vst.msk [vmem:[#allocation3 + $0x150] sm:$0xff] %vm3689_vm9, %v3570_v1  ;;  %3192 = vrot.lane.b32.xlu0 %v8881_v3, %s6794_s12  ;;  %v9236_v1 = vld [vmem:[#allocation2 + $0x200] sm:$0xff] }
 0x356   :  { %3322 = vst.msk [vmem:[#allocation3 + $0x148] sm:$0xff] %vm3280_vm8, %v3159_v52 }
 0x357   :  { %2713 = vrot.lane.b32.xlu1 %v2520_v11, %s6793_s11  ;;  %v2219_v35 = vpop.permute.xlu0 %2218 }
 0x358   :  { %2375 = vst.msk [vmem:[#allocation3 + $0x180] sm:$0xff] %vm2326_vm5, %v2219_v35  ;;  %v2526_v35 = vmul.f32 %v8983_v21, %v8985_v26  ;;  %v2939_v26 = vld [vmem:[#allocation2 + $0x237] sm:$0xff] }
 0x359   :  { %v3568_v56 = vpop.permute.xlu1 %3567  ;;  %2250 = vrot.lane.b32.xlu0 %v9228_v25, %s6792_s8 }
 0x35a   :  { %3731 = vst.msk [vmem:[#allocation3 + $0x148] sm:$0xff] %vm3689_vm9, %v3568_v56 }
 0x35b   :  { %3190 = vrot.lane.b32.xlu1 %v8883_v47, %s6794_s12  ;;  %v3578_v59 = vpop.permute.xlu0 %3577 }
 0x35d   :  { %v2686_v3 = vpop.permute.xlu1 %2685  ;;  %2246 = vrot.lane.b32.xlu0 %v9236_v1, %s6792_s8 }
 0x35e   :  { %2847 = vst.msk [vmem:[#allocation3 + $0x158] sm:$0xff] %vm2803_vm7, %v2686_v3 }
 0x35f   :  { %3324 = vst.msk [vmem:[#allocation3 + $0x158] sm:$0xff] %vm3280_vm8, %v3163_v27  ;;  %2717 = vrot.lane.b32.xlu1 %v2522_v30, %s6793_s11  ;;  %v2215_v10 = vpop.permute.xlu0 %2214  ;;  %v2938_v30 = vld [vmem:[#allocation2 + $0x22f] sm:$0xff] }
 0x360   :  { %3733 = vst.msk [vmem:[#allocation3 + $0x158] sm:$0xff] %vm3689_vm9, %v3572_v54 }
 0x361   :  { %2373 = vst.msk [vmem:[#allocation3 + $0x170] sm:$0xff] %vm2326_vm5, %v2215_v10  ;;  %v2221_v47 = vpop.permute.xlu1 %2220  ;;  %2727 = vrot.lane.b32.xlu0 %v9247_v53, %s6793_s11 }
 0x362   :  { %2376 = vst.msk [vmem:[#allocation3 + $0x188] sm:$0xff] %vm2326_vm5, %v2221_v47  ;;  %v3006_v47 = vmul.f32 %v8988_v39, %v2938_v30  ;;  %v3762_v30 = vld [vmem:[#allocation2 + $0x41] sm:$0xff] }
 0x363   :  { %2252 = vrot.lane.b32.xlu1 %v9252_v15, %s6792_s8  ;;  %v3574_v27 = vpop.permute.xlu0 %3573 }
 0x365   :  { %v3171_v32 = vpop.permute.xlu1 %3170  ;;  %2723 = vrot.lane.b32.xlu0 %v9256_v43, %s6793_s11 }
 0x367   :  { %3202 = vrot.lane.b32.xlu1 %v8969_v14, %s6794_s12  ;;  %v2696_v54 = vpop.permute.xlu0 %2695 }
 0x368   :  { %2852 = vst.msk [vmem:[#allocation3 + $0x180] sm:$0xff] %vm2803_vm7, %v2696_v54  ;;  %v9305_v54 = vld [vmem:[#allocation2 + $0x228] sm:$0xff] }
 0x369   :  { %v3580_v6 = vpop.permute.xlu1 %3579  ;;  %3196 = vrot.lane.b32.xlu0 %v8898_v49, %s6794_s12  ;;  %v9276_v49 = vld [vmem:[#allocation2 + $0x220] sm:$0xff] }
 0x36b   :  { %2248 = vrot.lane.b32.xlu1 %v9265_v58, %s6792_s8  ;;  %v2692_v2 = vpop.permute.xlu0 %2691 }
 0x36c   :  { %2850 = vst.msk [vmem:[#allocation3 + $0x170] sm:$0xff] %vm2803_vm7, %v2692_v2 }
 0x36d   :  { %v2217_v60 = vpop.permute.xlu1 %2216  ;;  %3200 = vrot.lane.b32.xlu0 %v8978_v19, %s6794_s12  ;;  %v1303_v19 = vadd.s32 520, %v7430_v40 }
 0x36e   :  { %2374 = vst.msk [vmem:[#allocation3 + $0x178] sm:$0xff] %vm2326_vm5, %v2217_v60 }
 0x36f   :  { %2721 = vrot.lane.b32.xlu1 %v2524_v20, %s6793_s11  ;;  %v3165_v14 = vpop.permute.xlu0 %3164 }
 0x370   :  { %3325 = vst.msk [vmem:[#allocation3 + $0x160] sm:$0xff] %vm3280_vm8, %v3165_v14 }
 0x371   :  { %v2690_v28 = vpop.permute.xlu1 %2689  ;;  %3734 = vst.msk [vmem:[#allocation3 + $0x160] sm:$0xff] %vm3689_vm9, %v3574_v27  ;;  %2254 = vrot.lane.b32.xlu0 %v9276_v49, %s6792_s8 }
 0x372   :  { %2849 = vst.msk [vmem:[#allocation3 + $0x168] sm:$0xff] %vm2803_vm7, %v2690_v28  ;;  %v9326_v28 = vld [vmem:[#allocation2 + $0x229] sm:$0xff] }
 0x373   :  { %3198 = vrot.lane.b32.xlu1 %v8980_v24, %s6794_s12  ;;  %v3169_v52 = vpop.permute.xlu0 %3168  ;;  %v1371_v24 = vand.u32 15, %v1303_v19 }
 0x374   :  { %3327 = vst.msk [vmem:[#allocation3 + $0x170] sm:$0xff] %vm3280_vm8, %v3169_v52 }
 0x375   :  { %v3167_v11 = vpop.permute.xlu1 %3166  ;;  %3736 = vst.msk [vmem:[#allocation3 + $0x170] sm:$0xff] %vm3689_vm9, %v3578_v59  ;;  %2731 = vrot.lane.b32.xlu0 %v9285_v36, %s6793_s11  ;;  %vm1643_vm15 = vcmp.ne.s32.totalorder %v1371_v24, 15  ;;  %v1305_v59 = vadd.s32 536, %v7430_v40 }
 0x376   :  { %3326 = vst.msk [vmem:[#allocation3 + $0x168] sm:$0xff] %vm3280_vm8, %v3167_v11  ;;  %v9308_v2 = vsel %vm1643_vm15, 1.0, %v10595_v57  ;;  %v3415_v11 = vld [vmem:[#allocation2 + $0x230] sm:$0xff] }
 0x377   :  { %2725 = vrot.lane.b32.xlu1 %v2526_v35, %s6793_s11  ;;  %v2227_v56 = vpop.permute.xlu0 %2226  ;;  %v2528_v20 = vmul.f32 %v9308_v2, %v8997_v42 }
 0x378   :  { %2379 = vst.msk [vmem:[#allocation3 + $0x1a0] sm:$0xff] %vm2326_vm5, %v2227_v56 }
 0x379   :  { %v3576_v3 = vpop.permute.xlu1 %3575  ;;  %3204 = vrot.lane.b32.xlu0 %v8995_v38, %s6794_s12  ;;  %v1373_v38 = vand.u32 15, %v1305_v59 }
 0x37a   :  { %3735 = vst.msk [vmem:[#allocation3 + $0x168] sm:$0xff] %vm3689_vm9, %v3576_v3 }
 0x37b   :  { %3210 = vrot.lane.b32.xlu1 %v2939_v26, %s6794_s12  ;;  %v3586_v10 = vpop.permute.xlu0 %3585  ;;  %vm1645_vm2 = vcmp.ne.s32.totalorder %v1373_v38, 15  ;;  %v3759_v26 = vld [vmem:[#allocation2 + $0x29] sm:$0xff] }
 0x37d   :  { %v2694_v27 = vpop.permute.xlu1 %2693  ;;  %3208 = vrot.lane.b32.xlu0 %v3006_v47, %s6794_s12  ;;  %v9376_v47 = vld [vmem:[#allocation2 + $0x51] sm:$0xff] }
 0x37e   :  { %2851 = vst.msk [vmem:[#allocation3 + $0x178] sm:$0xff] %vm2803_vm7, %v2694_v27  ;;  %v3827_v27 = vmul.f32 %v7870_v5, %v3759_v26  ;;  %v6782_v26 = vld [vmem:[#allocation2 + $0x99] sm:$0xff] }
 0x37f   :  { %3328 = vst.msk [vmem:[#allocation3 + $0x178] sm:$0xff] %vm3280_vm8, %v3171_v32  ;;  %2256 = vrot.lane.b32.xlu1 %v9305_v54, %s6792_s8  ;;  %v2223_v40 = vpop.permute.xlu0 %2222  ;;  %s6797_s8 = smov 24  }
 0x380   :  { %3737 = vst.msk [vmem:[#allocation3 + $0x178] sm:$0xff] %vm3689_vm9, %v3580_v6  ;;  %v9324_v6 = vsel %vm1645_vm2, 1.0, %v10595_v57 }
 0x381   :  { %2377 = vst.msk [vmem:[#allocation3 + $0x190] sm:$0xff] %vm2326_vm5, %v2223_v40  ;;  %v2229_v60 = vpop.permute.xlu1 %2228  ;;  %3593 = vrot.lane.b32.xlu0 %v9137_v55, %s6795_s13  ;;  %v2530_v19 = vmul.f32 %v9324_v6, %v9326_v28 }
 0x382   :  { %2380 = vst.msk [vmem:[#allocation3 + $0x1a8] sm:$0xff] %vm2326_vm5, %v2229_v60  ;;  %v9384_v60 = vld [vmem:[#allocation2 + $0x61] sm:$0xff] }
 0x383   :  { %2729 = vrot.lane.b32.xlu1 %v2528_v20, %s6793_s11  ;;  %v3582_v32 = vpop.permute.xlu0 %3581 }
 0x385   :  { %v3179_v14 = vpop.permute.xlu1 %3178  ;;  %3597 = vrot.lane.b32.xlu0 %v9195_v50, %s6795_s13 }
 0x387   :  { %3206 = vrot.lane.b32.xlu1 %v9054_v29, %s6794_s12  ;;  %v2704_v42 = vpop.permute.xlu0 %2703 }
 0x388   :  { %2856 = vst.msk [vmem:[#allocation3 + $0x1a0] sm:$0xff] %vm2803_vm7, %v2704_v42 }
 0x389   :  { %v3588_v55 = vpop.permute.xlu1 %3587  ;;  %3601 = vrot.lane.b32.xlu0 %v9184_v12, %s6795_s13 }
 0x38b   :  { %2733 = vrot.lane.b32.xlu1 %v2530_v19, %s6793_s11  ;;  %v2700_v50 = vpop.permute.xlu0 %2699  ;;  %s6798_s11 = smov 28  }
 0x38c   :  { %2854 = vst.msk [vmem:[#allocation3 + $0x190] sm:$0xff] %vm2803_vm7, %v2700_v50 }
 0x38d   :  { %v2225_v57 = vpop.permute.xlu1 %2224  ;;  %3605 = vrot.lane.b32.xlu0 %v9236_v1, %s6795_s13 }
 0x38e   :  { %2378 = vst.msk [vmem:[#allocation3 + $0x198] sm:$0xff] %vm2326_vm5, %v2225_v57 }
 0x38f   :  { %3595 = vrot.lane.b32.xlu1 %v9153_v37, %s6795_s13  ;;  %v3173_v29 = vpop.permute.xlu0 %3172 }
 0x390   :  { %3329 = vst.msk [vmem:[#allocation3 + $0x180] sm:$0xff] %vm3280_vm8, %v3173_v29  ;;  %v9401_v29 = vld [vmem:[#allocation2 + $0x81] sm:$0xff] }
 0x391   :  { %v2698_v52 = vpop.permute.xlu1 %2697  ;;  %3738 = vst.msk [vmem:[#allocation3 + $0x180] sm:$0xff] %vm3689_vm9, %v3582_v32  ;;  %3609 = vrot.lane.b32.xlu0 %v9228_v25, %s6795_s13  ;;  %v3763_v32 = vld [vmem:[#allocation2 + $0x49] sm:$0xff] }
 0x392   :  { %2853 = vst.msk [vmem:[#allocation3 + $0x188] sm:$0xff] %vm2803_vm7, %v2698_v52  ;;  %v3831_v19 = vmul.f32 %v7887_v13, %v3763_v32  ;;  %v6778_v52 = vld [vmem:[#allocation2 + $0x59] sm:$0xff] }
 0x393   :  { %3599 = vrot.lane.b32.xlu1 %v9217_v62, %s6795_s13  ;;  %v3177_v12 = vpop.permute.xlu0 %3176  ;;  %v6784_v32 = vld [vmem:[#allocation2 + $0xb9] sm:$0xff] }
 0x394   :  { %3331 = vst.msk [vmem:[#allocation3 + $0x190] sm:$0xff] %vm3280_vm8, %v3177_v12  ;;  %v3833_v12 = vmul.f32 %v6778_v52, %v7892_v44 }
 0x395   :  { %v3175_v1 = vpop.permute.xlu1 %3174  ;;  %3740 = vst.msk [vmem:[#allocation3 + $0x190] sm:$0xff] %vm3689_vm9, %v3586_v10  ;;  %3613 = vrot.lane.b32.xlu0 %v9276_v49, %s6795_s13  ;;  %v3758_v49 = vld [vmem:[#allocation2 + $0x21] sm:$0xff] }
 0x396   :  { %3330 = vst.msk [vmem:[#allocation3 + $0x188] sm:$0xff] %vm3280_vm8, %v3175_v1 }
 0x397   :  { %3603 = vrot.lane.b32.xlu1 %v9203_v0, %s6795_s13  ;;  %v2235_v37 = vpop.permute.xlu0 %2234 }
 0x398   :  { %2383 = vst.msk [vmem:[#allocation3 + $0x1c0] sm:$0xff] %vm2326_vm5, %v2235_v37  ;;  %v9409_v37 = vld [vmem:[#allocation2 + $0x91] sm:$0xff] }
 0x399   :  { %v3584_v25 = vpop.permute.xlu1 %3583  ;;  %3617 = vrot.lane.b32.xlu0 %v3415_v11, %s6795_s13 }
 0x39a   :  { %3739 = vst.msk [vmem:[#allocation3 + $0x188] sm:$0xff] %vm3689_vm9, %v3584_v25  ;;  %v6779_v25 = vld [vmem:[#allocation2 + $0x69] sm:$0xff] }
 0x39b   :  { %3607 = vrot.lane.b32.xlu1 %v9265_v58, %s6795_s13  ;;  %v2231_v62 = vpop.permute.xlu0 %2230  ;;  %v3760_v58 = vld [vmem:[#allocation2 + $0x31] sm:$0xff]  ;;  %v3835_v11 = vmul.f32 %v6779_v25, %v8009_v63 }
 0x39c   :  { %2381 = vst.msk [vmem:[#allocation3 + $0x1b0] sm:$0xff] %vm2326_vm5, %v2231_v62 }
 0x39d   :  { %v2702_v35 = vpop.permute.xlu1 %2701  ;;  %3962 = vrot.lane.b32.xlu0 %v3758_v49, %s6796_s0  ;;  %v6780_v49 = vld [vmem:[#allocation2 + $0x79] sm:$0xff] }
 0x39e   :  { %2855 = vst.msk [vmem:[#allocation3 + $0x198] sm:$0xff] %vm2803_vm7, %v2702_v35  ;;  %v9418_v35 = vld [vmem:[#allocation2 + $0xa1] sm:$0xff] }
 0x39f   :  { %3332 = vst.msk [vmem:[#allocation3 + $0x198] sm:$0xff] %vm3280_vm8, %v3179_v14  ;;  %3611 = vrot.lane.b32.xlu1 %v9252_v15, %s6795_s13  ;;  %v3590_v0 = vpop.permute.xlu0 %3589  ;;  %v3416_v15 = vld [vmem:[#allocation2 + $0x238] sm:$0xff] }
 0x3a0   :  { %3741 = vst.msk [vmem:[#allocation3 + $0x198] sm:$0xff] %vm3689_vm9, %v3588_v55  ;;  %v9393_v55 = vld [vmem:[#allocation2 + $0x71] sm:$0xff] }
 0x3a1   :  { %v2237_v24 = vpop.permute.xlu1 %2236  ;;  %3966 = vrot.lane.b32.xlu0 %v3760_v58, %s6796_s0  ;;  %v9426_v58 = vld [vmem:[#allocation2 + $0xb1] sm:$0xff] }
 0x3a2   :  { %2384 = vst.msk [vmem:[#allocation3 + $0x1c8] sm:$0xff] %vm2326_vm5, %v2237_v24 }
 0x3a3   :  { %3615 = vrot.lane.b32.xlu1 %v9305_v54, %s6795_s13  ;;  %v2712_v56 = vpop.permute.xlu0 %2711  ;;  %v3761_v54 = vld [vmem:[#allocation2 + $0x39] sm:$0xff] }
 0x3a4   :  { %2860 = vst.msk [vmem:[#allocation3 + $0x1c0] sm:$0xff] %vm2803_vm7, %v2712_v56  ;;  %v3829_v20 = vmul.f32 %v7875_v51, %v3761_v54  ;;  %v6781_v56 = vld [vmem:[#allocation2 + $0x89] sm:$0xff] }
 0x3a5   :  { %v3187_v3 = vpop.permute.xlu1 %3186  ;;  %3970 = vrot.lane.b32.xlu0 %v3762_v30, %s6796_s0  ;;  %v6783_v54 = vld [vmem:[#allocation2 + $0xa9] sm:$0xff] }
 0x3a7   :  { %3619 = vrot.lane.b32.xlu1 %v3416_v15, %s6795_s13  ;;  %v2708_v59 = vpop.permute.xlu0 %2707  ;;  %v9433_v15 = vld [vmem:[#allocation2 + $0xc1] sm:$0xff] }
 0x3a8   :  { %2858 = vst.msk [vmem:[#allocation3 + $0x1b0] sm:$0xff] %vm2803_vm7, %v2708_v59  ;;  %v3841_v59 = vmul.f32 %v6782_v26, %v8185_v16 }
 0x3a9   :  { %v2233_v10 = vpop.permute.xlu1 %2232  ;;  %3974 = vrot.lane.b32.xlu0 %v9376_v47, %s6796_s0 }
 0x3aa   :  { %2382 = vst.msk [vmem:[#allocation3 + $0x1b8] sm:$0xff] %vm2326_vm5, %v2233_v10 }
 0x3ab   :  { %3964 = vrot.lane.b32.xlu1 %v3827_v27, %s6796_s0  ;;  %v3181_v38 = vpop.permute.xlu0 %3180  ;;  %v9441_v27 = vld [vmem:[#allocation2 + $0xd1] sm:$0xff] }
 0x3ac   :  { %3333 = vst.msk [vmem:[#allocation3 + $0x1a0] sm:$0xff] %vm3280_vm8, %v3181_v38  ;;  %v3843_v38 = vmul.f32 %v6783_v54, %v8190_v46  ;;  %v3789_v54 = vld [vmem:[#allocation2 + $0x119] sm:$0xff] }
 0x3ad   :  { %v2706_v40 = vpop.permute.xlu1 %2705  ;;  %3742 = vst.msk [vmem:[#allocation3 + $0x1a0] sm:$0xff] %vm3689_vm9, %v3590_v0  ;;  %3978 = vrot.lane.b32.xlu0 %v9384_v60, %s6796_s0  ;;  %v3837_v0 = vmul.f32 %v6780_v49, %v8021_v61 }
 0x3ae   :  { %2857 = vst.msk [vmem:[#allocation3 + $0x1a8] sm:$0xff] %vm2803_vm7, %v2706_v40 }
 0x3af   :  { %3968 = vrot.lane.b32.xlu1 %v3829_v20, %s6796_s0  ;;  %v3185_v14 = vpop.permute.xlu0 %3184  ;;  %v9449_v20 = vld [vmem:[#allocation2 + $0xe1] sm:$0xff] }
 0x3b0   :  { %3335 = vst.msk [vmem:[#allocation3 + $0x1b0] sm:$0xff] %vm3280_vm8, %v3185_v14  ;;  %v3845_v14 = vmul.f32 %v6784_v32, %v8236_v34  ;;  %v3794_v32 = vld [vmem:[#allocation2 + $0x141] sm:$0xff] }
 0x3b1   :  { %v3183_v42 = vpop.permute.xlu1 %3182  ;;  %3982 = vrot.lane.b32.xlu0 %v9393_v55, %s6796_s0 }
 0x3b2   :  { %3334 = vst.msk [vmem:[#allocation3 + $0x1a8] sm:$0xff] %vm3280_vm8, %v3183_v42 }
 0x3b3   :  { %3972 = vrot.lane.b32.xlu1 %v3831_v19, %s6796_s0  ;;  %v2243_v50 = vpop.permute.xlu0 %2242  ;;  %v3784_v19 = vld [vmem:[#allocation2 + $0xf1] sm:$0xff] }
 0x3b4   :  { %2387 = vst.msk [vmem:[#allocation3 + $0x1e0] sm:$0xff] %vm2326_vm5, %v2243_v50  ;;  %v6785_v50 = vld [vmem:[#allocation2 + $0xc9] sm:$0xff] }
 0x3b5   :  { %v3592_v57 = vpop.permute.xlu1 %3591  ;;  %3986 = vrot.lane.b32.xlu0 %v9401_v29, %s6796_s0 }
 0x3b6   :  { %3743 = vst.msk [vmem:[#allocation3 + $0x1a8] sm:$0xff] %vm3689_vm9, %v3592_v57  ;;  %v3847_v57 = vmul.f32 %v6785_v50, %v8248_v41 }
 0x3b7   :  { %3976 = vrot.lane.b32.xlu1 %v3833_v12, %s6796_s0  ;;  %v2239_v13 = vpop.permute.xlu0 %2238  ;;  %v3786_v12 = vld [vmem:[#allocation2 + $0x101] sm:$0xff] }
 0x3b8   :  { %2385 = vst.msk [vmem:[#allocation3 + $0x1d0] sm:$0xff] %vm2326_vm5, %v2239_v13  ;;  %v6786_v13 = vld [vmem:[#allocation2 + $0xd9] sm:$0xff] }
 0x3b9   :  { %v2710_v1 = vpop.permute.xlu1 %2709  ;;  %3990 = vrot.lane.b32.xlu0 %v9409_v37, %s6796_s0 }
 0x3ba   :  { %2859 = vst.msk [vmem:[#allocation3 + $0x1b8] sm:$0xff] %vm2803_vm7, %v2710_v1  ;;  %v3849_v1 = vmul.f32 %v6786_v13, %v8327_v18 }
 0x3bb   :  { %3336 = vst.msk [vmem:[#allocation3 + $0x1b8] sm:$0xff] %vm3280_vm8, %v3187_v3  ;;  %3980 = vrot.lane.b32.xlu1 %v3835_v11, %s6796_s0  ;;  %v2720_v44 = vpop.permute.xlu0 %2719  ;;  %v3839_v3 = vmul.f32 %v6781_v56, %v8161_v22  ;;  %v3788_v11 = vld [vmem:[#allocation2 + $0x111] sm:$0xff]  ;;  %v10725_v56 = vld [vmem:[#allocation36_spill] sm:$0xff] }
 0x3bc   :  { %2864 = vst.msk [vmem:[#allocation3 + $0x1e0] sm:$0xff] %vm2803_vm7, %v2720_v44  ;;  %v6787_v44 = vld [vmem:[#allocation2 + $0xe9] sm:$0xff] }
 0x3bd   :  { %v2245_v62 = vpop.permute.xlu1 %2244  ;;  %3994 = vrot.lane.b32.xlu0 %v9418_v35, %s6796_s0 }
 0x3be   :  { %2388 = vst.msk [vmem:[#allocation3 + $0x1e8] sm:$0xff] %vm2326_vm5, %v2245_v62  ;;  %v10724_v62 = vld [vmem:[#allocation32_spill] sm:$0xff] }
 0x3bf   :  { %3984 = vrot.lane.b32.xlu1 %v3837_v0, %s6796_s0  ;;  %v2716_v63 = vpop.permute.xlu0 %2715  ;;  %v3851_v49 = vmul.f32 %v6787_v44, %v10724_v62  ;;  %v3790_v0 = vld [vmem:[#allocation2 + $0x121] sm:$0xff]  ;;  %v3795_v44 = vld [vmem:[#allocation2 + $0x149] sm:$0xff] }
 0x3c0   :  { %2862 = vst.msk [vmem:[#allocation3 + $0x1d0] sm:$0xff] %vm2803_vm7, %v2716_v63 }
 0x3c1   :  { %v3195_v24 = vpop.permute.xlu1 %3194  ;;  %3998 = vrot.lane.b32.xlu0 %v9426_v58, %s6796_s0 }
 0x3c3   :  { %3988 = vrot.lane.b32.xlu1 %v3839_v3, %s6796_s0  ;;  %v3189_v61 = vpop.permute.xlu0 %3188 }
 0x3c4   :  { %3337 = vst.msk [vmem:[#allocation3 + $0x1c0] sm:$0xff] %vm3280_vm8, %v3189_v61  ;;  %v3792_v61 = vld [vmem:[#allocation2 + $0x131] sm:$0xff] }
 0x3c5   :  { %v2241_v30 = vpop.permute.xlu1 %2240  ;;  %4002 = vrot.lane.b32.xlu0 %v9433_v15, %s6796_s0 }
 0x3c6   :  { %2386 = vst.msk [vmem:[#allocation3 + $0x1d8] sm:$0xff] %vm2326_vm5, %v2241_v30 }
 0x3c7   :  { %3992 = vrot.lane.b32.xlu1 %v3841_v59, %s6796_s0  ;;  %v3193_v22 = vpop.permute.xlu0 %3192  ;;  %v6789_v59 = vld [vmem:[#allocation2 + $0x109] sm:$0xff] }
 0x3c8   :  { %3339 = vst.msk [vmem:[#allocation3 + $0x1d0] sm:$0xff] %vm3280_vm8, %v3193_v22  ;;  %v10726_v22 = vld [vmem:[#allocation47_spill] sm:$0xff] }
 0x3c9   :  { %v2714_v10 = vpop.permute.xlu1 %2713  ;;  %4006 = vrot.lane.b32.xlu0 %v9441_v27, %s6796_s0 }
 0x3ca   :  { %2861 = vst.msk [vmem:[#allocation3 + $0x1c8] sm:$0xff] %vm2803_vm7, %v2714_v10  ;;  %v3855_v10 = vmul.f32 %v6789_v59, %v10726_v22 }
 0x3cb   :  { %3996 = vrot.lane.b32.xlu1 %v3843_v38, %s6796_s0  ;;  %v2251_v16 = vpop.permute.xlu0 %2250 }
 0x3cc   :  { %2391 = vst.msk [vmem:[#allocation3 + $0x200] sm:$0xff] %vm2326_vm5, %v2251_v16  ;;  %v3791_v16 = vld [vmem:[#allocation2 + $0x129] sm:$0xff] }
 0x3cd   :  { %v3191_v40 = vpop.permute.xlu1 %3190  ;;  %4010 = vrot.lane.b32.xlu0 %v9449_v20, %s6796_s0 }
 0x3ce   :  { %3338 = vst.msk [vmem:[#allocation3 + $0x1c8] sm:$0xff] %vm3280_vm8, %v3191_v40 }
 0x3cf   :  { %4000 = vrot.lane.b32.xlu1 %v3845_v14, %s6796_s0  ;;  %v2247_v46 = vpop.permute.xlu0 %2246  ;;  %v10727_v14 = vld [vmem:[#allocation49_spill] sm:$0xff] }
 0x3d0   :  { %2389 = vst.msk [vmem:[#allocation3 + $0x1f0] sm:$0xff] %vm2326_vm5, %v2247_v46  ;;  %v3857_v46 = vmul.f32 %v10727_v14, %v3789_v54  ;;  %v3804_v54 = vld [vmem:[#allocation2 + $0x191] sm:$0xff] }
 0x3d1   :  { %v2718_v42 = vpop.permute.xlu1 %2717  ;;  %4014 = vrot.lane.b32.xlu0 %v3784_v19, %s6796_s0 }
 0x3d2   :  { %2863 = vst.msk [vmem:[#allocation3 + $0x1d8] sm:$0xff] %vm2803_vm7, %v2718_v42  ;;  %v10728_v42 = vld [vmem:[#allocation48_spill] sm:$0xff] }
 0x3d3   :  { %3340 = vst.msk [vmem:[#allocation3 + $0x1d8] sm:$0xff] %vm3280_vm8, %v3195_v24  ;;  %4004 = vrot.lane.b32.xlu1 %v3847_v57, %s6796_s0  ;;  %v2728_v34 = vpop.permute.xlu0 %2727  ;;  %v6788_v24 = vld [vmem:[#allocation2 + $0xf9] sm:$0xff]  ;;  %v3859_v19 = vmul.f32 %v10728_v42, %v3791_v16 }
 0x3d4   :  { %2868 = vst.msk [vmem:[#allocation3 + $0x200] sm:$0xff] %vm2803_vm7, %v2728_v34  ;;  %v3853_v3 = vmul.f32 %v6788_v24, %v10725_v56  ;;  %v3796_v34 = vld [vmem:[#allocation2 + $0x151] sm:$0xff] }
 0x3d5   :  { %v2253_v52 = vpop.permute.xlu1 %2252  ;;  %4018 = vrot.lane.b32.xlu0 %v3786_v12, %s6796_s0 }
 0x3d6   :  { %2392 = vst.msk [vmem:[#allocation3 + $0x208] sm:$0xff] %vm2326_vm5, %v2253_v52  ;;  %v3793_v52 = vld [vmem:[#allocation2 + $0x139] sm:$0xff] }
 0x3d7   :  { %4008 = vrot.lane.b32.xlu1 %v3849_v1, %s6796_s0  ;;  %v2724_v41 = vpop.permute.xlu0 %2723  ;;  %v3798_v1 = vld [vmem:[#allocation2 + $0x161] sm:$0xff] }
 0x3d8   :  { %2866 = vst.msk [vmem:[#allocation3 + $0x1f0] sm:$0xff] %vm2803_vm7, %v2724_v41  ;;  %v10729_v41 = vld [vmem:[#allocation24_spill] sm:$0xff] }
 0x3d9   :  { %v3203_v25 = vpop.permute.xlu1 %3202  ;;  %4022 = vrot.lane.b32.xlu0 %v3788_v11, %s6796_s0  ;;  %v3861_v11 = vmul.f32 %v10729_v41, %v3793_v52 }
 0x3db   :  { %4012 = vrot.lane.b32.xlu1 %v3851_v49, %s6796_s0  ;;  %v3197_v18 = vpop.permute.xlu0 %3196 }
 0x3dc   :  { %3341 = vst.msk [vmem:[#allocation3 + $0x1e0] sm:$0xff] %vm3280_vm8, %v3197_v18 }
 0x3dd   :  { %v2249_v63 = vpop.permute.xlu1 %2248  ;;  %4026 = vrot.lane.b32.xlu0 %v3790_v0, %s6796_s0  ;;  %v3800_v0 = vld [vmem:[#allocation2 + $0x171] sm:$0xff] }
 0x3de   :  { %2390 = vst.msk [vmem:[#allocation3 + $0x1f8] sm:$0xff] %vm2326_vm5, %v2249_v63  ;;  %v3797_v63 = vld [vmem:[#allocation2 + $0x159] sm:$0xff] }
 0x3df   :  { %4016 = vrot.lane.b32.xlu1 %v3853_v3, %s6796_s0  ;;  %v3201_v30 = vpop.permute.xlu0 %3200  ;;  %v3802_v3 = vld [vmem:[#allocation2 + $0x181] sm:$0xff] }
 0x3e0   :  { %3343 = vst.msk [vmem:[#allocation3 + $0x1f0] sm:$0xff] %vm3280_vm8, %v3201_v30 }
 0x3e1   :  { %v2722_v26 = vpop.permute.xlu1 %2721  ;;  %4030 = vrot.lane.b32.xlu0 %v3792_v61, %s6796_s0  ;;  %v10731_v61 = vld [vmem:[#allocation53_spill] sm:$0xff] }
 0x3e2   :  { %2865 = vst.msk [vmem:[#allocation3 + $0x1e8] sm:$0xff] %vm2803_vm7, %v2722_v26  ;;  %v3865_v30 = vmul.f32 %v10731_v61, %v3797_v63  ;;  %v3799_v26 = vld [vmem:[#allocation2 + $0x169] sm:$0xff] }
 0x3e3   :  { %4020 = vrot.lane.b32.xlu1 %v3855_v10, %s6796_s0  ;;  %v2255_v38 = vpop.permute.xlu0 %2254 }
 0x3e4   :  { %2393 = vst.msk [vmem:[#allocation3 + $0x210] sm:$0xff] %vm2326_vm5, %v2255_v38  ;;  %v10732_v38 = vld [vmem:[#allocation58_spill] sm:$0xff] }
 0x3e5   :  { %v3199_v40 = vpop.permute.xlu1 %3198  ;;  %4034 = vrot.lane.b32.xlu0 %v3794_v32, %s6796_s0  ;;  %v3867_v16 = vmul.f32 %v10732_v38, %v3799_v26 }
 0x3e6   :  { %3342 = vst.msk [vmem:[#allocation3 + $0x1e8] sm:$0xff] %vm3280_vm8, %v3199_v40  ;;  %v3801_v40 = vld [vmem:[#allocation2 + $0x179] sm:$0xff] }
 0x3e7   :  { %4024 = vrot.lane.b32.xlu1 %v3857_v46, %s6796_s0  ;;  %v2732_v50 = vpop.permute.xlu0 %2731 }
 0x3e8   :  { %2870 = vst.msk [vmem:[#allocation3 + $0x210] sm:$0xff] %vm2803_vm7, %v2732_v50  ;;  %v3869_v50 = vmul.f32 %v9023_v8, %v3801_v40 }
 0x3e9   :  { %v2726_v57 = vpop.permute.xlu1 %2725  ;;  %4038 = vrot.lane.b32.xlu0 %v3796_v34, %s6796_s0 }
 0x3ea   :  { %2867 = vst.msk [vmem:[#allocation3 + $0x1f8] sm:$0xff] %vm2803_vm7, %v2726_v57  ;;  %v3803_v57 = vld [vmem:[#allocation2 + $0x189] sm:$0xff] }
 0x3eb   :  { %3344 = vst.msk [vmem:[#allocation3 + $0x1f8] sm:$0xff] %vm3280_vm8, %v3203_v25  ;;  %4028 = vrot.lane.b32.xlu1 %v3859_v19, %s6796_s0  ;;  %v3205_v12 = vpop.permute.xlu0 %3204  ;;  %v10730_v25 = vld [vmem:[#allocation52_spill] sm:$0xff] }
 0x3ec   :  { %3345 = vst.msk [vmem:[#allocation3 + $0x200] sm:$0xff] %vm3280_vm8, %v3205_v12  ;;  %v3863_v18 = vmul.f32 %v10730_v25, %v3795_v44  ;;  %v3806_v19 = vld [vmem:[#allocation2 + $0x1a1] sm:$0xff]  ;;  %v3808_v12 = vld [vmem:[#allocation2 + $0x1b1] sm:$0xff] }
 0x3ed   :  { %v3211_v13 = vpop.permute.xlu1 %3210  ;;  %4042 = vrot.lane.b32.xlu0 %v3798_v1, %s6796_s0  ;;  %v3871_v1 = vmul.f32 %v9061_v7, %v3803_v57 }
 0x3ef   :  { %4032 = vrot.lane.b32.xlu1 %v3861_v11, %s6796_s0  ;;  %v3209_v62 = vpop.permute.xlu0 %3208  ;;  %v3805_v11 = vld [vmem:[#allocation2 + $0x199] sm:$0xff] }
 0x3f0   :  { %3347 = vst.msk [vmem:[#allocation3 + $0x210] sm:$0xff] %vm3280_vm8, %v3209_v62  ;;  %v3810_v62 = vld [vmem:[#allocation2 + $0x1c1] sm:$0xff] }
 0x3f1   :  { %v2257_v49 = vpop.permute.xlu1 %2256  ;;  %4046 = vrot.lane.b32.xlu0 %v3800_v0, %s6796_s0  ;;  %v3807_v0 = vld [vmem:[#allocation2 + $0x1a9] sm:$0xff] }
 0x3f2   :  { %2394 = vst.msk [vmem:[#allocation3 + $0x218] sm:$0xff] %vm2326_vm5, %v2257_v49  ;;  %v3873_v49 = vmul.f32 %v9084_v17, %v3805_v11  ;;  %vm4166_vm5 = vcmask 195744  }
 0x3f3   :  { %4036 = vrot.lane.b32.xlu1 %v3863_v18, %s6796_s0  ;;  %v3594_v24 = vpop.permute.xlu0 %3593 }
 0x3f4   :  { %3744 = vst.msk [vmem:[#allocation3 + $0x1b0] sm:$0xff] %vm3689_vm9, %v3594_v24  ;;  %v3812_v24 = vld [vmem:[#allocation2 + $0x1d1] sm:$0xff] }
 0x3f5   :  { %v2730_v56 = vpop.permute.xlu1 %2729  ;;  %4050 = vrot.lane.b32.xlu0 %v3802_v3, %s6796_s0  ;;  %v3809_v3 = vld [vmem:[#allocation2 + $0x1b9] sm:$0xff] }
 0x3f6   :  { %2869 = vst.msk [vmem:[#allocation3 + $0x208] sm:$0xff] %vm2803_vm7, %v2730_v56  ;;  %v3875_v56 = vmul.f32 %v9115_v33, %v3807_v0 }
 0x3f7   :  { %4040 = vrot.lane.b32.xlu1 %v3865_v30, %s6796_s0  ;;  %v3598_v59 = vpop.permute.xlu0 %3597 }
 0x3f8   :  { %3746 = vst.msk [vmem:[#allocation3 + $0x1c0] sm:$0xff] %vm3689_vm9, %v3598_v59  ;;  %v3814_v59 = vld [vmem:[#allocation2 + $0x1e1] sm:$0xff] }
 0x3f9   :  { %v3207_v10 = vpop.permute.xlu1 %3206  ;;  %4054 = vrot.lane.b32.xlu0 %v3804_v54, %s6796_s0  ;;  %v3811_v54 = vld [vmem:[#allocation2 + $0x1c9] sm:$0xff] }
 0x3fa   :  { %3346 = vst.msk [vmem:[#allocation3 + $0x208] sm:$0xff] %vm3280_vm8, %v3207_v10  ;;  %v3877_v10 = vmul.f32 %v9142_v31, %v3809_v3  ;;  %v4242_v3 = vld [vmem:[#allocation2 + $0x67] sm:$0xff] }
 0x3fb   :  { %4044 = vrot.lane.b32.xlu1 %v3867_v16, %s6796_s0  ;;  %v3602_v32 = vpop.permute.xlu0 %3601 }
 0x3fc   :  { %3748 = vst.msk [vmem:[#allocation3 + $0x1d0] sm:$0xff] %vm3689_vm9, %v3602_v32  ;;  %v3816_v32 = vld [vmem:[#allocation2 + $0x1f1] sm:$0xff] }
 0x3fd   :  { %v2734_v46 = vpop.permute.xlu1 %2733  ;;  %4058 = vrot.lane.b32.xlu0 %v3806_v19, %s6796_s0  ;;  %v3813_v19 = vld [vmem:[#allocation2 + $0x1d9] sm:$0xff] }
 0x3fe   :  { %2871 = vst.msk [vmem:[#allocation3 + $0x218] sm:$0xff] %vm2803_vm7, %v2734_v46  ;;  %v3879_v46 = vmul.f32 %v9168_v48, %v3811_v54  ;;  %v4717_v54 = vld [vmem:[#allocation2 + $0x58] sm:$0xff]  ;;  %vm5052_vm7 = vcmask 261344  }
 0x3ff   :  { %3348 = vst.msk [vmem:[#allocation3 + $0x218] sm:$0xff] %vm3280_vm8, %v3211_v13  ;;  %4048 = vrot.lane.b32.xlu1 %v3869_v50, %s6796_s0  ;;  %v3606_v34 = vpop.permute.xlu0 %3605  ;;  %vm5529_vm8 = vcmask 294144  }
 0x400   :  { %3750 = vst.msk [vmem:[#allocation3 + $0x1e0] sm:$0xff] %vm3689_vm9, %v3606_v34  ;;  %v3881_v34 = vmul.f32 %v9192_v9, %v3813_v19  ;;  %v4719_v19 = vld [vmem:[#allocation2 + $0x68] sm:$0xff] }
 0x401   :  { %v3596_v52 = vpop.permute.xlu1 %3595  ;;  %4062 = vrot.lane.b32.xlu0 %v3808_v12, %s6796_s0 }
 0x402   :  { %3745 = vst.msk [vmem:[#allocation3 + $0x1b8] sm:$0xff] %vm3689_vm9, %v3596_v52 }
 0x403   :  { %4052 = vrot.lane.b32.xlu1 %v3871_v1, %s6796_s0  ;;  %v3610_v44 = vpop.permute.xlu0 %3609  ;;  %v10733_v1 = vld [vmem:[#allocation56_spill] sm:$0xff] }
 0x404   :  { %3752 = vst.msk [vmem:[#allocation3 + $0x1f0] sm:$0xff] %vm3689_vm9, %v3610_v44 }
 0x405   :  { %v3600_v13 = vpop.permute.xlu1 %3599  ;;  %4066 = vrot.lane.b32.xlu0 %v3810_v62, %s6796_s0 }
 0x406   :  { %3747 = vst.msk [vmem:[#allocation3 + $0x1c8] sm:$0xff] %vm3689_vm9, %v3600_v13 }
 0x407   :  { %4056 = vrot.lane.b32.xlu1 %v3873_v49, %s6796_s0  ;;  %v3614_v18 = vpop.permute.xlu0 %3613  ;;  %v10735_v49 = vld [vmem:[#allocation60_spill] sm:$0xff] }
 0x408   :  { %3754 = vst.msk [vmem:[#allocation3 + $0x200] sm:$0xff] %vm3689_vm9, %v3614_v18 }
 0x409   :  { %v3604_v63 = vpop.permute.xlu1 %3603  ;;  %4070 = vrot.lane.b32.xlu0 %v3812_v24, %s6796_s0 }
 0x40a   :  { %3749 = vst.msk [vmem:[#allocation3 + $0x1d8] sm:$0xff] %vm3689_vm9, %v3604_v63  ;;  %v10736_v63 = vld [vmem:[#allocation61_spill] sm:$0xff] }
 0x40b   :  { %4060 = vrot.lane.b32.xlu1 %v3875_v56, %s6796_s0  ;;  %v3618_v30 = vpop.permute.xlu0 %3617 }
 0x40c   :  { %3756 = vst.msk [vmem:[#allocation3 + $0x210] sm:$0xff] %vm3689_vm9, %v3618_v30  ;;  %v3891_v30 = vmul.f32 %v9308_v2, %v9326_v28  ;;  %v4241_v28 = vld [vmem:[#allocation2 + $0x5f] sm:$0xff] }
 0x40d   :  { %v3608_v26 = vpop.permute.xlu1 %3607  ;;  %4074 = vrot.lane.b32.xlu0 %v3814_v59, %s6796_s0 }
 0x40e   :  { %3751 = vst.msk [vmem:[#allocation3 + $0x1e8] sm:$0xff] %vm3689_vm9, %v3608_v26  ;;  %v4239_v26 = vld [vmem:[#allocation2 + $0x4f] sm:$0xff] }
 0x40f   :  { %4064 = vrot.lane.b32.xlu1 %v3877_v10, %s6796_s0  ;;  %v3963_v16 = vpop.permute.xlu0 %3962 }
 0x410   :  { %4167 = vst.msk [vmem:[#allocation3] sm:$0xff] %vm4166_vm5, %v3963_v16  ;;  %v10737_v16 = vld [vmem:[#allocation7_spill] sm:$0xff] }
 0x411   :  { %v3612_v40 = vpop.permute.xlu1 %3611  ;;  %4078 = vrot.lane.b32.xlu0 %v3816_v32, %s6796_s0 }
 0x412   :  { %3753 = vst.msk [vmem:[#allocation3 + $0x1f8] sm:$0xff] %vm3689_vm9, %v3612_v40  ;;  %v4307_v40 = vmul.f32 %v10737_v16, %v4239_v26  ;;  %v4245_v16 = vld [vmem:[#allocation2 + $0x7f] sm:$0xff] }
 0x413   :  { %4068 = vrot.lane.b32.xlu1 %v3879_v46, %s6796_s0  ;;  %v3967_v50 = vpop.permute.xlu0 %3966 }
 0x414   :  { %4169 = vst.msk [vmem:[#allocation3 + $0x10] sm:$0xff] %vm4166_vm5, %v3967_v50  ;;  %v10738_v50 = vld [vmem:[#allocation8_spill] sm:$0xff] }
 0x415   :  { %v3616_v57 = vpop.permute.xlu1 %3615  ;;  %4082 = vrot.lane.b32.xlu0 %v9256_v43, %s6796_s0  ;;  %v10734_v43 = vld [vmem:[#allocation57_spill] sm:$0xff] }
 0x416   :  { %3755 = vst.msk [vmem:[#allocation3 + $0x208] sm:$0xff] %vm3689_vm9, %v3616_v57  ;;  %v4309_v57 = vmul.f32 %v10738_v50, %v4241_v28 }
 0x417   :  { %4072 = vrot.lane.b32.xlu1 %v3881_v34, %s6796_s0  ;;  %v3971_v52 = vpop.permute.xlu0 %3970 }
 0x418   :  { %4171 = vst.msk [vmem:[#allocation3 + $0x20] sm:$0xff] %vm4166_vm5, %v3971_v52  ;;  %v6761_v52 = vld [vmem:[%s10501_s2] sm:$0xff]  }
 0x419   :  { %v3620_v12 = vpop.permute.xlu1 %3619  ;;  %4086 = vrot.lane.b32.xlu0 %v9247_v53, %s6796_s0  ;;  %v3824_v53 = vld [vmem:[#allocation2 + $0x231] sm:$0xff]  ;;  %6743 = vmatprep.subr.bf16.mxu1 %v6761_v52 }
 0x41a   :  { %3757 = vst.msk [vmem:[#allocation3 + $0x218] sm:$0xff] %vm3689_vm9, %v3620_v12  ;;  %6746 = vmatpush3.bf16.msra.mxu1 %v6761_v52  ;;  %6669 = vmatprep.subr.bf16.mxu0 %v6761_v52  ;;  %vm5727_vm9 = vcmask 293888  }
 0x41b   :  { %4076 = vrot.lane.b32.xlu1 %v10733_v1, %s6796_s0  ;;  %v3975_v11 = vpop.permute.xlu0 %3974  ;;  %v10739_v1 = vld [vmem:[#allocation13_spill] sm:$0xff]  ;;  %6670 = vmatpush3.bf16.msra.mxu0 %v6761_v52 }
 0x41c   :  { %4173 = vst.msk [vmem:[#allocation3 + $0x30] sm:$0xff] %vm4166_vm5, %v3975_v11  ;;  %v4716_v11 = vld [vmem:[#allocation2 + $0x50] sm:$0xff] }
 0x41d   :  { %v3965_v44 = vpop.permute.xlu1 %3964  ;;  %4090 = vrot.lane.b32.xlu0 %v9285_v36, %s6796_s0  ;;  %v4240_v36 = vld [vmem:[#allocation2 + $0x57] sm:$0xff] }
 0x41e   :  { %4168 = vst.msk [vmem:[#allocation3 + $0x8] sm:$0xff] %vm4166_vm5, %v3965_v44  ;;  %v6762_v44 = vld [vmem:[%s10501_s2 + $0x8] sm:$0xff]  }
 0x41f   :  { %4080 = vrot.lane.b32.xlu1 %v10734_v43, %s6796_s0  ;;  %v3979_v13 = vpop.permute.xlu0 %3978  ;;  %6744 = vmatprep.subr.bf16.mxu1 %v6762_v44 }
 0x420   :  { %4175 = vst.msk [vmem:[#allocation3 + $0x40] sm:$0xff] %vm4166_vm5, %v3979_v13  ;;  %6671 = vmatprep.subr.bf16.mxu0 %v6762_v44  ;;  %6747 = vmatpush3.bf16.msra.mxu1 %v6762_v44 }
 0x421   :  { %v3969_v62 = vpop.permute.xlu1 %3968  ;;  %4094 = vrot.lane.b32.xlu0 %v3824_v53, %s6796_s0  ;;  %v4718_v53 = vld [vmem:[#allocation2 + $0x60] sm:$0xff]  ;;  %6672 = vmatpush3.bf16.msra.mxu0 %v6762_v44 }
 0x422   :  { %4170 = vst.msk [vmem:[#allocation3 + $0x18] sm:$0xff] %vm4166_vm5, %v3969_v62  ;;  %v10740_v62 = vld [vmem:[#allocation14_spill] sm:$0xff] }
 0x423   :  { %4084 = vrot.lane.b32.xlu1 %v10735_v49, %s6796_s0  ;;  %v3983_v0 = vpop.permute.xlu0 %3982  ;;  %v6763_v49 = vld [vmem:[%s10501_s2 + $0x10] ss:$0 sps:$4 sm:$0x33]  }
 0x424   :  { %4177 = vst.msk [vmem:[#allocation3 + $0x50] sm:$0xff] %vm4166_vm5, %v3983_v0  ;;  %6751 = vmatprep.subr.msk.bf16.mxu1 %vm676_vm0, %v6763_v49  ;;  %6750 = vmatprep.subr.msk.bf16.mxu0 %vm676_vm0, %v6763_v49 }
 0x425   :  { %v3973_v18 = vpop.permute.xlu1 %3972  ;;  %4449 = vrot.lane.b32.xlu0 %v4240_v36, %s6797_s8  ;;  %v4244_v36 = vld [vmem:[#allocation2 + $0x77] sm:$0xff] }
 0x426   :  { %4172 = vst.msk [vmem:[#allocation3 + $0x28] sm:$0xff] %vm4166_vm5, %v3973_v18 }
 0x427   :  { %4088 = vrot.lane.b32.xlu1 %v10736_v63, %s6796_s0  ;;  %v3987_v24 = vpop.permute.xlu0 %3986  ;;  %v5831_v63 = vsel %vm676_vm0, %v6763_v49, 0  ;;  %v4250_v49 = vld [vmem:[#allocation2 + $0xa7] sm:$0xff]  ;;  %vm4643_vm0 = vcmask 228544  }
 0x428   :  { %4179 = vst.msk [vmem:[#allocation3 + $0x60] sm:$0xff] %vm4166_vm5, %v3987_v24  ;;  %6748 = vmatpush3.bf16.msra.mxu1 %v5831_v63  ;;  %6674 = vmatpush3.bf16.msra.mxu0 %v5831_v63  ;;  %v4725_v63 = vld [vmem:[#allocation2 + $0x98] sm:$0xff] }
 0x429   :  { %v3977_v56 = vpop.permute.xlu1 %3976  ;;  %4453 = vrot.lane.b32.xlu0 %v4242_v3, %s6797_s8  ;;  %v4246_v3 = vld [vmem:[#allocation2 + $0x87] sm:$0xff] }
 0x42a   :  { %4174 = vst.msk [vmem:[#allocation3 + $0x38] sm:$0xff] %vm4166_vm5, %v3977_v56 }
 0x42b   :  { %4092 = vrot.lane.b32.xlu1 %v3891_v30, %s6796_s0  ;;  %v3991_v59 = vpop.permute.xlu0 %3990  ;;  %v4243_v30 = vld [vmem:[#allocation2 + $0x6f] sm:$0xff] }
 0x42c   :  { %4181 = vst.msk [vmem:[#allocation3 + $0x70] sm:$0xff] %vm4166_vm5, %v3991_v59 }
 0x42d   :  { %v3981_v10 = vpop.permute.xlu1 %3980  ;;  %4858 = vrot.lane.b32.xlu0 %v4717_v54, %s6798_s11 }
 0x42e   :  { %4176 = vst.msk [vmem:[#allocation3 + $0x48] sm:$0xff] %vm4166_vm5, %v3981_v10  ;;  %v10741_v10 = vld [vmem:[#allocation9_spill] sm:$0xff] }
 0x42f   :  { %4447 = vrot.lane.b32.xlu1 %v4307_v40, %s6797_s8  ;;  %v3995_v32 = vpop.permute.xlu0 %3994  ;;  %v4311_v54 = vmul.f32 %v10741_v10, %v4243_v30 }
 0x430   :  { %4183 = vst.msk [vmem:[#allocation3 + $0x80] sm:$0xff] %vm4166_vm5, %v3995_v32  ;;  %v4723_v32 = vld [vmem:[#allocation2 + $0x88] sm:$0xff] }
 0x431   :  { %v3985_v46 = vpop.permute.xlu1 %3984  ;;  %4862 = vrot.lane.b32.xlu0 %v4719_v19, %s6798_s11 }
 0x432   :  { %4178 = vst.msk [vmem:[#allocation3 + $0x58] sm:$0xff] %vm4166_vm5, %v3985_v46 }
 0x433   :  { %4451 = vrot.lane.b32.xlu1 %v4309_v57, %s6797_s8  ;;  %v3999_v34 = vpop.permute.xlu0 %3998  ;;  %v10743_v57 = vld [vmem:[#allocation20_spill] sm:$0xff] }
 0x434   :  { %4185 = vst.msk [vmem:[#allocation3 + $0x90] sm:$0xff] %vm4166_vm5, %v3999_v34  ;;  %v4720_v34 = vld [vmem:[#allocation2 + $0x70] sm:$0xff] }
 0x435   :  { %v3989_v12 = vpop.permute.xlu1 %3988  ;;  %5335 = vrot.lane.b32.xlu0 %v10739_v1, %s6799_s15  ;;  %v10744_v1 = vld [vmem:[#allocation22_spill] sm:$0xff] }
 0x436   :  { %4180 = vst.msk [vmem:[#allocation3 + $0x68] sm:$0xff] %vm4166_vm5, %v3989_v12 }
 0x437   :  { %4856 = vrot.lane.b32.xlu1 %v4716_v11, %s6798_s11  ;;  %v4003_v43 = vpop.permute.xlu0 %4002  ;;  %v4722_v11 = vld [vmem:[#allocation2 + $0x80] sm:$0xff] }
 0x438   :  { %4187 = vst.msk [vmem:[#allocation3 + $0xa0] sm:$0xff] %vm4166_vm5, %v4003_v43 }
 0x439   :  { %v3993_v13 = vpop.permute.xlu1 %3992  ;;  %5339 = vrot.lane.b32.xlu0 %v10740_v62, %s6799_s15 }
 0x43a   :  { %4182 = vst.msk [vmem:[#allocation3 + $0x78] sm:$0xff] %vm4166_vm5, %v3993_v13  ;;  %v4248_v13 = vld [vmem:[#allocation2 + $0x97] sm:$0xff] }
 0x43b   :  { %4860 = vrot.lane.b32.xlu1 %v4718_v53, %s6798_s11  ;;  %v4007_v0 = vpop.permute.xlu0 %4006 }
 0x43c   :  { %4189 = vst.msk [vmem:[#allocation3 + $0xb0] sm:$0xff] %vm4166_vm5, %v4007_v0  ;;  %v4247_v0 = vld [vmem:[#allocation2 + $0x8f] sm:$0xff] }
 0x43d   :  { %v3997_v18 = vpop.permute.xlu1 %3996  ;;  %4457 = vrot.lane.b32.xlu0 %v4244_v36, %s6797_s8 }
 0x43e   :  { %4184 = vst.msk [vmem:[#allocation3 + $0x88] sm:$0xff] %vm4166_vm5, %v3997_v18 }
 0x43f   :  { %5333 = vrot.lane.b32.xlu1 %v9376_v47, %s6799_s15  ;;  %v4011_v24 = vpop.permute.xlu0 %4010  ;;  %v4721_v47 = vld [vmem:[#allocation2 + $0x78] sm:$0xff] }
 0x440   :  { %4191 = vst.msk [vmem:[#allocation3 + $0xc0] sm:$0xff] %vm4166_vm5, %v4011_v24  ;;  %v10745_v24 = vld [vmem:[#allocation11_spill] sm:$0xff] }
 0x441   :  { %v4001_v56 = vpop.permute.xlu1 %4000  ;;  %4461 = vrot.lane.b32.xlu0 %v4246_v3, %s6797_s8 }
 0x442   :  { %4186 = vst.msk [vmem:[#allocation3 + $0x98] sm:$0xff] %vm4166_vm5, %v4001_v56  ;;  %v4249_v56 = vld [vmem:[#allocation2 + $0x9f] sm:$0xff] }
 0x443   :  { %5337 = vrot.lane.b32.xlu1 %v9384_v60, %s6799_s15  ;;  %v4015_v26 = vpop.permute.xlu0 %4014  ;;  %v10742_v60 = vld [vmem:[#allocation10_spill] sm:$0xff] }
 0x444   :  { %4193 = vst.msk [vmem:[#allocation3 + $0xd0] sm:$0xff] %vm4166_vm5, %v4015_v26  ;;  %v4313_v46 = vmul.f32 %v10742_v60, %v4245_v16  ;;  %v4727_v26 = vld [vmem:[#allocation2 + $0xa8] sm:$0xff]  ;;  %v4724_v16 = vld [vmem:[#allocation2 + $0x90] sm:$0xff]  ;;  %v4726_v60 = vld [vmem:[#allocation2 + $0xa0] sm:$0xff] }
 0x445   :  { %v4005_v59 = vpop.permute.xlu1 %4004  ;;  %4866 = vrot.lane.b32.xlu0 %v4721_v47, %s6798_s11 }
 0x446   :  { %4188 = vst.msk [vmem:[#allocation3 + $0xa8] sm:$0xff] %vm4166_vm5, %v4005_v59 }
 0x447   :  { %4455 = vrot.lane.b32.xlu1 %v4311_v54, %s6797_s8  ;;  %v4019_v40 = vpop.permute.xlu0 %4018  ;;  %v10747_v54 = vld [vmem:[#allocation23_spill] sm:$0xff] }
 0x448   :  { %4195 = vst.msk [vmem:[#allocation3 + $0xe0] sm:$0xff] %vm4166_vm5, %v4019_v40 }
 0x449   :  { %v4009_v28 = vpop.permute.xlu1 %4008  ;;  %4870 = vrot.lane.b32.xlu0 %v4723_v32, %s6798_s11  ;;  %v10748_v32 = vld [vmem:[#allocation26_spill] sm:$0xff] }
 0x44a   :  { %4190 = vst.msk [vmem:[#allocation3 + $0xb8] sm:$0xff] %vm4166_vm5, %v4009_v28 }
 0x44b   :  { %4459 = vrot.lane.b32.xlu1 %v4313_v46, %s6797_s8  ;;  %v4023_v19 = vpop.permute.xlu0 %4022 }
 0x44c   :  { %4197 = vst.msk [vmem:[#allocation3 + $0xf0] sm:$0xff] %vm4166_vm5, %v4023_v19 }
 0x44d   :  { %v4013_v50 = vpop.permute.xlu1 %4012  ;;  %5343 = vrot.lane.b32.xlu0 %v10743_v57, %s6799_s15 }
 0x44e   :  { %4192 = vst.msk [vmem:[#allocation3 + $0xc8] sm:$0xff] %vm4166_vm5, %v4013_v50  ;;  %v4252_v50 = vld [vmem:[#allocation2 + $0xb7] sm:$0xff] }
 0x44f   :  { %4864 = vrot.lane.b32.xlu1 %v4720_v34, %s6798_s11  ;;  %v4027_v52 = vpop.permute.xlu0 %4026 }
 0x450   :  { %4199 = vst.msk [vmem:[#allocation3 + $0x100] sm:$0xff] %vm4166_vm5, %v4027_v52  ;;  %v4254_v52 = vld [vmem:[#allocation2 + $0xc7] sm:$0xff] }
 0x451   :  { %v4017_v12 = vpop.permute.xlu1 %4016  ;;  %5347 = vrot.lane.b32.xlu0 %v10744_v1, %s6799_s15 }
 0x452   :  { %4194 = vst.msk [vmem:[#allocation3 + $0xd8] sm:$0xff] %vm4166_vm5, %v4017_v12  ;;  %v4251_v12 = vld [vmem:[#allocation2 + $0xaf] sm:$0xff] }
 0x453   :  { %4868 = vrot.lane.b32.xlu1 %v4722_v11, %s6798_s11  ;;  %v4031_v44 = vpop.permute.xlu0 %4030 }
 0x454   :  { %4201 = vst.msk [vmem:[#allocation3 + $0x110] sm:$0xff] %vm4166_vm5, %v4031_v44  ;;  %v4729_v44 = vld [vmem:[#allocation2 + $0xb8] sm:$0xff] }
 0x455   :  { %v4021_v43 = vpop.permute.xlu1 %4020  ;;  %4465 = vrot.lane.b32.xlu0 %v4248_v13, %s6797_s8  ;;  %v4253_v13 = vld [vmem:[#allocation2 + $0xbf] sm:$0xff] }
 0x456   :  { %4196 = vst.msk [vmem:[#allocation3 + $0xe8] sm:$0xff] %vm4166_vm5, %v4021_v43  ;;  %v10749_v43 = vld [vmem:[#allocation15_spill] sm:$0xff] }
 0x457   :  { %5341 = vrot.lane.b32.xlu1 %v9393_v55, %s6799_s15  ;;  %v4035_v62 = vpop.permute.xlu0 %4034  ;;  %v4315_v55 = vmul.f32 %v10745_v24, %v4247_v0  ;;  %v4728_v24 = vld [vmem:[#allocation2 + $0xb0] sm:$0xff] }
 0x458   :  { %4203 = vst.msk [vmem:[#allocation3 + $0x120] sm:$0xff] %vm4166_vm5, %v4035_v62 }
 0x459   :  { %v4025_v53 = vpop.permute.xlu1 %4024  ;;  %4469 = vrot.lane.b32.xlu0 %v4250_v49, %s6797_s8  ;;  %v4731_v49 = vld [vmem:[#allocation2 + $0xc8] sm:$0xff] }
 0x45a   :  { %4198 = vst.msk [vmem:[#allocation3 + $0xf8] sm:$0xff] %vm4166_vm5, %v4025_v53 }
 0x45b   :  { %5345 = vrot.lane.b32.xlu1 %v9401_v29, %s6799_s15  ;;  %v4039_v18 = vpop.permute.xlu0 %4038  ;;  %v10746_v29 = vld [vmem:[#allocation12_spill] sm:$0xff] }
 0x45c   :  { %4205 = vst.msk [vmem:[#allocation3 + $0x130] sm:$0xff] %vm4166_vm5, %v4039_v18  ;;  %v4317_v59 = vmul.f32 %v10746_v29, %v4249_v56 }
 0x45d   :  { %v4029_v36 = vpop.permute.xlu1 %4028  ;;  %4874 = vrot.lane.b32.xlu0 %v4725_v63, %s6798_s11  ;;  %v10751_v63 = vld [vmem:[#allocation27_spill] sm:$0xff] }
 0x45e   :  { %4200 = vst.msk [vmem:[#allocation3 + $0x108] sm:$0xff] %vm4166_vm5, %v4029_v36 }
 0x45f   :  { %4463 = vrot.lane.b32.xlu1 %v4315_v55, %s6797_s8  ;;  %v4043_v3 = vpop.permute.xlu0 %4042 }
 0x460   :  { %4207 = vst.msk [vmem:[#allocation3 + $0x140] sm:$0xff] %vm4166_vm5, %v4043_v3  ;;  %v10752_v3 = vld [vmem:[#allocation28_spill] sm:$0xff] }
 0x461   :  { %v4033_v30 = vpop.permute.xlu1 %4032  ;;  %4878 = vrot.lane.b32.xlu0 %v4727_v26, %s6798_s11 }
 0x462   :  { %4202 = vst.msk [vmem:[#allocation3 + $0x118] sm:$0xff] %vm4166_vm5, %v4033_v30  ;;  %v4730_v30 = vld [vmem:[#allocation2 + $0xc0] sm:$0xff] }
 0x463   :  { %4467 = vrot.lane.b32.xlu1 %v4317_v59, %s6797_s8  ;;  %v4047_v47 = vpop.permute.xlu0 %4046  ;;  %v4256_v59 = vld [vmem:[#allocation2 + $0xd7] sm:$0xff] }
 0x464   :  { %4209 = vst.msk [vmem:[#allocation3 + $0x150] sm:$0xff] %vm4166_vm5, %v4047_v47 }
 0x465   :  { %v4037_v10 = vpop.permute.xlu1 %4036  ;;  %5351 = vrot.lane.b32.xlu0 %v10747_v54, %s6799_s15  ;;  %v4258_v54 = vld [vmem:[#allocation2 + $0xe7] sm:$0xff] }
 0x466   :  { %4204 = vst.msk [vmem:[#allocation3 + $0x128] sm:$0xff] %vm4166_vm5, %v4037_v10 }
 0x467   :  { %4872 = vrot.lane.b32.xlu1 %v4724_v16, %s6798_s11  ;;  %v4051_v40 = vpop.permute.xlu0 %4050  ;;  %v4255_v16 = vld [vmem:[#allocation2 + $0xcf] sm:$0xff] }
 0x468   :  { %4211 = vst.msk [vmem:[#allocation3 + $0x160] sm:$0xff] %vm4166_vm5, %v4051_v40 }
 0x469   :  { %v4041_v28 = vpop.permute.xlu1 %4040  ;;  %5355 = vrot.lane.b32.xlu0 %v10748_v32, %s6799_s15  ;;  %v4733_v32 = vld [vmem:[#allocation2 + $0xd8] sm:$0xff] }
 0x46a   :  { %4206 = vst.msk [vmem:[#allocation3 + $0x138] sm:$0xff] %vm4166_vm5, %v4041_v28 }
 0x46b   :  { %4876 = vrot.lane.b32.xlu1 %v4726_v60, %s6798_s11  ;;  %v4055_v46 = vpop.permute.xlu0 %4054  ;;  %v10753_v60 = vld [vmem:[#allocation17_spill] sm:$0xff] }
 0x46c   :  { %4213 = vst.msk [vmem:[#allocation3 + $0x170] sm:$0xff] %vm4166_vm5, %v4055_v46  ;;  %v4257_v46 = vld [vmem:[#allocation2 + $0xdf] sm:$0xff] }
 0x46d   :  { %v4045_v19 = vpop.permute.xlu1 %4044  ;;  %4473 = vrot.lane.b32.xlu0 %v4252_v50, %s6797_s8 }
 0x46e   :  { %4208 = vst.msk [vmem:[#allocation3 + $0x148] sm:$0xff] %vm4166_vm5, %v4045_v19 }
 0x46f   :  { %5349 = vrot.lane.b32.xlu1 %v9409_v37, %s6799_s15  ;;  %v4059_v57 = vpop.permute.xlu0 %4058  ;;  %v4319_v37 = vmul.f32 %v10749_v43, %v4251_v12 }
 0x470   :  { %4215 = vst.msk [vmem:[#allocation3 + $0x180] sm:$0xff] %vm4166_vm5, %v4059_v57  ;;  %v4735_v57 = vld [vmem:[#allocation2 + $0xe8] sm:$0xff] }
 0x471   :  { %v4049_v34 = vpop.permute.xlu1 %4048  ;;  %4477 = vrot.lane.b32.xlu0 %v4254_v52, %s6797_s8 }
 0x472   :  { %4210 = vst.msk [vmem:[#allocation3 + $0x158] sm:$0xff] %vm4166_vm5, %v4049_v34 }
 0x473   :  { %5353 = vrot.lane.b32.xlu1 %v9418_v35, %s6799_s15  ;;  %v4063_v1 = vpop.permute.xlu0 %4062  ;;  %v10750_v35 = vld [vmem:[#allocation16_spill] sm:$0xff] }
 0x474   :  { %4217 = vst.msk [vmem:[#allocation3 + $0x190] sm:$0xff] %vm4166_vm5, %v4063_v1  ;;  %v4321_v0 = vmul.f32 %v10750_v35, %v4253_v13  ;;  %v10755_v1 = vld [vmem:[#allocation29_spill] sm:$0xff]  ;;  %v4734_v13 = vld [vmem:[#allocation2 + $0xe0] sm:$0xff] }
 0x475   :  { %v4053_v11 = vpop.permute.xlu1 %4052  ;;  %4882 = vrot.lane.b32.xlu0 %v4729_v44, %s6798_s11 }
 0x476   :  { %4212 = vst.msk [vmem:[#allocation3 + $0x168] sm:$0xff] %vm4166_vm5, %v4053_v11  ;;  %v4732_v11 = vld [vmem:[#allocation2 + $0xd0] sm:$0xff] }
 0x477   :  { %4471 = vrot.lane.b32.xlu1 %v4319_v37, %s6797_s8  ;;  %v4067_v62 = vpop.permute.xlu0 %4066  ;;  %v10756_v37 = vld [vmem:[#allocation33_spill] sm:$0xff] }
 0x478   :  { %4219 = vst.msk [vmem:[#allocation3 + $0x1a0] sm:$0xff] %vm4166_vm5, %v4067_v62 }
 0x479   :  { %v4057_v53 = vpop.permute.xlu1 %4056  ;;  %4886 = vrot.lane.b32.xlu0 %v4731_v49, %s6798_s11  ;;  %v4260_v49 = vld [vmem:[#allocation2 + $0xf7] sm:$0xff] }
 0x47a   :  { %4214 = vst.msk [vmem:[#allocation3 + $0x178] sm:$0xff] %vm4166_vm5, %v4057_v53 }
 0x47b   :  { %4475 = vrot.lane.b32.xlu1 %v4321_v0, %s6797_s8  ;;  %v4071_v18 = vpop.permute.xlu0 %4070 }
 0x47c   :  { %4221 = vst.msk [vmem:[#allocation3 + $0x1b0] sm:$0xff] %vm4166_vm5, %v4071_v18  ;;  %v4262_v18 = vld [vmem:[#allocation2 + $0x107] sm:$0xff] }
 0x47d   :  { %v4061_v36 = vpop.permute.xlu1 %4060  ;;  %5359 = vrot.lane.b32.xlu0 %v10751_v63, %s6799_s15 }
 0x47e   :  { %4216 = vst.msk [vmem:[#allocation3 + $0x188] sm:$0xff] %vm4166_vm5, %v4061_v36  ;;  %v4259_v36 = vld [vmem:[#allocation2 + $0xef] sm:$0xff] }
 0x47f   :  { %4880 = vrot.lane.b32.xlu1 %v4728_v24, %s6798_s11  ;;  %v4075_v55 = vpop.permute.xlu0 %4074 }
 0x480   :  { %4223 = vst.msk [vmem:[#allocation3 + $0x1c0] sm:$0xff] %vm4166_vm5, %v4075_v55  ;;  %v4737_v55 = vld [vmem:[#allocation2 + $0xf8] sm:$0xff] }
 0x481   :  { %v4065_v56 = vpop.permute.xlu1 %4064  ;;  %5363 = vrot.lane.b32.xlu0 %v10752_v3, %s6799_s15  ;;  %v4261_v3 = vld [vmem:[#allocation2 + $0xff] sm:$0xff] }
 0x482   :  { %4218 = vst.msk [vmem:[#allocation3 + $0x198] sm:$0xff] %vm4166_vm5, %v4065_v56  ;;  %v10757_v56 = vld [vmem:[#allocation19_spill] sm:$0xff] }
 0x483   :  { %4884 = vrot.lane.b32.xlu1 %v4730_v30, %s6798_s11  ;;  %v4079_v26 = vpop.permute.xlu0 %4078 }
 0x484   :  { %4225 = vst.msk [vmem:[#allocation3 + $0x1d0] sm:$0xff] %vm4166_vm5, %v4079_v26 }
 0x485   :  { %v4069_v29 = vpop.permute.xlu1 %4068  ;;  %4481 = vrot.lane.b32.xlu0 %v4256_v59, %s6797_s8 }
 0x486   :  { %4220 = vst.msk [vmem:[#allocation3 + $0x1a8] sm:$0xff] %vm4166_vm5, %v4069_v29  ;;  %v10758_v29 = vld [vmem:[#allocation21_spill] sm:$0xff] }
 0x487   :  { %5357 = vrot.lane.b32.xlu1 %v9426_v58, %s6799_s15  ;;  %v4083_v47 = vpop.permute.xlu0 %4082  ;;  %v4323_v58 = vmul.f32 %v10753_v60, %v4255_v16  ;;  %v4329_v59 = vmul.f32 %v10758_v29, %v4261_v3  ;;  %v4736_v16 = vld [vmem:[#allocation2 + $0xf0] sm:$0xff]  ;;  %v4738_v60 = vld [vmem:[#allocation2 + $0x100] sm:$0xff] }
 0x488   :  { %4227 = vst.msk [vmem:[#allocation3 + $0x1e0] sm:$0xff] %vm4166_vm5, %v4083_v47  ;;  %v5152_v3 = vld [vmem:[#allocation2 + $0x129] sm:$0xff] }
 0x489   :  { %v4073_v10 = vpop.permute.xlu1 %4072  ;;  %4485 = vrot.lane.b32.xlu0 %v4258_v54, %s6797_s8  ;;  %v10759_v54 = vld [vmem:[#allocation34_spill] sm:$0xff] }
 0x48a   :  { %4222 = vst.msk [vmem:[#allocation3 + $0x1b8] sm:$0xff] %vm4166_vm5, %v4073_v10  ;;  %v4740_v29 = vld [vmem:[#allocation2 + $0x110] sm:$0xff] }
 0x48b   :  { %5361 = vrot.lane.b32.xlu1 %v9433_v15, %s6799_s15  ;;  %v4087_v40 = vpop.permute.xlu0 %4086  ;;  %v10754_v15 = vld [vmem:[#allocation18_spill] sm:$0xff] }
 0x48c   :  { %4229 = vst.msk [vmem:[#allocation3 + $0x1f0] sm:$0xff] %vm4166_vm5, %v4087_v40  ;;  %v4325_v34 = vmul.f32 %v10754_v15, %v4257_v46 }
 0x48d   :  { %v4077_v28 = vpop.permute.xlu1 %4076  ;;  %4890 = vrot.lane.b32.xlu0 %v4733_v32, %s6798_s11  ;;  %v10760_v32 = vld [vmem:[#allocation37_spill] sm:$0xff] }
 0x48e   :  { %4224 = vst.msk [vmem:[#allocation3 + $0x1c8] sm:$0xff] %vm4166_vm5, %v4077_v28 }
 0x48f   :  { %4479 = vrot.lane.b32.xlu1 %v4323_v58, %s6797_s8  ;;  %v4091_v19 = vpop.permute.xlu0 %4090 }
 0x490   :  { %4231 = vst.msk [vmem:[#allocation3 + $0x200] sm:$0xff] %vm4166_vm5, %v4091_v19  ;;  %v4264_v19 = vld [vmem:[#allocation2 + $0x117] sm:$0xff] }
 0x491   :  { %v4081_v50 = vpop.permute.xlu1 %4080  ;;  %4894 = vrot.lane.b32.xlu0 %v4735_v57, %s6798_s11  ;;  %v4266_v57 = vld [vmem:[#allocation2 + $0x127] sm:$0xff] }
 0x492   :  { %4226 = vst.msk [vmem:[#allocation3 + $0x1d8] sm:$0xff] %vm4166_vm5, %v4081_v50  ;;  %v5145_v50 = vld [vmem:[#allocation2 + $0xf1] sm:$0xff] }
 0x493   :  { %4483 = vrot.lane.b32.xlu1 %v4325_v34, %s6797_s8  ;;  %v4095_v52 = vpop.permute.xlu0 %4094 }
 0x494   :  { %4233 = vst.msk [vmem:[#allocation3 + $0x210] sm:$0xff] %vm4166_vm5, %v4095_v52 }
 0x495   :  { %v4085_v12 = vpop.permute.xlu1 %4084  ;;  %5367 = vrot.lane.b32.xlu0 %v10755_v1, %s6799_s15  ;;  %v5147_v1 = vld [vmem:[#allocation2 + $0x101] sm:$0xff] }
 0x496   :  { %4228 = vst.msk [vmem:[#allocation3 + $0x1e8] sm:$0xff] %vm4166_vm5, %v4085_v12 }
 0x497   :  { %4888 = vrot.lane.b32.xlu1 %v4732_v11, %s6798_s11  ;;  %v4450_v44 = vpop.permute.xlu0 %4449 }
 0x498   :  { %4649 = vst.msk [vmem:[#allocation3 + $0x28] sm:$0xff] %vm4643_vm0, %v4450_v44  ;;  %v4263_v44 = vld [vmem:[#allocation2 + $0x10f] sm:$0xff] }
 0x499   :  { %v4089_v43 = vpop.permute.xlu1 %4088  ;;  %5371 = vrot.lane.b32.xlu0 %v10756_v37, %s6799_s15 }
 0x49a   :  { %4230 = vst.msk [vmem:[#allocation3 + $0x1f8] sm:$0xff] %vm4166_vm5, %v4089_v43 }
 0x49b   :  { %4892 = vrot.lane.b32.xlu1 %v4734_v13, %s6798_s11  ;;  %v4454_v62 = vpop.permute.xlu0 %4453  ;;  %v4741_v13 = vld [vmem:[#allocation2 + $0x118] sm:$0xff] }
 0x49c   :  { %4651 = vst.msk [vmem:[#allocation3 + $0x38] sm:$0xff] %vm4643_vm0, %v4454_v62  ;;  %v10761_v62 = vld [vmem:[#allocation30_spill] sm:$0xff] }
 0x49d   :  { %v4093_v53 = vpop.permute.xlu1 %4092  ;;  %4489 = vrot.lane.b32.xlu0 %v4260_v49, %s6797_s8 }
 0x49e   :  { %4232 = vst.msk [vmem:[#allocation3 + $0x208] sm:$0xff] %vm4166_vm5, %v4093_v53  ;;  %v4331_v53 = vmul.f32 %v10761_v62, %v4263_v44 }
 0x49f   :  { %5365 = vrot.lane.b32.xlu1 %v9441_v27, %s6799_s15  ;;  %v4859_v35 = vpop.permute.xlu0 %4858  ;;  %v4327_v27 = vmul.f32 %v10757_v56, %v4259_v36  ;;  %v4743_v36 = vld [vmem:[#allocation2 + $0x128] sm:$0xff] }
 0x4a0   :  { %5058 = vst.msk [vmem:[#allocation3 + $0x28] sm:$0xff] %vm5052_vm7, %v4859_v35 }
 0x4a1   :  { %v4448_v0 = vpop.permute.xlu1 %4447  ;;  %4493 = vrot.lane.b32.xlu0 %v4262_v18, %s6797_s8  ;;  %v4265_v18 = vld [vmem:[#allocation2 + $0x11f] sm:$0xff] }
 0x4a2   :  { %4648 = vst.msk [vmem:[#allocation3 + $0x20] sm:$0xff] %vm4643_vm0, %v4448_v0 }
 0x4a3   :  { %5369 = vrot.lane.b32.xlu1 %v9449_v20, %s6799_s15  ;;  %v4863_v63 = vpop.permute.xlu0 %4862  ;;  %v4739_v20 = vld [vmem:[#allocation2 + $0x108] sm:$0xff] }
 0x4a4   :  { %5060 = vst.msk [vmem:[#allocation3 + $0x38] sm:$0xff] %vm5052_vm7, %v4863_v63 }
 0x4a5   :  { %v4452_v24 = vpop.permute.xlu1 %4451  ;;  %4898 = vrot.lane.b32.xlu0 %v4737_v55, %s6798_s11  ;;  %v10762_v55 = vld [vmem:[#allocation31_spill] sm:$0xff] }
 0x4a6   :  { %4650 = vst.msk [vmem:[#allocation3 + $0x30] sm:$0xff] %vm4643_vm0, %v4452_v24  ;;  %v4333_v56 = vmul.f32 %v10762_v55, %v4265_v18  ;;  %v5156_v55 = vld [vmem:[#allocation2 + $0x149] sm:$0xff] }
 0x4a7   :  { %4487 = vrot.lane.b32.xlu1 %v4327_v27, %s6797_s8  ;;  %v5336_v30 = vpop.permute.xlu0 %5335  ;;  %v5150_v27 = vld [vmem:[#allocation2 + $0x119] sm:$0xff] }
 0x4a8   :  { %5535 = vst.msk [vmem:[#allocation3 + $0x28] sm:$0xff] %vm5529_vm8, %v5336_v30 }
 0x4a9   :  { %v4857_v26 = vpop.permute.xlu1 %4856  ;;  %4902 = vrot.lane.b32.xlu0 %v4739_v20, %s6798_s11 }
 0x4aa   :  { %5057 = vst.msk [vmem:[#allocation3 + $0x20] sm:$0xff] %vm5052_vm7, %v4857_v26  ;;  %v5218_v26 = vmul.f32 %v10726_v22, %v5150_v27  ;;  %v4268_v22 = vld [vmem:[#allocation2 + $0x137] sm:$0xff]  ;;  %v5224_v27 = vmul.f32 %v10729_v41, %v5156_v55  ;;  %v4278_v55 = vld [vmem:[#allocation2 + $0x187] sm:$0xff] }
 0x4ab   :  { %4491 = vrot.lane.b32.xlu1 %v4329_v59, %s6797_s8  ;;  %v5340_v47 = vpop.permute.xlu0 %5339  ;;  %v5220_v59 = vmul.f32 %v10727_v14, %v5152_v3  ;;  %v5149_v14 = vld [vmem:[#allocation2 + $0x111] sm:$0xff] }
 0x4ac   :  { %5537 = vst.msk [vmem:[#allocation3 + $0x38] sm:$0xff] %vm5529_vm8, %v5340_v47 }
 0x4ad   :  { %v4861_v10 = vpop.permute.xlu1 %4860  ;;  %5375 = vrot.lane.b32.xlu0 %v10759_v54, %s6799_s15 }
 0x4ae   :  { %5059 = vst.msk [vmem:[#allocation3 + $0x30] sm:$0xff] %vm5052_vm7, %v4861_v10  ;;  %v4742_v10 = vld [vmem:[#allocation2 + $0x120] sm:$0xff] }
 0x4af   :  { %4896 = vrot.lane.b32.xlu1 %v4736_v16, %s6798_s11  ;;  %v4458_v40 = vpop.permute.xlu0 %4457  ;;  %v5603_v12 = vld [vmem:[#allocation3 + $0x28] sm:$0xff] }
 0x4b0   :  { %4653 = vst.msk [vmem:[#allocation3 + $0x48] sm:$0xff] %vm4643_vm0, %v4458_v40 }
 0x4b1   :  { %v5334_v28 = vpop.permute.xlu1 %5333  ;;  %5379 = vrot.lane.b32.xlu0 %v10760_v32, %s6799_s15  ;;  %v5151_v32 = vld [vmem:[#allocation2 + $0x121] sm:$0xff] }
 0x4b2   :  { %5534 = vst.msk [vmem:[#allocation3 + $0x20] sm:$0xff] %vm5529_vm8, %v5334_v28 }
 0x4b3   :  { %4900 = vrot.lane.b32.xlu1 %v4738_v60, %s6798_s11  ;;  %v4462_v58 = vpop.permute.xlu0 %4461  ;;  %v5605_v35 = vld [vmem:[#allocation3 + $0x38] sm:$0xff]  ;;  %v4267_v60 = vld [vmem:[#allocation2 + $0x12f] sm:$0xff] }
 0x4b4   :  { %4655 = vst.msk [vmem:[#allocation3 + $0x58] sm:$0xff] %vm4643_vm0, %v4462_v58 }
 0x4b5   :  { %v5338_v46 = vpop.permute.xlu1 %5337  ;;  %4497 = vrot.lane.b32.xlu0 %v4264_v19, %s6797_s8 }
 0x4b6   :  { %5536 = vst.msk [vmem:[#allocation3 + $0x30] sm:$0xff] %vm5529_vm8, %v5338_v46  ;;  %v4270_v46 = vld [vmem:[#allocation2 + $0x147] sm:$0xff] }
 0x4b7   :  { %5373 = vrot.lane.b32.xlu1 %v5145_v50, %s6799_s15  ;;  %v4867_v15 = vpop.permute.xlu0 %4866 }
 0x4b8   :  { %5062 = vst.msk [vmem:[#allocation3 + $0x48] sm:$0xff] %vm5052_vm7, %v4867_v15  ;;  %v4745_v15 = vld [vmem:[#allocation2 + $0x138] sm:$0xff] }
 0x4b9   :  { %v4456_v34 = vpop.permute.xlu1 %4455  ;;  %v5602_v52 = vld [vmem:[#allocation3 + $0x20] sm:$0xff]  ;;  %4501 = vrot.lane.b32.xlu0 %v4266_v57, %s6797_s8 }
 0x4ba   :  { %4652 = vst.msk [vmem:[#allocation3 + $0x40] sm:$0xff] %vm4643_vm0, %v4456_v34  ;;  %v5668_v11 = vpack.c.bf16 %v5603_v12, %v5602_v52  ;;  %v10763_v34 = vld [vmem:[#allocation35_spill] sm:$0xff] }
 0x4bb   :  { %5377 = vrot.lane.b32.xlu1 %v5147_v1, %s6799_s15  ;;  %v4871_v43 = vpop.permute.xlu0 %4870  ;;  %v4335_v52 = vmul.f32 %v10763_v34, %v4267_v60  ;;  %v10765_v60 = vld [vmem:[#allocation5_spill] sm:$0xff] }
 0x4bc   :  { %6679 = vmatprep.mubr.msk.bf16.mxu1 %vm5727_vm9, %v5668_v11  ;;  %5064 = vst.msk [vmem:[#allocation3 + $0x58] sm:$0xff] %vm5052_vm7, %v4871_v43 }
 0x4bd   :  { %v4460_v37 = vpop.permute.xlu1 %4459  ;;  %v5604_v49 = vld [vmem:[#allocation3 + $0x30] sm:$0xff]  ;;  %4906 = vrot.lane.b32.xlu0 %v4741_v13, %s6798_s11 }
 0x4be   :  { %4654 = vst.msk [vmem:[#allocation3 + $0x50] sm:$0xff] %vm4643_vm0, %v4460_v37  ;;  %v5669_v0 = vpack.c.bf16 %v5605_v35, %v5604_v49  ;;  %v4269_v37 = vld [vmem:[#allocation2 + $0x13f] sm:$0xff]  ;;  %v10764_v49 = vld [vmem:[#allocation25_spill] sm:$0xff] }
 0x4bf   :  { %4495 = vrot.lane.b32.xlu1 %v4331_v53, %s6797_s8  ;;  %v5344_v63 = vpop.permute.xlu0 %5343  ;;  %v4747_v53 = vld [vmem:[#allocation2 + $0x148] sm:$0xff]  ;;  %v4337_v35 = vmul.f32 %v10764_v49, %v4269_v37 }
 0x4c0   :  { %6680 = vmatmul.mubr.msk.bf16.vlgmr.msra.gmra.mrb[0].mxu1 %vm5727_vm9, %v5669_v0  ;;  %5539 = vst.msk [vmem:[#allocation3 + $0x48] sm:$0xff] %vm5529_vm8, %v5344_v63  ;;  %v5154_v0 = vld [vmem:[#allocation2 + $0x139] sm:$0xff]  ;;  %v4744_v63 = vld [vmem:[#allocation2 + $0x130] sm:$0xff] }
 0x4c1   :  { %v4865_v24 = vpop.permute.xlu1 %4864  ;;  %4910 = vrot.lane.b32.xlu0 %v4743_v36, %s6798_s11  ;;  %v5222_v36 = vmul.f32 %v10728_v42, %v5154_v0  ;;  %v4746_v42 = vld [vmem:[#allocation2 + $0x140] sm:$0xff] }
 0x4c2   :  { %5061 = vst.msk [vmem:[#allocation3 + $0x40] sm:$0xff] %vm5052_vm7, %v4865_v24 }
 0x4c3   :  { %4499 = vrot.lane.b32.xlu1 %v4333_v56, %s6797_s8  ;;  %v5348_v30 = vpop.permute.xlu0 %5347 }
 0x4c4   :  { %5541 = vst.msk [vmem:[#allocation3 + $0x58] sm:$0xff] %vm5529_vm8, %v5348_v30 }
 0x4c5   :  { %v4869_v20 = vpop.permute.xlu1 %4868  ;;  %5383 = vrot.lane.b32.xlu0 %v5218_v26, %s6799_s15  ;;  %v5153_v26 = vld [vmem:[#allocation2 + $0x131] sm:$0xff] }
 0x4c6   :  { %5063 = vst.msk [vmem:[#allocation3 + $0x50] sm:$0xff] %vm5052_vm7, %v4869_v20 }
 0x4c7   :  { %4904 = vrot.lane.b32.xlu1 %v4740_v29, %s6798_s11  ;;  %v4466_v47 = vpop.permute.xlu0 %4465  ;;  %v5607_v50 = vld [vmem:[#allocation3 + $0x48] sm:$0xff]  ;;  %v4272_v29 = vld [vmem:[#allocation2 + $0x157] sm:$0xff] }
 0x4c8   :  { %4657 = vst.msk [vmem:[#allocation3 + $0x68] sm:$0xff] %vm4643_vm0, %v4466_v47  ;;  %v4274_v47 = vld [vmem:[#allocation2 + $0x167] sm:$0xff] }
 0x4c9   :  { %v5342_v54 = vpop.permute.xlu1 %5341  ;;  %5387 = vrot.lane.b32.xlu0 %v5220_v59, %s6799_s15 }
 0x4ca   :  { %5538 = vst.msk [vmem:[#allocation3 + $0x40] sm:$0xff] %vm5529_vm8, %v5342_v54 }
 0x4cb   :  { %4908 = vrot.lane.b32.xlu1 %v4742_v10, %s6798_s11  ;;  %v4470_v16 = vpop.permute.xlu0 %4469  ;;  %v5609_v44 = vld [vmem:[#allocation3 + $0x58] sm:$0xff] }
 0x4cc   :  { %4659 = vst.msk [vmem:[#allocation3 + $0x78] sm:$0xff] %vm4643_vm0, %v4470_v16 }
 0x4cd   :  { %v5346_v40 = vpop.permute.xlu1 %5345  ;;  %4505 = vrot.lane.b32.xlu0 %v4268_v22, %s6797_s8  ;;  %v5155_v22 = vld [vmem:[#allocation2 + $0x141] sm:$0xff] }
 0x4ce   :  { %5540 = vst.msk [vmem:[#allocation3 + $0x50] sm:$0xff] %vm5529_vm8, %v5346_v40  ;;  %v4271_v40 = vld [vmem:[#allocation2 + $0x14f] sm:$0xff] }
 0x4cf   :  { %5381 = vrot.lane.b32.xlu1 %v5149_v14, %s6799_s15  ;;  %v4875_v28 = vpop.permute.xlu0 %4874 }
 0x4d0   :  { %5066 = vst.msk [vmem:[#allocation3 + $0x68] sm:$0xff] %vm5052_vm7, %v4875_v28 }
 0x4d1   :  { %v4464_v58 = vpop.permute.xlu1 %4463  ;;  %v5606_v19 = vld [vmem:[#allocation3 + $0x40] sm:$0xff]  ;;  %4509 = vrot.lane.b32.xlu0 %v4270_v46, %s6797_s8 }
 0x4d2   :  { %4656 = vst.msk [vmem:[#allocation3 + $0x60] sm:$0xff] %vm4643_vm0, %v4464_v58  ;;  %v5670_v57 = vpack.c.bf16 %v5607_v50, %v5606_v19  ;;  %v4339_v58 = vmul.f32 %v10765_v60, %v4271_v40  ;;  %v5162_v60 = vld [vmem:[#allocation2 + $0x179] sm:$0xff] }
 0x4d3   :  { %5385 = vrot.lane.b32.xlu1 %v5151_v32, %s6799_s15  ;;  %v4879_v12 = vpop.permute.xlu0 %4878  ;;  %v4749_v32 = vld [vmem:[#allocation2 + $0x158] sm:$0xff] }
 0x4d4   :  { %6683 = vmatprep.mubr.msk.bf16.mxu1 %vm5727_vm9, %v5670_v57  ;;  %5068 = vst.msk [vmem:[#allocation3 + $0x78] sm:$0xff] %vm5052_vm7, %v4879_v12  ;;  %v4273_v57 = vld [vmem:[#allocation2 + $0x15f] sm:$0xff]  ;;  %v10766_v12 = vld [vmem:[#allocation38_spill] sm:$0xff] }
 0x4d5   :  { %v4468_v1 = vpop.permute.xlu1 %4467  ;;  %v5608_v11 = vld [vmem:[#allocation3 + $0x50] sm:$0xff]  ;;  %4914 = vrot.lane.b32.xlu0 %v4745_v15, %s6798_s11 }
 0x4d6   :  { %4658 = vst.msk [vmem:[#allocation3 + $0x70] sm:$0xff] %vm4643_vm0, %v4468_v1  ;;  %v5671_v43 = vpack.c.bf16 %v5609_v44, %v5608_v11  ;;  %v4341_v1 = vmul.f32 %v10766_v12, %v4273_v57  ;;  %v5158_v11 = vld [vmem:[#allocation2 + $0x159] sm:$0xff]  ;;  %v4752_v57 = vld [vmem:[#allocation2 + $0x170] sm:$0xff] }
 0x4d7   :  { %4503 = vrot.lane.b32.xlu1 %v4335_v52, %s6797_s8  ;;  %v5352_v13 = vpop.permute.xlu0 %5351  ;;  %v4751_v52 = vld [vmem:[#allocation2 + $0x168] sm:$0xff] }
 0x4d8   :  { %6684 = vmatmul.mubr.msk.bf16.gmra.mrb[4].mxu1 %vm5727_vm9, %v5671_v43  ;;  %5543 = vst.msk [vmem:[#allocation3 + $0x68] sm:$0xff] %vm5529_vm8, %v5352_v13  ;;  %v5226_v43 = vmul.f32 %v10730_v25, %v5158_v11  ;;  %v5160_v13 = vld [vmem:[#allocation2 + $0x169] sm:$0xff]  ;;  %v4750_v25 = vld [vmem:[#allocation2 + $0x160] sm:$0xff]  ;;  %v4280_v11 = vld [vmem:[#allocation2 + $0x197] sm:$0xff] }
 0x4d9   :  { %v4873_v62 = vpop.permute.xlu1 %4872  ;;  %4918 = vrot.lane.b32.xlu0 %v4747_v53, %s6798_s11  ;;  %v5228_v49 = vmul.f32 %v10731_v61, %v5160_v13  ;;  %v5157_v61 = vld [vmem:[#allocation2 + $0x151] sm:$0xff] }
 0x4da   :  { %5065 = vst.msk [vmem:[#allocation3 + $0x60] sm:$0xff] %vm5052_vm7, %v4873_v62  ;;  %v4748_v62 = vld [vmem:[#allocation2 + $0x150] sm:$0xff] }
 0x4db   :  { %4507 = vrot.lane.b32.xlu1 %v4337_v35, %s6797_s8  ;;  %v5356_v18 = vpop.permute.xlu0 %5355 }
 0x4dc   :  { %5545 = vst.msk [vmem:[#allocation3 + $0x78] sm:$0xff] %vm5529_vm8, %v5356_v18 }
 0x4dd   :  { %v4877_v24 = vpop.permute.xlu1 %4876  ;;  %5391 = vrot.lane.b32.xlu0 %v5222_v36, %s6799_s15  ;;  %v4276_v36 = vld [vmem:[#allocation2 + $0x177] sm:$0xff] }
 0x4de   :  { %5067 = vst.msk [vmem:[#allocation3 + $0x70] sm:$0xff] %vm5052_vm7, %v4877_v24 }
 0x4df   :  { %4912 = vrot.lane.b32.xlu1 %v4744_v63, %s6798_s11  ;;  %v4474_v56 = vpop.permute.xlu0 %4473  ;;  %v5611_v54 = vld [vmem:[#allocation3 + $0x68] sm:$0xff] }
 0x4e0   :  { %4661 = vst.msk [vmem:[#allocation3 + $0x88] sm:$0xff] %vm4643_vm0, %v4474_v56 }
 0x4e1   :  { %v5350_v3 = vpop.permute.xlu1 %5349  ;;  %5395 = vrot.lane.b32.xlu0 %v5224_v27, %s6799_s15 }
 0x4e2   :  { %5542 = vst.msk [vmem:[#allocation3 + $0x60] sm:$0xff] %vm5529_vm8, %v5350_v3  ;;  %v5159_v3 = vld [vmem:[#allocation2 + $0x161] sm:$0xff] }
 0x4e3   :  { %4916 = vrot.lane.b32.xlu1 %v4746_v42, %s6798_s11  ;;  %v4478_v30 = vpop.permute.xlu0 %4477  ;;  %v5613_v19 = vld [vmem:[#allocation3 + $0x78] sm:$0xff] }
 0x4e4   :  { %4663 = vst.msk [vmem:[#allocation3 + $0x98] sm:$0xff] %vm4643_vm0, %v4478_v30  ;;  %v4275_v30 = vld [vmem:[#allocation2 + $0x16f] sm:$0xff] }
 0x4e5   :  { %v5354_v20 = vpop.permute.xlu1 %5353  ;;  %4513 = vrot.lane.b32.xlu0 %v4272_v29, %s6797_s8  ;;  %v4753_v29 = vld [vmem:[#allocation2 + $0x178] sm:$0xff] }
 0x4e6   :  { %5544 = vst.msk [vmem:[#allocation3 + $0x70] sm:$0xff] %vm5529_vm8, %v5354_v20 }
 0x4e7   :  { %5389 = vrot.lane.b32.xlu1 %v5153_v26, %s6799_s15  ;;  %v4883_v41 = vpop.permute.xlu0 %4882 }
 0x4e8   :  { %5070 = vst.msk [vmem:[#allocation3 + $0x88] sm:$0xff] %vm5052_vm7, %v4883_v41  ;;  %v10767_v41 = vld [vmem:[#allocation39_spill] sm:$0xff] }
 0x4e9   :  { %v4472_v59 = vpop.permute.xlu1 %4471  ;;  %v5610_v10 = vld [vmem:[#allocation3 + $0x60] sm:$0xff]  ;;  %4517 = vrot.lane.b32.xlu0 %v4274_v47, %s6797_s8 }
 0x4ea   :  { %4660 = vst.msk [vmem:[#allocation3 + $0x80] sm:$0xff] %vm4643_vm0, %v4472_v59  ;;  %v5672_v16 = vpack.c.bf16 %v5611_v54, %v5610_v10  ;;  %v4343_v59 = vmul.f32 %v10767_v41, %v4275_v30  ;;  %v10770_v30 = vld [vmem:[#allocation42_spill] sm:$0xff] }
 0x4eb   :  { %5393 = vrot.lane.b32.xlu1 %v5155_v22, %s6799_s15  ;;  %v4887_v14 = vpop.permute.xlu0 %4886  ;;  %v4277_v22 = vld [vmem:[#allocation2 + $0x17f] sm:$0xff] }
 0x4ec   :  { %6687 = vmatprep.mubr.msk.bf16.mxu1 %vm5727_vm9, %v5672_v16  ;;  %5072 = vst.msk [vmem:[#allocation3 + $0x98] sm:$0xff] %vm5052_vm7, %v4887_v14  ;;  %v4755_v14 = vld [vmem:[#allocation2 + $0x188] sm:$0xff] }
 0x4ed   :  { %v4476_v28 = vpop.permute.xlu1 %4475  ;;  %v5612_v46 = vld [vmem:[#allocation3 + $0x70] sm:$0xff]  ;;  %4922 = vrot.lane.b32.xlu0 %v4749_v32, %s6798_s11 }
 0x4ee   :  { %4662 = vst.msk [vmem:[#allocation3 + $0x90] sm:$0xff] %vm4643_vm0, %v4476_v28  ;;  %v5673_v50 = vpack.c.bf16 %v5613_v19, %v5612_v46  ;;  %v10768_v28 = vld [vmem:[#allocation40_spill] sm:$0xff]  ;;  %v5230_v46 = vmul.f32 %v10732_v38, %v5162_v60 }
 0x4ef   :  { %4511 = vrot.lane.b32.xlu1 %v4339_v58, %s6797_s8  ;;  %v5360_v15 = vpop.permute.xlu0 %5359  ;;  %v4345_v32 = vmul.f32 %v10768_v28, %v4277_v22  ;;  %v4754_v38 = vld [vmem:[#allocation2 + $0x180] sm:$0xff]  ;;  %v4284_v28 = vld [vmem:[#allocation2 + $0x1b7] sm:$0xff] }
 0x4f0   :  { %6688 = vmatmul.mubr.msk.bf16.gmra.mrb[8].mxu1 %vm5727_vm9, %v5673_v50  ;;  %5547 = vst.msk [vmem:[#allocation3 + $0x88] sm:$0xff] %vm5529_vm8, %v5360_v15  ;;  %v5164_v50 = vld [vmem:[#allocation2 + $0x189] sm:$0xff] }
 0x4f1   :  { %v4881_v34 = vpop.permute.xlu1 %4880  ;;  %4926 = vrot.lane.b32.xlu0 %v4751_v52, %s6798_s11 }
 0x4f2   :  { %5069 = vst.msk [vmem:[#allocation3 + $0x80] sm:$0xff] %vm5052_vm7, %v4881_v34  ;;  %v5232_v34 = vmul.f32 %v9023_v8, %v5164_v50  ;;  %v5161_v8 = vld [vmem:[#allocation2 + $0x171] sm:$0xff]  ;;  %v5167_v50 = vld [vmem:[#allocation2 + $0x1a1] sm:$0xff] }
 0x4f3   :  { %4515 = vrot.lane.b32.xlu1 %v4341_v1, %s6797_s8  ;;  %v5364_v44 = vpop.permute.xlu0 %5363 }
 0x4f4   :  { %5549 = vst.msk [vmem:[#allocation3 + $0x98] sm:$0xff] %vm5529_vm8, %v5364_v44 }
 0x4f5   :  { %v4885_v37 = vpop.permute.xlu1 %4884  ;;  %5399 = vrot.lane.b32.xlu0 %v5226_v43, %s6799_s15 }
 0x4f6   :  { %5071 = vst.msk [vmem:[#allocation3 + $0x90] sm:$0xff] %vm5052_vm7, %v4885_v37  ;;  %v4282_v37 = vld [vmem:[#allocation2 + $0x1a7] sm:$0xff] }
 0x4f7   :  { %4920 = vrot.lane.b32.xlu1 %v4748_v62, %s6798_s11  ;;  %v4482_v53 = vpop.permute.xlu0 %4481  ;;  %v5615_v27 = vld [vmem:[#allocation3 + $0x88] sm:$0xff] }
 0x4f8   :  { %4665 = vst.msk [vmem:[#allocation3 + $0xa8] sm:$0xff] %vm4643_vm0, %v4482_v53  ;;  %v5163_v53 = vld [vmem:[#allocation2 + $0x181] sm:$0xff] }
 0x4f9   :  { %v5358_v35 = vpop.permute.xlu1 %5357  ;;  %5403 = vrot.lane.b32.xlu0 %v5228_v49, %s6799_s15 }
 0x4fa   :  { %5546 = vst.msk [vmem:[#allocation3 + $0x80] sm:$0xff] %vm5529_vm8, %v5358_v35  ;;  %v4279_v35 = vld [vmem:[#allocation2 + $0x18f] sm:$0xff] }
 0x4fb   :  { %4924 = vrot.lane.b32.xlu1 %v4750_v25, %s6798_s11  ;;  %v4486_v0 = vpop.permute.xlu0 %4485  ;;  %v5617_v10 = vld [vmem:[#allocation3 + $0x98] sm:$0xff] }
 0x4fc   :  { %4667 = vst.msk [vmem:[#allocation3 + $0xb8] sm:$0xff] %vm4643_vm0, %v4486_v0 }
 0x4fd   :  { %v5362_v18 = vpop.permute.xlu1 %5361  ;;  %4521 = vrot.lane.b32.xlu0 %v4276_v36, %s6797_s8  ;;  %v10769_v36 = vld [vmem:[#allocation41_spill] sm:$0xff] }
 0x4fe   :  { %5548 = vst.msk [vmem:[#allocation3 + $0x90] sm:$0xff] %vm5529_vm8, %v5362_v18  ;;  %v4757_v18 = vld [vmem:[#allocation2 + $0x198] sm:$0xff] }
 0x4ff   :  { %5397 = vrot.lane.b32.xlu1 %v5157_v61, %s6799_s15  ;;  %v4891_v63 = vpop.permute.xlu0 %4890  ;;  %v4347_v61 = vmul.f32 %v10769_v36, %v4279_v35  ;;  %v5170_v35 = vld [vmem:[#allocation2 + $0x1b9] sm:$0xff]  ;;  %v5172_v36 = vld [vmem:[#allocation2 + $0x1c9] sm:$0xff] }
 0x500   :  { %5074 = vst.msk [vmem:[#allocation3 + $0xa8] sm:$0xff] %vm5052_vm7, %v4891_v63 }
 0x501   :  { %v4480_v24 = vpop.permute.xlu1 %4479  ;;  %v5614_v56 = vld [vmem:[#allocation3 + $0x80] sm:$0xff]  ;;  %4525 = vrot.lane.b32.xlu0 %v4278_v55, %s6797_s8 }
 0x502   :  { %4664 = vst.msk [vmem:[#allocation3 + $0xa0] sm:$0xff] %vm4643_vm0, %v4480_v24  ;;  %v5674_v42 = vpack.c.bf16 %v5615_v27, %v5614_v56  ;;  %v4281_v56 = vld [vmem:[#allocation2 + $0x19f] sm:$0xff] }
 0x503   :  { %5401 = vrot.lane.b32.xlu1 %v5159_v3, %s6799_s15  ;;  %v4895_v26 = vpop.permute.xlu0 %4894 }
 0x504   :  { %6691 = vmatprep.mubr.msk.bf16.mxu1 %vm5727_vm9, %v5674_v42  ;;  %5076 = vst.msk [vmem:[#allocation3 + $0xb8] sm:$0xff] %vm5052_vm7, %v4895_v26  ;;  %v4759_v42 = vld [vmem:[#allocation2 + $0x1a8] sm:$0xff]  ;;  %v4349_v26 = vmul.f32 %v10770_v30, %v4281_v56 }
 0x505   :  { %v4484_v20 = vpop.permute.xlu1 %4483  ;;  %v5616_v47 = vld [vmem:[#allocation3 + $0x90] sm:$0xff]  ;;  %4930 = vrot.lane.b32.xlu0 %v4753_v29, %s6798_s11 }
 0x506   :  { %4666 = vst.msk [vmem:[#allocation3 + $0xb0] sm:$0xff] %vm4643_vm0, %v4484_v20  ;;  %v5675_v54 = vpack.c.bf16 %v5617_v10, %v5616_v47  ;;  %v5166_v20 = vld [vmem:[#allocation2 + $0x199] sm:$0xff]  ;;  %v5168_v47 = vld [vmem:[#allocation2 + $0x1a9] sm:$0xff] }
 0x507   :  { %4519 = vrot.lane.b32.xlu1 %v4343_v59, %s6797_s8  ;;  %v5368_v16 = vpop.permute.xlu0 %5367  ;;  %v5234_v41 = vmul.f32 %v9061_v7, %v5166_v20  ;;  %v4756_v10 = vld [vmem:[#allocation2 + $0x190] sm:$0xff]  ;;  %v5236_v22 = vmul.f32 %v9084_v17, %v5168_v47  ;;  %v4758_v7 = vld [vmem:[#allocation2 + $0x1a0] sm:$0xff] }
 0x508   :  { %6692 = vmatmul.mubr.msk.bf16.gmra.mrb[12].mxu1 %vm5727_vm9, %v5675_v54  ;;  %5551 = vst.msk [vmem:[#allocation3 + $0xa8] sm:$0xff] %vm5529_vm8, %v5368_v16  ;;  %v5165_v17 = vld [vmem:[#allocation2 + $0x191] sm:$0xff] }
 0x509   :  { %v4889_v40 = vpop.permute.xlu1 %4888  ;;  %4934 = vrot.lane.b32.xlu0 %v4755_v14, %s6798_s11  ;;  %v4287_v47 = vld [vmem:[#allocation2 + $0x1cf] sm:$0xff] }
 0x50a   :  { %5073 = vst.msk [vmem:[#allocation3 + $0xa0] sm:$0xff] %vm5052_vm7, %v4889_v40 }
 0x50b   :  { %4523 = vrot.lane.b32.xlu1 %v4345_v32, %s6797_s8  ;;  %v5372_v58 = vpop.permute.xlu0 %5371 }
 0x50c   :  { %5553 = vst.msk [vmem:[#allocation3 + $0xb8] sm:$0xff] %vm5529_vm8, %v5372_v58  ;;  %v4286_v58 = vld [vmem:[#allocation2 + $0x1c7] sm:$0xff] }
 0x50d   :  { %v4893_v19 = vpop.permute.xlu1 %4892  ;;  %5407 = vrot.lane.b32.xlu0 %v5230_v46, %s6799_s15 }
 0x50e   :  { %5075 = vst.msk [vmem:[#allocation3 + $0xb0] sm:$0xff] %vm5052_vm7, %v4893_v19 }
 0x50f   :  { %4928 = vrot.lane.b32.xlu1 %v4752_v57, %s6798_s11  ;;  %v4490_v15 = vpop.permute.xlu0 %4489  ;;  %v5619_v62 = vld [vmem:[#allocation3 + $0xa8] sm:$0xff] }
 0x510   :  { %4669 = vst.msk [vmem:[#allocation3 + $0xc8] sm:$0xff] %vm4643_vm0, %v4490_v15  ;;  %v4283_v15 = vld [vmem:[#allocation2 + $0x1af] sm:$0xff] }
 0x511   :  { %v5366_v52 = vpop.permute.xlu1 %5365  ;;  %5411 = vrot.lane.b32.xlu0 %v5232_v34, %s6799_s15 }
 0x512   :  { %5550 = vst.msk [vmem:[#allocation3 + $0xa0] sm:$0xff] %vm5529_vm8, %v5366_v52 }
 0x513   :  { %4932 = vrot.lane.b32.xlu1 %v4754_v38, %s6798_s11  ;;  %v4494_v12 = vpop.permute.xlu0 %4493  ;;  %v5621_v24 = vld [vmem:[#allocation3 + $0xb8] sm:$0xff] }
 0x514   :  { %4671 = vst.msk [vmem:[#allocation3 + $0xd8] sm:$0xff] %vm4643_vm0, %v4494_v12  ;;  %v4761_v38 = vld [vmem:[#allocation2 + $0x1b8] sm:$0xff] }
 0x515   :  { %v5370_v1 = vpop.permute.xlu1 %5369  ;;  %4529 = vrot.lane.b32.xlu0 %v4280_v11, %s6797_s8  ;;  %v10771_v12 = vld [vmem:[#allocation43_spill] sm:$0xff] }
 0x516   :  { %5552 = vst.msk [vmem:[#allocation3 + $0xb0] sm:$0xff] %vm5529_vm8, %v5370_v1  ;;  %v4351_v1 = vmul.f32 %v10771_v12, %v4283_v15 }
 0x517   :  { %5405 = vrot.lane.b32.xlu1 %v5161_v8, %s6799_s15  ;;  %v4899_v44 = vpop.permute.xlu0 %4898 }
 0x518   :  { %5078 = vst.msk [vmem:[#allocation3 + $0xc8] sm:$0xff] %vm5052_vm7, %v4899_v44 }
 0x519   :  { %v4488_v43 = vpop.permute.xlu1 %4487  ;;  %v5618_v13 = vld [vmem:[#allocation3 + $0xa0] sm:$0xff]  ;;  %4533 = vrot.lane.b32.xlu0 %v4282_v37, %s6797_s8 }
 0x51a   :  { %4668 = vst.msk [vmem:[#allocation3 + $0xc0] sm:$0xff] %vm4643_vm0, %v4488_v43  ;;  %v5676_v49 = vpack.c.bf16 %v5619_v62, %v5618_v13  ;;  %v4285_v43 = vld [vmem:[#allocation2 + $0x1bf] sm:$0xff]  ;;  %v4763_v62 = vld [vmem:[#allocation2 + $0x1c8] sm:$0xff] }
 0x51b   :  { %5409 = vrot.lane.b32.xlu1 %v5163_v53, %s6799_s15  ;;  %v4903_v25 = vpop.permute.xlu0 %4902  ;;  %v10772_v53 = vld [vmem:[#allocation44_spill] sm:$0xff] }
 0x51c   :  { %6695 = vmatprep.mubr.msk.bf16.mxu1 %vm5727_vm9, %v5676_v49  ;;  %5080 = vst.msk [vmem:[#allocation3 + $0xd8] sm:$0xff] %vm5052_vm7, %v4903_v25  ;;  %v4353_v49 = vmul.f32 %v10772_v53, %v4285_v43  ;;  %v4292_v43 = vld [vmem:[#allocation2 + $0x1f7] sm:$0xff] }
 0x51d   :  { %v4492_v0 = vpop.permute.xlu1 %4491  ;;  %v5620_v63 = vld [vmem:[#allocation3 + $0xb0] sm:$0xff]  ;;  %4938 = vrot.lane.b32.xlu0 %v4757_v18, %s6798_s11 }
 0x51e   :  { %4670 = vst.msk [vmem:[#allocation3 + $0xd0] sm:$0xff] %vm4643_vm0, %v4492_v0  ;;  %v5677_v55 = vpack.c.bf16 %v5621_v24, %v5620_v63  ;;  %v5238_v0 = vmul.f32 %v9115_v33, %v5170_v35  ;;  %v5240_v24 = vmul.f32 %v9142_v31, %v5172_v36  ;;  %v4762_v33 = vld [vmem:[#allocation2 + $0x1c0] sm:$0xff]  ;;  %v5169_v31 = vld [vmem:[#allocation2 + $0x1b1] sm:$0xff] }
 0x51f   :  { %4527 = vrot.lane.b32.xlu1 %v4347_v61, %s6797_s8  ;;  %v5376_v27 = vpop.permute.xlu0 %5375  ;;  %v4760_v61 = vld [vmem:[#allocation2 + $0x1b0] sm:$0xff]  ;;  %v5175_v35 = vld [vmem:[#allocation2 + $0x1e1] sm:$0xff] }
 0x520   :  { %6696 = vmatmul.mubr.msk.bf16.gmra.mrb[16].mxu1 %vm5727_vm9, %v5677_v55  ;;  %5555 = vst.msk [vmem:[#allocation3 + $0xc8] sm:$0xff] %vm5529_vm8, %v5376_v27 }
 0x521   :  { %v4897_v3 = vpop.permute.xlu1 %4896  ;;  %4942 = vrot.lane.b32.xlu0 %v4759_v42, %s6798_s11 }
 0x522   :  { %5077 = vst.msk [vmem:[#allocation3 + $0xc0] sm:$0xff] %vm5052_vm7, %v4897_v3  ;;  %v4288_v3 = vld [vmem:[#allocation2 + $0x1d7] sm:$0xff] }
 0x523   :  { %4531 = vrot.lane.b32.xlu1 %v4349_v26, %s6797_s8  ;;  %v5380_v29 = vpop.permute.xlu0 %5379  ;;  %v4290_v26 = vld [vmem:[#allocation2 + $0x1e7] sm:$0xff] }
 0x524   :  { %5557 = vst.msk [vmem:[#allocation3 + $0xd8] sm:$0xff] %vm5529_vm8, %v5380_v29 }
 0x525   :  { %v4901_v59 = vpop.permute.xlu1 %4900  ;;  %5415 = vrot.lane.b32.xlu0 %v5234_v41, %s6799_s15  ;;  %v5171_v41 = vld [vmem:[#allocation2 + $0x1c1] sm:$0xff] }
 0x526   :  { %5079 = vst.msk [vmem:[#allocation3 + $0xd0] sm:$0xff] %vm5052_vm7, %v4901_v59 }
 0x527   :  { %4936 = vrot.lane.b32.xlu1 %v4756_v10, %s6798_s11  ;;  %v4498_v54 = vpop.permute.xlu0 %4497  ;;  %v5623_v19 = vld [vmem:[#allocation3 + $0xc8] sm:$0xff] }
 0x528   :  { %4673 = vst.msk [vmem:[#allocation3 + $0xe8] sm:$0xff] %vm4643_vm0, %v4498_v54 }
 0x529   :  { %v5374_v16 = vpop.permute.xlu1 %5373  ;;  %5419 = vrot.lane.b32.xlu0 %v5236_v22, %s6799_s15 }
 0x52a   :  { %5554 = vst.msk [vmem:[#allocation3 + $0xc0] sm:$0xff] %vm5529_vm8, %v5374_v16  ;;  %v4765_v16 = vld [vmem:[#allocation2 + $0x1d8] sm:$0xff] }
 0x52b   :  { %4940 = vrot.lane.b32.xlu1 %v4758_v7, %s6798_s11  ;;  %v4502_v40 = vpop.permute.xlu0 %4501  ;;  %v5625_v8 = vld [vmem:[#allocation3 + $0xd8] sm:$0xff]  ;;  %v10773_v7 = vld [vmem:[#allocation45_spill] sm:$0xff] }
 0x52c   :  { %4675 = vst.msk [vmem:[#allocation3 + $0xf8] sm:$0xff] %vm4643_vm0, %v4502_v40  ;;  %v4355_v40 = vmul.f32 %v10773_v7, %v4287_v47  ;;  %v5180_v47 = vld [vmem:[#allocation2 + $0x209] sm:$0xff] }
 0x52d   :  { %v5378_v14 = vpop.permute.xlu1 %5377  ;;  %4537 = vrot.lane.b32.xlu0 %v4284_v28, %s6797_s8 }
 0x52e   :  { %5556 = vst.msk [vmem:[#allocation3 + $0xd0] sm:$0xff] %vm5529_vm8, %v5378_v14 }
 0x52f   :  { %5413 = vrot.lane.b32.xlu1 %v5165_v17, %s6799_s15  ;;  %v4907_v32 = vpop.permute.xlu0 %4906  ;;  %v4289_v17 = vld [vmem:[#allocation2 + $0x1df] sm:$0xff] }
 0x530   :  { %5082 = vst.msk [vmem:[#allocation3 + $0xe8] sm:$0xff] %vm5052_vm7, %v4907_v32 }
 0x531   :  { %v4496_v60 = vpop.permute.xlu1 %4495  ;;  %v5622_v46 = vld [vmem:[#allocation3 + $0xc0] sm:$0xff]  ;;  %4541 = vrot.lane.b32.xlu0 %v4286_v58, %s6797_s8  ;;  %v4767_v58 = vld [vmem:[#allocation2 + $0x1e8] sm:$0xff] }
 0x532   :  { %4672 = vst.msk [vmem:[#allocation3 + $0xe0] sm:$0xff] %vm4643_vm0, %v4496_v60  ;;  %v5678_v57 = vpack.c.bf16 %v5623_v19, %v5622_v46  ;;  %v10774_v46 = vld [vmem:[#allocation46_spill] sm:$0xff] }
 0x533   :  { %5417 = vrot.lane.b32.xlu1 %v5167_v50, %s6799_s15  ;;  %v4911_v34 = vpop.permute.xlu0 %4910  ;;  %v4357_v19 = vmul.f32 %v10774_v46, %v4289_v17  ;;  %v5174_v50 = vld [vmem:[#allocation2 + $0x1d9] sm:$0xff]  ;;  %v5179_v46 = vld [vmem:[#allocation2 + $0x201] sm:$0xff] }
 0x534   :  { %6699 = vmatprep.mubr.msk.bf16.mxu1 %vm5727_vm9, %v5678_v57  ;;  %5084 = vst.msk [vmem:[#allocation3 + $0xf8] sm:$0xff] %vm5052_vm7, %v4911_v34  ;;  %v5242_v15 = vmul.f32 %v9168_v48, %v5174_v50  ;;  %v4766_v48 = vld [vmem:[#allocation2 + $0x1e0] sm:$0xff]  ;;  %v4295_v50 = vld [vmem:[#allocation2 + $0x20f] sm:$0xff] }
 0x535   :  { %v4500_v52 = vpop.permute.xlu1 %4499  ;;  %v5624_v11 = vld [vmem:[#allocation3 + $0xd0] sm:$0xff]  ;;  %4946 = vrot.lane.b32.xlu0 %v4761_v38, %s6798_s11 }
 0x536   :  { %4674 = vst.msk [vmem:[#allocation3 + $0xf0] sm:$0xff] %vm4643_vm0, %v4500_v52  ;;  %v5679_v44 = vpack.c.bf16 %v5625_v8, %v5624_v11  ;;  %v5176_v52 = vld [vmem:[#allocation2 + $0x1e9] sm:$0xff] }
 0x537   :  { %4535 = vrot.lane.b32.xlu1 %v4351_v1, %s6797_s8  ;;  %v5384_v37 = vpop.permute.xlu0 %5383  ;;  %v4764_v38 = vld [vmem:[#allocation2 + $0x1d0] sm:$0xff]  ;;  %v5244_v1 = vmul.f32 %v9192_v9, %v5176_v52 }
 0x538   :  { %6700 = vmatmul.mubr.msk.bf16.gmra.mrb[20].mxu1 %vm5727_vm9, %v5679_v44  ;;  %5559 = vst.msk [vmem:[#allocation3 + $0xe8] sm:$0xff] %vm5529_vm8, %v5384_v37  ;;  %v5173_v9 = vld [vmem:[#allocation2 + $0x1d1] sm:$0xff] }
 0x539   :  { %v4905_v13 = vpop.permute.xlu1 %4904  ;;  %4950 = vrot.lane.b32.xlu0 %v4763_v62, %s6798_s11  ;;  %v4294_v62 = vld [vmem:[#allocation2 + $0x207] sm:$0xff]  ;;  %v10777_v52 = vld [vmem:[#allocation54_spill] sm:$0xff] }
 0x53a   :  { %5081 = vst.msk [vmem:[#allocation3 + $0xe0] sm:$0xff] %vm5052_vm7, %v4905_v13 }
 0x53b   :  { %4539 = vrot.lane.b32.xlu1 %v4353_v49, %s6797_s8  ;;  %v5388_v25 = vpop.permute.xlu0 %5387 }
 0x53c   :  { %5561 = vst.msk [vmem:[#allocation3 + $0xf8] sm:$0xff] %vm5529_vm8, %v5388_v25 }
 0x53d   :  { %v4909_v18 = vpop.permute.xlu1 %4908  ;;  %5423 = vrot.lane.b32.xlu0 %v5238_v0, %s6799_s15  ;;  %v4291_v0 = vld [vmem:[#allocation2 + $0x1ef] sm:$0xff] }
 0x53e   :  { %5083 = vst.msk [vmem:[#allocation3 + $0xf0] sm:$0xff] %vm5052_vm7, %v4909_v18 }
 0x53f   :  { %4944 = vrot.lane.b32.xlu1 %v4760_v61, %s6798_s11  ;;  %v4506_v63 = vpop.permute.xlu0 %4505  ;;  %v5627_v29 = vld [vmem:[#allocation3 + $0xe8] sm:$0xff]  ;;  %v4769_v61 = vld [vmem:[#allocation2 + $0x1f8] sm:$0xff] }
 0x540   :  { %4677 = vst.msk [vmem:[#allocation3 + $0x108] sm:$0xff] %vm4643_vm0, %v4506_v63  ;;  %v10775_v63 = vld [vmem:[#allocation50_spill] sm:$0xff] }
 0x541   :  { %v5382_v55 = vpop.permute.xlu1 %5381  ;;  %5427 = vrot.lane.b32.xlu0 %v5240_v24, %s6799_s15  ;;  %v4359_v24 = vmul.f32 %v10775_v63, %v4291_v0 }
 0x542   :  { %5558 = vst.msk [vmem:[#allocation3 + $0xe0] sm:$0xff] %vm5529_vm8, %v5382_v55 }
 0x543   :  { %4948 = vrot.lane.b32.xlu1 %v4762_v33, %s6798_s11  ;;  %v4510_v56 = vpop.permute.xlu0 %4509  ;;  %v5629_v10 = vld [vmem:[#allocation3 + $0xf8] sm:$0xff] }
 0x544   :  { %4679 = vst.msk [vmem:[#allocation3 + $0x118] sm:$0xff] %vm4643_vm0, %v4510_v56 }
 0x545   :  { %v5386_v27 = vpop.permute.xlu1 %5385  ;;  %4545 = vrot.lane.b32.xlu0 %v4288_v3, %s6797_s8 }
 0x546   :  { %5560 = vst.msk [vmem:[#allocation3 + $0xf0] sm:$0xff] %vm5529_vm8, %v5386_v27  ;;  %v4293_v27 = vld [vmem:[#allocation2 + $0x1ff] sm:$0xff] }
 0x547   :  { %5421 = vrot.lane.b32.xlu1 %v5169_v31, %s6799_s15  ;;  %v4915_v42 = vpop.permute.xlu0 %4914 }
 0x548   :  { %5086 = vst.msk [vmem:[#allocation3 + $0x108] sm:$0xff] %vm5052_vm7, %v4915_v42  ;;  %v4771_v42 = vld [vmem:[#allocation2 + $0x208] sm:$0xff] }
 0x549   :  { %v4504_v30 = vpop.permute.xlu1 %4503  ;;  %v5626_v20 = vld [vmem:[#allocation3 + $0xe0] sm:$0xff]  ;;  %4549 = vrot.lane.b32.xlu0 %v4290_v26, %s6797_s8 }
 0x54a   :  { %4676 = vst.msk [vmem:[#allocation3 + $0x100] sm:$0xff] %vm4643_vm0, %v4504_v30  ;;  %v5680_v59 = vpack.c.bf16 %v5627_v29, %v5626_v20  ;;  %v10776_v30 = vld [vmem:[#allocation51_spill] sm:$0xff] }
 0x54b   :  { %5425 = vrot.lane.b32.xlu1 %v5171_v41, %s6799_s15  ;;  %v4919_v54 = vpop.permute.xlu0 %4918  ;;  %v4361_v26 = vmul.f32 %v10776_v30, %v4293_v27  ;;  %v5178_v20 = vld [vmem:[#allocation2 + $0x1f9] sm:$0xff] }
 0x54c   :  { %6703 = vmatprep.mubr.msk.bf16.mxu1 %vm5727_vm9, %v5680_v59  ;;  %5088 = vst.msk [vmem:[#allocation3 + $0x118] sm:$0xff] %vm5052_vm7, %v4919_v54  ;;  %v5246_v41 = vmul.f32 %v8908_v45, %v5178_v20  ;;  %v4770_v45 = vld [vmem:[#allocation2 + $0x200] sm:$0xff] }
 0x54d   :  { %v4508_v22 = vpop.permute.xlu1 %4507  ;;  %v5628_v14 = vld [vmem:[#allocation3 + $0xf0] sm:$0xff]  ;;  %4954 = vrot.lane.b32.xlu0 %v4765_v16, %s6798_s11 }
 0x54e   :  { %4678 = vst.msk [vmem:[#allocation3 + $0x110] sm:$0xff] %vm4643_vm0, %v4508_v22  ;;  %v5681_v28 = vpack.c.bf16 %v5629_v10, %v5628_v14  ;;  %v4768_v10 = vld [vmem:[#allocation2 + $0x1f0] sm:$0xff]  ;;  %v5248_v22 = vmul.f32 %v8886_v4, %v5180_v47  ;;  %v10042_v47 = vld [vmem:[#allocation2 + $0x239] sm:$0xff] }
 0x54f   :  { %4543 = vrot.lane.b32.xlu1 %v4355_v40, %s6797_s8  ;;  %v5392_v32 = vpop.permute.xlu0 %5391  ;;  %v4296_v14 = vld [vmem:[#allocation2 + $0x217] sm:$0xff] }
 0x550   :  { %6704 = vmatmul.mubr.msk.bf16.gmra.mrb[24].mxu1 %vm5727_vm9, %v5681_v28  ;;  %5563 = vst.msk [vmem:[#allocation3 + $0x108] sm:$0xff] %vm5529_vm8, %v5392_v32  ;;  %v5177_v4 = vld [vmem:[#allocation2 + $0x1f1] sm:$0xff]  ;;  %v4298_v32 = vld [vmem:[#allocation2 + $0x227] sm:$0xff] }
 0x551   :  { %v4913_v60 = vpop.permute.xlu1 %4912  ;;  %4958 = vrot.lane.b32.xlu0 %v4767_v58, %s6798_s11 }
 0x552   :  { %5085 = vst.msk [vmem:[#allocation3 + $0x100] sm:$0xff] %vm5052_vm7, %v4913_v60 }
 0x553   :  { %4547 = vrot.lane.b32.xlu1 %v4357_v19, %s6797_s8  ;;  %v5396_v57 = vpop.permute.xlu0 %5395 }
 0x554   :  { %5565 = vst.msk [vmem:[#allocation3 + $0x118] sm:$0xff] %vm5529_vm8, %v5396_v57 }
 0x555   :  { %v4917_v34 = vpop.permute.xlu1 %4916  ;;  %5431 = vrot.lane.b32.xlu0 %v5242_v15, %s6799_s15 }
 0x556   :  { %5087 = vst.msk [vmem:[#allocation3 + $0x110] sm:$0xff] %vm5052_vm7, %v4917_v34  ;;  %v4773_v34 = vld [vmem:[#allocation2 + $0x218] sm:$0xff] }
 0x557   :  { %4952 = vrot.lane.b32.xlu1 %v4764_v38, %s6798_s11  ;;  %v4514_v12 = vpop.permute.xlu0 %4513  ;;  %v5631_v49 = vld [vmem:[#allocation3 + $0x108] sm:$0xff]  ;;  %v4363_v38 = vmul.f32 %v10777_v52, %v4295_v50 }
 0x558   :  { %4681 = vst.msk [vmem:[#allocation3 + $0x128] sm:$0xff] %vm4643_vm0, %v4514_v12 }
 0x559   :  { %v5390_v11 = vpop.permute.xlu1 %5389  ;;  %5435 = vrot.lane.b32.xlu0 %v5244_v1, %s6799_s15 }
 0x55a   :  { %5562 = vst.msk [vmem:[#allocation3 + $0x100] sm:$0xff] %vm5529_vm8, %v5390_v11 }
 0x55b   :  { %4956 = vrot.lane.b32.xlu1 %v4766_v48, %s6798_s11  ;;  %v4518_v8 = vpop.permute.xlu0 %4517  ;;  %v5633_v33 = vld [vmem:[#allocation3 + $0x118] sm:$0xff] }
 0x55c   :  { %4683 = vst.msk [vmem:[#allocation3 + $0x138] sm:$0xff] %vm4643_vm0, %v4518_v8  ;;  %v4297_v48 = vld [vmem:[#allocation2 + $0x21f] sm:$0xff] }
 0x55d   :  { %v5394_v44 = vpop.permute.xlu1 %5393  ;;  %4553 = vrot.lane.b32.xlu0 %v4292_v43, %s6797_s8  ;;  %v4775_v43 = vld [vmem:[#allocation2 + $0x228] sm:$0xff] }
 0x55e   :  { %5564 = vst.msk [vmem:[#allocation3 + $0x110] sm:$0xff] %vm5529_vm8, %v5394_v44 }
 0x55f   :  { %5429 = vrot.lane.b32.xlu1 %v5173_v9, %s6799_s15  ;;  %v4923_v37 = vpop.permute.xlu0 %4922  ;;  %v10778_v9 = vld [vmem:[#allocation55_spill] sm:$0xff] }
 0x560   :  { %5090 = vst.msk [vmem:[#allocation3 + $0x128] sm:$0xff] %vm5052_vm7, %v4923_v37  ;;  %v4365_v37 = vmul.f32 %v10778_v9, %v4297_v48 }
 0x561   :  { %v4512_v13 = vpop.permute.xlu1 %4511  ;;  %v5630_v53 = vld [vmem:[#allocation3 + $0x100] sm:$0xff]  ;;  %4557 = vrot.lane.b32.xlu0 %v4294_v62, %s6797_s8 }
 0x562   :  { %4680 = vst.msk [vmem:[#allocation3 + $0x120] sm:$0xff] %vm4643_vm0, %v4512_v13  ;;  %v5682_v25 = vpack.c.bf16 %v5631_v49, %v5630_v53  ;;  %v5182_v13 = vld [vmem:[#allocation2 + $0x219] sm:$0xff] }
 0x563   :  { %5433 = vrot.lane.b32.xlu1 %v5175_v35, %s6799_s15  ;;  %v4927_v18 = vpop.permute.xlu0 %4926  ;;  %v5250_v53 = vmul.f32 %v9006_v23, %v5182_v13  ;;  %v5184_v35 = vld [vmem:[#allocation2 + $0x229] sm:$0xff]  ;;  %v4774_v23 = vld [vmem:[#allocation2 + $0x220] sm:$0xff]  ;;  %v4300_v13 = vld [vmem:[#allocation2 + $0x237] sm:$0xff] }
 0x564   :  { %6707 = vmatprep.mubr.msk.bf16.mxu1 %vm5727_vm9, %v5682_v25  ;;  %5092 = vst.msk [vmem:[#allocation3 + $0x138] sm:$0xff] %vm5052_vm7, %v4927_v18  ;;  %v4772_v25 = vld [vmem:[#allocation2 + $0x210] sm:$0xff]  ;;  %v5252_v18 = vmul.f32 %v8983_v21, %v5184_v35  ;;  %v4238_v35 = vld [vmem:[#allocation2 + $0x47] sm:$0xff] }
 0x565   :  { %v4516_v36 = vpop.permute.xlu1 %4515  ;;  %v5632_v55 = vld [vmem:[#allocation3 + $0x110] sm:$0xff]  ;;  %4962 = vrot.lane.b32.xlu0 %v4769_v61, %s6798_s11 }
 0x566   :  { %4682 = vst.msk [vmem:[#allocation3 + $0x130] sm:$0xff] %vm4643_vm0, %v4516_v36  ;;  %v5683_v56 = vpack.c.bf16 %v5633_v33, %v5632_v55  ;;  %v4235_v61 = vld [vmem:[#allocation2 + $0x2f] sm:$0xff] }
 0x567   :  { %4551 = vrot.lane.b32.xlu1 %v4359_v24, %s6797_s8  ;;  %v5400_v3 = vpop.permute.xlu0 %5399  ;;  %v10779_v24 = vld [vmem:[#allocation4_spill] sm:$0xff]  ;;  %v5181_v21 = vld [vmem:[#allocation2 + $0x211] sm:$0xff] }
 0x568   :  { %6708 = vmatmul.mubr.msk.bf16.gmra.mrb[28].mxu1 %vm5727_vm9, %v5683_v56  ;;  %5567 = vst.msk [vmem:[#allocation3 + $0x128] sm:$0xff] %vm5529_vm8, %v5400_v3  ;;  %v4303_v55 = vmul.f32 %v10779_v24, %v4235_v61  ;;  %v4299_v56 = vld [vmem:[#allocation2 + $0x22f] sm:$0xff]  ;;  %v10780_v3 = vld [vmem:[#allocation59_spill] sm:$0xff]  ;;  %v4778_v61 = vld [vmem:[#allocation2 + $0x240] sm:$0xff] }
 0x569   :  { %v4921_v31 = vpop.permute.xlu1 %4920  ;;  %4966 = vrot.lane.b32.xlu0 %v4771_v42, %s6798_s11  ;;  %v4237_v42 = vld [vmem:[#allocation2 + $0x3f] sm:$0xff] }
 0x56a   :  { %5089 = vst.msk [vmem:[#allocation3 + $0x120] sm:$0xff] %vm5052_vm7, %v4921_v31  ;;  %v4367_v31 = vmul.f32 %v10780_v3, %v4299_v56 }
 0x56b   :  { %4555 = vrot.lane.b32.xlu1 %v4361_v26, %s6797_s8  ;;  %v5404_v29 = vpop.permute.xlu0 %5403  ;;  %v10038_v26 = vld [vmem:[%s10502_s3] ss:$0 sm:$0xff] }
 0x56c   :  { %5569 = vst.msk [vmem:[#allocation3 + $0x138] sm:$0xff] %vm5529_vm8, %v5404_v29 }
 0x56d   :  { %v4925_v59 = vpop.permute.xlu1 %4924  ;;  %5439 = vrot.lane.b32.xlu0 %v5246_v41, %s6799_s15  ;;  %v5183_v41 = vld [vmem:[#allocation2 + $0x221] sm:$0xff] }
 0x56e   :  { %5091 = vst.msk [vmem:[#allocation3 + $0x130] sm:$0xff] %vm5052_vm7, %v4925_v59 }
 0x56f   :  { %4960 = vrot.lane.b32.xlu1 %v4768_v10, %s6798_s11  ;;  %v4522_v54 = vpop.permute.xlu0 %4521  ;;  %v5635_v58 = vld [vmem:[#allocation3 + $0x128] sm:$0xff] }
 0x570   :  { %4685 = vst.msk [vmem:[#allocation3 + $0x148] sm:$0xff] %vm4643_vm0, %v4522_v54 }
 0x571   :  { %v5398_v16 = vpop.permute.xlu1 %5397  ;;  %5443 = vrot.lane.b32.xlu0 %v5248_v22, %s6799_s15 }
 0x572   :  { %5566 = vst.msk [vmem:[#allocation3 + $0x120] sm:$0xff] %vm5529_vm8, %v5398_v16 }
 0x573   :  { %4964 = vrot.lane.b32.xlu1 %v4770_v45, %s6798_s11  ;;  %v4526_v7 = vpop.permute.xlu0 %4525  ;;  %v5637_v1 = vld [vmem:[#allocation3 + $0x138] sm:$0xff]  ;;  %v10781_v45 = vld [vmem:[#allocation6_spill] sm:$0xff] }
 0x574   :  { %4687 = vst.msk [vmem:[#allocation3 + $0x158] sm:$0xff] %vm4643_vm0, %v4526_v7  ;;  %v4305_v7 = vmul.f32 %v10781_v45, %v4237_v42 }
 0x575   :  { %v5402_v40 = vpop.permute.xlu1 %5401  ;;  %4561 = vrot.lane.b32.xlu0 %v4296_v14, %s6797_s8 }
 0x576   :  { %5568 = vst.msk [vmem:[#allocation3 + $0x130] sm:$0xff] %vm5529_vm8, %v5402_v40 }
 0x577   :  { %5437 = vrot.lane.b32.xlu1 %v5177_v4, %s6799_s15  ;;  %v4931_v28 = vpop.permute.xlu0 %4930 }
 0x578   :  { %5094 = vst.msk [vmem:[#allocation3 + $0x148] sm:$0xff] %vm5052_vm7, %v4931_v28  ;;  %v3893_v28 = vmul.f32 %v9324_v6, %v10042_v47 }
 0x579   :  { %v4520_v17 = vpop.permute.xlu1 %4519  ;;  %v5634_v60 = vld [vmem:[#allocation3 + $0x120] sm:$0xff]  ;;  %4565 = vrot.lane.b32.xlu0 %v4298_v32, %s6797_s8 }
 0x57a   :  { %4684 = vst.msk [vmem:[#allocation3 + $0x140] sm:$0xff] %vm4643_vm0, %v4520_v17  ;;  %v5684_v19 = vpack.c.bf16 %v5635_v58, %v5634_v60  ;;  %v4301_v60 = vld [vmem:[#allocation2 + $0x23f] sm:$0xff] }
 0x57b   :  { %5441 = vrot.lane.b32.xlu1 %v5179_v46, %s6799_s15  ;;  %v4935_v57 = vpop.permute.xlu0 %4934 }
 0x57c   :  { %6711 = vmatprep.mubr.msk.bf16.mxu1 %vm5727_vm9, %v5684_v19  ;;  %5096 = vst.msk [vmem:[#allocation3 + $0x158] sm:$0xff] %vm5052_vm7, %v4935_v57 }
 0x57d   :  { %v4524_v15 = vpop.permute.xlu1 %4523  ;;  %v5636_v12 = vld [vmem:[#allocation3 + $0x130] sm:$0xff]  ;;  %4970 = vrot.lane.b32.xlu0 %v4773_v34, %s6798_s11 }
 0x57e   :  { %4686 = vst.msk [vmem:[#allocation3 + $0x150] sm:$0xff] %vm4643_vm0, %v4524_v15  ;;  %v5685_v11 = vpack.c.bf16 %v5637_v1, %v5636_v12  ;;  %v4369_v12 = vmul.f32 %v8988_v39, %v4301_v60  ;;  %v4236_v39 = vld [vmem:[#allocation2 + $0x37] sm:$0xff] }
 0x57f   :  { %4559 = vrot.lane.b32.xlu1 %v4363_v38, %s6797_s8  ;;  %v5408_v8 = vpop.permute.xlu0 %5407 }
 0x580   :  { %6712 = vmatmul.mubr.msk.bf16.gmra.mrb[32].mxu1 %vm5727_vm9, %v5685_v11  ;;  %5571 = vst.msk [vmem:[#allocation3 + $0x148] sm:$0xff] %vm5529_vm8, %v5408_v8 }
 0x581   :  { %v4929_v44 = vpop.permute.xlu1 %4928  ;;  %4974 = vrot.lane.b32.xlu0 %v4775_v43, %s6798_s11 }
 0x582   :  { %5093 = vst.msk [vmem:[#allocation3 + $0x140] sm:$0xff] %vm5052_vm7, %v4929_v44 }
 0x583   :  { %4563 = vrot.lane.b32.xlu1 %v4365_v37, %s6797_s8  ;;  %v5412_v62 = vpop.permute.xlu0 %5411  ;;  %v4712_v37 = vld [vmem:[#allocation2 + $0x30] sm:$0xff] }
 0x584   :  { %5573 = vst.msk [vmem:[#allocation3 + $0x158] sm:$0xff] %vm5529_vm8, %v5412_v62 }
 0x585   :  { %v4933_v49 = vpop.permute.xlu1 %4932  ;;  %5447 = vrot.lane.b32.xlu0 %v5250_v53, %s6799_s15 }
 0x586   :  { %5095 = vst.msk [vmem:[#allocation3 + $0x150] sm:$0xff] %vm5052_vm7, %v4933_v49  ;;  %v4776_v49 = vld [vmem:[#allocation2 + $0x230] sm:$0xff] }
 0x587   :  { %4968 = vrot.lane.b32.xlu1 %v4772_v25, %s6798_s11  ;;  %v4530_v0 = vpop.permute.xlu0 %4529  ;;  %v5639_v29 = vld [vmem:[#allocation3 + $0x148] sm:$0xff] }
 0x588   :  { %4689 = vst.msk [vmem:[#allocation3 + $0x168] sm:$0xff] %vm4643_vm0, %v4530_v0  ;;  %v4302_v0 = vld [vmem:[#allocation2 + $0x247] sm:$0xff] }
 0x589   :  { %v5406_v36 = vpop.permute.xlu1 %5405  ;;  %5451 = vrot.lane.b32.xlu0 %v5252_v18, %s6799_s15 }
 0x58a   :  { %5570 = vst.msk [vmem:[#allocation3 + $0x140] sm:$0xff] %vm5529_vm8, %v5406_v36  ;;  %v4714_v36 = vld [vmem:[#allocation2 + $0x40] sm:$0xff] }
 0x58b   :  { %4972 = vrot.lane.b32.xlu1 %v4774_v23, %s6798_s11  ;;  %v4534_v63 = vpop.permute.xlu0 %4533  ;;  %v5641_v32 = vld [vmem:[#allocation3 + $0x158] sm:$0xff] }
 0x58c   :  { %4691 = vst.msk [vmem:[#allocation3 + $0x178] sm:$0xff] %vm4643_vm0, %v4534_v63 }
 0x58d   :  { %v5410_v33 = vpop.permute.xlu1 %5409  ;;  %4439 = vrot.lane.b32.xlu0 %v4303_v55, %s6797_s8 }
 0x58e   :  { %5572 = vst.msk [vmem:[#allocation3 + $0x150] sm:$0xff] %vm5529_vm8, %v5410_v33  ;;  %v4713_v33 = vld [vmem:[#allocation2 + $0x38] sm:$0xff] }
 0x58f   :  { %5445 = vrot.lane.b32.xlu1 %v5181_v21, %s6799_s15  ;;  %v4939_v27 = vpop.permute.xlu0 %4938 }
 0x590   :  { %5098 = vst.msk [vmem:[#allocation3 + $0x168] sm:$0xff] %vm5052_vm7, %v4939_v27 }
 0x591   :  { %v4528_v30 = vpop.permute.xlu1 %4527  ;;  %v5638_v20 = vld [vmem:[#allocation3 + $0x140] sm:$0xff]  ;;  %4567 = vrot.lane.b32.xlu0 %v4367_v31, %s6797_s8 }
 0x592   :  { %4688 = vst.msk [vmem:[#allocation3 + $0x160] sm:$0xff] %vm4643_vm0, %v4528_v30  ;;  %v5686_v59 = vpack.c.bf16 %v5639_v29, %v5638_v20  ;;  %v5121_v29 = vld [vmem:[#allocation2 + $0x31] sm:$0xff] }
 0x593   :  { %v6681_v10 = vpop.f32.mrb[0].mxu1  ;;  %5449 = vrot.lane.b32.xlu1 %v5183_v41, %s6799_s15  ;;  %v4943_v22 = vpop.permute.xlu0 %4942 }
 0x594   :  { %v5892_v54 = vadd.f32 %v6681_v10, %v10038_v26  ;;  %v5883_v16 = vpop.f32.mrb[1].mxu1  ;;  %6715 = vmatprep.mubr.msk.bf16.mxu1 %vm5727_vm9, %v5686_v59  ;;  %5100 = vst.msk [vmem:[#allocation3 + $0x178] sm:$0xff] %vm5052_vm7, %v4943_v22 }
 0x595   :  { %v5884_v40 = vadd.f32 %v10038_v26, %v5883_v16  ;;  %v6682_v14 = vpop.f32.mrb[2].mxu1  ;;  %v4532_v4 = vpop.permute.xlu1 %4531  ;;  %v5640_v17 = vld [vmem:[#allocation3 + $0x150] sm:$0xff]  ;;  %4443 = vrot.lane.b32.xlu0 %v4305_v7, %s6797_s8  ;;  %v4777_v16 = vld [vmem:[#allocation2 + $0x238] sm:$0xff] }
 0x596   :  { %vm6140_vm6 = vcmp.gt.f32.partialorder %v5892_v54, 0.0  ;;  %v6204_v58 = vmul.f32 0.01, %v5892_v54  ;;  %v5895_v46 = vadd.f32 %v6682_v14, %v10038_v26  ;;  %4690 = vst.msk [vmem:[#allocation3 + $0x170] sm:$0xff] %vm4643_vm0, %v4532_v4  ;;  %v5886_v19 = vpop.f32.mrb[3].mxu1  ;;  %v5687_v50 = vpack.c.bf16 %v5641_v32, %v5640_v17 }
 0x597   :  { %vm6138_vm4 = vcmp.gt.f32.partialorder %v5884_v40, 0.0  ;;  %v6202_v57 = vmul.f32 0.01, %v5884_v40  ;;  %v5887_v15 = vadd.f32 %v10038_v26, %v5886_v19  ;;  %4096 = vrot.lane.b32.xlu1 %v3893_v28, %s6796_s0  ;;  %v5416_v38 = vpop.permute.xlu0 %5415  ;;  %v4715_v19 = vld [vmem:[#allocation2 + $0x48] sm:$0xff] }
 0x598   :  { %v6268_v34 = vsel %vm6140_vm6, %v5892_v54, %v6204_v58  ;;  %vm6141_vm14 = vcmp.gt.f32.partialorder %v5895_v46, 0.0  ;;  %v6205_v52 = vmul.f32 0.01, %v5895_v46  ;;  %6716 = vmatmul.mubr.msk.bf16.gmra.mrb[36].mxu1 %vm5727_vm9, %v5687_v50  ;;  %5575 = vst.msk [vmem:[#allocation3 + $0x168] sm:$0xff] %vm5529_vm8, %v5416_v38  ;;  %v5185_v58 = vld [vmem:[#allocation2 + $0x231] sm:$0xff]  ;;  %v5122_v38 = vld [vmem:[#allocation2 + $0x39] sm:$0xff] }
 0x599   :  { %6333 = vst.msk [vmem:[%s10503_s4 + $0x30] sm:$0xff] %vm6326_vm3, %v6268_v34  ;;  %v6266_v1 = vsel %vm6138_vm4, %v5884_v40, %v6202_v57  ;;  %vm6139_vm1 = vcmp.gt.f32.partialorder %v5887_v15, 0.0  ;;  %v6203_v11 = vmul.f32 0.01, %v5887_v15  ;;  %v4937_v48 = vpop.permute.xlu1 %4936  ;;  %4571 = vrot.lane.b32.xlu0 %v4369_v12, %s6797_s8  ;;  %v5187_v12 = vld [vmem:[#allocation2 + $0x241] sm:$0xff] }
 0x59a   :  { %6331 = vst.msk [vmem:[%s10503_s4 + $0x20] sm:$0xff] %vm6326_vm3, %v6266_v1  ;;  %v6269_v8 = vsel %vm6141_vm14, %v5895_v46, %v6205_v52  ;;  %v5123_v52 = vld [vmem:[#allocation2 + $0x41] sm:$0xff] }
 0x59b   :  { %5097 = vst.msk [vmem:[#allocation3 + $0x160] sm:$0xff] %vm5052_vm7, %v4937_v48  ;;  %v6267_v44 = vsel %vm6139_vm1, %v5887_v15, %v6203_v11  ;;  %4441 = vrot.lane.b32.xlu1 %v4236_v39, %s6797_s8  ;;  %v5420_v43 = vpop.permute.xlu0 %5419  ;;  %v4779_v15 = vld [vmem:[#allocation2 + $0x248] sm:$0xff]  ;;  %v5190_v48 = vmul.f32 %v7870_v5, %v5122_v38 }
 0x59c   :  { %6334 = vst.msk [vmem:[%s10503_s4 + $0x38] sm:$0xff] %vm6326_vm3, %v6269_v8  ;;  %6332 = vst.msk [vmem:[%s10503_s4 + $0x28] sm:$0xff] %vm6326_vm3, %v6267_v44  ;;  %v5254_v44 = vmul.f32 %v9308_v2, %v10042_v47  ;;  %v5188_v5 = vld [vmem:[#allocation2 + $0x249] sm:$0xff] }
 0x59d   :  { %5577 = vst.msk [vmem:[#allocation3 + $0x178] sm:$0xff] %vm5529_vm8, %v5420_v43  ;;  %v4941_v9 = vpop.permute.xlu1 %4940  ;;  %4848 = vrot.lane.b32.xlu0 %v4712_v37, %s6798_s11  ;;  %v5124_v43 = vld [vmem:[#allocation2 + $0x49] sm:$0xff]  ;;  %v5256_v2 = vmul.f32 %v9324_v6, %v5188_v5 }
 0x59e   :  { %5099 = vst.msk [vmem:[#allocation3 + $0x170] sm:$0xff] %vm5052_vm7, %v4941_v9 }
 0x59f   :  { %4569 = vrot.lane.b32.xlu1 %v4300_v13, %s6797_s8  ;;  %v4538_v62 = vpop.permute.xlu0 %4537  ;;  %v5643_v55 = vld [vmem:[#allocation3 + $0x168] sm:$0xff]  ;;  %v5192_v13 = vmul.f32 %v7875_v51, %v5124_v43 }
 0x5a0   :  { %4693 = vst.msk [vmem:[#allocation3 + $0x188] sm:$0xff] %vm4643_vm0, %v4538_v62 }
 0x5a1   :  { %v5414_v53 = vpop.permute.xlu1 %5413  ;;  %4976 = vrot.lane.b32.xlu0 %v4776_v49, %s6798_s11 }
 0x5a2   :  { %5574 = vst.msk [vmem:[#allocation3 + $0x160] sm:$0xff] %vm5529_vm8, %v5414_v53 }
 0x5a3   :  { %4445 = vrot.lane.b32.xlu1 %v4238_v35, %s6797_s8  ;;  %v4542_v25 = vpop.permute.xlu0 %4541 }
 0x5a4   :  { %4695 = vst.msk [vmem:[#allocation3 + $0x198] sm:$0xff] %vm4643_vm0, %v4542_v25  ;;  %v5645_v59 = vld [vmem:[#allocation3 + $0x178] sm:$0xff] }
 0x5a5   :  { %v5418_v18 = vpop.permute.xlu1 %5417  ;;  %4852 = vrot.lane.b32.xlu0 %v4714_v36, %s6798_s11 }
 0x5a6   :  { %5576 = vst.msk [vmem:[#allocation3 + $0x170] sm:$0xff] %vm5529_vm8, %v5418_v18 }
 0x5a7   :  { %4573 = vrot.lane.b32.xlu1 %v4302_v0, %s6797_s8  ;;  %v4947_v23 = vpop.permute.xlu0 %4946 }
 0x5a8   :  { %5102 = vst.msk [vmem:[#allocation3 + $0x188] sm:$0xff] %vm5052_vm7, %v4947_v23 }
 0x5a9   :  { %v4536_v63 = vpop.permute.xlu1 %4535  ;;  %v5642_v24 = vld [vmem:[#allocation3 + $0x160] sm:$0xff]  ;;  %4980 = vrot.lane.b32.xlu0 %v4778_v61, %s6798_s11 }
 0x5aa   :  { %4692 = vst.msk [vmem:[#allocation3 + $0x180] sm:$0xff] %vm4643_vm0, %v4536_v63  ;;  %v5688_v56 = vpack.c.bf16 %v5643_v55, %v5642_v24 }
 0x5ab   :  { %v6685_v21 = vpop.f32.mrb[4].mxu1  ;;  %4850 = vrot.lane.b32.xlu1 %v4713_v33, %s6798_s11  ;;  %v4951_v3 = vpop.permute.xlu0 %4950 }
 0x5ac   :  { %v5908_v27 = vadd.f32 %v6685_v21, %v10038_v26  ;;  %v5899_v31 = vpop.f32.mrb[5].mxu1  ;;  %6719 = vmatprep.mubr.msk.bf16.mxu1 %vm5727_vm9, %v5688_v56  ;;  %5104 = vst.msk [vmem:[#allocation3 + $0x198] sm:$0xff] %vm5052_vm7, %v4951_v3 }
 0x5ad   :  { %v5900_v42 = vadd.f32 %v10038_v26, %v5899_v31  ;;  %v6686_v30 = vpop.f32.mrb[6].mxu1  ;;  %v4540_v20 = vpop.permute.xlu1 %4539  ;;  %v5644_v41 = vld [vmem:[#allocation3 + $0x170] sm:$0xff]  ;;  %5325 = vrot.lane.b32.xlu0 %v5121_v29, %s6799_s15 }
 0x5ae   :  { %vm6144_vm10 = vcmp.gt.f32.partialorder %v5908_v27, 0.0  ;;  %v6208_v10 = vmul.f32 0.01, %v5908_v27  ;;  %v5911_v54 = vadd.f32 %v6686_v30, %v10038_v26  ;;  %4694 = vst.msk [vmem:[#allocation3 + $0x190] sm:$0xff] %vm4643_vm0, %v4540_v20  ;;  %v5902_v22 = vpop.f32.mrb[7].mxu1  ;;  %v5689_v45 = vpack.c.bf16 %v5645_v59, %v5644_v41 }
 0x5af   :  { %vm6142_vm11 = vcmp.gt.f32.partialorder %v5900_v42, 0.0  ;;  %v6206_v7 = vmul.f32 0.01, %v5900_v42  ;;  %v5903_v40 = vadd.f32 %v10038_v26, %v5902_v22  ;;  %4978 = vrot.lane.b32.xlu1 %v4777_v16, %s6798_s11  ;;  %v5424_v28 = vpop.permute.xlu0 %5423 }
 0x5b0   :  { %v6272_v14 = vsel %vm6144_vm10, %v5908_v27, %v6208_v10  ;;  %vm6145_vm12 = vcmp.gt.f32.partialorder %v5911_v54, 0.0  ;;  %v6209_v4 = vmul.f32 0.01, %v5911_v54  ;;  %6720 = vmatmul.mubr.msk.bf16.gmra.mrb[40].mxu1 %vm5727_vm9, %v5689_v45  ;;  %5579 = vst.msk [vmem:[#allocation3 + $0x188] sm:$0xff] %vm5529_vm8, %v5424_v28 }
 0x5b1   :  { %6337 = vst.msk [vmem:[%s10503_s4 + $0x50] sm:$0xff] %vm6326_vm3, %v6272_v14  ;;  %v6270_v17 = vsel %vm6142_vm11, %v5900_v42, %v6206_v7  ;;  %vm6143_vm13 = vcmp.gt.f32.partialorder %v5903_v40, 0.0  ;;  %v6207_v32 = vmul.f32 0.01, %v5903_v40  ;;  %v4945_v60 = vpop.permute.xlu1 %4944  ;;  %5453 = vrot.lane.b32.xlu0 %v5185_v58, %s6799_s15 }
 0x5b2   :  { %6335 = vst.msk [vmem:[%s10503_s4 + $0x40] sm:$0xff] %vm6326_vm3, %v6270_v17  ;;  %v6273_v46 = vsel %vm6145_vm12, %v5911_v54, %v6209_v4 }
 0x5b3   :  { %5101 = vst.msk [vmem:[#allocation3 + $0x180] sm:$0xff] %vm5052_vm7, %v4945_v60  ;;  %v6271_v50 = vsel %vm6143_vm13, %v5903_v40, %v6207_v32  ;;  %4854 = vrot.lane.b32.xlu1 %v4715_v19, %s6798_s11  ;;  %v5428_v57 = vpop.permute.xlu0 %5427 }
 0x5b4   :  { %6338 = vst.msk [vmem:[%s10503_s4 + $0x58] sm:$0xff] %vm6326_vm3, %v6273_v46  ;;  %6336 = vst.msk [vmem:[%s10503_s4 + $0x48] sm:$0xff] %vm6326_vm3, %v6271_v50 }
 0x5b5   :  { %5581 = vst.msk [vmem:[#allocation3 + $0x198] sm:$0xff] %vm5529_vm8, %v5428_v57  ;;  %v4949_v34 = vpop.permute.xlu1 %4948  ;;  %5329 = vrot.lane.b32.xlu0 %v5123_v52, %s6799_s15 }
 0x5b6   :  { %5103 = vst.msk [vmem:[#allocation3 + $0x190] sm:$0xff] %vm5052_vm7, %v4949_v34 }
 0x5b7   :  { %4982 = vrot.lane.b32.xlu1 %v4779_v15, %s6798_s11  ;;  %v4546_v1 = vpop.permute.xlu0 %4545  ;;  %v5647_v53 = vld [vmem:[#allocation3 + $0x188] sm:$0xff] }
 0x5b8   :  { %4697 = vst.msk [vmem:[#allocation3 + $0x1a8] sm:$0xff] %vm4643_vm0, %v4546_v1 }
 0x5b9   :  { %v5422_v11 = vpop.permute.xlu1 %5421  ;;  %5457 = vrot.lane.b32.xlu0 %v5187_v12, %s6799_s15 }
 0x5ba   :  { %5578 = vst.msk [vmem:[#allocation3 + $0x180] sm:$0xff] %vm5529_vm8, %v5422_v11 }
 0x5bb   :  { %5327 = vrot.lane.b32.xlu1 %v5190_v48, %s6799_s15  ;;  %v4550_v8 = vpop.permute.xlu0 %4549 }
 0x5bc   :  { %4699 = vst.msk [vmem:[#allocation3 + $0x1b8] sm:$0xff] %vm4643_vm0, %v4550_v8  ;;  %v5649_v23 = vld [vmem:[#allocation3 + $0x198] sm:$0xff] }
 0x5bd   :  { %v5426_v39 = vpop.permute.xlu1 %5425 }
 0x5be   :  { %5580 = vst.msk [vmem:[#allocation3 + $0x190] sm:$0xff] %vm5529_vm8, %v5426_v39 }
 0x5bf   :  { %5455 = vrot.lane.b32.xlu1 %v5254_v44, %s6799_s15  ;;  %v4955_v9 = vpop.permute.xlu0 %4954 }
 0x5c0   :  { %5106 = vst.msk [vmem:[#allocation3 + $0x1a8] sm:$0xff] %vm5052_vm7, %v4955_v9 }
 0x5c1   :  { %v4544_v37 = vpop.permute.xlu1 %4543  ;;  %v5646_v62 = vld [vmem:[#allocation3 + $0x180] sm:$0xff] }
 0x5c2   :  { %4696 = vst.msk [vmem:[#allocation3 + $0x1a0] sm:$0xff] %vm4643_vm0, %v4544_v37  ;;  %v5690_v49 = vpack.c.bf16 %v5647_v53, %v5646_v62 }
 0x5c3   :  { %v6689_v35 = vpop.f32.mrb[8].mxu1  ;;  %5331 = vrot.lane.b32.xlu1 %v5192_v13, %s6799_s15  ;;  %v4959_v25 = vpop.permute.xlu0 %4958 }
 0x5c4   :  { %v5924_v47 = vadd.f32 %v6689_v35, %v10038_v26  ;;  %v5915_v0 = vpop.f32.mrb[9].mxu1  ;;  %6723 = vmatprep.mubr.msk.bf16.mxu1 %vm5727_vm9, %v5690_v49  ;;  %5108 = vst.msk [vmem:[#allocation3 + $0x1b8] sm:$0xff] %vm5052_vm7, %v4959_v25 }
 0x5c5   :  { %v5916_v51 = vadd.f32 %v10038_v26, %v5915_v0  ;;  %v6690_v18 = vpop.f32.mrb[10].mxu1  ;;  %v4548_v36 = vpop.permute.xlu1 %4547  ;;  %v5648_v61 = vld [vmem:[#allocation3 + $0x190] sm:$0xff] }
 0x5c6   :  { %vm6148_vm15 = vcmp.gt.f32.partialorder %v5924_v47, 0.0  ;;  %v6212_v63 = vmul.f32 0.01, %v5924_v47  ;;  %v5927_v24 = vadd.f32 %v6690_v18, %v10038_v26  ;;  %4698 = vst.msk [vmem:[#allocation3 + $0x1b0] sm:$0xff] %vm4643_vm0, %v4548_v36  ;;  %v5918_v6 = vpop.f32.mrb[11].mxu1  ;;  %v5691_v55 = vpack.c.bf16 %v5649_v23, %v5648_v61 }
 0x5c7   :  { %vm6146_vm2 = vcmp.gt.f32.partialorder %v5916_v51, 0.0  ;;  %v6210_v33 = vmul.f32 0.01, %v5916_v51  ;;  %v5919_v56 = vadd.f32 %v10038_v26, %v5918_v6  ;;  %5459 = vrot.lane.b32.xlu1 %v5256_v2, %s6799_s15  ;;  %v5432_v3 = vpop.permute.xlu0 %5431 }
 0x5c8   :  { %v6276_v21 = vsel %vm6148_vm15, %v5924_v47, %v6212_v63  ;;  %vm6149_vm6 = vcmp.gt.f32.partialorder %v5927_v24, 0.0  ;;  %v6213_v27 = vmul.f32 0.01, %v5927_v24  ;;  %6724 = vmatmul.mubr.msk.bf16.gmra.mrb[44].mxu1 %vm5727_vm9, %v5691_v55  ;;  %5583 = vst.msk [vmem:[#allocation3 + $0x1a8] sm:$0xff] %vm5529_vm8, %v5432_v3 }
 0x5c9   :  { %6341 = vst.msk [vmem:[%s10503_s4 + $0x70] sm:$0xff] %vm6326_vm3, %v6276_v21  ;;  %v6274_v31 = vsel %vm6146_vm2, %v5916_v51, %v6210_v33  ;;  %vm6147_vm4 = vcmp.gt.f32.partialorder %v5919_v56, 0.0  ;;  %v6211_v42 = vmul.f32 0.01, %v5919_v56  ;;  %v4953_v30 = vpop.permute.xlu1 %4952 }
 0x5ca   :  { %6339 = vst.msk [vmem:[%s10503_s4 + $0x60] sm:$0xff] %vm6326_vm3, %v6274_v31  ;;  %v6277_v20 = vsel %vm6149_vm6, %v5927_v24, %v6213_v27 }
 0x5cb   :  { %5105 = vst.msk [vmem:[#allocation3 + $0x1a0] sm:$0xff] %vm5052_vm7, %v4953_v30  ;;  %v6275_v29 = vsel %vm6147_vm4, %v5919_v56, %v6211_v42  ;;  %v5436_v41 = vpop.permute.xlu0 %5435 }
 0x5cc   :  { %6342 = vst.msk [vmem:[%s10503_s4 + $0x78] sm:$0xff] %vm6326_vm3, %v6277_v20  ;;  %6340 = vst.msk [vmem:[%s10503_s4 + $0x68] sm:$0xff] %vm6326_vm3, %v6275_v29 }
 0x5cd   :  { %5585 = vst.msk [vmem:[#allocation3 + $0x1b8] sm:$0xff] %vm5529_vm8, %v5436_v41  ;;  %v4957_v59 = vpop.permute.xlu1 %4956 }
 0x5ce   :  { %5107 = vst.msk [vmem:[#allocation3 + $0x1b0] sm:$0xff] %vm5052_vm7, %v4957_v59 }
 0x5cf   :  { %v4554_v10 = vpop.permute.xlu0 %4553  ;;  %v5651_v14 = vld [vmem:[#allocation3 + $0x1a8] sm:$0xff] }
 0x5d0   :  { %4701 = vst.msk [vmem:[#allocation3 + $0x1c8] sm:$0xff] %vm4643_vm0, %v4554_v10 }
 0x5d1   :  { %v5430_v54 = vpop.permute.xlu1 %5429 }
 0x5d2   :  { %5582 = vst.msk [vmem:[#allocation3 + $0x1a0] sm:$0xff] %vm5529_vm8, %v5430_v54 }
 0x5d3   :  { %v4558_v22 = vpop.permute.xlu0 %4557 }
 0x5d4   :  { %4703 = vst.msk [vmem:[#allocation3 + $0x1d8] sm:$0xff] %vm4643_vm0, %v4558_v22  ;;  %v5653_v57 = vld [vmem:[#allocation3 + $0x1b8] sm:$0xff] }
 0x5d5   :  { %v5434_v16 = vpop.permute.xlu1 %5433 }
 0x5d6   :  { %5584 = vst.msk [vmem:[#allocation3 + $0x1b0] sm:$0xff] %vm5529_vm8, %v5434_v16 }
 0x5d7   :  { %v4963_v45 = vpop.permute.xlu0 %4962 }
 0x5d8   :  { %5110 = vst.msk [vmem:[#allocation3 + $0x1c8] sm:$0xff] %vm5052_vm7, %v4963_v45 }
 0x5d9   :  { %v4552_v7 = vpop.permute.xlu1 %4551  ;;  %v5650_v40 = vld [vmem:[#allocation3 + $0x1a0] sm:$0xff] }
 0x5da   :  { %4700 = vst.msk [vmem:[#allocation3 + $0x1c0] sm:$0xff] %vm4643_vm0, %v4552_v7  ;;  %v5692_v4 = vpack.c.bf16 %v5651_v14, %v5650_v40 }
 0x5db   :  { %v6693_v28 = vpop.f32.mrb[12].mxu1  ;;  %v4967_v32 = vpop.permute.xlu0 %4966 }
 0x5dc   :  { %v5940_v17 = vadd.f32 %v6693_v28, %v10038_v26  ;;  %v5931_v60 = vpop.f32.mrb[13].mxu1  ;;  %6727 = vmatprep.mubr.msk.bf16.mxu1 %vm5727_vm9, %v5692_v4  ;;  %5112 = vst.msk [vmem:[#allocation3 + $0x1d8] sm:$0xff] %vm5052_vm7, %v4967_v32 }
 0x5dd   :  { %v5932_v58 = vadd.f32 %v10038_v26, %v5931_v60  ;;  %v6694_v46 = vpop.f32.mrb[14].mxu1  ;;  %v4556_v19 = vpop.permute.xlu1 %4555  ;;  %v5652_v50 = vld [vmem:[#allocation3 + $0x1b0] sm:$0xff] }
 0x5de   :  { %vm6152_vm14 = vcmp.gt.f32.partialorder %v5940_v17, 0.0  ;;  %v6216_v15 = vmul.f32 0.01, %v5940_v17  ;;  %v5943_v34 = vadd.f32 %v6694_v46, %v10038_v26  ;;  %4702 = vst.msk [vmem:[#allocation3 + $0x1d0] sm:$0xff] %vm4643_vm0, %v4556_v19  ;;  %v5934_v52 = vpop.f32.mrb[15].mxu1  ;;  %v5693_v38 = vpack.c.bf16 %v5653_v57, %v5652_v50 }
 0x5df   :  { %vm6150_vm1 = vcmp.gt.f32.partialorder %v5932_v58, 0.0  ;;  %v6214_v12 = vmul.f32 0.01, %v5932_v58  ;;  %v5935_v1 = vadd.f32 %v10038_v26, %v5934_v52  ;;  %v5440_v8 = vpop.permute.xlu0 %5439 }
 0x5e0   :  { %v6280_v11 = vsel %vm6152_vm14, %v5940_v17, %v6216_v15  ;;  %vm6153_vm10 = vcmp.gt.f32.partialorder %v5943_v34, 0.0  ;;  %v6217_v48 = vmul.f32 0.01, %v5943_v34  ;;  %6728 = vmatmul.mubr.msk.bf16.gmra.mrb[48].mxu1 %vm5727_vm9, %v5693_v38  ;;  %5587 = vst.msk [vmem:[#allocation3 + $0x1c8] sm:$0xff] %vm5529_vm8, %v5440_v8 }
 0x5e1   :  { %6345 = vst.msk [vmem:[%s10503_s4 + $0x90] sm:$0xff] %vm6326_vm3, %v6280_v11  ;;  %v6278_v39 = vsel %vm6150_vm1, %v5932_v58, %v6214_v12  ;;  %vm6151_vm11 = vcmp.gt.f32.partialorder %v5935_v1, 0.0  ;;  %v6215_v44 = vmul.f32 0.01, %v5935_v1  ;;  %v4961_v43 = vpop.permute.xlu1 %4960 }
 0x5e2   :  { %6343 = vst.msk [vmem:[%s10503_s4 + $0x80] sm:$0xff] %vm6326_vm3, %v6278_v39  ;;  %v6281_v9 = vsel %vm6153_vm10, %v5943_v34, %v6217_v48 }
 0x5e3   :  { %5109 = vst.msk [vmem:[#allocation3 + $0x1c0] sm:$0xff] %vm5052_vm7, %v4961_v43  ;;  %v6279_v5 = vsel %vm6151_vm11, %v5935_v1, %v6215_v44  ;;  %v5444_v37 = vpop.permute.xlu0 %5443 }
 0x5e4   :  { %6346 = vst.msk [vmem:[%s10503_s4 + $0x98] sm:$0xff] %vm6326_vm3, %v6281_v9  ;;  %6344 = vst.msk [vmem:[%s10503_s4 + $0x88] sm:$0xff] %vm6326_vm3, %v6279_v5 }
 0x5e5   :  { %5589 = vst.msk [vmem:[#allocation3 + $0x1d8] sm:$0xff] %vm5529_vm8, %v5444_v37  ;;  %v4965_v13 = vpop.permute.xlu1 %4964 }
 0x5e6   :  { %5111 = vst.msk [vmem:[#allocation3 + $0x1d0] sm:$0xff] %vm5052_vm7, %v4965_v13 }
 0x5e7   :  { %v4562_v62 = vpop.permute.xlu0 %4561  ;;  %v5655_v0 = vld [vmem:[#allocation3 + $0x1c8] sm:$0xff] }
 0x5e8   :  { %4705 = vst.msk [vmem:[#allocation3 + $0x1e8] sm:$0xff] %vm4643_vm0, %v4562_v62 }
 0x5e9   :  { %v5438_v53 = vpop.permute.xlu1 %5437 }
 0x5ea   :  { %5586 = vst.msk [vmem:[#allocation3 + $0x1c0] sm:$0xff] %vm5529_vm8, %v5438_v53 }
 0x5eb   :  { %v4566_v49 = vpop.permute.xlu0 %4565 }
 0x5ec   :  { %4707 = vst.msk [vmem:[#allocation3 + $0x1f8] sm:$0xff] %vm4643_vm0, %v4566_v49  ;;  %v5657_v33 = vld [vmem:[#allocation3 + $0x1d8] sm:$0xff] }
 0x5ed   :  { %v5442_v35 = vpop.permute.xlu1 %5441 }
 0x5ee   :  { %5588 = vst.msk [vmem:[#allocation3 + $0x1d0] sm:$0xff] %vm5529_vm8, %v5442_v35 }
 0x5ef   :  { %v4971_v2 = vpop.permute.xlu0 %4970 }
 0x5f0   :  { %5114 = vst.msk [vmem:[#allocation3 + $0x1e8] sm:$0xff] %vm5052_vm7, %v4971_v2 }
 0x5f1   :  { %v4560_v47 = vpop.permute.xlu1 %4559  ;;  %v5654_v25 = vld [vmem:[#allocation3 + $0x1c0] sm:$0xff] }
 0x5f2   :  { %4704 = vst.msk [vmem:[#allocation3 + $0x1e0] sm:$0xff] %vm4643_vm0, %v4560_v47  ;;  %v5694_v51 = vpack.c.bf16 %v5655_v0, %v5654_v25 }
 0x5f3   :  { %v6697_v18 = vpop.f32.mrb[16].mxu1  ;;  %v4975_v61 = vpop.permute.xlu0 %4974 }
 0x5f4   :  { %v5956_v36 = vadd.f32 %v6697_v18, %v10038_v26  ;;  %v5947_v23 = vpop.f32.mrb[17].mxu1  ;;  %6731 = vmatprep.mubr.msk.bf16.mxu1 %vm5727_vm9, %v5694_v51  ;;  %5116 = vst.msk [vmem:[#allocation3 + $0x1f8] sm:$0xff] %vm5052_vm7, %v4975_v61 }
 0x5f5   :  { %v5948_v63 = vadd.f32 %v10038_v26, %v5947_v23  ;;  %v6698_v24 = vpop.f32.mrb[18].mxu1  ;;  %v4564_v6 = vpop.permute.xlu1 %4563  ;;  %v5656_v55 = vld [vmem:[#allocation3 + $0x1d0] sm:$0xff] }
 0x5f6   :  { %vm6156_vm12 = vcmp.gt.f32.partialorder %v5956_v36, 0.0  ;;  %v6220_v56 = vmul.f32 0.01, %v5956_v36  ;;  %v5959_v21 = vadd.f32 %v6698_v24, %v10038_v26  ;;  %4706 = vst.msk [vmem:[#allocation3 + $0x1f0] sm:$0xff] %vm4643_vm0, %v4564_v6  ;;  %v5950_v27 = vpop.f32.mrb[19].mxu1  ;;  %v5695_v3 = vpack.c.bf16 %v5657_v33, %v5656_v55 }
 0x5f7   :  { %vm6154_vm13 = vcmp.gt.f32.partialorder %v5948_v63, 0.0  ;;  %v6218_v31 = vmul.f32 0.01, %v5948_v63  ;;  %v5951_v42 = vadd.f32 %v10038_v26, %v5950_v27  ;;  %v5448_v29 = vpop.permute.xlu0 %5447 }
 0x5f8   :  { %v6284_v30 = vsel %vm6156_vm12, %v5956_v36, %v6220_v56  ;;  %vm6157_vm15 = vcmp.gt.f32.partialorder %v5959_v21, 0.0  ;;  %v6221_v20 = vmul.f32 0.01, %v5959_v21  ;;  %6732 = vmatmul.mubr.msk.bf16.gmra.mrb[52].mxu1 %vm5727_vm9, %v5695_v3  ;;  %5591 = vst.msk [vmem:[#allocation3 + $0x1e8] sm:$0xff] %vm5529_vm8, %v5448_v29 }
 0x5f9   :  { %6349 = vst.msk [vmem:[%s10503_s4 + $0xb0] sm:$0xff] %vm6326_vm3, %v6284_v30  ;;  %v6282_v41 = vsel %vm6154_vm13, %v5948_v63, %v6218_v31  ;;  %vm6155_vm2 = vcmp.gt.f32.partialorder %v5951_v42, 0.0  ;;  %v6219_v59 = vmul.f32 0.01, %v5951_v42  ;;  %v4969_v10 = vpop.permute.xlu1 %4968 }
 0x5fa   :  { %6347 = vst.msk [vmem:[%s10503_s4 + $0xa0] sm:$0xff] %vm6326_vm3, %v6282_v41  ;;  %v6285_v54 = vsel %vm6157_vm15, %v5959_v21, %v6221_v20 }
 0x5fb   :  { %5113 = vst.msk [vmem:[#allocation3 + $0x1e0] sm:$0xff] %vm5052_vm7, %v4969_v10  ;;  %v6283_v22 = vsel %vm6155_vm2, %v5951_v42, %v6219_v59  ;;  %v5452_v16 = vpop.permute.xlu0 %5451 }
 0x5fc   :  { %6350 = vst.msk [vmem:[%s10503_s4 + $0xb8] sm:$0xff] %vm6326_vm3, %v6285_v54  ;;  %6348 = vst.msk [vmem:[%s10503_s4 + $0xa8] sm:$0xff] %vm6326_vm3, %v6283_v22 }
 0x5fd   :  { %5593 = vst.msk [vmem:[#allocation3 + $0x1f8] sm:$0xff] %vm5529_vm8, %v5452_v16  ;;  %v4973_v45 = vpop.permute.xlu1 %4972 }
 0x5fe   :  { %5115 = vst.msk [vmem:[#allocation3 + $0x1f0] sm:$0xff] %vm5052_vm7, %v4973_v45 }
 0x5ff   :  { %v4440_v7 = vpop.permute.xlu0 %4439  ;;  %v5659_v60 = vld [vmem:[#allocation3 + $0x1e8] sm:$0xff] }
 0x600   :  { %4644 = vst.msk [vmem:[#allocation3] sm:$0xff] %vm4643_vm0, %v4440_v7 }
 0x601   :  { %v5446_v40 = vpop.permute.xlu1 %5445 }
 0x602   :  { %5590 = vst.msk [vmem:[#allocation3 + $0x1e0] sm:$0xff] %vm5529_vm8, %v5446_v40 }
 0x603   :  { %v4568_v14 = vpop.permute.xlu0 %4567 }
 0x604   :  { %4708 = vst.msk [vmem:[#allocation3 + $0x200] sm:$0xff] %vm4643_vm0, %v4568_v14  ;;  %v5661_v12 = vld [vmem:[#allocation3 + $0x1f8] sm:$0xff] }
 0x605   :  { %v5450_v4 = vpop.permute.xlu1 %5449 }
 0x606   :  { %5592 = vst.msk [vmem:[#allocation3 + $0x1f0] sm:$0xff] %vm5529_vm8, %v5450_v4 }
 0x607   :  { %v4444_v28 = vpop.permute.xlu0 %4443 }
 0x608   :  { %4646 = vst.msk [vmem:[#allocation3 + $0x10] sm:$0xff] %vm4643_vm0, %v4444_v28 }
 0x609   :  { %v4097_v17 = vpop.permute.xlu1 %4096  ;;  %v5658_v32 = vld [vmem:[#allocation3 + $0x1e0] sm:$0xff] }
 0x60a   :  { %4234 = vst.msk [vmem:[#allocation3 + $0x218] sm:$0xff] %vm4166_vm5, %v4097_v17  ;;  %v5696_v58 = vpack.c.bf16 %v5659_v60, %v5658_v32 }
 0x60b   :  { %v6701_v46 = vpop.f32.mrb[20].mxu1  ;;  %v4572_v50 = vpop.permute.xlu0 %4571 }
 0x60c   :  { %v5972_v19 = vadd.f32 %v6701_v46, %v10038_v26  ;;  %v5963_v57 = vpop.f32.mrb[21].mxu1  ;;  %6735 = vmatprep.mubr.msk.bf16.mxu1 %vm5727_vm9, %v5696_v58  ;;  %4710 = vst.msk [vmem:[#allocation3 + $0x210] sm:$0xff] %vm4643_vm0, %v4572_v50 }
 0x60d   :  { %v5964_v15 = vadd.f32 %v10038_v26, %v5963_v57  ;;  %v6702_v34 = vpop.f32.mrb[22].mxu1  ;;  %v4442_v52 = vpop.permute.xlu1 %4441  ;;  %v5660_v38 = vld [vmem:[#allocation3 + $0x1f0] sm:$0xff] }
 0x60e   :  { %vm6160_vm6 = vcmp.gt.f32.partialorder %v5972_v19, 0.0  ;;  %v6224_v1 = vmul.f32 0.01, %v5972_v19  ;;  %v5975_v11 = vadd.f32 %v6702_v34, %v10038_v26  ;;  %4645 = vst.msk [vmem:[#allocation3 + $0x8] sm:$0xff] %vm4643_vm0, %v4442_v52  ;;  %v5966_v48 = vpop.f32.mrb[23].mxu1  ;;  %v5697_v8 = vpack.c.bf16 %v5661_v12, %v5660_v38 }
 0x60f   :  { %vm6158_vm5 = vcmp.gt.f32.partialorder %v5964_v15, 0.0  ;;  %v6222_v39 = vmul.f32 0.01, %v5964_v15  ;;  %v5967_v44 = vadd.f32 %v10038_v26, %v5966_v48  ;;  %v4849_v5 = vpop.permute.xlu0 %4848 }
 0x610   :  { %v6288_v43 = vsel %vm6160_vm6, %v5972_v19, %v6224_v1  ;;  %vm6161_vm4 = vcmp.gt.f32.partialorder %v5975_v11, 0.0  ;;  %v6225_v9 = vmul.f32 0.01, %v5975_v11  ;;  %6736 = vmatmul.mubr.msk.bf16.gmra.mrb[56].mxu1 %vm5727_vm9, %v5697_v8  ;;  %5053 = vst.msk [vmem:[#allocation3] sm:$0xff] %vm5052_vm7, %v4849_v5 }
 0x611   :  { %6353 = vst.msk [vmem:[%s10503_s4 + $0xd0] sm:$0xff] %vm6326_vm3, %v6288_v43  ;;  %v6286_v37 = vsel %vm6158_vm5, %v5964_v15, %v6222_v39  ;;  %vm6159_vm14 = vcmp.gt.f32.partialorder %v5967_v44, 0.0  ;;  %v6223_v13 = vmul.f32 0.01, %v5967_v44  ;;  %v4570_v62 = vpop.permute.xlu1 %4569 }
 0x612   :  { %6351 = vst.msk [vmem:[%s10503_s4 + $0xc0] sm:$0xff] %vm6326_vm3, %v6286_v37  ;;  %v6289_v53 = vsel %vm6161_vm4, %v5975_v11, %v6225_v9 }
 0x613   :  { %4709 = vst.msk [vmem:[#allocation3 + $0x208] sm:$0xff] %vm4643_vm0, %v4570_v62  ;;  %v6287_v49 = vsel %vm6159_vm14, %v5967_v44, %v6223_v13  ;;  %v4977_v35 = vpop.permute.xlu0 %4976 }
 0x614   :  { %6354 = vst.msk [vmem:[%s10503_s4 + $0xd8] sm:$0xff] %vm6326_vm3, %v6289_v53  ;;  %6352 = vst.msk [vmem:[%s10503_s4 + $0xc8] sm:$0xff] %vm6326_vm3, %v6287_v49 }
 0x615   :  { %5117 = vst.msk [vmem:[#allocation3 + $0x200] sm:$0xff] %vm5052_vm7, %v4977_v35  ;;  %v4446_v2 = vpop.permute.xlu1 %4445 }
 0x616   :  { %4647 = vst.msk [vmem:[#allocation3 + $0x18] sm:$0xff] %vm4643_vm0, %v4446_v2 }
 0x617   :  { %v4853_v47 = vpop.permute.xlu0 %4852 }
 0x618   :  { %5055 = vst.msk [vmem:[#allocation3 + $0x10] sm:$0xff] %vm5052_vm7, %v4853_v47 }
 0x619   :  { %v4574_v25 = vpop.permute.xlu1 %4573 }
 0x61a   :  { %4711 = vst.msk [vmem:[#allocation3 + $0x218] sm:$0xff] %vm4643_vm0, %v4574_v25 }
 0x61b   :  { %v4981_v0 = vpop.permute.xlu0 %4980 }
 0x61c   :  { %5119 = vst.msk [vmem:[#allocation3 + $0x210] sm:$0xff] %vm5052_vm7, %v4981_v0 }
 0x61d   :  { %v4851_v51 = vpop.permute.xlu1 %4850 }
 0x61e   :  { %5054 = vst.msk [vmem:[#allocation3 + $0x8] sm:$0xff] %vm5052_vm7, %v4851_v51 }
 0x61f   :  { %v5326_v18 = vpop.permute.xlu0 %5325 }
 0x620   :  { %5530 = vst.msk [vmem:[#allocation3] sm:$0xff] %vm5529_vm8, %v5326_v18 }
 0x621   :  { %v4979_v36 = vpop.permute.xlu1 %4978 }
 0x622   :  { %5118 = vst.msk [vmem:[#allocation3 + $0x208] sm:$0xff] %vm5052_vm7, %v4979_v36 }
 0x623   :  { %v6705_v61 = vpop.f32.mrb[24].mxu1  ;;  %v5454_v63 = vpop.permute.xlu0 %5453 }
 0x624   :  { %v5988_v23 = vadd.f32 %v6705_v61, %v10038_v26  ;;  %v5979_v24 = vpop.f32.mrb[25].mxu1  ;;  %5594 = vst.msk [vmem:[#allocation3 + $0x200] sm:$0xff] %vm5529_vm8, %v5454_v63 }
 0x625   :  { %v5980_v6 = vadd.f32 %v10038_v26, %v5979_v24  ;;  %v6706_v55 = vpop.f32.mrb[26].mxu1  ;;  %v4855_v33 = vpop.permute.xlu1 %4854 }
 0x626   :  { %vm6164_vm0 = vcmp.gt.f32.partialorder %v5988_v23, 0.0  ;;  %v6228_v56 = vmul.f32 0.01, %v5988_v23  ;;  %v5991_v21 = vadd.f32 %v6706_v55, %v10038_v26  ;;  %5056 = vst.msk [vmem:[#allocation3 + $0x18] sm:$0xff] %vm5052_vm7, %v4855_v33  ;;  %v5982_v27 = vpop.f32.mrb[27].mxu1 }
 0x627   :  { %vm6162_vm1 = vcmp.gt.f32.partialorder %v5980_v6, 0.0  ;;  %v6226_v3 = vmul.f32 0.01, %v5980_v6  ;;  %v5983_v31 = vadd.f32 %v10038_v26, %v5982_v27  ;;  %v5330_v20 = vpop.permute.xlu0 %5329  ;;  %v5598_v40 = vld [vmem:[#allocation3] sm:$0xff] }
 0x628   :  { %v6292_v42 = vsel %vm6164_vm0, %v5988_v23, %v6228_v56  ;;  %vm6165_vm10 = vcmp.gt.f32.partialorder %v5991_v21, 0.0  ;;  %v6229_v30 = vmul.f32 0.01, %v5991_v21  ;;  %5532 = vst.msk [vmem:[#allocation3 + $0x10] sm:$0xff] %vm5529_vm8, %v5330_v20 }
 0x629   :  { %6357 = vst.msk [vmem:[%s10503_s4 + $0xf0] sm:$0xff] %vm6326_vm3, %v6292_v42  ;;  %v6290_v29 = vsel %vm6162_vm1, %v5980_v6, %v6226_v3  ;;  %vm6163_vm11 = vcmp.gt.f32.partialorder %v5983_v31, 0.0  ;;  %v6227_v41 = vmul.f32 0.01, %v5983_v31  ;;  %v4983_v59 = vpop.permute.xlu1 %4982 }
 0x62a   :  { %6355 = vst.msk [vmem:[%s10503_s4 + $0xe0] sm:$0xff] %vm6326_vm3, %v6290_v29  ;;  %v6293_v10 = vsel %vm6165_vm10, %v5991_v21, %v6229_v30 }
 0x62b   :  { %5120 = vst.msk [vmem:[#allocation3 + $0x218] sm:$0xff] %vm5052_vm7, %v4983_v59  ;;  %v6291_v54 = vsel %vm6163_vm11, %v5983_v31, %v6227_v41  ;;  %v5458_v22 = vpop.permute.xlu0 %5457  ;;  %v5662_v17 = vld [vmem:[#allocation3 + $0x200] sm:$0xff] }
 0x62c   :  { %6358 = vst.msk [vmem:[%s10503_s4 + $0xf8] sm:$0xff] %vm6326_vm3, %v6293_v10  ;;  %6356 = vst.msk [vmem:[%s10503_s4 + $0xe8] sm:$0xff] %vm6326_vm3, %v6291_v54  ;;  %v10360_v54 = vld [vmem:[%s10502_s3] ss:$0 sm:$0xff] }
 0x62d   :  { %v5328_v16 = vpop.permute.xlu1 %5327  ;;  %5596 = vst.msk [vmem:[#allocation3 + $0x210] sm:$0xff] %vm5529_vm8, %v5458_v22 }
 0x62e   :  { %5531 = vst.msk [vmem:[#allocation3 + $0x8] sm:$0xff] %vm5529_vm8, %v5328_v16 }
 0x62f   :  { %v5600_v50 = vld [vmem:[#allocation3 + $0x10] sm:$0xff] }
 0x631   :  { %v5456_v45 = vpop.permute.xlu1 %5455 }
 0x632   :  { %5595 = vst.msk [vmem:[#allocation3 + $0x208] sm:$0xff] %vm5529_vm8, %v5456_v45 }
 0x634   :  { %v5664_v52 = vld [vmem:[#allocation3 + $0x210] sm:$0xff] }
 0x635   :  { %v5332_v7 = vpop.permute.xlu1 %5331  ;;  %v5599_v14 = vld [vmem:[#allocation3 + $0x8] sm:$0xff] }
 0x636   :  { %5533 = vst.msk [vmem:[#allocation3 + $0x18] sm:$0xff] %vm5529_vm8, %v5332_v7  ;;  %v5666_v4 = vpack.c.bf16 %v5599_v14, %v5598_v40 }
 0x638   :  { %6675 = vmatprep.mubr.msk.bf16.mxu0 %vm5727_vm9, %v5666_v4 }
 0x639   :  { %v5460_v28 = vpop.permute.xlu1 %5459  ;;  %v5663_v32 = vld [vmem:[#allocation3 + $0x208] sm:$0xff] }
 0x63a   :  { %5597 = vst.msk [vmem:[#allocation3 + $0x218] sm:$0xff] %vm5529_vm8, %v5460_v28  ;;  %v5698_v60 = vpack.c.bf16 %v5663_v32, %v5662_v17 }
 0x63b   :  { %v6709_v58 = vpop.f32.mrb[28].mxu1 }
 0x63c   :  { %v5995_v46 = vpop.f32.mrb[29].mxu1  ;;  %6739 = vmatprep.mubr.msk.bf16.mxu1 %vm5727_vm9, %v5698_v60 }
 0x63d   :  { %v6710_v19 = vpop.f32.mrb[30].mxu1  ;;  %v5601_v57 = vld [vmem:[#allocation3 + $0x18] sm:$0xff] }
 0x63e   :  { %v5997_v15 = vpop.f32.mrb[31].mxu1  ;;  %v5667_v34 = vpack.c.bf16 %v5601_v57, %v5600_v50 }
 0x640   :  { %6676 = vmatmul.mubr.msk.bf16.vlgmr.msra.gmra.mrb[64].mxu0 %vm5727_vm9, %v5667_v34 }
 0x641   :  { %v5665_v38 = vld [vmem:[#allocation3 + $0x218] sm:$0xff] }
 0x642   :  { %v5699_v12 = vpack.c.bf16 %v5665_v38, %v5664_v52 }
 0x644   :  { %6740 = vmatmul.mubr.msk.bf16.gmra.mrb[60].mxu1 %vm5727_vm9, %v5699_v12 }
 0x653   :  { %v6713_v1 = vpop.f32.mrb[32].mxu1 }
 0x654   :  { %v6016_v11 = vadd.f32 %v6713_v1, %v10038_v26  ;;  %v6007_v48 = vpop.f32.mrb[33].mxu1 }
 0x655   :  { %v6008_v8 = vadd.f32 %v10038_v26, %v6007_v48  ;;  %v6714_v39 = vpop.f32.mrb[34].mxu1 }
 0x656   :  { %vm6168_vm7 = vcmp.gt.f32.partialorder %v6016_v11, 0.0  ;;  %v6232_v44 = vmul.f32 0.01, %v6016_v11  ;;  %v6019_v43 = vadd.f32 %v6714_v39, %v10038_v26  ;;  %v6010_v9 = vpop.f32.mrb[35].mxu1 }
 0x657   :  { %vm6166_vm8 = vcmp.gt.f32.partialorder %v6008_v8, 0.0  ;;  %v6230_v5 = vmul.f32 0.01, %v6008_v8  ;;  %v6011_v37 = vadd.f32 %v10038_v26, %v6010_v9 }
 0x658   :  { %v6296_v13 = vsel %vm6168_vm7, %v6016_v11, %v6232_v44  ;;  %vm6169_vm12 = vcmp.gt.f32.partialorder %v6019_v43, 0.0  ;;  %v6233_v62 = vmul.f32 0.01, %v6019_v43 }
 0x659   :  { %6361 = vst.msk [vmem:[%s10503_s4 + $0x110] sm:$0xff] %vm6326_vm3, %v6296_v13  ;;  %v6294_v53 = vsel %vm6166_vm8, %v6008_v8, %v6230_v5  ;;  %vm6167_vm9 = vcmp.gt.f32.partialorder %v6011_v37, 0.0  ;;  %v6231_v49 = vmul.f32 0.01, %v6011_v37 }
 0x65a   :  { %6359 = vst.msk [vmem:[%s10503_s4 + $0x100] sm:$0xff] %vm6326_vm3, %v6294_v53  ;;  %v6297_v35 = vsel %vm6169_vm12, %v6019_v43, %v6233_v62 }
 0x65b   :  { %6362 = vst.msk [vmem:[%s10503_s4 + $0x118] sm:$0xff] %vm6326_vm3, %v6297_v35  ;;  %v6295_v2 = vsel %vm6167_vm9, %v6011_v37, %v6231_v49 }
 0x65c   :  { %6360 = vst.msk [vmem:[%s10503_s4 + $0x108] sm:$0xff] %vm6326_vm3, %v6295_v2 }
 0x66b   :  { %v6717_v47 = vpop.f32.mrb[36].mxu1 }
 0x66c   :  { %v6032_v25 = vadd.f32 %v6717_v47, %v10038_v26  ;;  %v6023_v0 = vpop.f32.mrb[37].mxu1 }
 0x66d   :  { %v6024_v51 = vadd.f32 %v10038_v26, %v6023_v0  ;;  %v6718_v18 = vpop.f32.mrb[38].mxu1 }
 0x66e   :  { %vm6172_vm13 = vcmp.gt.f32.partialorder %v6032_v25, 0.0  ;;  %v6236_v36 = vmul.f32 0.01, %v6032_v25  ;;  %v6035_v61 = vadd.f32 %v6718_v18, %v10038_v26  ;;  %v6026_v23 = vpop.f32.mrb[39].mxu1 }
 0x66f   :  { %vm6170_vm15 = vcmp.gt.f32.partialorder %v6024_v51, 0.0  ;;  %v6234_v63 = vmul.f32 0.01, %v6024_v51  ;;  %v6027_v24 = vadd.f32 %v10038_v26, %v6026_v23 }
 0x670   :  { %v6300_v6 = vsel %vm6172_vm13, %v6032_v25, %v6236_v36  ;;  %vm6173_vm2 = vcmp.gt.f32.partialorder %v6035_v61, 0.0  ;;  %v6237_v55 = vmul.f32 0.01, %v6035_v61 }
 0x671   :  { %6365 = vst.msk [vmem:[%s10503_s4 + $0x130] sm:$0xff] %vm6326_vm3, %v6300_v6  ;;  %v6298_v33 = vsel %vm6170_vm15, %v6024_v51, %v6234_v63  ;;  %vm6171_vm6 = vcmp.gt.f32.partialorder %v6027_v24, 0.0  ;;  %v6235_v56 = vmul.f32 0.01, %v6027_v24 }
 0x672   :  { %6363 = vst.msk [vmem:[%s10503_s4 + $0x120] sm:$0xff] %vm6326_vm3, %v6298_v33  ;;  %v6301_v21 = vsel %vm6173_vm2, %v6035_v61, %v6237_v55 }
 0x673   :  { %6366 = vst.msk [vmem:[%s10503_s4 + $0x138] sm:$0xff] %vm6326_vm3, %v6301_v21  ;;  %v6299_v27 = vsel %vm6171_vm6, %v6027_v24, %v6235_v56 }
 0x674   :  { %6364 = vst.msk [vmem:[%s10503_s4 + $0x128] sm:$0xff] %vm6326_vm3, %v6299_v27 }
 0x683   :  { %v6721_v3 = vpop.f32.mrb[40].mxu1 }
 0x684   :  { %v6048_v31 = vadd.f32 %v6721_v3, %v10038_v26  ;;  %v6039_v42 = vpop.f32.mrb[41].mxu1 }
 0x685   :  { %v6040_v30 = vadd.f32 %v10038_v26, %v6039_v42  ;;  %v6722_v20 = vpop.f32.mrb[42].mxu1 }
 0x686   :  { %vm6176_vm5 = vcmp.gt.f32.partialorder %v6048_v31, 0.0  ;;  %v6240_v29 = vmul.f32 0.01, %v6048_v31  ;;  %v6051_v41 = vadd.f32 %v6722_v20, %v10038_v26  ;;  %v6042_v59 = vpop.f32.mrb[43].mxu1 }
 0x687   :  { %vm6174_vm4 = vcmp.gt.f32.partialorder %v6040_v30, 0.0  ;;  %v6238_v10 = vmul.f32 0.01, %v6040_v30  ;;  %v6043_v22 = vadd.f32 %v10360_v54, %v6042_v59 }
 0x688   :  { %v6304_v16 = vsel %vm6176_vm5, %v6048_v31, %v6240_v29  ;;  %vm6177_vm14 = vcmp.gt.f32.partialorder %v6051_v41, 0.0  ;;  %v6241_v45 = vmul.f32 0.01, %v6051_v41 }
 0x689   :  { %6369 = vst.msk [vmem:[%s10503_s4 + $0x150] sm:$0xff] %vm6326_vm3, %v6304_v16  ;;  %v6302_v7 = vsel %vm6174_vm4, %v6040_v30, %v6238_v10  ;;  %vm6175_vm0 = vcmp.gt.f32.partialorder %v6043_v22, 0.0  ;;  %v6239_v26 = vmul.f32 0.01, %v6043_v22 }
 0x68a   :  { %6367 = vst.msk [vmem:[%s10503_s4 + $0x140] sm:$0xff] %vm6326_vm3, %v6302_v7  ;;  %v6305_v40 = vsel %vm6177_vm14, %v6051_v41, %v6241_v45 }
 0x68b   :  { %6370 = vst.msk [vmem:[%s10503_s4 + $0x158] sm:$0xff] %vm6326_vm3, %v6305_v40  ;;  %v6303_v14 = vsel %vm6175_vm0, %v6043_v22, %v6239_v26 }
 0x68c   :  { %6368 = vst.msk [vmem:[%s10503_s4 + $0x148] sm:$0xff] %vm6326_vm3, %v6303_v14 }
 0x69b   :  { %v6725_v4 = vpop.f32.mrb[44].mxu1 }
 0x69c   :  { %v6064_v28 = vadd.f32 %v10360_v54, %v6725_v4  ;;  %v6055_v17 = vpop.f32.mrb[45].mxu1 }
 0x69d   :  { %v6056_v32 = vadd.f32 %v10360_v54, %v6055_v17  ;;  %v6726_v60 = vpop.f32.mrb[46].mxu1 }
 0x69e   :  { %vm6180_vm1 = vcmp.gt.f32.partialorder %v6064_v28, 0.0  ;;  %v6244_v58 = vmul.f32 0.01, %v6064_v28  ;;  %v6067_v46 = vadd.f32 %v10360_v54, %v6726_v60  ;;  %v6058_v19 = vpop.f32.mrb[47].mxu1 }
 0x69f   :  { %vm6178_vm10 = vcmp.gt.f32.partialorder %v6056_v32, 0.0  ;;  %v6242_v50 = vmul.f32 0.01, %v6056_v32  ;;  %v6059_v57 = vadd.f32 %v10360_v54, %v6058_v19 }
 0x6a0   :  { %v6308_v15 = vsel %vm6180_vm1, %v6064_v28, %v6244_v58  ;;  %vm6181_vm11 = vcmp.gt.f32.partialorder %v6067_v46, 0.0  ;;  %v6245_v34 = vmul.f32 0.01, %v6067_v46 }
 0x6a1   :  { %6373 = vst.msk [vmem:[%s10503_s4 + $0x170] sm:$0xff] %vm6326_vm3, %v6308_v15  ;;  %v6306_v52 = vsel %vm6178_vm10, %v6056_v32, %v6242_v50  ;;  %vm6179_vm7 = vcmp.gt.f32.partialorder %v6059_v57, 0.0  ;;  %v6243_v38 = vmul.f32 0.01, %v6059_v57 }
 0x6a2   :  { %6371 = vst.msk [vmem:[%s10503_s4 + $0x160] sm:$0xff] %vm6326_vm3, %v6306_v52  ;;  %v6309_v12 = vsel %vm6181_vm11, %v6067_v46, %v6245_v34 }
 0x6a3   :  { %6374 = vst.msk [vmem:[%s10503_s4 + $0x178] sm:$0xff] %vm6326_vm3, %v6309_v12  ;;  %v6307_v1 = vsel %vm6179_vm7, %v6059_v57, %v6243_v38 }
 0x6a4   :  { %6372 = vst.msk [vmem:[%s10503_s4 + $0x168] sm:$0xff] %vm6326_vm3, %v6307_v1 }
 0x6b3   :  { %v6729_v11 = vpop.f32.mrb[48].mxu1 }
 0x6b4   :  { %v6080_v48 = vadd.f32 %v10360_v54, %v6729_v11  ;;  %v6071_v8 = vpop.f32.mrb[49].mxu1 }
 0x6b5   :  { %v6072_v39 = vadd.f32 %v10360_v54, %v6071_v8  ;;  %v6730_v44 = vpop.f32.mrb[50].mxu1 }
 0x6b6   :  { %vm6184_vm8 = vcmp.gt.f32.partialorder %v6080_v48, 0.0  ;;  %v6248_v43 = vmul.f32 0.01, %v6080_v48  ;;  %v6083_v9 = vadd.f32 %v10360_v54, %v6730_v44  ;;  %v6074_v5 = vpop.f32.mrb[51].mxu1 }
 0x6b7   :  { %vm6182_vm12 = vcmp.gt.f32.partialorder %v6072_v39, 0.0  ;;  %v6246_v37 = vmul.f32 0.01, %v6072_v39  ;;  %v6075_v13 = vadd.f32 %v10360_v54, %v6074_v5 }
 0x6b8   :  { %v6312_v62 = vsel %vm6184_vm8, %v6080_v48, %v6248_v43  ;;  %vm6185_vm9 = vcmp.gt.f32.partialorder %v6083_v9, 0.0  ;;  %v6249_v53 = vmul.f32 0.01, %v6083_v9 }
 0x6b9   :  { %6377 = vst.msk [vmem:[%s10503_s4 + $0x190] sm:$0xff] %vm6326_vm3, %v6312_v62  ;;  %v6310_v49 = vsel %vm6182_vm12, %v6072_v39, %v6246_v37  ;;  %vm6183_vm13 = vcmp.gt.f32.partialorder %v6075_v13, 0.0  ;;  %v6247_v35 = vmul.f32 0.01, %v6075_v13 }
 0x6ba   :  { %6375 = vst.msk [vmem:[%s10503_s4 + $0x180] sm:$0xff] %vm6326_vm3, %v6310_v49  ;;  %v6313_v2 = vsel %vm6185_vm9, %v6083_v9, %v6249_v53 }
 0x6bb   :  { %6378 = vst.msk [vmem:[%s10503_s4 + $0x198] sm:$0xff] %vm6326_vm3, %v6313_v2  ;;  %v6311_v47 = vsel %vm6183_vm13, %v6075_v13, %v6247_v35 }
 0x6bc   :  { %6376 = vst.msk [vmem:[%s10503_s4 + $0x188] sm:$0xff] %vm6326_vm3, %v6311_v47 }
 0x6cb   :  { %v6733_v25 = vpop.f32.mrb[52].mxu1 }
 0x6cc   :  { %v6096_v0 = vadd.f32 %v10360_v54, %v6733_v25  ;;  %v6087_v51 = vpop.f32.mrb[53].mxu1 }
 0x6cd   :  { %v6088_v18 = vadd.f32 %v10360_v54, %v6087_v51  ;;  %v6734_v36 = vpop.f32.mrb[54].mxu1 }
 0x6ce   :  { %vm6188_vm15 = vcmp.gt.f32.partialorder %v6096_v0, 0.0  ;;  %v6252_v61 = vmul.f32 0.01, %v6096_v0  ;;  %v6099_v23 = vadd.f32 %v10360_v54, %v6734_v36  ;;  %v6090_v63 = vpop.f32.mrb[55].mxu1 }
 0x6cf   :  { %vm6186_vm2 = vcmp.gt.f32.partialorder %v6088_v18, 0.0  ;;  %v6250_v24 = vmul.f32 0.01, %v6088_v18  ;;  %v6091_v6 = vadd.f32 %v10360_v54, %v6090_v63 }
 0x6d0   :  { %v6316_v55 = vsel %vm6188_vm15, %v6096_v0, %v6252_v61  ;;  %vm6189_vm6 = vcmp.gt.f32.partialorder %v6099_v23, 0.0  ;;  %v6253_v33 = vmul.f32 0.01, %v6099_v23 }
 0x6d1   :  { %6381 = vst.msk [vmem:[%s10503_s4 + $0x1b0] sm:$0xff] %vm6326_vm3, %v6316_v55  ;;  %v6314_v56 = vsel %vm6186_vm2, %v6088_v18, %v6250_v24  ;;  %vm6187_vm5 = vcmp.gt.f32.partialorder %v6091_v6, 0.0  ;;  %v6251_v21 = vmul.f32 0.01, %v6091_v6 }
 0x6d2   :  { %6379 = vst.msk [vmem:[%s10503_s4 + $0x1a0] sm:$0xff] %vm6326_vm3, %v6314_v56  ;;  %v6317_v27 = vsel %vm6189_vm6, %v6099_v23, %v6253_v33 }
 0x6d3   :  { %6382 = vst.msk [vmem:[%s10503_s4 + $0x1b8] sm:$0xff] %vm6326_vm3, %v6317_v27  ;;  %v6315_v3 = vsel %vm6187_vm5, %v6091_v6, %v6251_v21 }
 0x6d4   :  { %6380 = vst.msk [vmem:[%s10503_s4 + $0x1a8] sm:$0xff] %vm6326_vm3, %v6315_v3 }
 0x6e3   :  { %v6737_v31 = vpop.f32.mrb[56].mxu1 }
 0x6e4   :  { %v6112_v42 = vadd.f32 %v10360_v54, %v6737_v31  ;;  %v6103_v30 = vpop.f32.mrb[57].mxu1 }
 0x6e5   :  { %v6104_v20 = vadd.f32 %v10360_v54, %v6103_v30  ;;  %v6738_v29 = vpop.f32.mrb[58].mxu1 }
 0x6e6   :  { %vm6192_vm4 = vcmp.gt.f32.partialorder %v6112_v42, 0.0  ;;  %v6256_v41 = vmul.f32 0.01, %v6112_v42  ;;  %v6115_v59 = vadd.f32 %v10360_v54, %v6738_v29  ;;  %v6106_v10 = vpop.f32.mrb[59].mxu1 }
 0x6e7   :  { %vm6190_vm14 = vcmp.gt.f32.partialorder %v6104_v20, 0.0  ;;  %v6254_v22 = vmul.f32 0.01, %v6104_v20  ;;  %v6107_v16 = vadd.f32 %v10360_v54, %v6106_v10 }
 0x6e8   :  { %v6320_v45 = vsel %vm6192_vm4, %v6112_v42, %v6256_v41  ;;  %vm6193_vm0 = vcmp.gt.f32.partialorder %v6115_v59, 0.0  ;;  %v6257_v7 = vmul.f32 0.01, %v6115_v59 }
 0x6e9   :  { %6385 = vst.msk [vmem:[%s10503_s4 + $0x1d0] sm:$0xff] %vm6326_vm3, %v6320_v45  ;;  %v6318_v26 = vsel %vm6190_vm14, %v6104_v20, %v6254_v22  ;;  %vm6191_vm1 = vcmp.gt.f32.partialorder %v6107_v16, 0.0  ;;  %v6255_v40 = vmul.f32 0.01, %v6107_v16 }
 0x6ea   :  { %6383 = vst.msk [vmem:[%s10503_s4 + $0x1c0] sm:$0xff] %vm6326_vm3, %v6318_v26  ;;  %v6321_v14 = vsel %vm6193_vm0, %v6115_v59, %v6257_v7 }
 0x6eb   :  { %6386 = vst.msk [vmem:[%s10503_s4 + $0x1d8] sm:$0xff] %vm6326_vm3, %v6321_v14  ;;  %v6319_v4 = vsel %vm6191_vm1, %v6107_v16, %v6255_v40 }
 0x6ec   :  { %6384 = vst.msk [vmem:[%s10503_s4 + $0x1c8] sm:$0xff] %vm6326_vm3, %v6319_v4 }
 0x713   :  { %v6677_v28 = vpop.f32.mrb[64].mxu0 }
 0x714   :  { %v5876_v17 = vadd.f32 %v10360_v54, %v6677_v28  ;;  %v5867_v32 = vpop.f32.mrb[65].mxu0 }
 0x715   :  { %v5868_v60 = vadd.f32 %v10360_v54, %v5867_v32  ;;  %v6678_v58 = vpop.f32.mrb[66].mxu0 }
 0x716   :  { %vm6136_vm10 = vcmp.gt.f32.partialorder %v5876_v17, 0.0  ;;  %v6200_v46 = vmul.f32 0.01, %v5876_v17  ;;  %v5879_v19 = vadd.f32 %v10360_v54, %v6678_v58  ;;  %v5870_v50 = vpop.f32.mrb[67].mxu0 }
 0x717   :  { %vm6134_vm11 = vcmp.gt.f32.partialorder %v5868_v60, 0.0  ;;  %v6198_v57 = vmul.f32 0.01, %v5868_v60  ;;  %v5871_v15 = vadd.f32 %v10360_v54, %v5870_v50  ;;  %v6741_v34 = vpop.f32.mrb[60].mxu1 }
 0x718   :  { %v6264_v52 = vsel %vm6136_vm10, %v5876_v17, %v6200_v46  ;;  %vm6137_vm7 = vcmp.gt.f32.partialorder %v5879_v19, 0.0  ;;  %v6201_v38 = vmul.f32 0.01, %v5879_v19  ;;  %v6128_v12 = vadd.f32 %v10360_v54, %v6741_v34  ;;  %v6119_v1 = vpop.f32.mrb[61].mxu1 }
 0x719   :  { %6329 = vst.msk [vmem:[%s10503_s4 + $0x10] sm:$0xff] %vm6326_vm3, %v6264_v52  ;;  %v6262_v11 = vsel %vm6134_vm11, %v5868_v60, %v6198_v57  ;;  %vm6135_vm8 = vcmp.gt.f32.partialorder %v5871_v15, 0.0  ;;  %v6199_v48 = vmul.f32 0.01, %v5871_v15  ;;  %v6120_v8 = vadd.f32 %v10360_v54, %v6119_v1  ;;  %v6742_v39 = vpop.f32.mrb[62].mxu1 }
 0x71a   :  { %6327 = vst.msk [vmem:[%s10503_s4] sm:$0xff] %vm6326_vm3, %v6262_v11  ;;  %v6265_v44 = vsel %vm6137_vm7, %v5879_v19, %v6201_v38  ;;  %vm6196_vm12 = vcmp.gt.f32.partialorder %v6128_v12, 0.0  ;;  %v6260_v43 = vmul.f32 0.01, %v6128_v12  ;;  %v6131_v9 = vadd.f32 %v10360_v54, %v6742_v39  ;;  %v6122_v5 = vpop.f32.mrb[63].mxu1 }
 0x71b   :  { %6330 = vst.msk [vmem:[%s10503_s4 + $0x18] sm:$0xff] %vm6326_vm3, %v6265_v44  ;;  %v6263_v37 = vsel %vm6135_vm8, %v5871_v15, %v6199_v48  ;;  %vm6194_vm9 = vcmp.gt.f32.partialorder %v6120_v8, 0.0  ;;  %v6258_v13 = vmul.f32 0.01, %v6120_v8  ;;  %v6123_v62 = vadd.f32 %v10360_v54, %v6122_v5 }
 0x71c   :  { %6328 = vst.msk [vmem:[%s10503_s4 + $0x8] sm:$0xff] %vm6326_vm3, %v6263_v37  ;;  %v6324_v53 = vsel %vm6196_vm12, %v6128_v12, %v6260_v43  ;;  %vm6197_vm13 = vcmp.gt.f32.partialorder %v6131_v9, 0.0  ;;  %v6261_v49 = vmul.f32 0.01, %v6131_v9 }
 0x71d   :  { %6389 = vst.msk [vmem:[%s10503_s4 + $0x1f0] sm:$0xff] %vm6326_vm3, %v6324_v53  ;;  %v6322_v35 = vsel %vm6194_vm9, %v6120_v8, %v6258_v13  ;;  %vm6195_vm15 = vcmp.gt.f32.partialorder %v6123_v62, 0.0  ;;  %v6259_v2 = vmul.f32 0.01, %v6123_v62 }
 0x71e   :  { %6387 = vst.msk [vmem:[%s10503_s4 + $0x1e0] sm:$0xff] %vm6326_vm3, %v6322_v35  ;;  %v6325_v54 = vsel %vm6197_vm13, %v6131_v9, %v6261_v49 }
 0x71f   :  { %6390 = vst.msk [vmem:[%s10503_s4 + $0x1f8] sm:$0xff] %vm6326_vm3, %v6325_v54  ;;  %v6323_v47 = vsel %vm6195_vm15, %v6123_v62, %v6259_v2 }
 0x720   :  { %6388 = vst.msk [vmem:[%s10503_s4 + $0x1e8] sm:$0xff] %vm6326_vm3, %v6323_v47 }

</bundles_post_ra>
